<compile_context>
chip_gen: v6e
topology: v6e:2x2x1
jax: 0.10.0
libtpu: 0.0.40
codegen_flags: <defaults>
</compile_context>

<pallas_src>
import functools

import numpy as np
import jax
import jax.numpy as jnp
from jax.experimental import pallas as pl
from jax.experimental.pallas import tpu as pltpu

_EPS = 1e-5  # PyTorch BatchNorm3d default eps


def _mbconv_kernel(xp_ref, s1_ref, t1_ref, wexp_ref, s2_ref, t2_ref,
                   wpad_ref, wdw_ref, fold_ref, wse1_ref, bse1_ref,
                   wse2_ref, bse2_ref, tile_ref, wpw_ref, bpw_ref, wsc_ref,
                   o_ref, pad_ref, *, D, H, W, E, Cin):
    """Whole MBConv block for one batch element, fully resident in VMEM.

    Packed layout: activations are (rows=D*H, lanes=W*channels)."""
    f32 = jnp.float32
    WE = W * E                      # expanded packed lane width (=128 here)
    LE = (W + 2) * E                # padded packed lane width
    LCin = (W + 2) * Cin            # padded packed residual lane width
    mxu = wexp_ref.dtype            # matmul operand dtype (f32 / bf16)

    # ---- expand_proj (preact): relu(BN1(x)) @ blockdiag(W_expand) -----------
    # Full packed rows are loaded lane-aligned; the w-halo lanes are killed by
    # the zero rows of the block-diagonal expand weight.
    xi = xp_ref[0, 1:D + 1, 1:H + 1, :]                     # (D, H, (W+2)*Cin)
    a1 = jnp.maximum(xi * s1_ref[...] + t1_ref[...], 0.0)
    a1 = a1.reshape(D * H, LCin)
    h1 = jnp.dot(a1.astype(mxu), wexp_ref[...],
                 preferred_element_type=f32)                # (D*H, W*E)

    # ---- depthwise (preact): BN2 + ReLU, then 3x3x3 depthwise conv ----------
    a2 = jnp.maximum(h1 * s2_ref[...] + t2_ref[...], 0.0)   # (D*H, W*E)

    # Zero only the d/h halo planes (the w halo is zero-filled by the placement
    # matmul below, the interior is fully overwritten every step).
    zd = jnp.zeros((1, H + 2, LE), f32)
    pad_ref[0:1] = zd
    pad_ref[D + 1:D + 2] = zd
    zh = jnp.zeros((D, 1, LE), f32)
    pad_ref[1:D + 1, 0:1] = zh
    pad_ref[1:D + 1, H + 1:H + 2] = zh
    # Lane-aligned interior store; one small matmul shifts a2 into the padded
    # lane frame and injects the w-halo zeros at the same time.
    rows = jnp.dot(a2.astype(wpad_ref.dtype), wpad_ref[...],
                   preferred_element_type=f32)              # (D*H, (W+2)*E)
    pad_ref[1:D + 1, 1:H + 1, :] = rows.reshape(D, H, LE)

    # 27 taps, each a lane-dense (D, H, W*E) fused multiply-add.  The
    # accumulator is only D*H*W*E*4B = 32 KiB (~8 vregs), so the unrolled loop
    # no longer spills.
    dw = jnp.zeros((D, H, WE), f32)
    for kd in range(3):
        for kh in range(3):
            for kw in range(3):
                t = kd * 9 + kh * 3 + kw
                slab = pad_ref[kd:kd + D, kh:kh + H, kw * E:kw * E + WE]
                dw = dw + slab * wdw_ref[t:t + 1, :]
    dw = dw.reshape(D * H, WE)

    # ---- SE block: squeeze -> fc1 -> relu -> fc2 -> sigmoid -> gate ---------
    # squeeze: row-sum then a 0/1 fold matmul collapses the W lane groups; the
    # 1/(D*H*W) of the mean is folded into the fc1 weight in the wrapper.
    s = jnp.dot(jnp.sum(dw, axis=0, keepdims=True), fold_ref[...],
                preferred_element_type=f32)                 # (1, E)
    z1 = jnp.maximum(
        jnp.dot(s, wse1_ref[...], preferred_element_type=f32) + bse1_ref[...],
        0.0)                                                # (1, R)
    z2 = jnp.dot(z1, wse2_ref[...], preferred_element_type=f32) + bse2_ref[...]
    gate = 1.0 / (1.0 + jnp.exp(-z2))                       # sigmoid, (1, E)
    # tile the per-channel gate across the W lane groups with a 0/1 matmul
    hse = dw * jnp.dot(gate, tile_ref[...], preferred_element_type=f32)

    # ---- pointwise conv (BN3 folded) + shortcut conv: 1 + 9 MXU matmuls -----
    out = jnp.dot(hse.astype(wpw_ref.dtype), wpw_ref[...],
                  preferred_element_type=f32) + bpw_ref[...]  # (D*H, W*Cout)
    for kd in range(3):
        for kh in range(3):
            t = kd * 3 + kh
            slab = xp_ref[0, kd:kd + D, kh:kh + H, :].reshape(D * H, LCin)
            out = out + jnp.dot(slab.astype(wsc_ref.dtype), wsc_ref[t],
                                preferred_element_type=f32)

    o_ref[0] = out.astype(o_ref.dtype)


def mbconv_forward(x, p, *, mxu_dtype=jnp.float32):
    """x: (B, Cin, D, H, W) NCDHW; p: dict of PyTorch-layout parameters."""
    B, Cin, D, H, W = x.shape
    E = p["w_exp"].shape[0]       # expanded channels
    R = p["w_se1"].shape[0]       # SE bottleneck
    Cout = p["w_pw"].shape[0]
    N = D * H * W
    WE, WCo, LCin, LE = W * E, W * Cout, (W + 2) * Cin, (W + 2) * E

    def fold_bn(gamma, beta, mean, var):
        scale = (gamma / jnp.sqrt(var + _EPS)).astype(jnp.float32)
        return scale, (beta - mean * scale).astype(jnp.float32)

    s1, t1 = fold_bn(*p["bn1"])
    s2, t2 = fold_bn(*p["bn2"])
    s3, t3 = fold_bn(*p["bn3"])

    # ---- packed, padded residual: lanes = (W+2)*Cin --------------------------
    xl = jnp.transpose(x, (0, 2, 3, 4, 1)).reshape(B, D, H, W * Cin)
    xp = jnp.pad(xl, ((0, 0), (1, 1), (1, 1), (Cin, Cin)))

    # ---- BN1 / BN2 scale-shift tiled over the packed lane dim ----------------
    s1t = jnp.tile(s1, W + 2).reshape(1, LCin)
    t1t = jnp.tile(t1, W + 2).reshape(1, LCin)
    s2t = jnp.tile(s2, W).reshape(1, WE)
    t2t = jnp.tile(t2, W).reshape(1, WE)

    # ---- expand conv as a block-diagonal matmul (skips the w-halo lanes) -----
    w_exp_t = p["w_exp"].reshape(E, Cin).T                        # (Cin, E)
    sel = np.zeros((W + 2, W), np.float32)
    for w in range(W):
        sel[w + 1, w] = 1.0
    wexp_bd = jnp.einsum("pw,ce->pcwe", jnp.asarray(sel),
                         w_exp_t).reshape(LCin, WE)

    # ---- lane-placement matrix: a2 (., W*E) -> zero-padded row (., (W+2)*E) --
    wpad = jnp.zeros((WE, LE), jnp.float32).at[:, E:E + WE].set(
        jnp.eye(WE, dtype=jnp.float32))

    # ---- depthwise weights: one tiled lane-vector per tap --------------------
    wdw_t = jnp.transpose(p["w_dw"].reshape(E, 3, 3, 3),
                          (1, 2, 3, 0)).reshape(27, E)
    wdw_t = jnp.tile(wdw_t, (1, W))                               # (27, W*E)

    # ---- SE weights (1/N folded into fc1), squeeze-fold / gate-tile matrices -
    fold_m = jnp.tile(jnp.eye(E, dtype=jnp.float32), (W, 1))      # (W*E, E)
    tile_m = fold_m.T                                             # (E, W*E)
    w_se1 = p["w_se1"].reshape(R, E).T / float(N)                 # (E, R)
    b_se1 = p["b_se1"].reshape(1, R)
    w_se2 = p["w_se2"].reshape(E, R).T                            # (R, E)
    b_se2 = p["b_se2"].reshape(1, E)

    # ---- pointwise conv with BN3 folded, block-diagonal over w ---------------
    w_pw_t = p["w_pw"].reshape(Cout, E).T                         # (E, Cout)
    w_pwf = w_pw_t * s3[:, None]
    b_pwf = t3 @ w_pw_t                                           # (Cout,)
    wpw_bd = jnp.einsum("wv,ec->wevc", jnp.eye(W, dtype=jnp.float32),
                        w_pwf).reshape(WE, WCo)
    bpw_t = jnp.tile(b_pwf, W).reshape(1, WCo)

    # ---- shortcut conv: 9 banded (per kd,kh) weights over packed lanes -------
    wsc_t = jnp.transpose(p["w_sc"], (2, 3, 4, 1, 0))             # (3,3,3,Cin,Cout)
    band = np.zeros((W + 2, W, 3), np.float32)
    for w in range(W):
        for k in range(3):
            band[w + k, w, k] = 1.0
    wsc_band = jnp.einsum("pwk,dekic->depiwc", jnp.asarray(band),
                          wsc_t).reshape(9, LCin, WCo)

    # MXU operand dtype (bf16 recommended on v6e/v7x; f32 kept for validation).
    wexp_bd = wexp_bd.astype(mxu_dtype)
    wpad = wpad.astype(mxu_dtype)
    wpw_bd = wpw_bd.astype(mxu_dtype)
    wsc_band = wsc_band.astype(mxu_dtype)

    kernel = functools.partial(_mbconv_kernel, D=D, H=H, W=W, E=E, Cin=Cin)

    out_pk = pl.pallas_call(
        kernel,
        out_shape=jax.ShapeDtypeStruct((B, D * H, WCo), x.dtype),
        grid_spec=pltpu.PrefetchScalarGridSpec(
            num_scalar_prefetch=0,
            grid=(B,),
            in_specs=[
                pl.BlockSpec((1, D + 2, H + 2, LCin), lambda b: (b, 0, 0, 0)),
                pl.BlockSpec((1, LCin), lambda b: (0, 0)),
                pl.BlockSpec((1, LCin), lambda b: (0, 0)),
                pl.BlockSpec((LCin, WE), lambda b: (0, 0)),
                pl.BlockSpec((1, WE), lambda b: (0, 0)),
                pl.BlockSpec((1, WE), lambda b: (0, 0)),
                pl.BlockSpec((WE, LE), lambda b: (0, 0)),
                pl.BlockSpec((27, WE), lambda b: (0, 0)),
                pl.BlockSpec((WE, E), lambda b: (0, 0)),
                pl.BlockSpec((E, R), lambda b: (0, 0)),
                pl.BlockSpec((1, R), lambda b: (0, 0)),
                pl.BlockSpec((R, E), lambda b: (0, 0)),
                pl.BlockSpec((1, E), lambda b: (0, 0)),
                pl.BlockSpec((E, WE), lambda b: (0, 0)),
                pl.BlockSpec((WE, WCo), lambda b: (0, 0)),
                pl.BlockSpec((1, WCo), lambda b: (0, 0)),
                pl.BlockSpec((9, LCin, WCo), lambda b: (0, 0, 0)),
            ],
            out_specs=pl.BlockSpec((1, D * H, WCo), lambda b: (b, 0, 0)),
            scratch_shapes=[pltpu.VMEM((D + 2, H + 2, LE), jnp.float32)],
        ),
        compiler_params=pltpu.CompilerParams(
            dimension_semantics=("parallel",),
            vmem_limit_bytes=32 * 1024 * 1024),
    )(xp, s1t, t1t, wexp_bd, s2t, t2t, wpad, wdw_t, fold_m, w_se1, b_se1,
      w_se2, b_se2, tile_m, wpw_bd, bpw_t, wsc_band)

    # packed (B, D*H, W*Cout) -> NCDHW
    return out_pk.reshape(B, D, H, W, Cout).transpose(0, 4, 1, 2, 3)


def reference(x, p):
    """Pure-JAX reference mirroring the PyTorch MBConv forward (eval mode)."""
    dn_str = ("NCDHW", "OIDHW", "NCDHW")

    def conv(inp, w, padding, groups=1):
        dn = jax.lax.conv_dimension_numbers(inp.shape, w.shape, dn_str)
        return jax.lax.conv_general_dilated(
            inp, w, (1, 1, 1), [(padding, padding)] * 3,
            dimension_numbers=dn, feature_group_count=groups,
            precision=jax.lax.Precision.HIGHEST)

    def bn(inp, stats):
        gamma, beta, mean, var = stats
        inv = gamma / jnp.sqrt(var + _EPS)
        sh = (1, -1, 1, 1, 1)
        return inp * inv.reshape(sh) + (beta - mean * inv).reshape(sh)

    relu = lambda v: jnp.maximum(v, 0.0)

    a1 = relu(bn(x, p["bn1"]))
    h1 = conv(a1, p["w_exp"], 0)                                   # expand 1x1
    a2 = relu(bn(h1, p["bn2"]))
    h2 = conv(a2, p["w_dw"], 1, groups=p["w_dw"].shape[0])         # depthwise 3x3
    s = jnp.mean(h2, axis=(2, 3, 4), keepdims=True)                # SE squeeze
    z1 = relu(conv(s, p["w_se1"], 0) + p["b_se1"].reshape(1, -1, 1, 1, 1))
    z2 = conv(z1, p["w_se2"], 0) + p["b_se2"].reshape(1, -1, 1, 1, 1)
    hse = h2 * jax.nn.sigmoid(z2)
    h3 = conv(bn(hse, p["bn3"]), p["w_pw"], 0)                     # pointwise
    sc = conv(x, p["w_sc"], 1)                                     # shortcut conv
    return h3 + sc                                                 # DropPath = id


if __name__ == "__main__":
    # Small shapes consistent with the module: in_ch=4, out_ch=8, expansion=4.
    B, Cin, D, H, W = 2, 4, 8, 8, 8
    expansion, ratio = 4, 4
    Cout = 8
    E = expansion * Cin          # 16   (W*E = 128 -> fully lane-dense)
    R = E // ratio               # 4

    key = jax.random.PRNGKey(0)
    keys = jax.random.split(key, 12)

    def nrm(k, shape, scale=1.0):
        return scale * jax.random.normal(k, shape, dtype=jnp.float32)

    def bn_params(k, ch):
        k1, k2, k3, k4 = jax.random.split(k, 4)
        gamma = 1.0 + 0.1 * jax.random.normal(k1, (ch,), dtype=jnp.float32)
        beta = 0.1 * jax.random.normal(k2, (ch,), dtype=jnp.float32)
        mean = 0.1 * jax.random.normal(k3, (ch,), dtype=jnp.float32)
        var = 1.0 + 0.1 * jnp.abs(jax.random.normal(k4, (ch,), dtype=jnp.float32))
        return (gamma, beta, mean, var)

    x = nrm(keys[0], (B, Cin, D, H, W))
    params = {
        "bn1": bn_params(keys[1], Cin),
        "w_exp": nrm(keys[2], (E, Cin, 1, 1, 1), 0.25),
        "bn2": bn_params(keys[3], E),
        "w_dw": nrm(keys[4], (E, 1, 3, 3, 3), 0.2),
        "w_se1": nrm(keys[5], (R, E, 1, 1, 1), 0.2),
        "b_se1": nrm(keys[6], (R,), 0.1),
        "w_se2": nrm(keys[7], (E, R, 1, 1, 1), 0.2),
        "b_se2": nrm(keys[8], (E,), 0.1),
        "bn3": bn_params(keys[9], E),
        "w_pw": nrm(keys[10], (Cout, E, 1, 1, 1), 0.2),
        "w_sc": nrm(keys[11], (Cout, Cin, 3, 3, 3), 0.2),
    }

    run = jax.jit(mbconv_forward)
    out = run(x, params)
    jax.block_until_ready(out)

    ref = reference(x, params)
    assert out.shape == (B, Cout, D, H, W), out.shape
    max_err = float(jnp.max(jnp.abs(out - ref)))
    assert jnp.allclose(out, ref, rtol=1e-3, atol=1e-3), max_err

    print("KERNEL_OK")
</pallas_src>

<mosaic_0001>
module attributes {stable_mosaic.version = 11 : i64} {
  func.func @_mbconv_kernel(%arg0: i32, %arg1: memref<1x10x10x40xf32, #tpu.memory_space<vmem>>, %arg2: memref<1x40xf32, #tpu.memory_space<vmem>>, %arg3: memref<1x40xf32, #tpu.memory_space<vmem>>, %arg4: memref<40x128xf32, #tpu.memory_space<vmem>>, %arg5: memref<1x128xf32, #tpu.memory_space<vmem>>, %arg6: memref<1x128xf32, #tpu.memory_space<vmem>>, %arg7: memref<128x160xf32, #tpu.memory_space<vmem>>, %arg8: memref<27x128xf32, #tpu.memory_space<vmem>>, %arg9: memref<128x16xf32, #tpu.memory_space<vmem>>, %arg10: memref<16x4xf32, #tpu.memory_space<vmem>>, %arg11: memref<1x4xf32, #tpu.memory_space<vmem>>, %arg12: memref<4x16xf32, #tpu.memory_space<vmem>>, %arg13: memref<1x16xf32, #tpu.memory_space<vmem>>, %arg14: memref<16x128xf32, #tpu.memory_space<vmem>>, %arg15: memref<128x64xf32, #tpu.memory_space<vmem>>, %arg16: memref<1x64xf32, #tpu.memory_space<vmem>>, %arg17: memref<9x40x64xf32, #tpu.memory_space<vmem>>, %arg18: memref<1x64x64xf32, #tpu.memory_space<vmem>>, %arg19: memref<10x10x160xf32, #tpu.memory_space<vmem>>) attributes {dimension_semantics = [#tpu.dimension_semantics<parallel>], iteration_bounds = array<i64: 2>, scalar_prefetch = 0 : i64, scratch_operands = 1 : i64, tpu.core_type = #tpu.core_type<tc>, window_params = [{transform_indices = @transform_0, window_bounds = array<i64: 1, 10, 10, 40>}, {pipeline_mode = #tpu.pipeline_mode<synchronous>, transform_indices = @transform_1, window_bounds = array<i64: 1, 40>}, {pipeline_mode = #tpu.pipeline_mode<synchronous>, transform_indices = @transform_2, window_bounds = array<i64: 1, 40>}, {pipeline_mode = #tpu.pipeline_mode<synchronous>, transform_indices = @transform_3, window_bounds = array<i64: 40, 128>}, {pipeline_mode = #tpu.pipeline_mode<synchronous>, transform_indices = @transform_4, window_bounds = array<i64: 1, 128>}, {pipeline_mode = #tpu.pipeline_mode<synchronous>, transform_indices = @transform_5, window_bounds = array<i64: 1, 128>}, {pipeline_mode = #tpu.pipeline_mode<synchronous>, transform_indices = @transform_6, window_bounds = array<i64: 128, 160>}, {pipeline_mode = #tpu.pipeline_mode<synchronous>, transform_indices = @transform_7, window_bounds = array<i64: 27, 128>}, {pipeline_mode = #tpu.pipeline_mode<synchronous>, transform_indices = @transform_8, window_bounds = array<i64: 128, 16>}, {pipeline_mode = #tpu.pipeline_mode<synchronous>, transform_indices = @transform_9, window_bounds = array<i64: 16, 4>}, {pipeline_mode = #tpu.pipeline_mode<synchronous>, transform_indices = @transform_10, window_bounds = array<i64: 1, 4>}, {pipeline_mode = #tpu.pipeline_mode<synchronous>, transform_indices = @transform_11, window_bounds = array<i64: 4, 16>}, {pipeline_mode = #tpu.pipeline_mode<synchronous>, transform_indices = @transform_12, window_bounds = array<i64: 1, 16>}, {pipeline_mode = #tpu.pipeline_mode<synchronous>, transform_indices = @transform_13, window_bounds = array<i64: 16, 128>}, {pipeline_mode = #tpu.pipeline_mode<synchronous>, transform_indices = @transform_14, window_bounds = array<i64: 128, 64>}, {pipeline_mode = #tpu.pipeline_mode<synchronous>, transform_indices = @transform_15, window_bounds = array<i64: 1, 64>}, {pipeline_mode = #tpu.pipeline_mode<synchronous>, transform_indices = @transform_16, window_bounds = array<i64: 9, 40, 64>}, {transform_indices = @transform_17, window_bounds = array<i64: 1, 64, 64>}]} {
    %c0 = arith.constant 0 : index
    %c1 = arith.constant 1 : index
    %c1_0 = arith.constant 1 : index
    %c0_1 = arith.constant 0 : index
    %0 = vector.load %arg1[%c0, %c1, %c1_0, %c0_1] : memref<1x10x10x40xf32, #tpu.memory_space<vmem>>, vector<1x8x8x40xf32>
    %1 = vector.shape_cast %0 : vector<1x8x8x40xf32> to vector<8x8x40xf32>
    %c0_2 = arith.constant 0 : index
    %c0_3 = arith.constant 0 : index
    %2 = vector.load %arg2[%c0_2, %c0_3] : memref<1x40xf32, #tpu.memory_space<vmem>>, vector<1x40xf32>
    %3 = vector.shape_cast %2 : vector<1x40xf32> to vector<1x1x40xf32>
    %4 = vector.broadcast %3 : vector<1x1x40xf32> to vector<8x8x40xf32>
    %5 = arith.mulf %1, %4 : vector<8x8x40xf32>
    %c0_4 = arith.constant 0 : index
    %c0_5 = arith.constant 0 : index
    %6 = vector.load %arg3[%c0_4, %c0_5] : memref<1x40xf32, #tpu.memory_space<vmem>>, vector<1x40xf32>
    %7 = vector.shape_cast %6 : vector<1x40xf32> to vector<1x1x40xf32>
    %8 = vector.broadcast %7 : vector<1x1x40xf32> to vector<8x8x40xf32>
    %9 = arith.addf %5, %8 : vector<8x8x40xf32>
    %cst = arith.constant 0.000000e+00 : f32
    %10 = vector.broadcast %cst : f32 to vector<8x8x40xf32>
    %11 = arith.maximumf %9, %10 : vector<8x8x40xf32>
    %12 = vector.shape_cast %11 : vector<8x8x40xf32> to vector<64x40xf32>
    %c0_6 = arith.constant 0 : index
    %c0_7 = arith.constant 0 : index
    %13 = vector.load %arg4[%c0_6, %c0_7] : memref<40x128xf32, #tpu.memory_space<vmem>>, vector<40x128xf32>
    %cst_8 = arith.constant dense<0.000000e+00> : vector<64x128xf32>
    %14 = tpu.matmul %12, %13, %cst_8 {dimension_numbers = #tpu.dot_dimension_numbers<[1], [0], [0], [1], [0, 0, 1, 1], [], []>} : vector<64x40xf32>, vector<40x128xf32>, vector<64x128xf32> -> vector<64x128xf32>
    %c0_9 = arith.constant 0 : index
    %c0_10 = arith.constant 0 : index
    %15 = vector.load %arg5[%c0_9, %c0_10] : memref<1x128xf32, #tpu.memory_space<vmem>>, vector<1x128xf32>
    %16 = vector.broadcast %15 : vector<1x128xf32> to vector<64x128xf32>
    %17 = arith.mulf %14, %16 : vector<64x128xf32>
    %c0_11 = arith.constant 0 : index
    %c0_12 = arith.constant 0 : index
    %18 = vector.load %arg6[%c0_11, %c0_12] : memref<1x128xf32, #tpu.memory_space<vmem>>, vector<1x128xf32>
    %19 = vector.broadcast %18 : vector<1x128xf32> to vector<64x128xf32>
    %20 = arith.addf %17, %19 : vector<64x128xf32>
    %cst_13 = arith.constant 0.000000e+00 : f32
    %21 = vector.broadcast %cst_13 : f32 to vector<64x128xf32>
    %22 = arith.maximumf %20, %21 : vector<64x128xf32>
    %cst_14 = arith.constant 0.000000e+00 : f32
    %23 = vector.broadcast %cst_14 : f32 to vector<1x10x160xf32>
    %c0_15 = arith.constant 0 : index
    %c0_16 = arith.constant 0 : index
    %c0_17 = arith.constant 0 : index
    %24 = vector.load %arg19[%c0_15, %c0_16, %c0_17] : memref<10x10x160xf32, #tpu.memory_space<vmem>>, vector<1x10x160xf32>
    tpu.vector_store %arg19[%c0_15, %c0_16, %c0_17], %23 {strides = array<i32>} : memref<10x10x160xf32, #tpu.memory_space<vmem>>, vector<1x10x160xf32>,
    %c9 = arith.constant 9 : index
    %c0_18 = arith.constant 0 : index
    %c0_19 = arith.constant 0 : index
    %25 = vector.load %arg19[%c9, %c0_18, %c0_19] : memref<10x10x160xf32, #tpu.memory_space<vmem>>, vector<1x10x160xf32>
    tpu.vector_store %arg19[%c9, %c0_18, %c0_19], %23 {strides = array<i32>} : memref<10x10x160xf32, #tpu.memory_space<vmem>>, vector<1x10x160xf32>,
    %cst_20 = arith.constant 0.000000e+00 : f32
    %26 = vector.broadcast %cst_20 : f32 to vector<8x1x160xf32>
    %c1_21 = arith.constant 1 : index
    %c0_22 = arith.constant 0 : index
    %c0_23 = arith.constant 0 : index
    %27 = vector.load %arg19[%c1_21, %c0_22, %c0_23] : memref<10x10x160xf32, #tpu.memory_space<vmem>>, vector<8x1x160xf32>
    tpu.vector_store %arg19[%c1_21, %c0_22, %c0_23], %26 {strides = array<i32>} : memref<10x10x160xf32, #tpu.memory_space<vmem>>, vector<8x1x160xf32>,
    %c1_24 = arith.constant 1 : index
    %c9_25 = arith.constant 9 : index
    %c0_26 = arith.constant 0 : index
    %28 = vector.load %arg19[%c1_24, %c9_25, %c0_26] : memref<10x10x160xf32, #tpu.memory_space<vmem>>, vector<8x1x160xf32>
    tpu.vector_store %arg19[%c1_24, %c9_25, %c0_26], %26 {strides = array<i32>} : memref<10x10x160xf32, #tpu.memory_space<vmem>>, vector<8x1x160xf32>,
    %c0_27 = arith.constant 0 : index
    %c0_28 = arith.constant 0 : index
    %29 = vector.load %arg7[%c0_27, %c0_28] : memref<128x160xf32, #tpu.memory_space<vmem>>, vector<128x160xf32>
    %cst_29 = arith.constant dense<0.000000e+00> : vector<64x160xf32>
    %30 = tpu.matmul %22, %29, %cst_29 {dimension_numbers = #tpu.dot_dimension_numbers<[1], [0], [0], [1], [0, 0, 1, 1], [], []>} : vector<64x128xf32>, vector<128x160xf32>, vector<64x160xf32> -> vector<64x160xf32>
    %31 = vector.shape_cast %30 : vector<64x160xf32> to vector<8x8x160xf32>
    %c1_30 = arith.constant 1 : index
    %c1_31 = arith.constant 1 : index
    %c0_32 = arith.constant 0 : index
    %32 = vector.load %arg19[%c1_30, %c1_31, %c0_32] : memref<10x10x160xf32, #tpu.memory_space<vmem>>, vector<8x8x160xf32>
    tpu.vector_store %arg19[%c1_30, %c1_31, %c0_32], %31 {strides = array<i32>} : memref<10x10x160xf32, #tpu.memory_space<vmem>>, vector<8x8x160xf32>,
    %cst_33 = arith.constant 0.000000e+00 : f32
    %33 = vector.broadcast %cst_33 : f32 to vector<8x8x128xf32>
    %c0_34 = arith.constant 0 : index
    %c0_35 = arith.constant 0 : index
    %c0_36 = arith.constant 0 : index
    %34 = vector.load %arg19[%c0_34, %c0_35, %c0_36] : memref<10x10x160xf32, #tpu.memory_space<vmem>>, vector<8x8x128xf32>
    %c0_37 = arith.constant 0 : index
    %c0_38 = arith.constant 0 : index
    %35 = vector.load %arg8[%c0_37, %c0_38] : memref<27x128xf32, #tpu.memory_space<vmem>>, vector<1x128xf32>
    %36 = vector.shape_cast %35 : vector<1x128xf32> to vector<1x1x128xf32>
    %37 = vector.broadcast %36 : vector<1x1x128xf32> to vector<8x8x128xf32>
    %38 = arith.mulf %34, %37 : vector<8x8x128xf32>
    %39 = arith.addf %33, %38 : vector<8x8x128xf32>
    %c0_39 = arith.constant 0 : index
    %c0_40 = arith.constant 0 : index
    %c16 = arith.constant 16 : index
    %40 = vector.load %arg19[%c0_39, %c0_40, %c16] : memref<10x10x160xf32, #tpu.memory_space<vmem>>, vector<8x8x128xf32>
    %c1_41 = arith.constant 1 : index
    %c0_42 = arith.constant 0 : index
    %41 = vector.load %arg8[%c1_41, %c0_42] : memref<27x128xf32, #tpu.memory_space<vmem>>, vector<1x128xf32>
    %42 = vector.shape_cast %41 : vector<1x128xf32> to vector<1x1x128xf32>
    %43 = vector.broadcast %42 : vector<1x1x128xf32> to vector<8x8x128xf32>
    %44 = arith.mulf %40, %43 : vector<8x8x128xf32>
    %45 = arith.addf %39, %44 : vector<8x8x128xf32>
    %c0_43 = arith.constant 0 : index
    %c0_44 = arith.constant 0 : index
    %c32 = arith.constant 32 : index
    %46 = vector.load %arg19[%c0_43, %c0_44, %c32] : memref<10x10x160xf32, #tpu.memory_space<vmem>>, vector<8x8x128xf32>
    %c2 = arith.constant 2 : index
    %c0_45 = arith.constant 0 : index
    %47 = vector.load %arg8[%c2, %c0_45] : memref<27x128xf32, #tpu.memory_space<vmem>>, vector<1x128xf32>
    %48 = vector.shape_cast %47 : vector<1x128xf32> to vector<1x1x128xf32>
    %49 = vector.broadcast %48 : vector<1x1x128xf32> to vector<8x8x128xf32>
    %50 = arith.mulf %46, %49 : vector<8x8x128xf32>
    %51 = arith.addf %45, %50 : vector<8x8x128xf32>
    %c0_46 = arith.constant 0 : index
    %c1_47 = arith.constant 1 : index
    %c0_48 = arith.constant 0 : index
    %52 = vector.load %arg19[%c0_46, %c1_47, %c0_48] : memref<10x10x160xf32, #tpu.memory_space<vmem>>, vector<8x8x128xf32>
    %c3 = arith.constant 3 : index
    %c0_49 = arith.constant 0 : index
    %53 = vector.load %arg8[%c3, %c0_49] : memref<27x128xf32, #tpu.memory_space<vmem>>, vector<1x128xf32>
    %54 = vector.shape_cast %53 : vector<1x128xf32> to vector<1x1x128xf32>
    %55 = vector.broadcast %54 : vector<1x1x128xf32> to vector<8x8x128xf32>
    %56 = arith.mulf %52, %55 : vector<8x8x128xf32>
    %57 = arith.addf %51, %56 : vector<8x8x128xf32>
    %c0_50 = arith.constant 0 : index
    %c1_51 = arith.constant 1 : index
    %c16_52 = arith.constant 16 : index
    %58 = vector.load %arg19[%c0_50, %c1_51, %c16_52] : memref<10x10x160xf32, #tpu.memory_space<vmem>>, vector<8x8x128xf32>
    %c4 = arith.constant 4 : index
    %c0_53 = arith.constant 0 : index
    %59 = vector.load %arg8[%c4, %c0_53] : memref<27x128xf32, #tpu.memory_space<vmem>>, vector<1x128xf32>
    %60 = vector.shape_cast %59 : vector<1x128xf32> to vector<1x1x128xf32>
    %61 = vector.broadcast %60 : vector<1x1x128xf32> to vector<8x8x128xf32>
    %62 = arith.mulf %58, %61 : vector<8x8x128xf32>
    %63 = arith.addf %57, %62 : vector<8x8x128xf32>
    %c0_54 = arith.constant 0 : index
    %c1_55 = arith.constant 1 : index
    %c32_56 = arith.constant 32 : index
    %64 = vector.load %arg19[%c0_54, %c1_55, %c32_56] : memref<10x10x160xf32, #tpu.memory_space<vmem>>, vector<8x8x128xf32>
    %c5 = arith.constant 5 : index
    %c0_57 = arith.constant 0 : index
    %65 = vector.load %arg8[%c5, %c0_57] : memref<27x128xf32, #tpu.memory_space<vmem>>, vector<1x128xf32>
    %66 = vector.shape_cast %65 : vector<1x128xf32> to vector<1x1x128xf32>
    %67 = vector.broadcast %66 : vector<1x1x128xf32> to vector<8x8x128xf32>
    %68 = arith.mulf %64, %67 : vector<8x8x128xf32>
    %69 = arith.addf %63, %68 : vector<8x8x128xf32>
    %c0_58 = arith.constant 0 : index
    %c2_59 = arith.constant 2 : index
    %c0_60 = arith.constant 0 : index
    %70 = vector.load %arg19[%c0_58, %c2_59, %c0_60] : memref<10x10x160xf32, #tpu.memory_space<vmem>>, vector<8x8x128xf32>
    %c6 = arith.constant 6 : index
    %c0_61 = arith.constant 0 : index
    %71 = vector.load %arg8[%c6, %c0_61] : memref<27x128xf32, #tpu.memory_space<vmem>>, vector<1x128xf32>
    %72 = vector.shape_cast %71 : vector<1x128xf32> to vector<1x1x128xf32>
    %73 = vector.broadcast %72 : vector<1x1x128xf32> to vector<8x8x128xf32>
    %74 = arith.mulf %70, %73 : vector<8x8x128xf32>
    %75 = arith.addf %69, %74 : vector<8x8x128xf32>
    %c0_62 = arith.constant 0 : index
    %c2_63 = arith.constant 2 : index
    %c16_64 = arith.constant 16 : index
    %76 = vector.load %arg19[%c0_62, %c2_63, %c16_64] : memref<10x10x160xf32, #tpu.memory_space<vmem>>, vector<8x8x128xf32>
    %c7 = arith.constant 7 : index
    %c0_65 = arith.constant 0 : index
    %77 = vector.load %arg8[%c7, %c0_65] : memref<27x128xf32, #tpu.memory_space<vmem>>, vector<1x128xf32>
    %78 = vector.shape_cast %77 : vector<1x128xf32> to vector<1x1x128xf32>
    %79 = vector.broadcast %78 : vector<1x1x128xf32> to vector<8x8x128xf32>
    %80 = arith.mulf %76, %79 : vector<8x8x128xf32>
    %81 = arith.addf %75, %80 : vector<8x8x128xf32>
    %c0_66 = arith.constant 0 : index
    %c2_67 = arith.constant 2 : index
    %c32_68 = arith.constant 32 : index
    %82 = vector.load %arg19[%c0_66, %c2_67, %c32_68] : memref<10x10x160xf32, #tpu.memory_space<vmem>>, vector<8x8x128xf32>
    %c8 = arith.constant 8 : index
    %c0_69 = arith.constant 0 : index
    %83 = vector.load %arg8[%c8, %c0_69] : memref<27x128xf32, #tpu.memory_space<vmem>>, vector<1x128xf32>
    %84 = vector.shape_cast %83 : vector<1x128xf32> to vector<1x1x128xf32>
    %85 = vector.broadcast %84 : vector<1x1x128xf32> to vector<8x8x128xf32>
    %86 = arith.mulf %82, %85 : vector<8x8x128xf32>
    %87 = arith.addf %81, %86 : vector<8x8x128xf32>
    %c1_70 = arith.constant 1 : index
    %c0_71 = arith.constant 0 : index
    %c0_72 = arith.constant 0 : index
    %88 = vector.load %arg19[%c1_70, %c0_71, %c0_72] : memref<10x10x160xf32, #tpu.memory_space<vmem>>, vector<8x8x128xf32>
    %c9_73 = arith.constant 9 : index
    %c0_74 = arith.constant 0 : index
    %89 = vector.load %arg8[%c9_73, %c0_74] : memref<27x128xf32, #tpu.memory_space<vmem>>, vector<1x128xf32>
    %90 = vector.shape_cast %89 : vector<1x128xf32> to vector<1x1x128xf32>
    %91 = vector.broadcast %90 : vector<1x1x128xf32> to vector<8x8x128xf32>
    %92 = arith.mulf %88, %91 : vector<8x8x128xf32>
    %93 = arith.addf %87, %92 : vector<8x8x128xf32>
    %c1_75 = arith.constant 1 : index
    %c0_76 = arith.constant 0 : index
    %c16_77 = arith.constant 16 : index
    %94 = vector.load %arg19[%c1_75, %c0_76, %c16_77] : memref<10x10x160xf32, #tpu.memory_space<vmem>>, vector<8x8x128xf32>
    %c10 = arith.constant 10 : index
    %c0_78 = arith.constant 0 : index
    %95 = vector.load %arg8[%c10, %c0_78] : memref<27x128xf32, #tpu.memory_space<vmem>>, vector<1x128xf32>
    %96 = vector.shape_cast %95 : vector<1x128xf32> to vector<1x1x128xf32>
    %97 = vector.broadcast %96 : vector<1x1x128xf32> to vector<8x8x128xf32>
    %98 = arith.mulf %94, %97 : vector<8x8x128xf32>
    %99 = arith.addf %93, %98 : vector<8x8x128xf32>
    %c1_79 = arith.constant 1 : index
    %c0_80 = arith.constant 0 : index
    %c32_81 = arith.constant 32 : index
    %100 = vector.load %arg19[%c1_79, %c0_80, %c32_81] : memref<10x10x160xf32, #tpu.memory_space<vmem>>, vector<8x8x128xf32>
    %c11 = arith.constant 11 : index
    %c0_82 = arith.constant 0 : index
    %101 = vector.load %arg8[%c11, %c0_82] : memref<27x128xf32, #tpu.memory_space<vmem>>, vector<1x128xf32>
    %102 = vector.shape_cast %101 : vector<1x128xf32> to vector<1x1x128xf32>
    %103 = vector.broadcast %102 : vector<1x1x128xf32> to vector<8x8x128xf32>
    %104 = arith.mulf %100, %103 : vector<8x8x128xf32>
    %105 = arith.addf %99, %104 : vector<8x8x128xf32>
    %c1_83 = arith.constant 1 : index
    %c1_84 = arith.constant 1 : index
    %c0_85 = arith.constant 0 : index
    %106 = vector.load %arg19[%c1_83, %c1_84, %c0_85] : memref<10x10x160xf32, #tpu.memory_space<vmem>>, vector<8x8x128xf32>
    %c12 = arith.constant 12 : index
    %c0_86 = arith.constant 0 : index
    %107 = vector.load %arg8[%c12, %c0_86] : memref<27x128xf32, #tpu.memory_space<vmem>>, vector<1x128xf32>
    %108 = vector.shape_cast %107 : vector<1x128xf32> to vector<1x1x128xf32>
    %109 = vector.broadcast %108 : vector<1x1x128xf32> to vector<8x8x128xf32>
    %110 = arith.mulf %106, %109 : vector<8x8x128xf32>
    %111 = arith.addf %105, %110 : vector<8x8x128xf32>
    %c1_87 = arith.constant 1 : index
    %c1_88 = arith.constant 1 : index
    %c16_89 = arith.constant 16 : index
    %112 = vector.load %arg19[%c1_87, %c1_88, %c16_89] : memref<10x10x160xf32, #tpu.memory_space<vmem>>, vector<8x8x128xf32>
    %c13 = arith.constant 13 : index
    %c0_90 = arith.constant 0 : index
    %113 = vector.load %arg8[%c13, %c0_90] : memref<27x128xf32, #tpu.memory_space<vmem>>, vector<1x128xf32>
    %114 = vector.shape_cast %113 : vector<1x128xf32> to vector<1x1x128xf32>
    %115 = vector.broadcast %114 : vector<1x1x128xf32> to vector<8x8x128xf32>
    %116 = arith.mulf %112, %115 : vector<8x8x128xf32>
    %117 = arith.addf %111, %116 : vector<8x8x128xf32>
    %c1_91 = arith.constant 1 : index
    %c1_92 = arith.constant 1 : index
    %c32_93 = arith.constant 32 : index
    %118 = vector.load %arg19[%c1_91, %c1_92, %c32_93] : memref<10x10x160xf32, #tpu.memory_space<vmem>>, vector<8x8x128xf32>
    %c14 = arith.constant 14 : index
    %c0_94 = arith.constant 0 : index
    %119 = vector.load %arg8[%c14, %c0_94] : memref<27x128xf32, #tpu.memory_space<vmem>>, vector<1x128xf32>
    %120 = vector.shape_cast %119 : vector<1x128xf32> to vector<1x1x128xf32>
    %121 = vector.broadcast %120 : vector<1x1x128xf32> to vector<8x8x128xf32>
    %122 = arith.mulf %118, %121 : vector<8x8x128xf32>
    %123 = arith.addf %117, %122 : vector<8x8x128xf32>
    %c1_95 = arith.constant 1 : index
    %c2_96 = arith.constant 2 : index
    %c0_97 = arith.constant 0 : index
    %124 = vector.load %arg19[%c1_95, %c2_96, %c0_97] : memref<10x10x160xf32, #tpu.memory_space<vmem>>, vector<8x8x128xf32>
    %c15 = arith.constant 15 : index
    %c0_98 = arith.constant 0 : index
    %125 = vector.load %arg8[%c15, %c0_98] : memref<27x128xf32, #tpu.memory_space<vmem>>, vector<1x128xf32>
    %126 = vector.shape_cast %125 : vector<1x128xf32> to vector<1x1x128xf32>
    %127 = vector.broadcast %126 : vector<1x1x128xf32> to vector<8x8x128xf32>
    %128 = arith.mulf %124, %127 : vector<8x8x128xf32>
    %129 = arith.addf %123, %128 : vector<8x8x128xf32>
    %c1_99 = arith.constant 1 : index
    %c2_100 = arith.constant 2 : index
    %c16_101 = arith.constant 16 : index
    %130 = vector.load %arg19[%c1_99, %c2_100, %c16_101] : memref<10x10x160xf32, #tpu.memory_space<vmem>>, vector<8x8x128xf32>
    %c16_102 = arith.constant 16 : index
    %c0_103 = arith.constant 0 : index
    %131 = vector.load %arg8[%c16_102, %c0_103] : memref<27x128xf32, #tpu.memory_space<vmem>>, vector<1x128xf32>
    %132 = vector.shape_cast %131 : vector<1x128xf32> to vector<1x1x128xf32>
    %133 = vector.broadcast %132 : vector<1x1x128xf32> to vector<8x8x128xf32>
    %134 = arith.mulf %130, %133 : vector<8x8x128xf32>
    %135 = arith.addf %129, %134 : vector<8x8x128xf32>
    %c1_104 = arith.constant 1 : index
    %c2_105 = arith.constant 2 : index
    %c32_106 = arith.constant 32 : index
    %136 = vector.load %arg19[%c1_104, %c2_105, %c32_106] : memref<10x10x160xf32, #tpu.memory_space<vmem>>, vector<8x8x128xf32>
    %c17 = arith.constant 17 : index
    %c0_107 = arith.constant 0 : index
    %137 = vector.load %arg8[%c17, %c0_107] : memref<27x128xf32, #tpu.memory_space<vmem>>, vector<1x128xf32>
    %138 = vector.shape_cast %137 : vector<1x128xf32> to vector<1x1x128xf32>
    %139 = vector.broadcast %138 : vector<1x1x128xf32> to vector<8x8x128xf32>
    %140 = arith.mulf %136, %139 : vector<8x8x128xf32>
    %141 = arith.addf %135, %140 : vector<8x8x128xf32>
    %c2_108 = arith.constant 2 : index
    %c0_109 = arith.constant 0 : index
    %c0_110 = arith.constant 0 : index
    %142 = vector.load %arg19[%c2_108, %c0_109, %c0_110] : memref<10x10x160xf32, #tpu.memory_space<vmem>>, vector<8x8x128xf32>
    %c18 = arith.constant 18 : index
    %c0_111 = arith.constant 0 : index
    %143 = vector.load %arg8[%c18, %c0_111] : memref<27x128xf32, #tpu.memory_space<vmem>>, vector<1x128xf32>
    %144 = vector.shape_cast %143 : vector<1x128xf32> to vector<1x1x128xf32>
    %145 = vector.broadcast %144 : vector<1x1x128xf32> to vector<8x8x128xf32>
    %146 = arith.mulf %142, %145 : vector<8x8x128xf32>
    %147 = arith.addf %141, %146 : vector<8x8x128xf32>
    %c2_112 = arith.constant 2 : index
    %c0_113 = arith.constant 0 : index
    %c16_114 = arith.constant 16 : index
    %148 = vector.load %arg19[%c2_112, %c0_113, %c16_114] : memref<10x10x160xf32, #tpu.memory_space<vmem>>, vector<8x8x128xf32>
    %c19 = arith.constant 19 : index
    %c0_115 = arith.constant 0 : index
    %149 = vector.load %arg8[%c19, %c0_115] : memref<27x128xf32, #tpu.memory_space<vmem>>, vector<1x128xf32>
    %150 = vector.shape_cast %149 : vector<1x128xf32> to vector<1x1x128xf32>
    %151 = vector.broadcast %150 : vector<1x1x128xf32> to vector<8x8x128xf32>
    %152 = arith.mulf %148, %151 : vector<8x8x128xf32>
    %153 = arith.addf %147, %152 : vector<8x8x128xf32>
    %c2_116 = arith.constant 2 : index
    %c0_117 = arith.constant 0 : index
    %c32_118 = arith.constant 32 : index
    %154 = vector.load %arg19[%c2_116, %c0_117, %c32_118] : memref<10x10x160xf32, #tpu.memory_space<vmem>>, vector<8x8x128xf32>
    %c20 = arith.constant 20 : index
    %c0_119 = arith.constant 0 : index
    %155 = vector.load %arg8[%c20, %c0_119] : memref<27x128xf32, #tpu.memory_space<vmem>>, vector<1x128xf32>
    %156 = vector.shape_cast %155 : vector<1x128xf32> to vector<1x1x128xf32>
    %157 = vector.broadcast %156 : vector<1x1x128xf32> to vector<8x8x128xf32>
    %158 = arith.mulf %154, %157 : vector<8x8x128xf32>
    %159 = arith.addf %153, %158 : vector<8x8x128xf32>
    %c2_120 = arith.constant 2 : index
    %c1_121 = arith.constant 1 : index
    %c0_122 = arith.constant 0 : index
    %160 = vector.load %arg19[%c2_120, %c1_121, %c0_122] : memref<10x10x160xf32, #tpu.memory_space<vmem>>, vector<8x8x128xf32>
    %c21 = arith.constant 21 : index
    %c0_123 = arith.constant 0 : index
    %161 = vector.load %arg8[%c21, %c0_123] : memref<27x128xf32, #tpu.memory_space<vmem>>, vector<1x128xf32>
    %162 = vector.shape_cast %161 : vector<1x128xf32> to vector<1x1x128xf32>
    %163 = vector.broadcast %162 : vector<1x1x128xf32> to vector<8x8x128xf32>
    %164 = arith.mulf %160, %163 : vector<8x8x128xf32>
    %165 = arith.addf %159, %164 : vector<8x8x128xf32>
    %c2_124 = arith.constant 2 : index
    %c1_125 = arith.constant 1 : index
    %c16_126 = arith.constant 16 : index
    %166 = vector.load %arg19[%c2_124, %c1_125, %c16_126] : memref<10x10x160xf32, #tpu.memory_space<vmem>>, vector<8x8x128xf32>
    %c22 = arith.constant 22 : index
    %c0_127 = arith.constant 0 : index
    %167 = vector.load %arg8[%c22, %c0_127] : memref<27x128xf32, #tpu.memory_space<vmem>>, vector<1x128xf32>
    %168 = vector.shape_cast %167 : vector<1x128xf32> to vector<1x1x128xf32>
    %169 = vector.broadcast %168 : vector<1x1x128xf32> to vector<8x8x128xf32>
    %170 = arith.mulf %166, %169 : vector<8x8x128xf32>
    %171 = arith.addf %165, %170 : vector<8x8x128xf32>
    %c2_128 = arith.constant 2 : index
    %c1_129 = arith.constant 1 : index
    %c32_130 = arith.constant 32 : index
    %172 = vector.load %arg19[%c2_128, %c1_129, %c32_130] : memref<10x10x160xf32, #tpu.memory_space<vmem>>, vector<8x8x128xf32>
    %c23 = arith.constant 23 : index
    %c0_131 = arith.constant 0 : index
    %173 = vector.load %arg8[%c23, %c0_131] : memref<27x128xf32, #tpu.memory_space<vmem>>, vector<1x128xf32>
    %174 = vector.shape_cast %173 : vector<1x128xf32> to vector<1x1x128xf32>
    %175 = vector.broadcast %174 : vector<1x1x128xf32> to vector<8x8x128xf32>
    %176 = arith.mulf %172, %175 : vector<8x8x128xf32>
    %177 = arith.addf %171, %176 : vector<8x8x128xf32>
    %c2_132 = arith.constant 2 : index
    %c2_133 = arith.constant 2 : index
    %c0_134 = arith.constant 0 : index
    %178 = vector.load %arg19[%c2_132, %c2_133, %c0_134] : memref<10x10x160xf32, #tpu.memory_space<vmem>>, vector<8x8x128xf32>
    %c24 = arith.constant 24 : index
    %c0_135 = arith.constant 0 : index
    %179 = vector.load %arg8[%c24, %c0_135] : memref<27x128xf32, #tpu.memory_space<vmem>>, vector<1x128xf32>
    %180 = vector.shape_cast %179 : vector<1x128xf32> to vector<1x1x128xf32>
    %181 = vector.broadcast %180 : vector<1x1x128xf32> to vector<8x8x128xf32>
    %182 = arith.mulf %178, %181 : vector<8x8x128xf32>
    %183 = arith.addf %177, %182 : vector<8x8x128xf32>
    %c2_136 = arith.constant 2 : index
    %c2_137 = arith.constant 2 : index
    %c16_138 = arith.constant 16 : index
    %184 = vector.load %arg19[%c2_136, %c2_137, %c16_138] : memref<10x10x160xf32, #tpu.memory_space<vmem>>, vector<8x8x128xf32>
    %c25 = arith.constant 25 : index
    %c0_139 = arith.constant 0 : index
    %185 = vector.load %arg8[%c25, %c0_139] : memref<27x128xf32, #tpu.memory_space<vmem>>, vector<1x128xf32>
    %186 = vector.shape_cast %185 : vector<1x128xf32> to vector<1x1x128xf32>
    %187 = vector.broadcast %186 : vector<1x1x128xf32> to vector<8x8x128xf32>
    %188 = arith.mulf %184, %187 : vector<8x8x128xf32>
    %189 = arith.addf %183, %188 : vector<8x8x128xf32>
    %c2_140 = arith.constant 2 : index
    %c2_141 = arith.constant 2 : index
    %c32_142 = arith.constant 32 : index
    %190 = vector.load %arg19[%c2_140, %c2_141, %c32_142] : memref<10x10x160xf32, #tpu.memory_space<vmem>>, vector<8x8x128xf32>
    %c26 = arith.constant 26 : index
    %c0_143 = arith.constant 0 : index
    %191 = vector.load %arg8[%c26, %c0_143] : memref<27x128xf32, #tpu.memory_space<vmem>>, vector<1x128xf32>
    %192 = vector.shape_cast %191 : vector<1x128xf32> to vector<1x1x128xf32>
    %193 = vector.broadcast %192 : vector<1x1x128xf32> to vector<8x8x128xf32>
    %194 = arith.mulf %190, %193 : vector<8x8x128xf32>
    %195 = arith.addf %189, %194 : vector<8x8x128xf32>
    %196 = vector.shape_cast %195 : vector<8x8x128xf32> to vector<64x128xf32>
    %cst_144 = arith.constant dense<0.000000e+00> : vector<128xf32>
    %197 = vector.multi_reduction <add>, %196, %cst_144 [0] : vector<64x128xf32> to vector<128xf32>
    %198 = vector.shape_cast %197 : vector<128xf32> to vector<1x128xf32>
    %c0_145 = arith.constant 0 : index
    %c0_146 = arith.constant 0 : index
    %199 = vector.load %arg9[%c0_145, %c0_146] : memref<128x16xf32, #tpu.memory_space<vmem>>, vector<128x16xf32>
    %cst_147 = arith.constant dense<0.000000e+00> : vector<1x16xf32>
    %200 = tpu.matmul %198, %199, %cst_147 {dimension_numbers = #tpu.dot_dimension_numbers<[1], [0], [0], [1], [0, 0, 1, 1], [], []>} : vector<1x128xf32>, vector<128x16xf32>, vector<1x16xf32> -> vector<1x16xf32>
    %c0_148 = arith.constant 0 : index
    %c0_149 = arith.constant 0 : index
    %201 = vector.load %arg10[%c0_148, %c0_149] : memref<16x4xf32, #tpu.memory_space<vmem>>, vector<16x4xf32>
    %cst_150 = arith.constant dense<0.000000e+00> : vector<1x4xf32>
    %202 = tpu.matmul %200, %201, %cst_150 {dimension_numbers = #tpu.dot_dimension_numbers<[1], [0], [0], [1], [0, 0, 1, 1], [], []>} : vector<1x16xf32>, vector<16x4xf32>, vector<1x4xf32> -> vector<1x4xf32>
    %c0_151 = arith.constant 0 : index
    %c0_152 = arith.constant 0 : index
    %203 = vector.load %arg11[%c0_151, %c0_152] : memref<1x4xf32, #tpu.memory_space<vmem>>, vector<1x4xf32>
    %204 = arith.addf %202, %203 : vector<1x4xf32>
    %cst_153 = arith.constant 0.000000e+00 : f32
    %205 = vector.broadcast %cst_153 : f32 to vector<1x4xf32>
    %206 = arith.maximumf %204, %205 : vector<1x4xf32>
    %c0_154 = arith.constant 0 : index
    %c0_155 = arith.constant 0 : index
    %207 = vector.load %arg12[%c0_154, %c0_155] : memref<4x16xf32, #tpu.memory_space<vmem>>, vector<4x16xf32>
    %cst_156 = arith.constant dense<0.000000e+00> : vector<1x16xf32>
    %208 = tpu.matmul %206, %207, %cst_156 {dimension_numbers = #tpu.dot_dimension_numbers<[1], [0], [0], [1], [0, 0, 1, 1], [], []>} : vector<1x4xf32>, vector<4x16xf32>, vector<1x16xf32> -> vector<1x16xf32>
    %c0_157 = arith.constant 0 : index
    %c0_158 = arith.constant 0 : index
    %209 = vector.load %arg13[%c0_157, %c0_158] : memref<1x16xf32, #tpu.memory_space<vmem>>, vector<1x16xf32>
    %210 = arith.addf %208, %209 : vector<1x16xf32>
    %cst_159 = arith.constant 0.000000e+00 : f32
    %211 = vector.broadcast %cst_159 : f32 to vector<1x16xf32>
    %212 = arith.subf %211, %210 : vector<1x16xf32>
    %213 = math.exp %212 : vector<1x16xf32>
    %cst_160 = arith.constant 1.000000e+00 : f32
    %214 = vector.broadcast %cst_160 : f32 to vector<1x16xf32>
    %215 = arith.addf %214, %213 : vector<1x16xf32>
    %cst_161 = arith.constant 1.000000e+00 : f32
    %216 = vector.broadcast %cst_161 : f32 to vector<1x16xf32>
    %217 = arith.divf %216, %215 : vector<1x16xf32>
    %c0_162 = arith.constant 0 : index
    %c0_163 = arith.constant 0 : index
    %218 = vector.load %arg14[%c0_162, %c0_163] : memref<16x128xf32, #tpu.memory_space<vmem>>, vector<16x128xf32>
    %cst_164 = arith.constant dense<0.000000e+00> : vector<1x128xf32>
    %219 = tpu.matmul %217, %218, %cst_164 {dimension_numbers = #tpu.dot_dimension_numbers<[1], [0], [0], [1], [0, 0, 1, 1], [], []>} : vector<1x16xf32>, vector<16x128xf32>, vector<1x128xf32> -> vector<1x128xf32>
    %220 = vector.broadcast %219 : vector<1x128xf32> to vector<64x128xf32>
    %221 = arith.mulf %196, %220 : vector<64x128xf32>
    %c0_165 = arith.constant 0 : index
    %c0_166 = arith.constant 0 : index
    %222 = vector.load %arg15[%c0_165, %c0_166] : memref<128x64xf32, #tpu.memory_space<vmem>>, vector<128x64xf32>
    %cst_167 = arith.constant dense<0.000000e+00> : vector<64x64xf32>
    %223 = tpu.matmul %221, %222, %cst_167 {dimension_numbers = #tpu.dot_dimension_numbers<[1], [0], [0], [1], [0, 0, 1, 1], [], []>} : vector<64x128xf32>, vector<128x64xf32>, vector<64x64xf32> -> vector<64x64xf32>
    %c0_168 = arith.constant 0 : index
    %c0_169 = arith.constant 0 : index
    %224 = vector.load %arg16[%c0_168, %c0_169] : memref<1x64xf32, #tpu.memory_space<vmem>>, vector<1x64xf32>
    %225 = vector.broadcast %224 : vector<1x64xf32> to vector<64x64xf32>
    %226 = arith.addf %223, %225 : vector<64x64xf32>
    %c0_170 = arith.constant 0 : index
    %c0_171 = arith.constant 0 : index
    %c0_172 = arith.constant 0 : index
    %c0_173 = arith.constant 0 : index
    %227 = vector.load %arg1[%c0_170, %c0_171, %c0_172, %c0_173] : memref<1x10x10x40xf32, #tpu.memory_space<vmem>>, vector<1x8x8x40xf32>
    %228 = vector.shape_cast %227 : vector<1x8x8x40xf32> to vector<8x8x40xf32>
    %229 = vector.shape_cast %228 : vector<8x8x40xf32> to vector<64x40xf32>
    %c0_174 = arith.constant 0 : index
    %c0_175 = arith.constant 0 : index
    %c0_176 = arith.constant 0 : index
    %230 = vector.load %arg17[%c0_174, %c0_175, %c0_176] : memref<9x40x64xf32, #tpu.memory_space<vmem>>, vector<1x40x64xf32>
    %231 = vector.shape_cast %230 : vector<1x40x64xf32> to vector<40x64xf32>
    %cst_177 = arith.constant dense<0.000000e+00> : vector<64x64xf32>
    %232 = tpu.matmul %229, %231, %cst_177 {dimension_numbers = #tpu.dot_dimension_numbers<[1], [0], [0], [1], [0, 0, 1, 1], [], []>} : vector<64x40xf32>, vector<40x64xf32>, vector<64x64xf32> -> vector<64x64xf32>
    %233 = arith.addf %226, %232 : vector<64x64xf32>
    %c0_178 = arith.constant 0 : index
    %c0_179 = arith.constant 0 : index
    %c1_180 = arith.constant 1 : index
    %c0_181 = arith.constant 0 : index
    %234 = vector.load %arg1[%c0_178, %c0_179, %c1_180, %c0_181] : memref<1x10x10x40xf32, #tpu.memory_space<vmem>>, vector<1x8x8x40xf32>
    %235 = vector.shape_cast %234 : vector<1x8x8x40xf32> to vector<8x8x40xf32>
    %236 = vector.shape_cast %235 : vector<8x8x40xf32> to vector<64x40xf32>
    %c1_182 = arith.constant 1 : index
    %c0_183 = arith.constant 0 : index
    %c0_184 = arith.constant 0 : index
    %237 = vector.load %arg17[%c1_182, %c0_183, %c0_184] : memref<9x40x64xf32, #tpu.memory_space<vmem>>, vector<1x40x64xf32>
    %238 = vector.shape_cast %237 : vector<1x40x64xf32> to vector<40x64xf32>
    %cst_185 = arith.constant dense<0.000000e+00> : vector<64x64xf32>
    %239 = tpu.matmul %236, %238, %cst_185 {dimension_numbers = #tpu.dot_dimension_numbers<[1], [0], [0], [1], [0, 0, 1, 1], [], []>} : vector<64x40xf32>, vector<40x64xf32>, vector<64x64xf32> -> vector<64x64xf32>
    %240 = arith.addf %233, %239 : vector<64x64xf32>
    %c0_186 = arith.constant 0 : index
    %c0_187 = arith.constant 0 : index
    %c2_188 = arith.constant 2 : index
    %c0_189 = arith.constant 0 : index
    %241 = vector.load %arg1[%c0_186, %c0_187, %c2_188, %c0_189] : memref<1x10x10x40xf32, #tpu.memory_space<vmem>>, vector<1x8x8x40xf32>
    %242 = vector.shape_cast %241 : vector<1x8x8x40xf32> to vector<8x8x40xf32>
    %243 = vector.shape_cast %242 : vector<8x8x40xf32> to vector<64x40xf32>
    %c2_190 = arith.constant 2 : index
    %c0_191 = arith.constant 0 : index
    %c0_192 = arith.constant 0 : index
    %244 = vector.load %arg17[%c2_190, %c0_191, %c0_192] : memref<9x40x64xf32, #tpu.memory_space<vmem>>, vector<1x40x64xf32>
    %245 = vector.shape_cast %244 : vector<1x40x64xf32> to vector<40x64xf32>
    %cst_193 = arith.constant dense<0.000000e+00> : vector<64x64xf32>
    %246 = tpu.matmul %243, %245, %cst_193 {dimension_numbers = #tpu.dot_dimension_numbers<[1], [0], [0], [1], [0, 0, 1, 1], [], []>} : vector<64x40xf32>, vector<40x64xf32>, vector<64x64xf32> -> vector<64x64xf32>
    %247 = arith.addf %240, %246 : vector<64x64xf32>
    %c0_194 = arith.constant 0 : index
    %c1_195 = arith.constant 1 : index
    %c0_196 = arith.constant 0 : index
    %c0_197 = arith.constant 0 : index
    %248 = vector.load %arg1[%c0_194, %c1_195, %c0_196, %c0_197] : memref<1x10x10x40xf32, #tpu.memory_space<vmem>>, vector<1x8x8x40xf32>
    %249 = vector.shape_cast %248 : vector<1x8x8x40xf32> to vector<8x8x40xf32>
    %250 = vector.shape_cast %249 : vector<8x8x40xf32> to vector<64x40xf32>
    %c3_198 = arith.constant 3 : index
    %c0_199 = arith.constant 0 : index
    %c0_200 = arith.constant 0 : index
    %251 = vector.load %arg17[%c3_198, %c0_199, %c0_200] : memref<9x40x64xf32, #tpu.memory_space<vmem>>, vector<1x40x64xf32>
    %252 = vector.shape_cast %251 : vector<1x40x64xf32> to vector<40x64xf32>
    %cst_201 = arith.constant dense<0.000000e+00> : vector<64x64xf32>
    %253 = tpu.matmul %250, %252, %cst_201 {dimension_numbers = #tpu.dot_dimension_numbers<[1], [0], [0], [1], [0, 0, 1, 1], [], []>} : vector<64x40xf32>, vector<40x64xf32>, vector<64x64xf32> -> vector<64x64xf32>
    %254 = arith.addf %247, %253 : vector<64x64xf32>
    %c0_202 = arith.constant 0 : index
    %c1_203 = arith.constant 1 : index
    %c1_204 = arith.constant 1 : index
    %c0_205 = arith.constant 0 : index
    %255 = vector.load %arg1[%c0_202, %c1_203, %c1_204, %c0_205] : memref<1x10x10x40xf32, #tpu.memory_space<vmem>>, vector<1x8x8x40xf32>
    %256 = vector.shape_cast %255 : vector<1x8x8x40xf32> to vector<8x8x40xf32>
    %257 = vector.shape_cast %256 : vector<8x8x40xf32> to vector<64x40xf32>
    %c4_206 = arith.constant 4 : index
    %c0_207 = arith.constant 0 : index
    %c0_208 = arith.constant 0 : index
    %258 = vector.load %arg17[%c4_206, %c0_207, %c0_208] : memref<9x40x64xf32, #tpu.memory_space<vmem>>, vector<1x40x64xf32>
    %259 = vector.shape_cast %258 : vector<1x40x64xf32> to vector<40x64xf32>
    %cst_209 = arith.constant dense<0.000000e+00> : vector<64x64xf32>
    %260 = tpu.matmul %257, %259, %cst_209 {dimension_numbers = #tpu.dot_dimension_numbers<[1], [0], [0], [1], [0, 0, 1, 1], [], []>} : vector<64x40xf32>, vector<40x64xf32>, vector<64x64xf32> -> vector<64x64xf32>
    %261 = arith.addf %254, %260 : vector<64x64xf32>
    %c0_210 = arith.constant 0 : index
    %c1_211 = arith.constant 1 : index
    %c2_212 = arith.constant 2 : index
    %c0_213 = arith.constant 0 : index
    %262 = vector.load %arg1[%c0_210, %c1_211, %c2_212, %c0_213] : memref<1x10x10x40xf32, #tpu.memory_space<vmem>>, vector<1x8x8x40xf32>
    %263 = vector.shape_cast %262 : vector<1x8x8x40xf32> to vector<8x8x40xf32>
    %264 = vector.shape_cast %263 : vector<8x8x40xf32> to vector<64x40xf32>
    %c5_214 = arith.constant 5 : index
    %c0_215 = arith.constant 0 : index
    %c0_216 = arith.constant 0 : index
    %265 = vector.load %arg17[%c5_214, %c0_215, %c0_216] : memref<9x40x64xf32, #tpu.memory_space<vmem>>, vector<1x40x64xf32>
    %266 = vector.shape_cast %265 : vector<1x40x64xf32> to vector<40x64xf32>
    %cst_217 = arith.constant dense<0.000000e+00> : vector<64x64xf32>
    %267 = tpu.matmul %264, %266, %cst_217 {dimension_numbers = #tpu.dot_dimension_numbers<[1], [0], [0], [1], [0, 0, 1, 1], [], []>} : vector<64x40xf32>, vector<40x64xf32>, vector<64x64xf32> -> vector<64x64xf32>
    %268 = arith.addf %261, %267 : vector<64x64xf32>
    %c0_218 = arith.constant 0 : index
    %c2_219 = arith.constant 2 : index
    %c0_220 = arith.constant 0 : index
    %c0_221 = arith.constant 0 : index
    %269 = vector.load %arg1[%c0_218, %c2_219, %c0_220, %c0_221] : memref<1x10x10x40xf32, #tpu.memory_space<vmem>>, vector<1x8x8x40xf32>
    %270 = vector.shape_cast %269 : vector<1x8x8x40xf32> to vector<8x8x40xf32>
    %271 = vector.shape_cast %270 : vector<8x8x40xf32> to vector<64x40xf32>
    %c6_222 = arith.constant 6 : index
    %c0_223 = arith.constant 0 : index
    %c0_224 = arith.constant 0 : index
    %272 = vector.load %arg17[%c6_222, %c0_223, %c0_224] : memref<9x40x64xf32, #tpu.memory_space<vmem>>, vector<1x40x64xf32>
    %273 = vector.shape_cast %272 : vector<1x40x64xf32> to vector<40x64xf32>
    %cst_225 = arith.constant dense<0.000000e+00> : vector<64x64xf32>
    %274 = tpu.matmul %271, %273, %cst_225 {dimension_numbers = #tpu.dot_dimension_numbers<[1], [0], [0], [1], [0, 0, 1, 1], [], []>} : vector<64x40xf32>, vector<40x64xf32>, vector<64x64xf32> -> vector<64x64xf32>
    %275 = arith.addf %268, %274 : vector<64x64xf32>
    %c0_226 = arith.constant 0 : index
    %c2_227 = arith.constant 2 : index
    %c1_228 = arith.constant 1 : index
    %c0_229 = arith.constant 0 : index
    %276 = vector.load %arg1[%c0_226, %c2_227, %c1_228, %c0_229] : memref<1x10x10x40xf32, #tpu.memory_space<vmem>>, vector<1x8x8x40xf32>
    %277 = vector.shape_cast %276 : vector<1x8x8x40xf32> to vector<8x8x40xf32>
    %278 = vector.shape_cast %277 : vector<8x8x40xf32> to vector<64x40xf32>
    %c7_230 = arith.constant 7 : index
    %c0_231 = arith.constant 0 : index
    %c0_232 = arith.constant 0 : index
    %279 = vector.load %arg17[%c7_230, %c0_231, %c0_232] : memref<9x40x64xf32, #tpu.memory_space<vmem>>, vector<1x40x64xf32>
    %280 = vector.shape_cast %279 : vector<1x40x64xf32> to vector<40x64xf32>
    %cst_233 = arith.constant dense<0.000000e+00> : vector<64x64xf32>
    %281 = tpu.matmul %278, %280, %cst_233 {dimension_numbers = #tpu.dot_dimension_numbers<[1], [0], [0], [1], [0, 0, 1, 1], [], []>} : vector<64x40xf32>, vector<40x64xf32>, vector<64x64xf32> -> vector<64x64xf32>
    %282 = arith.addf %275, %281 : vector<64x64xf32>
    %c0_234 = arith.constant 0 : index
    %c2_235 = arith.constant 2 : index
    %c2_236 = arith.constant 2 : index
    %c0_237 = arith.constant 0 : index
    %283 = vector.load %arg1[%c0_234, %c2_235, %c2_236, %c0_237] : memref<1x10x10x40xf32, #tpu.memory_space<vmem>>, vector<1x8x8x40xf32>
    %284 = vector.shape_cast %283 : vector<1x8x8x40xf32> to vector<8x8x40xf32>
    %285 = vector.shape_cast %284 : vector<8x8x40xf32> to vector<64x40xf32>
    %c8_238 = arith.constant 8 : index
    %c0_239 = arith.constant 0 : index
    %c0_240 = arith.constant 0 : index
    %286 = vector.load %arg17[%c8_238, %c0_239, %c0_240] : memref<9x40x64xf32, #tpu.memory_space<vmem>>, vector<1x40x64xf32>
    %287 = vector.shape_cast %286 : vector<1x40x64xf32> to vector<40x64xf32>
    %cst_241 = arith.constant dense<0.000000e+00> : vector<64x64xf32>
    %288 = tpu.matmul %285, %287, %cst_241 {dimension_numbers = #tpu.dot_dimension_numbers<[1], [0], [0], [1], [0, 0, 1, 1], [], []>} : vector<64x40xf32>, vector<40x64xf32>, vector<64x64xf32> -> vector<64x64xf32>
    %289 = arith.addf %282, %288 : vector<64x64xf32>
    %c0_242 = arith.constant 0 : index
    %c0_243 = arith.constant 0 : index
    %c0_244 = arith.constant 0 : index
    %290 = vector.load %arg18[%c0_242, %c0_243, %c0_244] : memref<1x64x64xf32, #tpu.memory_space<vmem>>, vector<1x64x64xf32>
    %291 = vector.shape_cast %290 : vector<1x64x64xf32> to vector<64x64xf32>
    %292 = vector.shape_cast %289 : vector<64x64xf32> to vector<1x64x64xf32>
    tpu.vector_store %arg18[%c0_242, %c0_243, %c0_244], %292 {strides = array<i32>} : memref<1x64x64xf32, #tpu.memory_space<vmem>>, vector<1x64x64xf32>,
    return
  }
  func.func @transform_0(%arg0: i32) -> (i32, i32, i32, i32) {
    %c0_i32 = arith.constant 0 : i32
    %c0_i32_0 = arith.constant 0 : i32
    %c0_i32_1 = arith.constant 0 : i32
    %c0_i32_2 = arith.constant 0 : i32
    return %arg0, %c0_i32, %c0_i32_0, %c0_i32_1 : i32, i32, i32, i32
  }
  func.func @transform_1(%arg0: i32) -> (i32, i32) {
    %c0_i32 = arith.constant 0 : i32
    %c0_i32_0 = arith.constant 0 : i32
    %c0_i32_1 = arith.constant 0 : i32
    return %c0_i32, %c0_i32_0 : i32, i32
  }
  func.func @transform_2(%arg0: i32) -> (i32, i32) {
    %c0_i32 = arith.constant 0 : i32
    %c0_i32_0 = arith.constant 0 : i32
    %c0_i32_1 = arith.constant 0 : i32
    return %c0_i32, %c0_i32_0 : i32, i32
  }
  func.func @transform_3(%arg0: i32) -> (i32, i32) {
    %c0_i32 = arith.constant 0 : i32
    %c0_i32_0 = arith.constant 0 : i32
    %c0_i32_1 = arith.constant 0 : i32
    return %c0_i32, %c0_i32_0 : i32, i32
  }
  func.func @transform_4(%arg0: i32) -> (i32, i32) {
    %c0_i32 = arith.constant 0 : i32
    %c0_i32_0 = arith.constant 0 : i32
    %c0_i32_1 = arith.constant 0 : i32
    return %c0_i32, %c0_i32_0 : i32, i32
  }
  func.func @transform_5(%arg0: i32) -> (i32, i32) {
    %c0_i32 = arith.constant 0 : i32
    %c0_i32_0 = arith.constant 0 : i32
    %c0_i32_1 = arith.constant 0 : i32
    return %c0_i32, %c0_i32_0 : i32, i32
  }
  func.func @transform_6(%arg0: i32) -> (i32, i32) {
    %c0_i32 = arith.constant 0 : i32
    %c0_i32_0 = arith.constant 0 : i32
    %c0_i32_1 = arith.constant 0 : i32
    return %c0_i32, %c0_i32_0 : i32, i32
  }
  func.func @transform_7(%arg0: i32) -> (i32, i32) {
    %c0_i32 = arith.constant 0 : i32
    %c0_i32_0 = arith.constant 0 : i32
    %c0_i32_1 = arith.constant 0 : i32
    return %c0_i32, %c0_i32_0 : i32, i32
  }
  func.func @transform_8(%arg0: i32) -> (i32, i32) {
    %c0_i32 = arith.constant 0 : i32
    %c0_i32_0 = arith.constant 0 : i32
    %c0_i32_1 = arith.constant 0 : i32
    return %c0_i32, %c0_i32_0 : i32, i32
  }
  func.func @transform_9(%arg0: i32) -> (i32, i32) {
    %c0_i32 = arith.constant 0 : i32
    %c0_i32_0 = arith.constant 0 : i32
    %c0_i32_1 = arith.constant 0 : i32
    return %c0_i32, %c0_i32_0 : i32, i32
  }
  func.func @transform_10(%arg0: i32) -> (i32, i32) {
    %c0_i32 = arith.constant 0 : i32
    %c0_i32_0 = arith.constant 0 : i32
    %c0_i32_1 = arith.constant 0 : i32
    return %c0_i32, %c0_i32_0 : i32, i32
  }
  func.func @transform_11(%arg0: i32) -> (i32, i32) {
    %c0_i32 = arith.constant 0 : i32
    %c0_i32_0 = arith.constant 0 : i32
    %c0_i32_1 = arith.constant 0 : i32
    return %c0_i32, %c0_i32_0 : i32, i32
  }
  func.func @transform_12(%arg0: i32) -> (i32, i32) {
    %c0_i32 = arith.constant 0 : i32
    %c0_i32_0 = arith.constant 0 : i32
    %c0_i32_1 = arith.constant 0 : i32
    return %c0_i32, %c0_i32_0 : i32, i32
  }
  func.func @transform_13(%arg0: i32) -> (i32, i32) {
    %c0_i32 = arith.constant 0 : i32
    %c0_i32_0 = arith.constant 0 : i32
    %c0_i32_1 = arith.constant 0 : i32
    return %c0_i32, %c0_i32_0 : i32, i32
  }
  func.func @transform_14(%arg0: i32) -> (i32, i32) {
    %c0_i32 = arith.constant 0 : i32
    %c0_i32_0 = arith.constant 0 : i32
    %c0_i32_1 = arith.constant 0 : i32
    return %c0_i32, %c0_i32_0 : i32, i32
  }
  func.func @transform_15(%arg0: i32) -> (i32, i32) {
    %c0_i32 = arith.constant 0 : i32
    %c0_i32_0 = arith.constant 0 : i32
    %c0_i32_1 = arith.constant 0 : i32
    return %c0_i32, %c0_i32_0 : i32, i32
  }
  func.func @transform_16(%arg0: i32) -> (i32, i32, i32) {
    %c0_i32 = arith.constant 0 : i32
    %c0_i32_0 = arith.constant 0 : i32
    %c0_i32_1 = arith.constant 0 : i32
    %c0_i32_2 = arith.constant 0 : i32
    return %c0_i32, %c0_i32_0, %c0_i32_1 : i32, i32, i32
  }
  func.func @transform_17(%arg0: i32) -> (i32, i32, i32) {
    %c0_i32 = arith.constant 0 : i32
    %c0_i32_0 = arith.constant 0 : i32
    %c0_i32_1 = arith.constant 0 : i32
    return %arg0, %c0_i32, %c0_i32_0 : i32, i32, i32
  }
}

</mosaic_0001>

<bundles_post_ra>
// kernel: tile.66
= control target key start
LH: loop header
LB: loop body
LE: loop exit
PB: predicated region body
PF: predicated region fallthrough
CT: control target
= control target key end

     0   :  { %s22_s0 = inlined_call_operand.vmem [shape: f32[8], index: 0, kind: input, shape index: {}]   ;;  %s23_s1 = inlined_call_operand.vmem [shape: f32[8,8], index: 1, kind: output, shape index: {}]  }
   0x1   :  { %v4_v0 = vld [vmem:[%s22_s0] ss:$0 sm:$0xff] }
   0x2   :  { %5 = vst [vmem:[%s23_s1] sm:$0xff] %v4_v0 }

// kernel: tile.67
= control target key start
LH: loop header
LB: loop body
LE: loop exit
PB: predicated region body
PF: predicated region fallthrough
CT: control target
= control target key end

     0   :  { %s69_s10 = smov 56   ;;  %s70_s11 = smov 40   ;;  %vm3_vm0 = vcmask 64512   ;;  %vm9_vm1 = vcmask 523712   ;;  %vm15_vm2 = vcmask 458112   ;;  %vm21_vm3 = vcmask 392512   ;;  %s113_s0 = inlined_call_operand.vmem [shape: f32[8,8], index: 0, kind: input, shape index: {}]   ;;  %s114_s1 = inlined_call_operand.vmem [shape: f32[1,64], index: 1, kind: output, shape index: {}]  }
   0x1   :  { %v55_v0 = vld [vmem:[%s113_s0 + $0x7] sm:$0x1]   ;;  %v57_v1 = vld [vmem:[%s113_s0 + $0x5] sm:$0x1]   ;;  %v56_v2 = vld [vmem:[%s113_s0 + $0x6] sm:$0x1]  }
   0x2   :  { %7 = vrot.lane.b32.xlu0 %v55_v0, %s69_s10  ;;  %19 = vrot.lane.b32.xlu1 %v57_v1, %s70_s11  ;;  %v58_v3 = vld [vmem:[%s113_s0 + $0x4] sm:$0x1]   ;;  %v2_v4 = vld [vmem:[%s113_s0] sm:$0x1]   ;;  %s71_s18 = smov 48   ;;  %s72_s19 = smov 32  }
   0x3   :  { %4 = vst.msk [vmem:[#allocation0] sm:$0x1] %vm3_vm0, %v2_v4   ;;  %v59_v5 = vld [vmem:[%s113_s0 + $0x3] sm:$0x1]   ;;  %v60_v6 = vld [vmem:[%s113_s0 + $0x2] sm:$0x1]  }
   0x4   :  { %s73_s24 = smov 24   ;;  %s74_s25 = smov 16   ;;  %v61_v7 = vld [vmem:[%s113_s0 + $0x1] sm:$0x1]   ;;  %vm27_vm4 = vcmask 326912   ;;  %vm33_vm5 = vcmask 261312  }
   0x5   :  { %s75_s0 = smov 8   ;;  %vm39_vm6 = vcmask 195712   ;;  %vm45_vm7 = vcmask 130112  }
   0x6   :  { %13 = vrot.lane.b32.xlu0 %v56_v2, %s71_s18  ;;  %25 = vrot.lane.b32.xlu1 %v58_v3, %s72_s19 }
   0xa   :  { %31 = vrot.lane.b32.xlu0 %v59_v5, %s73_s24  ;;  %37 = vrot.lane.b32.xlu1 %v60_v6, %s74_s25 }
   0xe   :  { %43 = vrot.lane.b32.xlu0 %v61_v7, %s75_s0 }
  0x74   :  { %v8_v8 = vpop.permute.xlu0 %7   ;;  %v20_v9 = vpop.permute.xlu1 %19  }
  0x75   :  { %10 = vst.msk [vmem:[#allocation0] sm:$0x1] %vm9_vm1, %v8_v8  }
  0x78   :  { %v14_v10 = vpop.permute.xlu0 %13   ;;  %v26_v11 = vpop.permute.xlu1 %25  }
  0x79   :  { %16 = vst.msk [vmem:[#allocation0] sm:$0x1] %vm15_vm2, %v14_v10  }
  0x7a   :  { %22 = vst.msk [vmem:[#allocation0] sm:$0x1] %vm21_vm3, %v20_v9  }
  0x7b   :  { %28 = vst.msk [vmem:[#allocation0] sm:$0x1] %vm27_vm4, %v26_v11  }
  0x7c   :  { %v32_v12 = vpop.permute.xlu0 %31   ;;  %v38_v13 = vpop.permute.xlu1 %37  }
  0x7d   :  { %34 = vst.msk [vmem:[#allocation0] sm:$0x1] %vm33_vm5, %v32_v12  }
  0x7e   :  { %40 = vst.msk [vmem:[#allocation0] sm:$0x1] %vm39_vm6, %v38_v13  }
  0x80   :  { %v44_v14 = vpop.permute.xlu0 %43  }
  0x81   :  { %46 = vst.msk [vmem:[#allocation0] sm:$0x1] %vm45_vm7, %v44_v14  }
  0x88   :  { %v51_v15 = vld [vmem:[#allocation0] sm:$0x1] }
  0x89   :  { %54 = vst [vmem:[%s114_s1] sm:$0x1] %v51_v15 }

// kernel: tile.62
= control target key start
LH: loop header
LB: loop body
LE: loop exit
PB: predicated region body
PF: predicated region fallthrough
CT: control target
= control target key end

     0   :  { %vm4_vm0 = vcmask 1047556   ;;  %s209_s14 = smov 96   ;;  %s210_s19 = smov 112   ;;  %vm6_vm1 = vcmask 130048   ;;  %vm25_vm2 = vcmask 1048448   ;;  %vm46_vm3 = vcmask 917248   ;;  %s388_s0 = inlined_call_operand.vmem [shape: f32[8,16,16], index: 0, kind: input, shape index: {}]   ;;  %s389_s1 = inlined_call_operand.vmem [shape: f32[128,16], index: 1, kind: output, shape index: {}]  }
   0x1   :  { %v172_v0 = vld [vmem:[%s388_s0 + $0x6] ss:$8 sm:$0xf]   ;;  %v167_v3 = vld [vmem:[%s388_s0 + $0x7] ss:$8 sm:$0xf]  }
   0x2   :  { %v173_v1 = vld [vmem:[%s388_s0 + $0x6] ss:$8 sm:$0xf0]   ;;  %v168_v4 = vld [vmem:[%s388_s0 + $0x7] ss:$8 sm:$0xf0]  }
   0x3   :  { %v43_v2 = vsel %vm4_vm0, %v173_v1, %v172_v0  ;;  %v22_v5 = vsel %vm4_vm0, %v168_v4, %v167_v3  ;;  %v174_v6 = vld [vmem:[%s388_s0 + $0x46] ss:$8 sm:$0xf]   ;;  %v169_v9 = vld [vmem:[%s388_s0 + $0x47] ss:$8 sm:$0xf]  }
   0x4   :  { %44 = vrot.lane.b32.xlu1 %v43_v2, %s209_s14  ;;  %v175_v7 = vld [vmem:[%s388_s0 + $0x46] ss:$8 sm:$0xf0]   ;;  %23 = vrot.lane.b32.xlu0 %v22_v5, %s210_s19  ;;  %v170_v10 = vld [vmem:[%s388_s0 + $0x47] ss:$8 sm:$0xf0]  }
   0x5   :  { %v53_v8 = vsel %vm4_vm0, %v175_v7, %v174_v6  ;;  %v32_v11 = vsel %vm4_vm0, %v170_v10, %v169_v9  ;;  %v179_v12 = vld [vmem:[%s388_s0 + $0x45] ss:$8 sm:$0xf]   ;;  %v184_v18 = vld [vmem:[%s388_s0 + $0x44] ss:$8 sm:$0xf]  }
   0x6   :  { %v180_v13 = vld [vmem:[%s388_s0 + $0x45] ss:$8 sm:$0xf0]   ;;  %v185_v19 = vld [vmem:[%s388_s0 + $0x44] ss:$8 sm:$0xf0]  }
   0x7   :  { %v177_v14 = vld [vmem:[%s388_s0 + $0x5] ss:$8 sm:$0xf]   ;;  %v74_v16 = vsel %vm4_vm0, %v180_v13, %v179_v12  ;;  %v182_v20 = vld [vmem:[%s388_s0 + $0x4] ss:$8 sm:$0xf]   ;;  %v95_v22 = vsel %vm4_vm0, %v185_v19, %v184_v18 }
   0x8   :  { %54 = vrot.lane.b32.xlu1 %v53_v8, %s209_s14  ;;  %v178_v15 = vld [vmem:[%s388_s0 + $0x5] ss:$8 sm:$0xf0]   ;;  %33 = vrot.lane.b32.xlu0 %v32_v11, %s210_s19  ;;  %v183_v21 = vld [vmem:[%s388_s0 + $0x4] ss:$8 sm:$0xf0]  }
   0x9   :  { %v64_v17 = vsel %vm4_vm0, %v178_v15, %v177_v14  ;;  %s211_s11 = smov 80   ;;  %v85_v23 = vsel %vm4_vm0, %v183_v21, %v182_v20  ;;  %v189_v24 = vld [vmem:[%s388_s0 + $0x43] ss:$8 sm:$0xf]   ;;  %s212_s20 = smov 64   ;;  %vm67_vm4 = vcmask 786048  }
   0xa   :  { %v190_v25 = vld [vmem:[%s388_s0 + $0x43] ss:$8 sm:$0xf0]   ;;  %v194_v28 = vld [vmem:[%s388_s0 + $0x42] ss:$8 sm:$0xf]  }
   0xb   :  { %v187_v26 = vld [vmem:[%s388_s0 + $0x3] ss:$8 sm:$0xf]   ;;  %v195_v29 = vld [vmem:[%s388_s0 + $0x42] ss:$8 sm:$0xf0]   ;;  %v116_v30 = vsel %vm4_vm0, %v190_v25, %v189_v24 }
   0xc   :  { %75 = vrot.lane.b32.xlu1 %v74_v16, %s211_s11  ;;  %65 = vrot.lane.b32.xlu0 %v64_v17, %s211_s11  ;;  %v188_v27 = vld [vmem:[%s388_s0 + $0x3] ss:$8 sm:$0xf0]   ;;  %v192_v31 = vld [vmem:[%s388_s0 + $0x2] ss:$8 sm:$0xf]   ;;  %v137_v40 = vsel %vm4_vm0, %v195_v29, %v194_v28 }
   0xd   :  { %v2_v32 = vld [vmem:[%s388_s0] ss:$8 sm:$0xf]   ;;  %v106_v33 = vsel %vm4_vm0, %v188_v27, %v187_v26  ;;  %v193_v36 = vld [vmem:[%s388_s0 + $0x2] ss:$8 sm:$0xf0]  }
   0xe   :  { %v3_v34 = vld [vmem:[%s388_s0] ss:$8 sm:$0xf0]   ;;  %s213_s8 = smov 48   ;;  %v127_v41 = vsel %vm4_vm0, %v193_v36, %v192_v31  ;;  %s215_s21 = smov 16   ;;  %vm88_vm5 = vcmask 654848  }
   0xf   :  { %v164_v35 = vld [vmem:[%s388_s0 + $0x40] ss:$8 sm:$0xf]   ;;  %v5_v37 = vsel %vm4_vm0, %v3_v34, %v2_v32  ;;  %v199_v42 = vld [vmem:[%s388_s0 + $0x41] ss:$8 sm:$0xf]  }
  0x10   :  { %96 = vrot.lane.b32.xlu1 %v95_v22, %s212_s20  ;;  %86 = vrot.lane.b32.xlu0 %v85_v23, %s212_s20  ;;  %v165_v38 = vld [vmem:[%s388_s0 + $0x40] ss:$8 sm:$0xf0]   ;;  %7 = vst.msk [vmem:[%s389_s1] sm:$0xff] %vm6_vm1, %v5_v37   ;;  %vm109_vm6 = vcmask 523648   ;;  %vm130_vm7 = vcmask 392448  }
  0x11   :  { %v13_v39 = vsel %vm4_vm0, %v165_v38, %v164_v35  ;;  %v200_v43 = vld [vmem:[%s388_s0 + $0x41] ss:$8 sm:$0xf0]   ;;  %vm151_vm8 = vcmask 261248  }
  0x12   :  { %166 = vst.msk [vmem:[%s389_s1 + $0x8] sm:$0xff] %vm6_vm1, %v13_v39   ;;  %v197_v44 = vld [vmem:[%s388_s0 + $0x1] ss:$8 sm:$0xf]   ;;  %v158_v46 = vsel %vm4_vm0, %v200_v43, %v199_v42 }
  0x13   :  { %v198_v45 = vld [vmem:[%s388_s0 + $0x1] ss:$8 sm:$0xf0]   ;;  %s214_s0 = smov 32  }
  0x14   :  { %117 = vrot.lane.b32.xlu1 %v116_v30, %s213_s8  ;;  %107 = vrot.lane.b32.xlu0 %v106_v33, %s213_s8  ;;  %v148_v47 = vsel %vm4_vm0, %v198_v45, %v197_v44 }
  0x18   :  { %138 = vrot.lane.b32.xlu1 %v137_v40, %s214_s0  ;;  %128 = vrot.lane.b32.xlu0 %v127_v41, %s214_s0 }
  0x1c   :  { %159 = vrot.lane.b32.xlu1 %v158_v46, %s215_s21  ;;  %149 = vrot.lane.b32.xlu0 %v148_v47, %s215_s21 }
  0x76   :  { %v45_v48 = vpop.permute.xlu1 %44   ;;  %v24_v49 = vpop.permute.xlu0 %23  }
  0x77   :  { %26 = vst.msk [vmem:[%s389_s1] sm:$0xff] %vm25_vm2, %v24_v49  }
  0x78   :  { %47 = vst.msk [vmem:[%s389_s1] sm:$0xff] %vm46_vm3, %v45_v48  }
  0x7a   :  { %v55_v50 = vpop.permute.xlu1 %54   ;;  %v34_v51 = vpop.permute.xlu0 %33  }
  0x7b   :  { %171 = vst.msk [vmem:[%s389_s1 + $0x8] sm:$0xff] %vm25_vm2, %v34_v51  }
  0x7c   :  { %176 = vst.msk [vmem:[%s389_s1 + $0x8] sm:$0xff] %vm46_vm3, %v55_v50  }
  0x7e   :  { %v76_v52 = vpop.permute.xlu1 %75   ;;  %v66_v53 = vpop.permute.xlu0 %65  }
  0x7f   :  { %181 = vst.msk [vmem:[%s389_s1 + $0x8] sm:$0xff] %vm67_vm4, %v76_v52   ;;  %68 = vst.msk [vmem:[%s389_s1] sm:$0xff] %vm67_vm4, %v66_v53  }
  0x82   :  { %v97_v54 = vpop.permute.xlu1 %96   ;;  %v87_v55 = vpop.permute.xlu0 %86  }
  0x83   :  { %186 = vst.msk [vmem:[%s389_s1 + $0x8] sm:$0xff] %vm88_vm5, %v97_v54   ;;  %89 = vst.msk [vmem:[%s389_s1] sm:$0xff] %vm88_vm5, %v87_v55  }
  0x86   :  { %v118_v56 = vpop.permute.xlu1 %117   ;;  %v108_v57 = vpop.permute.xlu0 %107  }
  0x87   :  { %191 = vst.msk [vmem:[%s389_s1 + $0x8] sm:$0xff] %vm109_vm6, %v118_v56   ;;  %110 = vst.msk [vmem:[%s389_s1] sm:$0xff] %vm109_vm6, %v108_v57  }
  0x8a   :  { %v139_v58 = vpop.permute.xlu1 %138   ;;  %v129_v59 = vpop.permute.xlu0 %128  }
  0x8b   :  { %196 = vst.msk [vmem:[%s389_s1 + $0x8] sm:$0xff] %vm130_vm7, %v139_v58   ;;  %131 = vst.msk [vmem:[%s389_s1] sm:$0xff] %vm130_vm7, %v129_v59  }
  0x8e   :  { %v160_v60 = vpop.permute.xlu1 %159   ;;  %v150_v61 = vpop.permute.xlu0 %149  }
  0x8f   :  { %201 = vst.msk [vmem:[%s389_s1 + $0x8] sm:$0xff] %vm151_vm8, %v160_v60   ;;  %152 = vst.msk [vmem:[%s389_s1] sm:$0xff] %vm151_vm8, %v150_v61  }

// kernel: tile.37
= control target key start
LH: loop header
LB: loop body
LE: loop exit
PB: predicated region body
PF: predicated region fallthrough
CT: control target
= control target key end

     0   :  { %s28_s0 = inlined_call_operand.vmem [shape: f32[4], index: 0, kind: input, shape index: {}]   ;;  %s29_s1 = inlined_call_operand.vmem [shape: f32[10,4], index: 1, kind: output, shape index: {}]  }
   0x1   :  { %v4_v0 = vld [vmem:[%s28_s0] ss:$0 sm:$0xff] }
   0x2   :  { %5 = vst [vmem:[%s29_s1] sm:$0xff] %v4_v0  ;;  %8 = vst [vmem:[%s29_s1 + $0x8] sm:$0xff] %v4_v0 }

// kernel: tile.38
= control target key start
LH: loop header
LB: loop body
LE: loop exit
PB: predicated region body
PF: predicated region fallthrough
CT: control target
= control target key end

     0   :  { %s85_s10 = smov 36   ;;  %s86_s11 = smov 28   ;;  %vm3_vm0 = vcmask 31744   ;;  %vm9_vm1 = vcmask 326944   ;;  %vm15_vm2 = vcmask 294144   ;;  %vm21_vm3 = vcmask 261344   ;;  %s137_s0 = inlined_call_operand.vmem [shape: f32[10,4], index: 0, kind: input, shape index: {}]   ;;  %s138_s1 = inlined_call_operand.vmem [shape: f32[1,40], index: 1, kind: output, shape index: {}]  }
   0x1   :  { %v67_v0 = vld [vmem:[%s137_s0 + $0x9] sm:$0x1]   ;;  %v69_v1 = vld [vmem:[%s137_s0 + $0x7] sm:$0x1]   ;;  %v68_v2 = vld [vmem:[%s137_s0 + $0x8] sm:$0x1]  }
   0x2   :  { %7 = vrot.lane.b32.xlu0 %v67_v0, %s85_s10  ;;  %19 = vrot.lane.b32.xlu1 %v69_v1, %s86_s11  ;;  %v70_v3 = vld [vmem:[%s137_s0 + $0x6] sm:$0x1]   ;;  %v2_v4 = vld [vmem:[%s137_s0] sm:$0x1]   ;;  %s87_s18 = smov 32   ;;  %s88_s19 = smov 24  }
   0x3   :  { %v71_v5 = vld [vmem:[%s137_s0 + $0x5] sm:$0x1]   ;;  %v72_v6 = vld [vmem:[%s137_s0 + $0x4] sm:$0x1]   ;;  %4 = vst.msk [vmem:[#allocation0] sm:$0x1] %vm3_vm0, %v2_v4  }
   0x4   :  { %s89_s24 = smov 20   ;;  %s90_s25 = smov 16   ;;  %v73_v7 = vld [vmem:[%s137_s0 + $0x3] sm:$0x1]   ;;  %v74_v8 = vld [vmem:[%s137_s0 + $0x2] sm:$0x1]  }
   0x5   :  { %s91_s30 = smov 12   ;;  %s92_s2 = smov 8   ;;  %v75_v9 = vld [vmem:[%s137_s0 + $0x1] sm:$0x1]   ;;  %vm27_vm4 = vcmask 228544   ;;  %vm33_vm5 = vcmask 195744  }
   0x6   :  { %13 = vrot.lane.b32.xlu0 %v68_v2, %s87_s18  ;;  %25 = vrot.lane.b32.xlu1 %v70_v3, %s88_s19  ;;  %s93_s0 = smov 4   ;;  %vm39_vm6 = vcmask 162944   ;;  %vm45_vm7 = vcmask 130144   ;;  %vm51_vm8 = vcmask 97344   ;;  %vm57_vm9 = vcmask 64544  }
   0xa   :  { %31 = vrot.lane.b32.xlu0 %v71_v5, %s89_s24  ;;  %37 = vrot.lane.b32.xlu1 %v72_v6, %s90_s25 }
   0xe   :  { %43 = vrot.lane.b32.xlu0 %v73_v7, %s91_s30  ;;  %49 = vrot.lane.b32.xlu1 %v74_v8, %s92_s2 }
  0x12   :  { %55 = vrot.lane.b32.xlu0 %v75_v9, %s93_s0 }
  0x74   :  { %v8_v10 = vpop.permute.xlu0 %7   ;;  %v20_v11 = vpop.permute.xlu1 %19  }
  0x75   :  { %10 = vst.msk [vmem:[#allocation0] sm:$0x1] %vm9_vm1, %v8_v10  }
  0x78   :  { %v14_v12 = vpop.permute.xlu0 %13   ;;  %v26_v13 = vpop.permute.xlu1 %25  }
  0x79   :  { %16 = vst.msk [vmem:[#allocation0] sm:$0x1] %vm15_vm2, %v14_v12  }
  0x7a   :  { %22 = vst.msk [vmem:[#allocation0] sm:$0x1] %vm21_vm3, %v20_v11  }
  0x7b   :  { %28 = vst.msk [vmem:[#allocation0] sm:$0x1] %vm27_vm4, %v26_v13  }
  0x7c   :  { %v32_v14 = vpop.permute.xlu0 %31   ;;  %v38_v15 = vpop.permute.xlu1 %37  }
  0x7d   :  { %34 = vst.msk [vmem:[#allocation0] sm:$0x1] %vm33_vm5, %v32_v14  }
  0x7e   :  { %40 = vst.msk [vmem:[#allocation0] sm:$0x1] %vm39_vm6, %v38_v15  }
  0x80   :  { %v44_v16 = vpop.permute.xlu0 %43   ;;  %v50_v17 = vpop.permute.xlu1 %49  }
  0x81   :  { %46 = vst.msk [vmem:[#allocation0] sm:$0x1] %vm45_vm7, %v44_v16  }
  0x82   :  { %52 = vst.msk [vmem:[#allocation0] sm:$0x1] %vm51_vm8, %v50_v17  }
  0x84   :  { %v56_v18 = vpop.permute.xlu0 %55  }
  0x85   :  { %58 = vst.msk [vmem:[#allocation0] sm:$0x1] %vm57_vm9, %v56_v18  }
  0x8c   :  { %v63_v19 = vld [vmem:[#allocation0] sm:$0x1] }
  0x8d   :  { %66 = vst [vmem:[%s138_s1] sm:$0x1] %v63_v19 }

// kernel: tile.47
= control target key start
LH: loop header
LB: loop body
LE: loop exit
PB: predicated region body
PF: predicated region fallthrough
CT: control target
= control target key end

     0   :  { %s22_s0 = inlined_call_operand.vmem [shape: f32[16], index: 0, kind: input, shape index: {}]   ;;  %s23_s1 = inlined_call_operand.vmem [shape: f32[8,16], index: 1, kind: output, shape index: {}]  }
   0x1   :  { %v4_v0 = vld [vmem:[%s22_s0] ss:$0 sm:$0xff] }
   0x2   :  { %5 = vst [vmem:[%s23_s1] sm:$0xff] %v4_v0 }

// kernel: tile.48
= control target key start
LH: loop header
LB: loop body
LE: loop exit
PB: predicated region body
PF: predicated region fallthrough
CT: control target
= control target key end

     0   :  { %s69_s10 = smov 112   ;;  %s70_s11 = smov 80   ;;  %vm3_vm0 = vcmask 130048   ;;  %vm9_vm1 = vcmask 1048448   ;;  %vm15_vm2 = vcmask 917248   ;;  %vm21_vm3 = vcmask 786048   ;;  %s113_s0 = inlined_call_operand.vmem [shape: f32[8,16], index: 0, kind: input, shape index: {}]   ;;  %s114_s1 = inlined_call_operand.vmem [shape: f32[1,128], index: 1, kind: output, shape index: {}]  }
   0x1   :  { %v55_v0 = vld [vmem:[%s113_s0 + $0x7] sm:$0x1]   ;;  %v57_v1 = vld [vmem:[%s113_s0 + $0x5] sm:$0x1]   ;;  %v56_v2 = vld [vmem:[%s113_s0 + $0x6] sm:$0x1]  }
   0x2   :  { %7 = vrot.lane.b32.xlu0 %v55_v0, %s69_s10  ;;  %19 = vrot.lane.b32.xlu1 %v57_v1, %s70_s11  ;;  %v58_v3 = vld [vmem:[%s113_s0 + $0x4] sm:$0x1]   ;;  %v2_v4 = vld [vmem:[%s113_s0] sm:$0x1]   ;;  %s71_s18 = smov 96   ;;  %s72_s19 = smov 64  }
   0x3   :  { %4 = vst.msk [vmem:[#allocation0] sm:$0x1] %vm3_vm0, %v2_v4   ;;  %v59_v5 = vld [vmem:[%s113_s0 + $0x3] sm:$0x1]   ;;  %v60_v6 = vld [vmem:[%s113_s0 + $0x2] sm:$0x1]  }
   0x4   :  { %s73_s24 = smov 48   ;;  %s74_s25 = smov 32   ;;  %v61_v7 = vld [vmem:[%s113_s0 + $0x1] sm:$0x1]   ;;  %vm27_vm4 = vcmask 654848   ;;  %vm33_vm5 = vcmask 523648  }
   0x5   :  { %s75_s0 = smov 16   ;;  %vm39_vm6 = vcmask 392448   ;;  %vm45_vm7 = vcmask 261248  }
   0x6   :  { %13 = vrot.lane.b32.xlu0 %v56_v2, %s71_s18  ;;  %25 = vrot.lane.b32.xlu1 %v58_v3, %s72_s19 }
   0xa   :  { %31 = vrot.lane.b32.xlu0 %v59_v5, %s73_s24  ;;  %37 = vrot.lane.b32.xlu1 %v60_v6, %s74_s25 }
   0xe   :  { %43 = vrot.lane.b32.xlu0 %v61_v7, %s75_s0 }
  0x74   :  { %v8_v8 = vpop.permute.xlu0 %7   ;;  %v20_v9 = vpop.permute.xlu1 %19  }
  0x75   :  { %10 = vst.msk [vmem:[#allocation0] sm:$0x1] %vm9_vm1, %v8_v8  }
  0x78   :  { %v14_v10 = vpop.permute.xlu0 %13   ;;  %v26_v11 = vpop.permute.xlu1 %25  }
  0x79   :  { %16 = vst.msk [vmem:[#allocation0] sm:$0x1] %vm15_vm2, %v14_v10  }
  0x7a   :  { %22 = vst.msk [vmem:[#allocation0] sm:$0x1] %vm21_vm3, %v20_v9  }
  0x7b   :  { %28 = vst.msk [vmem:[#allocation0] sm:$0x1] %vm27_vm4, %v26_v11  }
  0x7c   :  { %v32_v12 = vpop.permute.xlu0 %31   ;;  %v38_v13 = vpop.permute.xlu1 %37  }
  0x7d   :  { %34 = vst.msk [vmem:[#allocation0] sm:$0x1] %vm33_vm5, %v32_v12  }
  0x7e   :  { %40 = vst.msk [vmem:[#allocation0] sm:$0x1] %vm39_vm6, %v38_v13  }
  0x80   :  { %v44_v14 = vpop.permute.xlu0 %43  }
  0x81   :  { %46 = vst.msk [vmem:[#allocation0] sm:$0x1] %vm45_vm7, %v44_v14  }
  0x88   :  { %v51_v15 = vld [vmem:[#allocation0] sm:$0x1] }
  0x89   :  { %54 = vst [vmem:[%s114_s1] sm:$0x1] %v51_v15 }

// kernel: tile.57
= control target key start
LH: loop header
LB: loop body
LE: loop exit
PB: predicated region body
PF: predicated region fallthrough
CT: control target
= control target key end

     0   :  { %vm4_vm0 = vcmask 1047556   ;;  %s389_s14 = smov 112   ;;  %s390_s4 = smov 96   ;;  %vm6_vm1 = vcmask 130048   ;;  %vm39_vm2 = vcmask 1048448   ;;  %vm78_vm3 = vcmask 917248   ;;  %s698_s0 = inlined_call_operand.vmem [shape: f32[27,8,16], index: 0, kind: input, shape index: {}]   ;;  %s699_s1 = inlined_call_operand.vmem [shape: f32[27,128], index: 1, kind: output, shape index: {}]  }
   0x1   :  { %v317_v0 = vld [vmem:[%s698_s0 + $0x87] ss:$8 sm:$0xf]   ;;  %v324_v10 = vld [vmem:[%s698_s0 + $0x46] ss:$8 sm:$0xf]  }
   0x2   :  { %v318_v1 = vld [vmem:[%s698_s0 + $0x87] ss:$8 sm:$0xf0]   ;;  %v325_v11 = vld [vmem:[%s698_s0 + $0x46] ss:$8 sm:$0xf0]  }
   0x3   :  { %v57_v2 = vsel %vm4_vm0, %v318_v1, %v317_v0  ;;  %v312_v3 = vld [vmem:[%s698_s0 + $0x7] ss:$8 sm:$0xf]   ;;  %v322_v12 = vld [vmem:[%s698_s0 + $0x6] ss:$8 sm:$0xf]   ;;  %v85_v14 = vsel %vm4_vm0, %v325_v11, %v324_v10 }
   0x4   :  { %v313_v4 = vld [vmem:[%s698_s0 + $0x7] ss:$8 sm:$0xf0]   ;;  %58 = vrot.lane.b32.xlu1 %v57_v2, %s389_s14  ;;  %v323_v13 = vld [vmem:[%s698_s0 + $0x6] ss:$8 sm:$0xf0]  }
   0x5   :  { %v36_v5 = vsel %vm4_vm0, %v313_v4, %v312_v3  ;;  %v314_v6 = vld [vmem:[%s698_s0 + $0x47] ss:$8 sm:$0xf]   ;;  %v75_v15 = vsel %vm4_vm0, %v323_v13, %v322_v12  ;;  %v327_v16 = vld [vmem:[%s698_s0 + $0x86] ss:$8 sm:$0xf]  }
   0x6   :  { %37 = vrot.lane.b32.xlu0 %v36_v5, %s389_s14  ;;  %v320_v7 = vld [vmem:[%s698_s0 + $0xc7] ss:$8 sm:$0x7]   ;;  %v328_v17 = vld [vmem:[%s698_s0 + $0x86] ss:$8 sm:$0xf0]  }
   0x7   :  { %v315_v8 = vld [vmem:[%s698_s0 + $0x47] ss:$8 sm:$0xf0]   ;;  %v330_v18 = vld [vmem:[%s698_s0 + $0xc6] ss:$8 sm:$0x7]   ;;  %v96_v19 = vsel %vm4_vm0, %v328_v17, %v327_v16 }
   0x8   :  { %v46_v9 = vsel %vm4_vm0, %v315_v8, %v314_v6  ;;  %65 = vrot.lane.b32.xlu1 %v320_v7, %s389_s14  ;;  %v334_v20 = vld [vmem:[%s698_s0 + $0x45] ss:$8 sm:$0xf]   ;;  %s391_s19 = smov 80   ;;  %s392_s7 = smov 64   ;;  %vm117_vm4 = vcmask 786048  }
   0x9   :  { %v335_v21 = vld [vmem:[%s698_s0 + $0x45] ss:$8 sm:$0xf0]   ;;  %v344_v30 = vld [vmem:[%s698_s0 + $0x44] ss:$8 sm:$0xf]  }
   0xa   :  { %47 = vrot.lane.b32.xlu0 %v46_v9, %s389_s14  ;;  %v332_v22 = vld [vmem:[%s698_s0 + $0x5] ss:$8 sm:$0xf]   ;;  %v124_v24 = vsel %vm4_vm0, %v335_v21, %v334_v20  ;;  %v345_v31 = vld [vmem:[%s698_s0 + $0x44] ss:$8 sm:$0xf0]  }
   0xb   :  { %v333_v23 = vld [vmem:[%s698_s0 + $0x5] ss:$8 sm:$0xf0]   ;;  %v342_v32 = vld [vmem:[%s698_s0 + $0x4] ss:$8 sm:$0xf]   ;;  %v163_v34 = vsel %vm4_vm0, %v345_v31, %v344_v30 }
   0xc   :  { %86 = vrot.lane.b32.xlu1 %v85_v14, %s390_s4  ;;  %v114_v25 = vsel %vm4_vm0, %v333_v23, %v332_v22  ;;  %v337_v26 = vld [vmem:[%s698_s0 + $0x85] ss:$8 sm:$0xf]   ;;  %v343_v33 = vld [vmem:[%s698_s0 + $0x4] ss:$8 sm:$0xf0]  }
   0xd   :  { %v338_v27 = vld [vmem:[%s698_s0 + $0x85] ss:$8 sm:$0xf0]   ;;  %v153_v35 = vsel %vm4_vm0, %v343_v33, %v342_v32  ;;  %v350_v36 = vld [vmem:[%s698_s0 + $0xc4] ss:$8 sm:$0x7]  }
   0xe   :  { %76 = vrot.lane.b32.xlu0 %v75_v15, %s390_s4  ;;  %v340_v28 = vld [vmem:[%s698_s0 + $0xc5] ss:$8 sm:$0x7]   ;;  %v135_v29 = vsel %vm4_vm0, %v338_v27, %v337_v26  ;;  %v347_v37 = vld [vmem:[%s698_s0 + $0x84] ss:$8 sm:$0xf]  }
   0xf   :  { %v348_v38 = vld [vmem:[%s698_s0 + $0x84] ss:$8 sm:$0xf0]   ;;  %v354_v39 = vld [vmem:[%s698_s0 + $0x43] ss:$8 sm:$0xf]  }
  0x10   :  { %104 = vrot.lane.b32.xlu1 %v330_v18, %s390_s4  ;;  %v355_v40 = vld [vmem:[%s698_s0 + $0x43] ss:$8 sm:$0xf0]   ;;  %v307_v41 = vld [vmem:[%s698_s0 + $0x80] ss:$8 sm:$0xf]   ;;  %v174_v47 = vsel %vm4_vm0, %v348_v38, %v347_v37 }
  0x11   :  { %v308_v42 = vld [vmem:[%s698_s0 + $0x80] ss:$8 sm:$0xf0]   ;;  %v352_v43 = vld [vmem:[%s698_s0 + $0x3] ss:$8 sm:$0xf]   ;;  %v202_v54 = vsel %vm4_vm0, %v355_v40, %v354_v39 }
  0x12   :  { %97 = vrot.lane.b32.xlu0 %v96_v19, %s390_s4  ;;  %v22_v44 = vsel %vm4_vm0, %v308_v42, %v307_v41  ;;  %v2_v45 = vld [vmem:[%s698_s0] ss:$8 sm:$0xf]   ;;  %v353_v51 = vld [vmem:[%s698_s0 + $0x3] ss:$8 sm:$0xf0]  }
  0x13   :  { %v3_v46 = vld [vmem:[%s698_s0] ss:$8 sm:$0xf0]   ;;  %309 = vst.msk [vmem:[%s699_s1 + $0x10] sm:$0xff] %vm6_vm1, %v22_v44   ;;  %v192_v55 = vsel %vm4_vm0, %v353_v51, %v352_v43  ;;  %s393_s13 = smov 48   ;;  %s394_s28 = smov 32  }
  0x14   :  { %125 = vrot.lane.b32.xlu1 %v124_v24, %s391_s19  ;;  %v5_v48 = vsel %vm4_vm0, %v3_v46, %v2_v45  ;;  %v310_v49 = vld [vmem:[%s698_s0 + $0xc0] ss:$8 sm:$0x7]   ;;  %v357_v56 = vld [vmem:[%s698_s0 + $0x83] ss:$8 sm:$0xf]  }
  0x15   :  { %v304_v50 = vld [vmem:[%s698_s0 + $0x40] ss:$8 sm:$0xf]   ;;  %7 = vst.msk [vmem:[%s699_s1] sm:$0xff] %vm6_vm1, %v5_v48   ;;  %311 = vst.msk [vmem:[%s699_s1 + $0x18] sm:$0x7] %vm6_vm1, %v310_v49  }
  0x16   :  { %115 = vrot.lane.b32.xlu0 %v114_v25, %s391_s19  ;;  %v305_v52 = vld [vmem:[%s698_s0 + $0x40] ss:$8 sm:$0xf0]   ;;  %v358_v57 = vld [vmem:[%s698_s0 + $0x83] ss:$8 sm:$0xf0]  }
  0x17   :  { %v13_v53 = vsel %vm4_vm0, %v305_v52, %v304_v50  ;;  %v360_v58 = vld [vmem:[%s698_s0 + $0xc3] ss:$8 sm:$0x7]   ;;  %v213_v59 = vsel %vm4_vm0, %v358_v57, %v357_v56  ;;  %v364_v60 = vld [vmem:[%s698_s0 + $0x42] ss:$8 sm:$0xf]  }
  0x18   :  { %143 = vrot.lane.b32.xlu1 %v340_v28, %s391_s19  ;;  %306 = vst.msk [vmem:[%s699_s1 + $0x8] sm:$0xff] %vm6_vm1, %v13_v53   ;;  %v365_v61 = vld [vmem:[%s698_s0 + $0x42] ss:$8 sm:$0xf0]   ;;  %s395_s14 = smov 16   ;;  %vm156_vm5 = vcmask 654848  }
  0x19   :  { %v362_v62 = vld [vmem:[%s698_s0 + $0x2] ss:$8 sm:$0xf]   ;;  %v241_v0 = vsel %vm4_vm0, %v365_v61, %v364_v60  ;;  %v374_v6 = vld [vmem:[%s698_s0 + $0x41] ss:$8 sm:$0xf]  }
  0x1a   :  { %136 = vrot.lane.b32.xlu0 %v135_v29, %s391_s19  ;;  %v363_v63 = vld [vmem:[%s698_s0 + $0x2] ss:$8 sm:$0xf0]   ;;  %v375_v7 = vld [vmem:[%s698_s0 + $0x41] ss:$8 sm:$0xf0]  }
  0x1b   :  { %v231_v1 = vsel %vm4_vm0, %v363_v63, %v362_v62  ;;  %v367_v2 = vld [vmem:[%s698_s0 + $0x82] ss:$8 sm:$0xf]   ;;  %v372_v8 = vld [vmem:[%s698_s0 + $0x1] ss:$8 sm:$0xf]   ;;  %v280_v10 = vsel %vm4_vm0, %v375_v7, %v374_v6 }
  0x1c   :  { %164 = vrot.lane.b32.xlu1 %v163_v34, %s392_s7  ;;  %v368_v3 = vld [vmem:[%s698_s0 + $0x82] ss:$8 sm:$0xf0]   ;;  %v373_v9 = vld [vmem:[%s698_s0 + $0x1] ss:$8 sm:$0xf0]  }
  0x1d   :  { %v370_v4 = vld [vmem:[%s698_s0 + $0xc2] ss:$8 sm:$0x7]   ;;  %v252_v5 = vsel %vm4_vm0, %v368_v3, %v367_v2  ;;  %v270_v11 = vsel %vm4_vm0, %v373_v9, %v372_v8  ;;  %v377_v12 = vld [vmem:[%s698_s0 + $0x81] ss:$8 sm:$0xf]  }
  0x1e   :  { %154 = vrot.lane.b32.xlu0 %v153_v35, %s392_s7  ;;  %v378_v13 = vld [vmem:[%s698_s0 + $0x81] ss:$8 sm:$0xf0]   ;;  %vm195_vm6 = vcmask 523648   ;;  %vm234_vm7 = vcmask 392448   ;;  %vm273_vm8 = vcmask 261248  }
  0x1f   :  { %v380_v14 = vld [vmem:[%s698_s0 + $0xc1] ss:$8 sm:$0x7]   ;;  %v291_v15 = vsel %vm4_vm0, %v378_v13, %v377_v12 }
  0x20   :  { %182 = vrot.lane.b32.xlu1 %v350_v36, %s392_s7 }
  0x22   :  { %175 = vrot.lane.b32.xlu0 %v174_v47, %s392_s7 }
  0x24   :  { %203 = vrot.lane.b32.xlu1 %v202_v54, %s393_s13 }
  0x26   :  { %193 = vrot.lane.b32.xlu0 %v192_v55, %s393_s13 }
  0x28   :  { %221 = vrot.lane.b32.xlu1 %v360_v58, %s393_s13 }
  0x2a   :  { %214 = vrot.lane.b32.xlu0 %v213_v59, %s393_s13 }
  0x2c   :  { %242 = vrot.lane.b32.xlu1 %v241_v0, %s394_s28 }
  0x2e   :  { %232 = vrot.lane.b32.xlu0 %v231_v1, %s394_s28 }
  0x30   :  { %260 = vrot.lane.b32.xlu1 %v370_v4, %s394_s28 }
  0x32   :  { %253 = vrot.lane.b32.xlu0 %v252_v5, %s394_s28 }
  0x34   :  { %281 = vrot.lane.b32.xlu1 %v280_v10, %s395_s14 }
  0x36   :  { %271 = vrot.lane.b32.xlu0 %v270_v11, %s395_s14 }
  0x38   :  { %299 = vrot.lane.b32.xlu1 %v380_v14, %s395_s14 }
  0x3a   :  { %292 = vrot.lane.b32.xlu0 %v291_v15, %s395_s14 }
  0x76   :  { %v59_v16 = vpop.permute.xlu1 %58  }
  0x77   :  { %319 = vst.msk [vmem:[%s699_s1 + $0x10] sm:$0xff] %vm39_vm2, %v59_v16  }
  0x78   :  { %v38_v17 = vpop.permute.xlu0 %37  }
  0x79   :  { %40 = vst.msk [vmem:[%s699_s1] sm:$0xff] %vm39_vm2, %v38_v17  }
  0x7a   :  { %v66_v18 = vpop.permute.xlu1 %65  }
  0x7b   :  { %321 = vst.msk [vmem:[%s699_s1 + $0x18] sm:$0x7] %vm39_vm2, %v66_v18  }
  0x7c   :  { %v48_v19 = vpop.permute.xlu0 %47  }
  0x7d   :  { %316 = vst.msk [vmem:[%s699_s1 + $0x8] sm:$0xff] %vm39_vm2, %v48_v19  }
  0x7e   :  { %v87_v20 = vpop.permute.xlu1 %86  }
  0x7f   :  { %326 = vst.msk [vmem:[%s699_s1 + $0x8] sm:$0xff] %vm78_vm3, %v87_v20  }
  0x80   :  { %v77_v21 = vpop.permute.xlu0 %76  }
  0x81   :  { %79 = vst.msk [vmem:[%s699_s1] sm:$0xff] %vm78_vm3, %v77_v21  }
  0x82   :  { %v105_v22 = vpop.permute.xlu1 %104  }
  0x83   :  { %331 = vst.msk [vmem:[%s699_s1 + $0x18] sm:$0x7] %vm78_vm3, %v105_v22  }
  0x84   :  { %v98_v23 = vpop.permute.xlu0 %97  }
  0x85   :  { %329 = vst.msk [vmem:[%s699_s1 + $0x10] sm:$0xff] %vm78_vm3, %v98_v23  }
  0x86   :  { %v126_v24 = vpop.permute.xlu1 %125  }
  0x87   :  { %336 = vst.msk [vmem:[%s699_s1 + $0x8] sm:$0xff] %vm117_vm4, %v126_v24  }
  0x88   :  { %v116_v25 = vpop.permute.xlu0 %115  }
  0x89   :  { %118 = vst.msk [vmem:[%s699_s1] sm:$0xff] %vm117_vm4, %v116_v25  }
  0x8a   :  { %v144_v26 = vpop.permute.xlu1 %143  }
  0x8b   :  { %341 = vst.msk [vmem:[%s699_s1 + $0x18] sm:$0x7] %vm117_vm4, %v144_v26  }
  0x8c   :  { %v137_v27 = vpop.permute.xlu0 %136  }
  0x8d   :  { %339 = vst.msk [vmem:[%s699_s1 + $0x10] sm:$0xff] %vm117_vm4, %v137_v27  }
  0x8e   :  { %v165_v28 = vpop.permute.xlu1 %164  }
  0x8f   :  { %346 = vst.msk [vmem:[%s699_s1 + $0x8] sm:$0xff] %vm156_vm5, %v165_v28  }
  0x90   :  { %v155_v29 = vpop.permute.xlu0 %154  }
  0x91   :  { %157 = vst.msk [vmem:[%s699_s1] sm:$0xff] %vm156_vm5, %v155_v29  }
  0x92   :  { %v183_v30 = vpop.permute.xlu1 %182  }
  0x93   :  { %351 = vst.msk [vmem:[%s699_s1 + $0x18] sm:$0x7] %vm156_vm5, %v183_v30  }
  0x94   :  { %v176_v31 = vpop.permute.xlu0 %175  }
  0x95   :  { %349 = vst.msk [vmem:[%s699_s1 + $0x10] sm:$0xff] %vm156_vm5, %v176_v31  }
  0x96   :  { %v204_v32 = vpop.permute.xlu1 %203  }
  0x97   :  { %356 = vst.msk [vmem:[%s699_s1 + $0x8] sm:$0xff] %vm195_vm6, %v204_v32  }
  0x98   :  { %v194_v33 = vpop.permute.xlu0 %193  }
  0x99   :  { %196 = vst.msk [vmem:[%s699_s1] sm:$0xff] %vm195_vm6, %v194_v33  }
  0x9a   :  { %v222_v34 = vpop.permute.xlu1 %221  }
  0x9b   :  { %361 = vst.msk [vmem:[%s699_s1 + $0x18] sm:$0x7] %vm195_vm6, %v222_v34  }
  0x9c   :  { %v215_v35 = vpop.permute.xlu0 %214  }
  0x9d   :  { %359 = vst.msk [vmem:[%s699_s1 + $0x10] sm:$0xff] %vm195_vm6, %v215_v35  }
  0x9e   :  { %v243_v36 = vpop.permute.xlu1 %242  }
  0x9f   :  { %366 = vst.msk [vmem:[%s699_s1 + $0x8] sm:$0xff] %vm234_vm7, %v243_v36  }
  0xa0   :  { %v233_v37 = vpop.permute.xlu0 %232  }
  0xa1   :  { %235 = vst.msk [vmem:[%s699_s1] sm:$0xff] %vm234_vm7, %v233_v37  }
  0xa2   :  { %v261_v38 = vpop.permute.xlu1 %260  }
  0xa3   :  { %371 = vst.msk [vmem:[%s699_s1 + $0x18] sm:$0x7] %vm234_vm7, %v261_v38  }
  0xa4   :  { %v254_v39 = vpop.permute.xlu0 %253  }
  0xa5   :  { %369 = vst.msk [vmem:[%s699_s1 + $0x10] sm:$0xff] %vm234_vm7, %v254_v39  }
  0xa6   :  { %v282_v40 = vpop.permute.xlu1 %281  }
  0xa7   :  { %376 = vst.msk [vmem:[%s699_s1 + $0x8] sm:$0xff] %vm273_vm8, %v282_v40  }
  0xa8   :  { %v272_v41 = vpop.permute.xlu0 %271  }
  0xa9   :  { %274 = vst.msk [vmem:[%s699_s1] sm:$0xff] %vm273_vm8, %v272_v41  }
  0xaa   :  { %v300_v42 = vpop.permute.xlu1 %299  }
  0xab   :  { %381 = vst.msk [vmem:[%s699_s1 + $0x18] sm:$0x7] %vm273_vm8, %v300_v42  }
  0xac   :  { %v293_v43 = vpop.permute.xlu0 %292  }
  0xad   :  { %379 = vst.msk [vmem:[%s699_s1 + $0x10] sm:$0xff] %vm273_vm8, %v293_v43  }

// kernel: mbconv_forward.1
= control target key start
LH: loop header
LB: loop body
LE: loop exit
PB: predicated region body
PF: predicated region fallthrough
CT: control target
= control target key end

     0   :  { %s7381_s24 = smov 0   ;;  %s11131_s0 = inlined_call_operand.vmem [shape: f32[2,10,10,40], index: 0, kind: input, shape index: {}]   ;;  %s11132_s1 = inlined_call_operand.vmem [shape: f32[1,40], index: 1, kind: input, shape index: {}]   ;;  %s11133_s2 = inlined_call_operand.vmem [shape: f32[1,40], index: 2, kind: input, shape index: {}]   ;;  %s11134_s3 = inlined_call_operand.vmem [shape: f32[40,128], index: 3, kind: input, shape index: {}]   ;;  %s11135_s4 = inlined_call_operand.vmem [shape: f32[1,128], index: 4, kind: input, shape index: {}]   ;;  %s11136_s5 = inlined_call_operand.vmem [shape: f32[1,128], index: 5, kind: input, shape index: {}]   ;;  %s11137_s6 = inlined_call_operand.vmem [shape: f32[128,160], index: 6, kind: input, shape index: {}]   ;;  %s11138_s7 = inlined_call_operand.vmem [shape: f32[27,128], index: 7, kind: input, shape index: {}]   ;;  %s11139_s8 = inlined_call_operand.vmem [shape: f32[128,16], index: 8, kind: input, shape index: {}]   ;;  %s11140_s9 = inlined_call_operand.vmem [shape: f32[16,4], index: 9, kind: input, shape index: {}]   ;;  %s11141_s10 = inlined_call_operand.vmem [shape: f32[1,4], index: 10, kind: input, shape index: {}]   ;;  %s11142_s11 = inlined_call_operand.vmem [shape: f32[4,16], index: 11, kind: input, shape index: {}]   ;;  %s11143_s12 = inlined_call_operand.vmem [shape: f32[1,16], index: 12, kind: input, shape index: {}]   ;;  %s11144_s13 = inlined_call_operand.vmem [shape: f32[16,128], index: 13, kind: input, shape index: {}]   ;;  %s11145_s14 = inlined_call_operand.vmem [shape: f32[128,64], index: 14, kind: input, shape index: {}]   ;;  %s11146_s15 = inlined_call_operand.vmem [shape: f32[1,64], index: 15, kind: input, shape index: {}]   ;;  %s11147_s16 = inlined_call_operand.vmem [shape: f32[9,40,64], index: 16, kind: input, shape index: {}]   ;;  %s11148_s17 = inlined_call_operand.vmem [shape: f32[2,64,64], index: 17, kind: output, shape index: {}]  }
   0x1   :  { %11167 = sst [smem:[#allocation114_spill]] %s11131_s0 }
   0x2   :  { %11168 = sst [smem:[#allocation115_spill]] %s11132_s1 }
   0x3 LB: > { %11169 = sst [smem:[#allocation3_spill]] %s7283_s24  ;;  %s6451_s25 = sadd.s32 4294967295, %s7283_s24   ;;  %s7283_s24 = sphi %s7381_s24, %s27_s24  }
   0x4   : > { %p6455_p0 = scmp.ge.s32.totalorder %s7283_s24, 1  ;;  %p487_p1 = scmp.lt.s32.totalorder %s7283_s24, 3 }
   0x6   : > { %p488_p2 = pnand %p6455_p0, %p487_p1 }
   0x8   : > { %491 = sbr.rel (%p488_p2) target bundleno = 2210 (0x8a2), region = 88 }
   0xd   : > { %v600_v0 = vld [vmem:[%s11134_s3 + $0x20] sm:$0xff]  ;;  %v599_v1 = vld [vmem:[%s11134_s3 + $0x18] sm:$0xff]  ;;  %p539_p3 = scmp.lt.s32.totalorder %s6451_s25, 1  ;;  %v598_v2 = vld [vmem:[%s11134_s3 + $0x10] sm:$0xff]  ;;  %s11149_s21 = smov 16   ;;  %vm601_vm0 = vcmask 326656  }
   0xe   : > { %6853 = vmatprep.subr.mxu0 %v600_v0  ;;  %v6480_v3 = vld [vmem:[%s11138_s7 + $0x1] ss:$0 sm:$0xff]  ;;  %v863_v4 = vld [vmem:[%s11137_s6 + $0xf8] sm:$0xff]  ;;  %v6483_v5 = vld [vmem:[%s11138_s7 + $0x4] ss:$0 sm:$0xff]  ;;  %s11170_s23 = sld [smem:[#allocation115_spill]] }
   0xf   : > { %6854 = vmatpush3.msra.mxu0 %v600_v0  ;;  %s11437_s25 = smov (!%p539_p3, %s6451_s25), 1  ;;  %1102 = vrot.lane.b32.xlu0 %v6480_v3, %s11149_s21  ;;  %v597_v6 = vld [vmem:[%s11134_s3 + $0x8] sm:$0xff]  ;;  %v6481_v7 = vld [vmem:[%s11138_s7 + $0x2] ss:$0 sm:$0xff]  ;;  %v862_v8 = vld [vmem:[%s11137_s6 + $0xf0] sm:$0xff]  ;;  %s7286_s24 = smov 32  }
  0x10   : > { %6855 = vmatprep.subr.mxu0 %v599_v1  ;;  %s7171_s28 = smul.u32 160, %s11437_s25  ;;  %1408 = vrot.lane.b32.xlu1 %v6483_v5, %s11149_s21  ;;  %v596_v9 = vld [vmem:[%s11134_s3] sm:$0xff]  ;;  %s11171_s21 = sld [smem:[#allocation114_spill]]  ;;  %v861_v14 = vld [vmem:[%s11137_s6 + $0xe8] sm:$0xff]  ;;  %v859_v32 = vld [vmem:[%s11137_s6 + $0xd8] sm:$0xff]  ;;  %vm770_vm1 = vcmask 261120  }
  0x11   : > { %6856 = vmatpush3.msra.mxu0 %v599_v1  ;;  %v6484_v11 = vld [vmem:[%s11138_s7 + $0x5] ss:$0 sm:$0xff]  ;;  %864 = vmatprep.subr.mxu1 %v863_v4  ;;  %v7438_v12 = vld [vmem:[%s11133_s2] ss:$0 sm:$0xff]  ;;  %v6486_v13 = vld [vmem:[%s11138_s7 + $0x7] ss:$0 sm:$0xff] }
  0x12   : > { %6857 = vmatprep.subr.mxu0 %v598_v2  ;;  %865 = vmatpush1.msra.mxu1 %v862_v8  ;;  %v6487_v27 = vld [vmem:[%s11138_s7 + $0x8] ss:$0 sm:$0xff]  ;;  %v860_v28 = vld [vmem:[%s11137_s6 + $0xe0] sm:$0xff]  ;;  %s11172_s0 = smov 16   ;;  %v858_v36 = vld [vmem:[%s11137_s6 + $0xd0] sm:$0xff]  ;;  %vm773_vm2 = vcmask 254976  }
  0x13   : > { %6858 = vmatpush3.msra.mxu0 %v598_v2  ;;  %1200 = vrot.lane.b32.xlu0 %v6481_v7, %s7286_s24  ;;  %v857_v42 = vld [vmem:[%s11137_s6 + $0xc8] sm:$0xff]  ;;  %v856_v43 = vld [vmem:[%s11137_s6 + $0xc0] sm:$0xff]  ;;  %v855_v44 = vld [vmem:[%s11137_s6 + $0xb8] sm:$0xff]  ;;  %vm1345_vm3 = vcmask 1046528   ;;  %vm1809_vm4 = vcmask 1045504   ;;  %vm1026_vm6 = vcmask 261121  }
  0x14   : > { %v6467_v10 = vld [vmem:[%s11170_s23] ss:$0 sm:$0xff]  ;;  %6859 = vmatprep.subr.mxu0 %v597_v6  ;;  %1585 = vrot.lane.b32.xlu1 %v6484_v11, %s7286_s24  ;;  %v854_v48 = vld [vmem:[%s11137_s6 + $0xb0] sm:$0xff]  ;;  %v853_v51 = vld [vmem:[%s11137_s6 + $0xa8] sm:$0xff]  ;;  %vm1029_vm7 = vcmask 253952   ;;  %vm1169_vm8 = vcmask 916480  }
  0x15   : > { %6860 = vmatpush3.msra.mxu0 %v597_v6  ;;  %866 = vmatprep.subr.mxu1 %v861_v14  ;;  %v852_v52 = vld [vmem:[%s11137_s6 + $0xa0] sm:$0xff]  ;;  %v851_v53 = vld [vmem:[%s11137_s6 + $0x98] sm:$0xff]  ;;  %v850_v56 = vld [vmem:[%s11137_s6 + $0x90] sm:$0xff]  ;;  %vm1267_vm9 = vcmask 785408   ;;  %vm7290_vm10 = vmmov 0   ;;  %vm4637_vm11 = vcmask 130048  }
  0x16   : > { %s7433_s30 = scalar_lea.vmem %s11171_s21, %s7171_s28  ;;  %6861 = vmatprep.subr.mxu0 %v596_v9  ;;  %867 = vmatpush1.msra.mxu1 %v860_v28  ;;  %v849_v58 = vld [vmem:[%s11137_s6 + $0x88] sm:$0xff]  ;;  %v848_v59 = vld [vmem:[%s11137_s6 + $0x80] sm:$0xff]  ;;  %v847_v60 = vld [vmem:[%s11137_s6 + $0x78] sm:$0xff]  ;;  %vm4718_vm12 = vcmask 1043456   ;;  %vm4714_vm13 = vcmask 31744   ;;  %s6673_s29 = sshll.u32 %s11437_s25, 6 }
  0x17   : > { %v6459_v15 = vld [vmem:[%s7433_s30 + $0x11] sm:$0xff]  ;;  %v6460_v16 = vld [vmem:[%s7433_s30 + $0x21] sm:$0xff]  ;;  %6862 = vmatpush3.msra.mxu0 %v596_v9  ;;  %1872 = vrot.lane.b32.xlu0 %v6486_v13, %s11172_s0  ;;  %v7287_v13 = vmov 0.0   ;;  %v6490_v14 = vld [vmem:[%s11138_s7 + $0xb] ss:$0 sm:$0xff]  ;;  %s11105_s19 = scalar_lea.vmem %s11148_s17, %s6673_s29  ;;  %vm6372_vm14 = vcmask 523264  }
  0x18   : > { %v6461_v17 = vld [vmem:[%s7433_s30 + $0x31] sm:$0xff]  ;;  %v565_v18 = vmul.f32 %v6467_v10, %v6459_v15  ;;  %v566_v19 = vmul.f32 %v6467_v10, %v6460_v16  ;;  %v6462_v21 = vld [vmem:[%s7433_s30 + $0x41] sm:$0xff]  ;;  %2049 = vrot.lane.b32.xlu1 %v6487_v27, %s7286_s24  ;;  %868 = vmatprep.subr.mxu1 %v859_v32  ;;  %769 = vst [vmem:[#allocation2] sm:$0xff] %v7287_v13  ;;  %772 = vst [vmem:[#allocation2 + $0x10] sm:$0x3] %v7287_v13 }
  0x19   : > { %v567_v20 = vmul.f32 %v6467_v10, %v6461_v17  ;;  %v6463_v22 = vld [vmem:[%s7433_s30 + $0x51] sm:$0xff]  ;;  %v6464_v23 = vld [vmem:[%s7433_s30 + $0x61] sm:$0xff]  ;;  %v568_v24 = vmul.f32 %v6467_v10, %v6462_v21  ;;  %869 = vmatpush1.msra.mxu1 %v858_v36  ;;  %928 = vmatprep.mubr.f32.mxu1 %v7287_v13  ;;  %776 = vst [vmem:[#allocation2 + $0x120] sm:$0xff] %v7287_v13  ;;  %778 = vst [vmem:[#allocation2 + $0x130] sm:$0x3] %v7287_v13 }
  0x1a   : > { %v569_v25 = vmul.f32 %v6467_v10, %v6463_v22  ;;  %v6465_v26 = vld [vmem:[%s7433_s30 + $0x71] sm:$0xff]  ;;  %v580_v29 = vadd.f32 %v7438_v12, %v565_v18  ;;  %v581_v30 = vadd.f32 %v7438_v12, %v566_v19  ;;  %v570_v34 = vmul.f32 %v6467_v10, %v6464_v23  ;;  %v6466_v41 = vld [vmem:[%s7433_s30 + $0x81] sm:$0xff]  ;;  %870 = vmatprep.subr.mxu1 %v857_v42  ;;  %v6489_v15 = vld [vmem:[%s11138_s7 + $0xa] ss:$0 sm:$0xff] }
  0x1b   : > { %v582_v31 = vadd.f32 %v7438_v12, %v567_v20  ;;  %v583_v33 = vadd.f32 %v7438_v12, %v568_v24  ;;  %v571_v35 = vmul.f32 %v6467_v10, %v6465_v26  ;;  %v572_v47 = vmul.f32 %v6467_v10, %v6466_v41  ;;  %871 = vmatpush1.msra.mxu1 %v856_v43  ;;  %v846_v62 = vld [vmem:[%s11137_s6 + $0x70] sm:$0xff]  ;;  %v845_v63 = vld [vmem:[%s11137_s6 + $0x68] sm:$0xff]  ;;  %v844_v0 = vld [vmem:[%s11137_s6 + $0x60] sm:$0xff] }
  0x1c   : > { %v588_v37 = vmax.f32 %v580_v29, 0.0  ;;  %v589_v38 = vmax.f32 %v581_v30, 0.0  ;;  %v584_v40 = vadd.f32 %v7438_v12, %v569_v25  ;;  %v585_v46 = vadd.f32 %v7438_v12, %v570_v34  ;;  %872 = vmatprep.subr.mxu1 %v855_v44  ;;  %v843_v1 = vld [vmem:[%s11137_s6 + $0x58] sm:$0xff]  ;;  %v842_v2 = vld [vmem:[%s11137_s6 + $0x50] sm:$0xff]  ;;  %v841_v3 = vld [vmem:[%s11137_s6 + $0x48] sm:$0xff]  ;;  %6875 = vmatprep.subr.mxu0 %v7287_v13  ;;  %771 = vst.msk [vmem:[#allocation2 + $0x8] sm:$0xff] %vm770_vm1, %v7287_v13 }
  0x1d   : > { %v590_v39 = vmax.f32 %v582_v31, 0.0  ;;  %v591_v45 = vmax.f32 %v583_v33, 0.0  ;;  %v586_v50 = vadd.f32 %v7438_v12, %v571_v35  ;;  %873 = vmatpush1.msra.mxu1 %v854_v48  ;;  %v587_v55 = vadd.f32 %v7438_v12, %v572_v47  ;;  %v840_v4 = vld [vmem:[%s11137_s6 + $0x40] sm:$0xff]  ;;  %v839_v5 = vld [vmem:[%s11137_s6 + $0x38] sm:$0xff]  ;;  %v838_v6 = vld [vmem:[%s11137_s6 + $0x30] sm:$0xff]  ;;  %2360 = vrot.lane.b32.xlu1 %v6490_v14, %s7286_s24  ;;  %777 = vst.msk [vmem:[#allocation2 + $0x128] sm:$0xff] %vm770_vm1, %v7287_v13 }
  0x1e   : > { %6863 = vmatprep.mubr.msk.f32.mxu0 %vm601_vm0, %v588_v37  ;;  %v592_v49 = vmax.f32 %v584_v40, 0.0  ;;  %v593_v54 = vmax.f32 %v585_v46, 0.0  ;;  %874 = vmatprep.subr.mxu1 %v853_v51  ;;  %v837_v7 = vld [vmem:[%s11137_s6 + $0x28] sm:$0xff]  ;;  %v836_v8 = vld [vmem:[%s11137_s6 + $0x20] sm:$0xff]  ;;  %v835_v9 = vld [vmem:[%s11137_s6 + $0x18] sm:$0xff] }
  0x1f   : > { %6864 = vmatmul.mubr.msk.f32.vlgmr.msra.gmra.mxu0 %vm601_vm0, %v589_v38  ;;  %v594_v57 = vmax.f32 %v586_v50, 0.0  ;;  %875 = vmatpush1.msra.mxu1 %v852_v52  ;;  %v595_v61 = vmax.f32 %v587_v55, 0.0  ;;  %v834_v10 = vld [vmem:[%s11137_s6 + $0x10] sm:$0xff]  ;;  %v833_v11 = vld [vmem:[%s11137_s6 + $0x8] sm:$0xff]  ;;  %v832_v12 = vld [vmem:[%s11137_s6] sm:$0xff] }
  0x20   : > { %6866 = vmatprep.mubr.msk.f32.mxu0 %vm601_vm0, %v590_v39  ;;  %876 = vmatprep.subr.mxu1 %v851_v53  ;;  %v6493_v16 = vld [vmem:[%s11138_s7 + $0xe] ss:$0 sm:$0xff]  ;;  %v6492_v17 = vld [vmem:[%s11138_s7 + $0xd] ss:$0 sm:$0xff]  ;;  %774 = vst.msk [vmem:[#allocation2 + $0x18] sm:$0x3] %vm773_vm2, %v7287_v13 }
  0x21   : > { %877 = vmatpush1.msra.mxu1 %v850_v56  ;;  %2263 = vrot.lane.b32.xlu0 %v6489_v15, %s11172_s0  ;;  %779 = vst.msk [vmem:[#allocation2 + $0x138] sm:$0x3] %vm773_vm2, %v7287_v13  ;;  %v6496_v18 = vld [vmem:[%s11138_s7 + $0x11] ss:$0 sm:$0xff]  ;;  %v6495_v19 = vld [vmem:[%s11138_s7 + $0x10] ss:$0 sm:$0xff] }
  0x22   : > { %878 = vmatprep.subr.mxu1 %v849_v58  ;;  %2743 = vrot.lane.b32.xlu1 %v6493_v16, %s7286_s24  ;;  %v6499_v20 = vld [vmem:[%s11138_s7 + $0x14] ss:$0 sm:$0xff]  ;;  %v6498_v21 = vld [vmem:[%s11138_s7 + $0x13] ss:$0 sm:$0xff]  ;;  %v6502_v22 = vld [vmem:[%s11138_s7 + $0x17] ss:$0 sm:$0xff] }
  0x23   : > { %6867 = vmatmul.mubr.msk.f32.gmra.mxu0 %vm601_vm0, %v591_v45  ;;  %879 = vmatpush1.msra.mxu1 %v848_v59  ;;  %v6501_v23 = vld [vmem:[%s11138_s7 + $0x16] ss:$0 sm:$0xff]  ;;  %v1292_v26 = vld [vmem:[#allocation2] sm:$0xfe]  ;;  %v1293_v27 = vld [vmem:[#allocation2 + $0x10] sm:$0x1] }
  0x24   : > { %6869 = vmatprep.mubr.msk.f32.mxu0 %vm601_vm0, %v592_v49  ;;  %880 = vmatprep.subr.mxu1 %v847_v60  ;;  %v6505_v28 = vld [vmem:[%s11138_s7 + $0x1a] ss:$0 sm:$0xff]  ;;  %v6504_v29 = vld [vmem:[%s11138_s7 + $0x19] ss:$0 sm:$0xff]  ;;  %v1088_v30 = vld [vmem:[#allocation2 + $0x8] sm:$0xff] }
  0x25   : > { %881 = vmatpush1.msra.mxu1 %v846_v62  ;;  %2566 = vrot.lane.b32.xlu0 %v6492_v17, %s11172_s0  ;;  %v1386_v31 = vld [vmem:[#allocation2 + $0x8] sm:$0xfe]  ;;  %v7627_v33 = vld [vmem:[%s11138_s7 + $0x3] ss:$0 sm:$0xff]  ;;  %v7658_v60 = vld [vmem:[#allocation2 + $0x10] sm:$0x3] }
  0x26   : > { %882 = vmatprep.subr.mxu1 %v845_v63  ;;  %3206 = vrot.lane.b32.xlu1 %v6496_v18, %s7286_s24  ;;  %v1313_v37 = vmul.f32 %v7627_v33, %v1292_v26  ;;  %v1314_v38 = vmul.f32 %v7627_v33, %v1293_v27  ;;  %v7652_v53 = vld [vmem:[#allocation2] sm:$0xfc]  ;;  %v1850_v59 = vld [vmem:[#allocation2 + $0x8] sm:$0xfc] }
  0x27   : > { %6870 = vmatmul.mubr.msk.f32.gmra.mxu0 %vm601_vm0, %v593_v54  ;;  %883 = vmatpush1.msra.mxu1 %v844_v0  ;;  %v1387_v32 = vld [vmem:[#allocation2 + $0x18] sm:$0x1] }
  0x28   : > { %6872 = vmatprep.mubr.msk.f32.mxu0 %vm601_vm0, %v594_v57  ;;  %884 = vmatprep.subr.mxu1 %v843_v1  ;;  %v1346_v44 = vrot.slane %v1313_v37, 1  ;;  %v1347_v45 = vrot.slane %v1314_v38, 1  ;;  %v6478_v37 = vld [vmem:[%s11136_s5] ss:$0 sm:$0xff] }
  0x29   : > { %885 = vmatpush1.msra.mxu1 %v842_v2  ;;  %3029 = vrot.lane.b32.xlu0 %v6495_v19, %s11172_s0 }
  0x2a   : > { %886 = vmatprep.subr.mxu1 %v841_v3  ;;  %3518 = vrot.lane.b32.xlu1 %v6499_v20, %s7286_s24  ;;  %v7646_v50 = vsel %vm1345_vm3, %v1346_v44, %v1347_v45 }
  0x2b   : > { %6873 = vmatmul.mubr.msk.f32.gmra.mxu0 %vm601_vm0, %v595_v61  ;;  %887 = vmatpush1.msra.mxu1 %v840_v4  ;;  %v1851_v61 = vld [vmem:[#allocation2 + $0x18] sm:$0x3] }
  0x2c   : > { %888 = vmatprep.subr.mxu1 %v839_v5 }
  0x2d   : > { %889 = vmatpush1.msra.mxu1 %v838_v6  ;;  %3421 = vrot.lane.b32.xlu0 %v6498_v21, %s11172_s0 }
  0x2e   : > { %890 = vmatprep.subr.mxu1 %v837_v7  ;;  %3901 = vrot.lane.b32.xlu1 %v6502_v22, %s7286_s24 }
  0x2f   : > { %891 = vmatpush1.msra.mxu1 %v836_v8 }
  0x30   : > { %892 = vmatprep.subr.mxu1 %v835_v9 }
  0x31   : > { %893 = vmatpush1.msra.mxu1 %v834_v10  ;;  %3724 = vrot.lane.b32.xlu0 %v6501_v23, %s11172_s0 }
  0x32   : > { %894 = vmatprep.subr.mxu1 %v833_v11  ;;  %4364 = vrot.lane.b32.xlu1 %v6505_v28, %s7286_s24  ;;  %s7288_s24 = smov 112  }
  0x33   : > { %895 = vmatpush1.msra.mxu1 %v832_v12 }
  0x35   : > { %4187 = vrot.lane.b32.xlu0 %v6504_v29, %s11172_s0  ;;  %s7289_s0 = smov 96  }
  0x81   : > { %v7614_v25 = vpop.permute.xlu0 %1102 }
  0x82   : > { %v7612_v24 = vpop.permute.xlu1 %1408  ;;  %v1106_v39 = vmul.f32 %v7614_v25, %v1088_v30  ;;  %v1105_v40 = vmul.f32 0.0, %v7614_v25 }
  0x83   : > { %v1411_v35 = vmul.f32 %v7612_v24, %v1292_v26  ;;  %v1413_v36 = vmul.f32 %v7612_v24, %v1293_v27  ;;  %v1412_v42 = vmul.f32 %v7612_v24, %v1386_v31  ;;  %v1414_v43 = vmul.f32 %v7612_v24, %v1387_v32 }
  0x84   : > { %1139 = vrot.lane.b32.xlu1 %v1106_v39, %s7288_s24  ;;  %1137 = vrot.lane.b32.xlu0 %v1105_v40, %s7288_s24 }
  0x85   : > { %v7639_v41 = vpop.permute.xlu0 %1200  ;;  %v1475_v47 = vrot.slane %v1411_v35, 1  ;;  %v1476_v48 = vrot.slane %v1413_v36, 1  ;;  %v1478_v54 = vrot.slane %v1412_v42, 1  ;;  %v1479_v55 = vrot.slane %v1414_v43, 1 }
  0x86   : > { %v7629_v34 = vpop.permute.xlu1 %1585  ;;  %v1204_v51 = vmul.f32 %v7639_v41, %v1088_v30  ;;  %v1203_v52 = vmul.f32 0.0, %v7639_v41 }
  0x87   : > { %v1588_v46 = vmul.f32 %v7629_v34, %v1292_v26  ;;  %v1590_v49 = vmul.f32 %v7629_v34, %v1293_v27  ;;  %v1589_v57 = vmul.f32 %v7629_v34, %v1386_v31  ;;  %v1591_v58 = vmul.f32 %v7629_v34, %v1387_v32  ;;  %v6477_v31 = vld [vmem:[%s11135_s4] ss:$0 sm:$0xff] }
  0x88   : > { %v1477_v62 = vsel %vm1345_vm3, %v1475_v47, %v1476_v48  ;;  %1237 = vrot.lane.b32.xlu1 %v1204_v51, %s7289_s0  ;;  %1235 = vrot.lane.b32.xlu0 %v1203_v52, %s7289_s0  ;;  %v1480_v5 = vsel %vm1345_vm3, %v1478_v54, %v1479_v55 }
  0x89   : > { %v7654_v56 = vpop.permute.xlu0 %1872  ;;  %v1652_v63 = vrot.slane %v1588_v46, 1  ;;  %v1653_v0 = vrot.slane %v1590_v49, 1  ;;  %v1655_v6 = vrot.slane %v1589_v57, 1  ;;  %v1656_v7 = vrot.slane %v1591_v58, 1 }
  0x8a   : > { %v7663_v1 = vpop.permute.xlu1 %2049  ;;  %v1876_v2 = vmul.f32 %v7654_v56, %v1850_v59  ;;  %v1875_v3 = vmul.f32 %v7654_v56, %v7652_v53  ;;  %v1877_v4 = vmul.f32 %v7654_v56, %v7658_v60  ;;  %v1878_v8 = vmul.f32 %v7654_v56, %v1851_v61 }
  0x8b   : > { %v1654_v9 = vsel %vm1345_vm3, %v1652_v63, %v1653_v0  ;;  %v2053_v10 = vmul.f32 %v7663_v1, %v1850_v59  ;;  %v2052_v15 = vmul.f32 %v7663_v1, %v7652_v53  ;;  %v1657_v16 = vsel %vm1345_vm3, %v1655_v6, %v1656_v7 }
  0x8c   : > { %1525 = vrot.lane.b32.xlu1 %v1480_v5, %s7288_s24  ;;  %1523 = vrot.lane.b32.xlu0 %v1477_v62, %s7288_s24  ;;  %v1942_v11 = vrot.slane %v1876_v2, 2  ;;  %v1939_v12 = vrot.slane %v1875_v3, 2  ;;  %v1940_v14 = vrot.slane %v1877_v4, 2  ;;  %v1943_v17 = vrot.slane %v1878_v8, 2 }
  0x8d   : > { %v2055_v18 = vmul.f32 %v7663_v1, %v1851_v61  ;;  %v2054_v19 = vmul.f32 %v7663_v1, %v7658_v60  ;;  %v2119_v21 = vrot.slane %v2053_v10, 2  ;;  %v2116_v26 = vrot.slane %v2052_v15, 2 }
  0x8e   : > { %v1941_v20 = vsel %vm1809_vm4, %v1939_v12, %v1940_v14  ;;  %v1944_v22 = vsel %vm1809_vm4, %v1942_v11, %v1943_v17  ;;  %v11152_v8 = vlaneseq }
  0x8f   : > { %v2120_v23 = vrot.slane %v2055_v18, 2  ;;  %v2117_v27 = vrot.slane %v2054_v19, 2  ;;  %v7758_v10 = vpop.permute.xlu1 %2360 }
  0x90   : > { %1702 = vrot.lane.b32.xlu1 %v1657_v16, %s7289_s0  ;;  %1700 = vrot.lane.b32.xlu0 %v1654_v9, %s7289_s0  ;;  %vm7706_vm5 = vcmp.lt.s32.totalorder %v11152_v8, 160 }
  0x91   : > { %v2121_v28 = vsel %vm1809_vm4, %v2119_v21, %v2120_v23  ;;  %v2118_v29 = vsel %vm1809_vm4, %v2116_v26, %v2117_v27  ;;  %785 = vst.msk [vmem:[#allocation2 + $0x20] ss:$8 sm:$0x3] %vm7706_vm5, %v7287_v13  ;;  %788 = vst.msk [vmem:[#allocation2 + $0x40] ss:$8 sm:$0x3] %vm7706_vm5, %v7287_v13 }
  0x92   : > { %791 = vst.msk [vmem:[#allocation2 + $0x60] ss:$8 sm:$0x3] %vm7706_vm5, %v7287_v13  ;;  %794 = vst.msk [vmem:[#allocation2 + $0x80] ss:$8 sm:$0x3] %vm7706_vm5, %v7287_v13 }
  0x93   : > { %797 = vst.msk [vmem:[#allocation2 + $0xa0] ss:$8 sm:$0x3] %vm7706_vm5, %v7287_v13  ;;  %800 = vst.msk [vmem:[#allocation2 + $0xc0] ss:$8 sm:$0x3] %vm7706_vm5, %v7287_v13  ;;  %v7760_v11 = vpop.permute.xlu0 %2263 }
  0x94   : > { %1989 = vrot.lane.b32.xlu1 %v1944_v22, %s7288_s24  ;;  %1987 = vrot.lane.b32.xlu0 %v1941_v20, %s7288_s24  ;;  %803 = vst.msk [vmem:[#allocation2 + $0xe0] ss:$8 sm:$0x3] %vm7706_vm5, %v7287_v13  ;;  %806 = vst.msk [vmem:[#allocation2 + $0x100] ss:$8 sm:$0x3] %vm7706_vm5, %v7287_v13  ;;  %v7762_v12 = vpop.permute.xlu1 %2743 }
  0x95   : > { %809 = vst.msk [vmem:[#allocation2 + $0x31] ss:$8 sm:$0x3] %vm7706_vm5, %v7287_v13  ;;  %812 = vst.msk [vmem:[#allocation2 + $0x51] ss:$8 sm:$0x3] %vm7706_vm5, %v7287_v13 }
  0x96   : > { %815 = vst.msk [vmem:[#allocation2 + $0x71] ss:$8 sm:$0x3] %vm7706_vm5, %v7287_v13  ;;  %818 = vst.msk [vmem:[#allocation2 + $0x91] ss:$8 sm:$0x3] %vm7706_vm5, %v7287_v13 }
  0x97   : > { %821 = vst.msk [vmem:[#allocation2 + $0xb1] ss:$8 sm:$0x3] %vm7706_vm5, %v7287_v13  ;;  %824 = vst.msk [vmem:[#allocation2 + $0xd1] ss:$8 sm:$0x3] %vm7706_vm5, %v7287_v13  ;;  %v7764_v14 = vpop.permute.xlu0 %2566 }
  0x98   : > { %2166 = vrot.lane.b32.xlu1 %v2121_v28, %s7289_s0  ;;  %2164 = vrot.lane.b32.xlu0 %v2118_v29, %s7289_s0  ;;  %827 = vst.msk [vmem:[#allocation2 + $0xf1] ss:$8 sm:$0x3] %vm7706_vm5, %v7287_v13  ;;  %830 = vst.msk [vmem:[#allocation2 + $0x111] ss:$8 sm:$0x3] %vm7706_vm5, %v7287_v13  ;;  %v7766_v16 = vpop.permute.xlu1 %3206 }
  0x9b   : > { %v7768_v17 = vpop.permute.xlu0 %3029 }
  0x9c   : > { %v7772_v23 = vpop.permute.xlu1 %3518 }
  0x9f   : > { %v7774_v26 = vpop.permute.xlu0 %3421 }
  0xdf   : > { %v6865_v30 = vpop.f32.mrf.mxu0 }
  0xe0   : > { %v739_v35 = vmul.f32 %v6865_v30, %v6477_v31 }
  0xe1   : > { %v692_v32 = vpop.f32.mrf.mxu0 }
  0xe2   : > { %v738_v36 = vmul.f32 %v6477_v31, %v692_v32  ;;  %v754_v42 = vadd.f32 %v6478_v37, %v739_v35 }
  0xe3   : > { %v6868_v38 = vpop.f32.mrf.mxu0 }
  0xe4   : > { %v753_v39 = vadd.f32 %v6478_v37, %v738_v36  ;;  %v741_v46 = vmul.f32 %v6868_v38, %v6477_v31  ;;  %v762_v49 = vmax.f32 %v754_v42, 0.0  ;;  %v7784_v38 = vpop.permute.xlu1 %3901 }
  0xe5   : > { %v702_v40 = vpop.f32.mrf.mxu0 }
  0xe6   : > { %v761_v43 = vmax.f32 %v753_v39, 0.0  ;;  %v740_v44 = vmul.f32 %v6477_v31, %v702_v40  ;;  %v756_v51 = vadd.f32 %v6478_v37, %v741_v46  ;;  %v7786_v39 = vpop.permute.xlu0 %3724 }
  0xe7   : > { %v6871_v45 = vpop.f32.mrf.mxu0 }
  0xe8   : > { %929 = vmatmul.mubr.f32.vlgmr.msra.gmra.mxu1 %v761_v43  ;;  %v755_v47 = vadd.f32 %v6478_v37, %v740_v44  ;;  %v764_v57 = vmax.f32 %v756_v51, 0.0  ;;  %v743_v58 = vmul.f32 %v6871_v45, %v6477_v31 }
  0xe9   : > { %934 = vmatprep.mubr.f32.mxu1 %v7287_v13  ;;  %v712_v48 = vpop.f32.mrf.mxu0 }
  0xea   : > { %v763_v52 = vmax.f32 %v755_v47, 0.0  ;;  %v742_v54 = vmul.f32 %v6477_v31, %v712_v48  ;;  %v758_v62 = vadd.f32 %v6478_v37, %v743_v58 }
  0xeb   : > { %v6874_v55 = vpop.f32.mrf.mxu0 }
  0xec   : > { %935 = vmatmul.mubr.f32.gmra.mxu1 %v762_v49  ;;  %v757_v59 = vadd.f32 %v6478_v37, %v742_v54  ;;  %v766_v2 = vmax.f32 %v758_v62, 0.0  ;;  %v745_v3 = vmul.f32 %v6874_v55, %v6477_v31  ;;  %v7805_v54 = vpop.permute.xlu1 %4364  ;;  %v7807_v55 = vpop.permute.xlu0 %4187 }
  0xed   : > { %940 = vmatprep.mubr.f32.mxu1 %v7287_v13  ;;  %v722_v61 = vpop.f32.mrf.mxu0  ;;  %11175 = vst [vmem:[#allocation4_spill] sm:$0xff] %v7805_v54  ;;  %11176 = vst [vmem:[#allocation5_spill] sm:$0xff] %v7807_v55 }
  0xee   : > { %v765_v63 = vmax.f32 %v757_v59, 0.0  ;;  %v744_v0 = vmul.f32 %v6477_v31, %v722_v61  ;;  %v760_v5 = vadd.f32 %v6478_v37, %v745_v3 }
  0xf0   : > { %941 = vmatmul.mubr.f32.gmra.mxu1 %v763_v52  ;;  %v759_v4 = vadd.f32 %v6478_v37, %v744_v0  ;;  %v768_v7 = vmax.f32 %v760_v5, 0.0 }
  0xf1   : > { %946 = vmatprep.mubr.f32.mxu1 %v7287_v13 }
  0xf2   : > { %v767_v6 = vmax.f32 %v759_v4, 0.0 }
  0xf4   : > { %947 = vmatmul.mubr.f32.gmra.mxu1 %v764_v57 }
  0xf5   : > { %952 = vmatprep.mubr.f32.mxu1 %v7287_v13 }
  0xf8   : > { %953 = vmatmul.mubr.f32.gmra.mxu1 %v765_v63 }
  0xf9   : > { %958 = vmatprep.mubr.f32.mxu1 %v7287_v13 }
  0xfc   : > { %959 = vmatmul.mubr.f32.gmra.mxu1 %v766_v2 }
  0xfd   : > { %964 = vmatprep.mubr.f32.mxu1 %v7287_v13 }
 0x100   : > { %965 = vmatmul.mubr.f32.gmra.mxu1 %v767_v6 }
 0x101   : > { %970 = vmatprep.mubr.f32.mxu1 %v7287_v13 }
 0x104   : > { %971 = vmatmul.mubr.f32.gmra.mxu1 %v768_v7  ;;  %v7826_v7 = vld [vmem:[%s11138_s7] ss:$0 sm:$0xff] }
 0x1a8   : > { %v930_v15 = vpop.f32.mrf.mxu1 }
 0x1a9   : > { %v993_v18 = vrot.slane %v930_v15, 7 }
 0x1aa   : > { %v932_v19 = vpop.f32.mrf.mxu1 }
 0x1ab   : > { %1025 = vst [vmem:[#allocation2 + $0x20] sm:$0xfe] %v993_v18  ;;  %1028 = vst [vmem:[#allocation2 + $0x30] sm:$0x1] %v993_v18  ;;  %v994_v13 = vrot.slane %v932_v19, 7 }
 0x1ac   : > { %v936_v20 = vpop.f32.mrf.mxu1 }
 0x1ad   : > { %1027 = vst.msk [vmem:[#allocation2 + $0x28] sm:$0xfe] %vm1026_vm6, %v994_v13  ;;  %v995_v21 = vrot.slane %v936_v20, 7 }
 0x1ae   : > { %1030 = vst.msk [vmem:[#allocation2 + $0x38] sm:$0x1] %vm1029_vm7, %v994_v13  ;;  %v938_v22 = vpop.f32.mrf.mxu1 }
 0x1af   : > { %1031 = vst [vmem:[#allocation2 + $0x40] sm:$0xfe] %v995_v21  ;;  %1033 = vst [vmem:[#allocation2 + $0x50] sm:$0x1] %v995_v21  ;;  %v996_v27 = vrot.slane %v938_v22, 7 }
 0x1b0   : > { %v942_v28 = vpop.f32.mrf.mxu1 }
 0x1b1   : > { %1032 = vst.msk [vmem:[#allocation2 + $0x48] sm:$0xfe] %vm1026_vm6, %v996_v27  ;;  %v997_v29 = vrot.slane %v942_v28, 7  ;;  %v1140_v28 = vpop.permute.xlu1 %1139 }
 0x1b2   : > { %1034 = vst.msk [vmem:[#allocation2 + $0x58] sm:$0x1] %vm1029_vm7, %v996_v27  ;;  %v944_v30 = vpop.f32.mrf.mxu1  ;;  %v7778_v31 = vld [vmem:[#allocation2 + $0x20] sm:$0xff]  ;;  %v7803_v51 = vld [vmem:[#allocation2 + $0x30] sm:$0x1] }
 0x1b3   : > { %1035 = vst [vmem:[#allocation2 + $0x60] sm:$0xfe] %v997_v29  ;;  %1037 = vst [vmem:[#allocation2 + $0x70] sm:$0x1] %v997_v29  ;;  %v998_v32 = vrot.slane %v944_v30, 7  ;;  %v1107_v35 = vmul.f32 %v7614_v25, %v7778_v31  ;;  %v1205_v45 = vmul.f32 %v7639_v41, %v7778_v31  ;;  %v2266_v58 = vmul.f32 %v7760_v11, %v7778_v31  ;;  %v1138_v29 = vpop.permute.xlu0 %1137 }
 0x1b4   : > { %v948_v36 = vpop.f32.mrf.mxu1  ;;  %v7782_v37 = vld [vmem:[#allocation2 + $0x28] sm:$0xff]  ;;  %v7801_v49 = vld [vmem:[#allocation2 + $0x20] sm:$0xfe]  ;;  %v1417_v0 = vmul.f32 %v7612_v24, %v7803_v51  ;;  %v2363_v15 = vmul.f32 %v7758_v10, %v7778_v31  ;;  %v1594_v21 = vmul.f32 %v7629_v34, %v7803_v51  ;;  %v7837_v27 = vld [vmem:[#allocation2 + $0x30] sm:$0x3] }
 0x1b5   : > { %1036 = vst.msk [vmem:[#allocation2 + $0x68] sm:$0xfe] %vm1026_vm6, %v998_v32  ;;  %v999_v40 = vrot.slane %v948_v36, 7  ;;  %1141 = vrot.lane.b32.xlu0 %v1107_v35, %s7288_s24  ;;  %v1108_v42 = vmul.f32 %v7614_v25, %v7782_v37  ;;  %v1206_v48 = vmul.f32 %v7639_v41, %v7782_v37  ;;  %v1388_v59 = vld [vmem:[#allocation2 + $0x28] sm:$0xfe]  ;;  %v1415_v63 = vmul.f32 %v7612_v24, %v7801_v49 }
 0x1b6   : > { %1038 = vst.msk [vmem:[#allocation2 + $0x78] sm:$0x1] %vm1029_vm7, %v998_v32  ;;  %v950_v43 = vpop.f32.mrf.mxu1  ;;  %v1389_v61 = vld [vmem:[#allocation2 + $0x38] sm:$0x1]  ;;  %v2267_v3 = vmul.f32 %v7760_v11, %v7782_v37  ;;  %v1416_v5 = vmul.f32 %v7612_v24, %v1388_v59  ;;  %v1482_v13 = vrot.slane %v1417_v0, 1  ;;  %v1592_v20 = vmul.f32 %v7629_v34, %v7801_v49 }
 0x1b7   : > { %1039 = vst [vmem:[#allocation2 + $0x80] sm:$0xfe] %v999_v40  ;;  %1041 = vst [vmem:[#allocation2 + $0x90] sm:$0x1] %v999_v40  ;;  %v1000_v44 = vrot.slane %v950_v43, 7  ;;  %1143 = vrot.lane.b32.xlu1 %v1108_v42, %s7288_s24  ;;  %v1418_v6 = vmul.f32 %v7612_v24, %v1389_v61  ;;  %v1481_v19 = vrot.slane %v1415_v63, 1  ;;  %v2364_v32 = vmul.f32 %v7758_v10, %v7782_v37 }
 0x1b8   : > { %v954_v46 = vpop.f32.mrf.mxu1  ;;  %v7835_v22 = vld [vmem:[#allocation2 + $0x20] sm:$0xfc]  ;;  %v1593_v35 = vmul.f32 %v7629_v34, %v1388_v59  ;;  %v1484_v40 = vrot.slane %v1416_v5, 1  ;;  %v1595_v43 = vmul.f32 %v7629_v34, %v1389_v61  ;;  %v1881_v37 = vmul.f32 %v7654_v56, %v7837_v27 }
 0x1b9   : > { %1040 = vst.msk [vmem:[#allocation2 + $0x88] sm:$0xfe] %vm1026_vm6, %v1000_v44  ;;  %v1001_v47 = vrot.slane %v954_v46, 7  ;;  %1239 = vrot.lane.b32.xlu0 %v1205_v45, %s7289_s0  ;;  %v1485_v42 = vrot.slane %v1418_v6, 1  ;;  %v1879_v46 = vmul.f32 %v7654_v56, %v7835_v22  ;;  %v1658_v59 = vrot.slane %v1592_v20, 1 }
 0x1ba   : > { %1042 = vst.msk [vmem:[#allocation2 + $0x98] sm:$0x1] %vm1029_vm7, %v1000_v44  ;;  %v956_v52 = vpop.f32.mrf.mxu1  ;;  %v1072_v44 = vmul.f32 0.0, %v7826_v7  ;;  %v1659_v61 = vrot.slane %v1594_v21, 1  ;;  %v1661_v63 = vrot.slane %v1593_v35, 1 }
 0x1bb   : > { %1043 = vst [vmem:[#allocation2 + $0xa0] sm:$0xfe] %v1001_v47  ;;  %1045 = vst [vmem:[#allocation2 + $0xb0] sm:$0x1] %v1001_v47  ;;  %v1002_v57 = vrot.slane %v956_v52, 7  ;;  %1241 = vrot.lane.b32.xlu1 %v1206_v48, %s7289_s0  ;;  %v1170_v52 = vsel %vm1169_vm8, %v1138_v29, %v1140_v28  ;;  %v2056_v28 = vmul.f32 %v7663_v1, %v7835_v22 }
 0x1bc   : > { %v960_v62 = vpop.f32.mrf.mxu1  ;;  %v1852_v47 = vld [vmem:[#allocation2 + $0x28] sm:$0xfc]  ;;  %v1853_v48 = vld [vmem:[#allocation2 + $0x38] sm:$0x3]  ;;  %v1186_v6 = vadd.f32 %v1170_v52, %v1072_v44  ;;  %v1660_v21 = vsel %vm1345_vm3, %v1658_v59, %v1659_v61  ;;  %v2058_v29 = vmul.f32 %v7663_v1, %v7837_v27  ;;  %v7873_v35 = vld [vmem:[#allocation2 + $0x30] sm:$0x1] }
 0x1bd   : > { %1044 = vst.msk [vmem:[#allocation2 + $0xa8] sm:$0xfe] %vm1026_vm6, %v1002_v57  ;;  %v1003_v2 = vrot.slane %v960_v62, 7  ;;  %2298 = vrot.lane.b32.xlu0 %v2266_v58, %s7288_s24  ;;  %v1483_v58 = vsel %vm1345_vm3, %v1481_v19, %v1482_v13  ;;  %v1882_v5 = vmul.f32 %v7654_v56, %v1853_v48  ;;  %v1945_v19 = vrot.slane %v1879_v46, 2  ;;  %v2544_v46 = vld [vmem:[#allocation2 + $0x28] sm:$0xfe] }
 0x1be   : > { %1046 = vst.msk [vmem:[#allocation2 + $0xb8] sm:$0x1] %vm1029_vm7, %v1002_v57  ;;  %v962_v4 = vpop.f32.mrf.mxu1  ;;  %v1946_v13 = vrot.slane %v1881_v37, 2  ;;  %v2545_v37 = vld [vmem:[#allocation2 + $0x38] sm:$0x1]  ;;  %v2122_v52 = vrot.slane %v2056_v28, 2 }
 0x1bf   : > { %1047 = vst [vmem:[#allocation2 + $0xc0] sm:$0xfe] %v1003_v2  ;;  %1049 = vst [vmem:[#allocation2 + $0xd0] sm:$0x1] %v1003_v2  ;;  %v1004_v9 = vrot.slane %v962_v4, 7  ;;  %2300 = vrot.lane.b32.xlu1 %v2267_v3, %s7288_s24  ;;  %v1486_v2 = vsel %vm1345_vm3, %v1484_v40, %v1485_v42  ;;  %v1662_v3 = vrot.slane %v1595_v43, 1  ;;  %v1880_v4 = vmul.f32 %v7654_v56, %v1852_v47 }
 0x1c0   : > { %v966_v18 = vpop.f32.mrf.mxu1  ;;  %v1949_v42 = vrot.slane %v1882_v5, 2  ;;  %v2059_v43 = vmul.f32 %v7663_v1, %v1853_v48  ;;  %v7907_v28 = vld [vmem:[#allocation2 + $0x20] sm:$0xfc] }
 0x1c1   : > { %1048 = vst.msk [vmem:[#allocation2 + $0xc8] sm:$0xfe] %vm1026_vm6, %v1004_v9  ;;  %v1005_v30 = vrot.slane %v966_v18, 7  ;;  %2395 = vrot.lane.b32.xlu0 %v2363_v15, %s7289_s0  ;;  %v1236_v15 = vpop.permute.xlu0 %1235  ;;  %v1948_v40 = vrot.slane %v1880_v4, 2 }
 0x1c2   : > { %1050 = vst.msk [vmem:[#allocation2 + $0xd8] sm:$0x1] %vm1029_vm7, %v1004_v9  ;;  %v968_v36 = vpop.f32.mrf.mxu1  ;;  %v1238_v9 = vpop.permute.xlu1 %1237 }
 0x1c3   : > { %1051 = vst [vmem:[#allocation2 + $0xe0] sm:$0xfe] %v1005_v30  ;;  %1053 = vst [vmem:[#allocation2 + $0xf0] sm:$0x1] %v1005_v30  ;;  %v1006_v45 = vrot.slane %v968_v36, 7  ;;  %2397 = vrot.lane.b32.xlu1 %v2364_v32, %s7289_s0  ;;  %v1268_v20 = vsel %vm1267_vm9, %v1236_v15, %v1238_v9  ;;  %v2057_v30 = vmul.f32 %v7663_v1, %v1852_v47 }
 0x1c4   : > { %v972_v57 = vpop.f32.mrf.mxu1  ;;  %v7871_v32 = vld [vmem:[#allocation2 + $0x20] sm:$0xfe]  ;;  %v1663_v36 = vsel %vm1345_vm3, %v1661_v63, %v1662_v3  ;;  %v1284_v44 = vadd.f32 %v1268_v20, %v1186_v6  ;;  %v1950_v63 = vsel %vm1809_vm4, %v1948_v40, %v1949_v42  ;;  %v2572_v3 = vmul.f32 %v7764_v14, %v2545_v37 }
 0x1c5   : > { %1052 = vst.msk [vmem:[#allocation2 + $0xe8] sm:$0xfe] %vm1026_vm6, %v1006_v45  ;;  %v1007_v62 = vrot.slane %v972_v57, 7  ;;  %1527 = vrot.lane.b32.xlu0 %v1483_v58, %s7288_s24  ;;  %v2123_v57 = vrot.slane %v2058_v29, 2  ;;  %v2569_v47 = vmul.f32 %v7764_v14, %v7871_v32  ;;  %v2571_v58 = vmul.f32 %v7764_v14, %v7873_v35  ;;  %v1524_v61 = vpop.permute.xlu0 %1523  ;;  %v7909_v29 = vld [vmem:[#allocation2 + $0x30] sm:$0x3] }
 0x1c6   : > { %1054 = vst.msk [vmem:[#allocation2 + $0xf8] sm:$0x1] %vm1029_vm7, %v1006_v45  ;;  %v974_v0 = vpop.f32.mrf.mxu1  ;;  %v1947_v45 = vsel %vm1809_vm4, %v1945_v19, %v1946_v13  ;;  %v1526_v59 = vpop.permute.xlu1 %1525  ;;  %v2125_v48 = vrot.slane %v2057_v30, 2  ;;  %v1378_v4 = vadd.f32 %v7646_v50, %v1284_v44  ;;  %v2746_v5 = vmul.f32 %v7762_v12, %v7871_v32  ;;  %v3007_v44 = vld [vmem:[#allocation2 + $0x28] sm:$0xfc] }
 0x1c7   : > { %1055 = vst [vmem:[#allocation2 + $0x100] sm:$0xfe] %v1007_v62  ;;  %1057 = vst [vmem:[#allocation2 + $0x110] sm:$0x1] %v1007_v62  ;;  %v1008_v18 = vrot.slane %v974_v0, 7  ;;  %1529 = vrot.lane.b32.xlu1 %v1486_v2, %s7288_s24  ;;  %v2126_v0 = vrot.slane %v2059_v43, 2  ;;  %v2570_v2 = vmul.f32 %v7764_v14, %v2544_v46  ;;  %v2748_v6 = vmul.f32 %v7762_v12, %v7873_v35 }
 0x1c8   : > { %v7887_v62 = vld [vmem:[%s11138_s7 + $0x6] ss:$0 sm:$0xff]  ;;  %v1555_v9 = vsel %vm1169_vm8, %v1524_v61, %v1526_v59  ;;  %v2124_v15 = vsel %vm1809_vm4, %v2122_v52, %v2123_v57  ;;  %v2634_v19 = vrot.slane %v2571_v58, 1  ;;  %v2747_v20 = vmul.f32 %v7762_v12, %v2544_v46 }
 0x1c9   : > { %1056 = vst.msk [vmem:[#allocation2 + $0x108] sm:$0xfe] %vm1026_vm6, %v1008_v18  ;;  %1704 = vrot.lane.b32.xlu0 %v1660_v21, %s7289_s0  ;;  %v1777_v13 = vmul.f32 %v7887_v62, %v7652_v53  ;;  %v1778_v50 = vmul.f32 %v7887_v62, %v7658_v60  ;;  %v2749_v21 = vmul.f32 %v7762_v12, %v2545_v37  ;;  %v2637_v40 = vrot.slane %v2572_v3, 1  ;;  %v1701_v43 = vpop.permute.xlu0 %1700 }
 0x1ca   : > { %1058 = vst.msk [vmem:[#allocation2 + $0x118] sm:$0x1] %vm1029_vm7, %v1008_v18  ;;  %v2633_v18 = vrot.slane %v2569_v47, 1  ;;  %v2127_v30 = vsel %vm1809_vm4, %v2125_v48, %v2126_v0  ;;  %v1703_v42 = vpop.permute.xlu1 %1702  ;;  %v2810_v53 = vrot.slane %v2746_v5, 1  ;;  %v2811_v60 = vrot.slane %v2748_v6, 1 }
 0x1cb   : > { %1706 = vrot.lane.b32.xlu1 %v1663_v36, %s7289_s0  ;;  %v2636_v36 = vrot.slane %v2570_v2, 1  ;;  %v1571_v52 = vadd.f32 %v1555_v9, %v1378_v4  ;;  %v3032_v37 = vmul.f32 %v7768_v17, %v7907_v28  ;;  %v3034_v57 = vmul.f32 %v7768_v17, %v7909_v29 }
 0x1cc   : > { %v2635_v46 = vsel %vm1345_vm3, %v2633_v18, %v2634_v19  ;;  %v1810_v47 = vrot.slane %v1777_v13, 2  ;;  %v1811_v58 = vrot.slane %v1778_v50, 2  ;;  %v2813_v59 = vrot.slane %v2747_v20, 1 }
 0x1cd   : > { %1991 = vrot.lane.b32.xlu0 %v1947_v45, %s7288_s24  ;;  %v3008_v45 = vld [vmem:[#allocation2 + $0x38] sm:$0x3]  ;;  %v2814_v61 = vrot.slane %v2749_v21, 1  ;;  %v1732_v48 = vsel %vm1267_vm9, %v1701_v43, %v1703_v42  ;;  %v3033_v0 = vmul.f32 %v7768_v17, %v3007_v44  ;;  %v2812_v3 = vsel %vm1345_vm3, %v2810_v53, %v2811_v60  ;;  %v1988_v13 = vpop.permute.xlu0 %1987 }
 0x1ce   : > { %v3035_v2 = vmul.f32 %v7768_v17, %v3008_v45  ;;  %v3096_v4 = vrot.slane %v3032_v37, 2  ;;  %v3097_v5 = vrot.slane %v3034_v57, 2  ;;  %v3209_v6 = vmul.f32 %v7766_v16, %v7907_v28  ;;  %v1990_v18 = vpop.permute.xlu1 %1989 }
 0x1cf   : > { %1993 = vrot.lane.b32.xlu1 %v1950_v63, %s7288_s24  ;;  %v2638_v63 = vsel %vm1345_vm3, %v2636_v36, %v2637_v40  ;;  %v3211_v9 = vmul.f32 %v7766_v16, %v7909_v29  ;;  %v1812_v19 = vsel %vm1809_vm4, %v1810_v47, %v1811_v58  ;;  %v2815_v50 = vsel %vm1345_vm3, %v2813_v59, %v2814_v61 }
 0x1d0   : > { %v3099_v20 = vrot.slane %v3033_v0, 2  ;;  %v3100_v21 = vrot.slane %v3035_v2, 2  ;;  %v3212_v36 = vmul.f32 %v7766_v16, %v3008_v45  ;;  %v3098_v40 = vsel %vm1809_vm4, %v3096_v4, %v3097_v5  ;;  %v7941_v45 = vld [vmem:[#allocation2 + $0x40] sm:$0xff]  ;;  %v7952_v0 = vld [vmem:[%s11138_s7 + $0x9] ss:$0 sm:$0xff] }
 0x1d1   : > { %2168 = vrot.lane.b32.xlu0 %v2124_v15, %s7289_s0  ;;  %v1748_v15 = vadd.f32 %v1732_v48, %v1571_v52  ;;  %v3273_v42 = vrot.slane %v3209_v6, 2  ;;  %v3274_v43 = vrot.slane %v3211_v9, 2  ;;  %v2019_v60 = vsel %vm1169_vm8, %v1988_v13, %v1990_v18  ;;  %v2165_v47 = vpop.permute.xlu0 %2164  ;;  %v1090_v48 = vld [vmem:[#allocation2 + $0x48] sm:$0xff] }
 0x1d2   : > { %v3101_v52 = vsel %vm1809_vm4, %v3099_v20, %v3100_v21  ;;  %v3277_v37 = vrot.slane %v3212_v36, 2  ;;  %v2167_v57 = vpop.permute.xlu1 %2166  ;;  %v1207_v4 = vmul.f32 %v7639_v41, %v7941_v45  ;;  %v2233_v5 = vmul.f32 %v7952_v0, %v7778_v31 }
 0x1d3   : > { %2170 = vrot.lane.b32.xlu1 %v2127_v30, %s7289_s0  ;;  %v3210_v30 = vmul.f32 %v7766_v16, %v3007_v44  ;;  %v1842_v53 = vadd.f32 %v1812_v19, %v1748_v15  ;;  %v3275_v44 = vsel %vm1809_vm4, %v3273_v42, %v3274_v43  ;;  %v2196_v59 = vsel %vm1267_vm9, %v2165_v47, %v2167_v57  ;;  %v7986_v43 = vld [vmem:[#allocation2 + $0x40] sm:$0xfe] }
 0x1d4   : > { %v1315_v6 = vmul.f32 %v7627_v33, %v7801_v49  ;;  %v1208_v9 = vmul.f32 %v7639_v41, %v1090_v48  ;;  %v1316_v18 = vmul.f32 %v7627_v33, %v7803_v51  ;;  %v2268_v13 = vmul.f32 %v7760_v11, %v7941_v45 }
 0x1d5   : > { %2681 = vrot.lane.b32.xlu0 %v2635_v46, %s7288_s24  ;;  %v3276_v46 = vrot.slane %v3210_v30, 2  ;;  %v2035_v58 = vadd.f32 %v2019_v60, %v1842_v53  ;;  %v2269_v49 = vmul.f32 %v7760_v11, %v1090_v48  ;;  %v1779_v21 = vmul.f32 %v7887_v62, %v7835_v22  ;;  %v7988_v53 = vld [vmem:[#allocation2 + $0x50] sm:$0x1]  ;;  %v7993_v22 = vld [vmem:[%s11138_s7 + $0xc] ss:$0 sm:$0xff] }
 0x1d6   : > { %v1349_v19 = vrot.slane %v1315_v6, 1  ;;  %v1780_v51 = vmul.f32 %v7887_v62, %v7837_v27  ;;  %v2365_v30 = vmul.f32 %v7758_v10, %v7941_v45  ;;  %v2366_v42 = vmul.f32 %v7758_v10, %v1090_v48 }
 0x1d7   : > { %2683 = vrot.lane.b32.xlu1 %v2638_v63, %s7288_s24  ;;  %v3278_v61 = vsel %vm1809_vm4, %v3276_v46, %v3277_v37  ;;  %v1109_v63 = vmul.f32 %v7614_v25, %v7941_v45  ;;  %v2212_v2 = vadd.f32 %v2196_v59, %v2035_v58  ;;  %v1813_v36 = vrot.slane %v1779_v21, 2  ;;  %v1391_v46 = vld [vmem:[#allocation2 + $0x58] sm:$0x1] }
 0x1d8   : > { %v3424_v60 = vmul.f32 %v7774_v26, %v7941_v45  ;;  %v1419_v37 = vmul.f32 %v7612_v24, %v7986_v43  ;;  %v1421_v57 = vmul.f32 %v7612_v24, %v7988_v53  ;;  %v2472_v47 = vmul.f32 %v7993_v22, %v7871_v32 }
 0x1d9   : > { %2858 = vrot.lane.b32.xlu0 %v2812_v3, %s7289_s0  ;;  %v1110_v3 = vmul.f32 %v7614_v25, %v1090_v48  ;;  %v7965_v15 = vadd.f32 %v2233_v5, %v2212_v2  ;;  %v3425_v58 = vmul.f32 %v7774_v26, %v1090_v48  ;;  %v1596_v32 = vmul.f32 %v7629_v34, %v7986_v43 }
 0x1da   : > { %v1487_v5 = vrot.slane %v1419_v37, 1  ;;  %v1488_v6 = vrot.slane %v1421_v57, 1 }
 0x1db   : > { %2860 = vrot.lane.b32.xlu1 %v2815_v50, %s7289_s0  ;;  %v1350_v50 = vrot.slane %v1316_v18, 1 }
 0x1dd   : > { %3144 = vrot.lane.b32.xlu0 %v3098_v40, %s7288_s24  ;;  %v7975_v20 = vsel %vm1345_vm3, %v1349_v19, %v1350_v50  ;;  %v1814_v40 = vrot.slane %v1780_v51, 2  ;;  %v3522_v19 = vmul.f32 %v7772_v23, %v1090_v48  ;;  %v1599_v50 = vmul.f32 %v7629_v34, %v1391_v46 }
 0x1df   : > { %3146 = vrot.lane.b32.xlu1 %v3101_v52, %s7288_s24  ;;  %v7996_v27 = vsel %vm1809_vm4, %v1813_v36, %v1814_v40  ;;  %v1390_v52 = vld [vmem:[#allocation2 + $0x48] sm:$0xfe]  ;;  %v1664_v40 = vrot.slane %v1596_v32, 1 }
 0x1e0   : > { %v1420_v59 = vmul.f32 %v7612_v24, %v1390_v52 }
 0x1e1   : > { %3321 = vrot.lane.b32.xlu0 %v3275_v44, %s7289_s0  ;;  %v2473_v44 = vmul.f32 %v7993_v22, %v7873_v35  ;;  %v1598_v35 = vmul.f32 %v7629_v34, %v7988_v53 }
 0x1e2   : > { %v1490_v21 = vrot.slane %v1420_v59, 1 }
 0x1e3   : > { %3323 = vrot.lane.b32.xlu1 %v3278_v61, %s7289_s0  ;;  %v1422_v61 = vmul.f32 %v7612_v24, %v1391_v46  ;;  %v2505_v2 = vrot.slane %v2473_v44, 1  ;;  %v1489_v46 = vsel %vm1345_vm3, %v1487_v5, %v1488_v6  ;;  %v8059_v5 = vld [vmem:[#allocation2 + $0x40] sm:$0xfe]  ;;  %v8061_v6 = vld [vmem:[#allocation2 + $0x50] sm:$0x1] }
 0x1e5   : > { %1145 = vrot.lane.b32.xlu0 %v1109_v63, %s7288_s24  ;;  %v2504_v63 = vrot.slane %v2472_v47, 1  ;;  %v1491_v51 = vrot.slane %v1422_v61, 1 }
 0x1e7   : > { %1147 = vrot.lane.b32.xlu1 %v1110_v3, %s7288_s24  ;;  %v3521_v3 = vmul.f32 %v7772_v23, %v7941_v45  ;;  %v8028_v18 = vsel %vm1345_vm3, %v2504_v63, %v2505_v2  ;;  %v1492_v44 = vsel %vm1345_vm3, %v1490_v21, %v1491_v51 }
 0x1e9   : > { %1243 = vrot.lane.b32.xlu0 %v1207_v4, %s7289_s0  ;;  %v8023_v4 = vld [vmem:[%s11138_s7 + $0xf] ss:$0 sm:$0xff] }
 0x1ea   : > { %v2936_v36 = vmul.f32 %v8023_v4, %v7909_v29  ;;  %v1668_v29 = vrot.slane %v1599_v50, 1 }
 0x1eb   : > { %1245 = vrot.lane.b32.xlu1 %v1208_v9, %s7289_s0  ;;  %v8025_v9 = vld [vmem:[#allocation2 + $0x40] sm:$0xfc] }
 0x1ec   : > { %v1883_v48 = vmul.f32 %v7654_v56, %v8025_v9  ;;  %v2968_v47 = vrot.slane %v2936_v36, 2  ;;  %v2060_v32 = vmul.f32 %v7663_v1, %v8025_v9  ;;  %v2573_v36 = vmul.f32 %v7764_v14, %v8059_v5 }
 0x1ed   : > { %2302 = vrot.lane.b32.xlu0 %v2268_v13, %s7288_s24  ;;  %v1597_v13 = vmul.f32 %v7629_v34, %v1390_v52  ;;  %v1855_v52 = vld [vmem:[#allocation2 + $0x58] sm:$0x3] }
 0x1ee   : > { %v1886_v59 = vmul.f32 %v7654_v56, %v1855_v52  ;;  %v1951_v2 = vrot.slane %v1883_v48, 2 }
 0x1ef   : > { %2304 = vrot.lane.b32.xlu1 %v2269_v49, %s7288_s24  ;;  %v8034_v49 = vld [vmem:[#allocation2 + $0x50] sm:$0x3] }
 0x1f0   : > { %v1885_v37 = vmul.f32 %v7654_v56, %v8034_v49  ;;  %v1955_v51 = vrot.slane %v1886_v59, 2 }
 0x1f1   : > { %2399 = vrot.lane.b32.xlu0 %v2365_v30, %s7289_s0  ;;  %v2935_v30 = vmul.f32 %v8023_v4, %v7907_v28  ;;  %v1667_v28 = vrot.slane %v1597_v13, 1  ;;  %v2063_v13 = vmul.f32 %v7663_v1, %v1855_v52 }
 0x1f3   : > { %2401 = vrot.lane.b32.xlu1 %v2366_v42, %s7289_s0  ;;  %v1665_v42 = vrot.slane %v1598_v35, 1  ;;  %v2967_v57 = vrot.slane %v2935_v30, 2  ;;  %v2062_v35 = vmul.f32 %v7663_v1, %v8034_v49  ;;  %v1669_v50 = vsel %vm1345_vm3, %v1667_v28, %v1668_v29  ;;  %v2546_v30 = vld [vmem:[#allocation2 + $0x48] sm:$0xfe] }
 0x1f5   : > { %3456 = vrot.lane.b32.xlu0 %v3424_v60, %s7288_s24  ;;  %v1854_v60 = vld [vmem:[#allocation2 + $0x48] sm:$0xfc]  ;;  %v8051_v61 = vsel %vm1809_vm4, %v2967_v57, %v2968_v47  ;;  %v1666_v63 = vsel %vm1345_vm3, %v1664_v40, %v1665_v42  ;;  %v2575_v40 = vmul.f32 %v7764_v14, %v8061_v6  ;;  %v2547_v42 = vld [vmem:[#allocation2 + $0x58] sm:$0x1]  ;;  %v2574_v57 = vmul.f32 %v7764_v14, %v2546_v30 }
 0x1f6   : > { %v1317_v47 = vmul.f32 %v7627_v33, %v7986_v43  ;;  %v2576_v29 = vmul.f32 %v7764_v14, %v2547_v42  ;;  %v2752_v43 = vmul.f32 %v7762_v12, %v8061_v6 }
 0x1f7   : > { %3458 = vrot.lane.b32.xlu1 %v3425_v58, %s7288_s24  ;;  %v1884_v58 = vmul.f32 %v7654_v56, %v1854_v60  ;;  %v2640_v59 = vrot.slane %v2575_v40, 1 }
 0x1f9   : > { %3553 = vrot.lane.b32.xlu0 %v3521_v3, %s7289_s0  ;;  %v1952_v3 = vrot.slane %v1885_v37, 2  ;;  %v1954_v21 = vrot.slane %v1884_v58, 2  ;;  %v2132_v37 = vrot.slane %v2063_v13, 2  ;;  %v2639_v58 = vrot.slane %v2573_v36, 1  ;;  %v2917_v13 = vld [vmem:[#allocation2 + $0x50] sm:$0x3] }
 0x1fa   : > { %v3010_v36 = vld [vmem:[#allocation2 + $0x58] sm:$0x3] }
 0x1fb   : > { %3555 = vrot.lane.b32.xlu1 %v3522_v19, %s7289_s0  ;;  %v2061_v19 = vmul.f32 %v7663_v1, %v1854_v60  ;;  %v1953_v48 = vsel %vm1809_vm4, %v1951_v2, %v1952_v3  ;;  %v2129_v60 = vrot.slane %v2062_v35, 2  ;;  %v1956_v28 = vsel %vm1809_vm4, %v1954_v21, %v1955_v51  ;;  %v3009_v51 = vld [vmem:[#allocation2 + $0x48] sm:$0xfc] }
 0x1fc   : > { %v1352_v2 = vrot.slane %v1317_v47, 1  ;;  %v2753_v21 = vmul.f32 %v7762_v12, %v2547_v42  ;;  %v3038_v42 = vmul.f32 %v7768_v17, %v2917_v13  ;;  %v3037_v47 = vmul.f32 %v7768_v17, %v3009_v51 }
 0x1fd   : > { %1531 = vrot.lane.b32.xlu0 %v1489_v46, %s7288_s24  ;;  %v2128_v46 = vrot.slane %v2060_v32, 2  ;;  %v2131_v52 = vrot.slane %v2061_v19, 2  ;;  %v2642_v19 = vrot.slane %v2574_v57, 1 }
 0x1ff   : > { %1533 = vrot.lane.b32.xlu1 %v1492_v44, %s7288_s24  ;;  %v1318_v44 = vmul.f32 %v7627_v33, %v7988_v53  ;;  %v2130_v3 = vsel %vm1809_vm4, %v2128_v46, %v2129_v60  ;;  %v2133_v35 = vsel %vm1809_vm4, %v2131_v52, %v2132_v37  ;;  %v2751_v33 = vmul.f32 %v7762_v12, %v2546_v30  ;;  %v2916_v53 = vld [vmem:[#allocation2 + $0x40] sm:$0xfc] }
 0x200   : > { %v2641_v46 = vsel %vm1345_vm3, %v2639_v58, %v2640_v59  ;;  %v1782_v30 = vmul.f32 %v7887_v62, %v8034_v49  ;;  %v2817_v52 = vrot.slane %v2752_v43, 1  ;;  %v3036_v37 = vmul.f32 %v7768_v17, %v2916_v53 }
 0x201   : > { %1708 = vrot.lane.b32.xlu0 %v1666_v63, %s7289_s0  ;;  %v2750_v63 = vmul.f32 %v7762_v12, %v8059_v5  ;;  %v1353_v32 = vrot.slane %v1318_v44, 1  ;;  %v2819_v44 = vrot.slane %v2751_v33, 1  ;;  %v2820_v58 = vrot.slane %v2753_v21, 1  ;;  %v3610_v33 = vld [vmem:[#allocation2 + $0x50] sm:$0x1] }
 0x202   : > { %v3213_v49 = vmul.f32 %v7766_v16, %v2916_v53  ;;  %v3215_v43 = vmul.f32 %v7766_v16, %v2917_v13  ;;  %v2475_v21 = vmul.f32 %v7993_v22, %v8061_v6  ;;  %v3729_v6 = vmul.f32 %v7786_v39, %v3610_v33 }
 0x203   : > { %1710 = vrot.lane.b32.xlu1 %v1669_v50, %s7289_s0  ;;  %v2643_v50 = vrot.slane %v2576_v29, 1  ;;  %v8092_v40 = vsel %vm1345_vm3, %v1352_v2, %v1353_v32  ;;  %v2816_v60 = vrot.slane %v2750_v63, 1  ;;  %v3102_v2 = vrot.slane %v3036_v37, 2  ;;  %v3703_v37 = vld [vmem:[#allocation2 + $0x58] sm:$0x1] }
 0x204   : > { %v3105_v32 = vrot.slane %v3037_v47, 2 }
 0x205   : > { %1995 = vrot.lane.b32.xlu0 %v1953_v48, %s7288_s24  ;;  %v1781_v48 = vmul.f32 %v7887_v62, %v8025_v9  ;;  %v3039_v9 = vmul.f32 %v7768_v17, %v3010_v36  ;;  %v2644_v29 = vsel %vm1345_vm3, %v2642_v19, %v2643_v50  ;;  %v2818_v63 = vsel %vm1345_vm3, %v2816_v60, %v2817_v52  ;;  %v3609_v19 = vld [vmem:[#allocation2 + $0x40] sm:$0xfe] }
 0x206   : > { %v2474_v50 = vmul.f32 %v7993_v22, %v8059_v5  ;;  %v3216_v60 = vmul.f32 %v7766_v16, %v3010_v36  ;;  %v3279_v52 = vrot.slane %v3213_v49, 2  ;;  %v3727_v5 = vmul.f32 %v7786_v39, %v3609_v19 }
 0x207   : > { %1997 = vrot.lane.b32.xlu1 %v1956_v28, %s7288_s24  ;;  %v1816_v57 = vrot.slane %v1781_v48, 2  ;;  %v1817_v28 = vrot.slane %v1782_v30, 2  ;;  %v2821_v48 = vsel %vm1345_vm3, %v2819_v44, %v2820_v58  ;;  %v3702_v30 = vld [vmem:[#allocation2 + $0x48] sm:$0xfe]  ;;  %v3730_v58 = vmul.f32 %v7786_v39, %v3703_v37  ;;  %v1298_v37 = vld [vmem:[#allocation2 + $0x60] sm:$0xfe] }
 0x208   : > { %v3728_v44 = vmul.f32 %v7786_v39, %v3702_v30  ;;  %v2937_v49 = vmul.f32 %v8023_v4, %v2916_v53 }
 0x209   : > { %2172 = vrot.lane.b32.xlu0 %v2130_v3, %s7289_s0  ;;  %v8109_v59 = vsel %vm1809_vm4, %v1816_v57, %v1817_v28  ;;  %v3103_v3 = vrot.slane %v3038_v42, 2  ;;  %v2507_v42 = vrot.slane %v2474_v50, 1  ;;  %v2508_v57 = vrot.slane %v2475_v21, 1 }
 0x20a   : > { %v3794_v33 = vrot.slane %v3728_v44, 1  ;;  %v3795_v50 = vrot.slane %v3730_v58, 1 }
 0x20b   : > { %2174 = vrot.lane.b32.xlu1 %v2133_v35, %s7289_s0  ;;  %v3106_v35 = vrot.slane %v3039_v9, 2  ;;  %v3104_v47 = vsel %vm1809_vm4, %v3102_v2, %v3103_v3  ;;  %v3280_v9 = vrot.slane %v3215_v43, 2  ;;  %v8128_v36 = vsel %vm1345_vm3, %v2507_v42, %v2508_v57  ;;  %v1299_v42 = vld [vmem:[#allocation2 + $0x70] sm:$0x1]  ;;  %v7190_v57 = vld [vmem:[%s11138_s7 + $0x3] ss:$0 sm:$0xff] }
 0x20c   : > { %v3791_v3 = vrot.slane %v3727_v5, 1  ;;  %v3792_v43 = vrot.slane %v3729_v6, 1  ;;  %v1320_v5 = vmul.f32 %v7190_v57, %v1299_v42 }
 0x20d   : > { %2685 = vrot.lane.b32.xlu0 %v2641_v46, %s7288_s24  ;;  %v3214_v46 = vmul.f32 %v7766_v16, %v3009_v51  ;;  %v3107_v51 = vsel %vm1809_vm4, %v3105_v32, %v3106_v35  ;;  %v3281_v2 = vsel %vm1809_vm4, %v3279_v52, %v3280_v9  ;;  %v2970_v32 = vrot.slane %v2937_v49, 2 }
 0x20e   : > { %v3793_v53 = vsel %vm1345_vm3, %v3791_v3, %v3792_v43  ;;  %v1073_v3 = vmul.f32 %v7826_v7, %v7778_v31  ;;  %v1392_v7 = vld [vmem:[#allocation2 + $0x68] sm:$0xfe] }
 0x20f   : > { %2687 = vrot.lane.b32.xlu1 %v2644_v29, %s7288_s24  ;;  %v3282_v28 = vrot.slane %v3214_v46, 2  ;;  %v3283_v29 = vrot.slane %v3216_v60, 2  ;;  %v1091_v46 = vld [vmem:[#allocation2 + $0x68] sm:$0xff] }
 0x210   : > { %v1112_v30 = vmul.f32 %v7614_v25, %v1091_v46  ;;  %v1210_v9 = vmul.f32 %v7639_v41, %v1091_v46  ;;  %v2271_v58 = vmul.f32 %v7760_v11, %v1091_v46  ;;  %v2368_v31 = vmul.f32 %v7758_v10, %v1091_v46 }
 0x211   : > { %2862 = vrot.lane.b32.xlu0 %v2818_v63, %s7289_s0  ;;  %v2938_v63 = vmul.f32 %v8023_v4, %v2917_v13  ;;  %v3284_v19 = vsel %vm1809_vm4, %v3282_v28, %v3283_v29  ;;  %v8143_v13 = vld [vmem:[#allocation2 + $0x60] sm:$0xff]  ;;  %v1356_v29 = vrot.slane %v1320_v5, 1  ;;  %v1425_v5 = vmul.f32 %v7612_v24, %v1299_v42 }
 0x212   : > { %v1111_v60 = vmul.f32 %v7614_v25, %v8143_v13  ;;  %v1209_v52 = vmul.f32 %v7639_v41, %v8143_v13  ;;  %v2270_v28 = vmul.f32 %v7760_v11, %v8143_v13 }
 0x213   : > { %2864 = vrot.lane.b32.xlu1 %v2821_v48, %s7289_s0  ;;  %v2971_v35 = vrot.slane %v2938_v63, 2  ;;  %v3796_v48 = vsel %vm1345_vm3, %v3794_v33, %v3795_v50 }
 0x215   : > { %3148 = vrot.lane.b32.xlu0 %v3104_v47, %s7288_s24  ;;  %v8140_v21 = vsel %vm1809_vm4, %v2970_v32, %v2971_v35  ;;  %v1319_v47 = vmul.f32 %v7190_v57, %v1298_v37  ;;  %v2367_v32 = vmul.f32 %v7758_v10, %v8143_v13  ;;  %v8176_v35 = vld [vmem:[#allocation2 + $0x70] sm:$0x3] }
 0x216   : > { %v1784_v33 = vmul.f32 %v7887_v62, %v8176_v35 }
 0x217   : > { %3150 = vrot.lane.b32.xlu1 %v3107_v51, %s7288_s24  ;;  %v1355_v6 = vrot.slane %v1319_v47, 1 }
 0x219   : > { %3325 = vrot.lane.b32.xlu0 %v3281_v2, %s7289_s0  ;;  %v8166_v49 = vsel %vm1345_vm3, %v1355_v6, %v1356_v29  ;;  %v8169_v2 = vld [vmem:[#allocation2 + $0x60] sm:$0xfc]  ;;  %v1424_v6 = vmul.f32 %v7612_v24, %v1392_v7 }
 0x21b   : > { %3327 = vrot.lane.b32.xlu1 %v3284_v19, %s7289_s0  ;;  %v1783_v19 = vmul.f32 %v7887_v62, %v8169_v2  ;;  %v1423_v62 = vmul.f32 %v7612_v24, %v1298_v37 }
 0x21d   : > { %3839 = vrot.lane.b32.xlu0 %v3793_v53, %s7288_s24 }
 0x21f   : > { %3841 = vrot.lane.b32.xlu1 %v3796_v48, %s7288_s24  ;;  %v1393_v48 = vld [vmem:[#allocation2 + $0x78] sm:$0x1] }
 0x221   : > { %1149 = vrot.lane.b32.xlu0 %v1111_v60, %s7288_s24  ;;  %v1819_v60 = vrot.slane %v1783_v19, 2 }
 0x223   : > { %1151 = vrot.lane.b32.xlu1 %v1112_v30, %s7288_s24 }
 0x225   : > { %1247 = vrot.lane.b32.xlu0 %v1209_v52, %s7289_s0  ;;  %v1820_v52 = vrot.slane %v1784_v33, 2  ;;  %v3523_v33 = vmul.f32 %v7772_v23, %v8143_v13 }
 0x227   : > { %v1142_v51 = vpop.permute.xlu0 %1141  ;;  %1249 = vrot.lane.b32.xlu1 %v1210_v9, %s7289_s0  ;;  %v3426_v9 = vmul.f32 %v7774_v26, %v8143_v13 }
 0x229   : > { %v1144_v44 = vpop.permute.xlu1 %1143  ;;  %2306 = vrot.lane.b32.xlu0 %v2270_v28, %s7288_s24  ;;  %v8193_v28 = vsel %vm1809_vm4, %v1819_v60, %v1820_v52  ;;  %v1496_v60 = vrot.slane %v1424_v6, 1 }
 0x22a   : > { %v1171_v63 = vsel %vm1169_vm8, %v1142_v51, %v1144_v44  ;;  %v1426_v51 = vmul.f32 %v7612_v24, %v1393_v48  ;;  %v3427_v44 = vmul.f32 %v7774_v26, %v1091_v46 }
 0x22b   : > { %v1240_v43 = vpop.permute.xlu0 %1239  ;;  %2308 = vrot.lane.b32.xlu1 %v2271_v58, %s7288_s24  ;;  %v1187_v50 = vadd.f32 %v1171_v63, %v1073_v3  ;;  %v1600_v63 = vmul.f32 %v7629_v34, %v1298_v37  ;;  %v1494_v37 = vrot.slane %v1425_v5, 1  ;;  %v1603_v5 = vmul.f32 %v7629_v34, %v1393_v48 }
 0x22d   : > { %v1242_v53 = vpop.permute.xlu1 %1241  ;;  %2403 = vrot.lane.b32.xlu0 %v2367_v32, %s7289_s0  ;;  %v8201_v32 = vld [vmem:[#allocation2 + $0x60] sm:$0xfe] }
 0x22e   : > { %v1269_v30 = vsel %vm1267_vm9, %v1240_v43, %v1242_v53  ;;  %v1602_v43 = vmul.f32 %v7629_v34, %v1299_v42  ;;  %v1493_v53 = vrot.slane %v1423_v62, 1  ;;  %v1857_v62 = vld [vmem:[#allocation2 + $0x78] sm:$0x3] }
 0x22f   : > { %v1285_v57 = vadd.f32 %v1269_v30, %v1187_v50  ;;  %v2299_v47 = vpop.permute.xlu0 %2298  ;;  %2405 = vrot.lane.b32.xlu1 %v2368_v31, %s7289_s0  ;;  %v3524_v50 = vmul.f32 %v7772_v23, %v1091_v46  ;;  %v8207_v31 = vld [vmem:[#allocation2 + $0x70] sm:$0x1]  ;;  %v1497_v30 = vrot.slane %v1426_v51, 1  ;;  %v1601_v46 = vmul.f32 %v7629_v34, %v1392_v7 }
 0x230   : > { %v2477_v42 = vmul.f32 %v7993_v22, %v8207_v31  ;;  %v1671_v8 = vrot.slane %v1602_v43, 1  ;;  %v1495_v7 = vsel %vm1345_vm3, %v1493_v53, %v1494_v37  ;;  %v1674_v37 = vrot.slane %v1603_v5, 1 }
 0x231   : > { %v2301_v29 = vpop.permute.xlu1 %2300  ;;  %3460 = vrot.lane.b32.xlu0 %v3426_v9, %s7288_s24  ;;  %v1379_v58 = vadd.f32 %v7975_v20, %v1285_v57  ;;  %v2476_v20 = vmul.f32 %v7993_v22, %v8201_v32  ;;  %v1856_v9 = vld [vmem:[#allocation2 + $0x68] sm:$0xfc]  ;;  %v1889_v22 = vmul.f32 %v7654_v56, %v8176_v35  ;;  %v1673_v53 = vrot.slane %v1601_v46, 1 }
 0x232   : > { %v2330_v3 = vsel %vm1169_vm8, %v2299_v47, %v2301_v29  ;;  %v1670_v47 = vrot.slane %v1600_v63, 1  ;;  %v2511_v6 = vrot.slane %v2477_v42, 1  ;;  %v1888_v63 = vmul.f32 %v7654_v56, %v1856_v9  ;;  %v8236_v42 = vld [vmem:[#allocation2 + $0x60] sm:$0xfc] }
 0x233   : > { %v2396_v19 = vpop.permute.xlu0 %2395  ;;  %3462 = vrot.lane.b32.xlu1 %v3427_v44, %s7288_s24  ;;  %v2346_v52 = vadd.f32 %v2330_v3, %v7965_v15  ;;  %v2510_v29 = vrot.slane %v2476_v20, 1  ;;  %v1887_v15 = vmul.f32 %v7654_v56, %v8169_v2  ;;  %v1890_v3 = vmul.f32 %v7654_v56, %v1857_v62 }
 0x234   : > { %v1672_v20 = vsel %vm1345_vm3, %v1670_v47, %v1671_v8  ;;  %v2064_v8 = vmul.f32 %v7663_v1, %v8169_v2  ;;  %v2066_v47 = vmul.f32 %v7663_v1, %v8176_v35  ;;  %v2548_v35 = vld [vmem:[#allocation2 + $0x68] sm:$0xfe] }
 0x235   : > { %v2398_v57 = vpop.permute.xlu1 %2397  ;;  %3557 = vrot.lane.b32.xlu0 %v3523_v33, %s7289_s0  ;;  %v8227_v43 = vsel %vm1345_vm3, %v2510_v29, %v2511_v6  ;;  %v1957_v29 = vrot.slane %v1887_v15, 2  ;;  %v2065_v6 = vmul.f32 %v7663_v1, %v1856_v9 }
 0x236   : > { %v2427_v44 = vsel %vm1267_vm9, %v2396_v19, %v2398_v57  ;;  %v1498_v19 = vsel %vm1345_vm3, %v1496_v60, %v1497_v30  ;;  %v2939_v60 = vmul.f32 %v8023_v4, %v8236_v42  ;;  %v1961_v30 = vrot.slane %v1890_v3, 2 }
 0x237   : > { %v2443_v51 = vadd.f32 %v2427_v44, %v2346_v52  ;;  %v1528_v54 = vpop.permute.xlu0 %1527  ;;  %3559 = vrot.lane.b32.xlu1 %v3524_v50, %s7289_s0  ;;  %v8238_v52 = vld [vmem:[#allocation2 + $0x70] sm:$0x3]  ;;  %v1958_v44 = vrot.slane %v1889_v22, 2  ;;  %v2134_v9 = vrot.slane %v2064_v8, 2 }
 0x239   : > { %v1530_v48 = vpop.permute.xlu1 %1529  ;;  %1535 = vrot.lane.b32.xlu0 %v1495_v7, %s7288_s24  ;;  %v8232_v33 = vadd.f32 %v8028_v18, %v2443_v51  ;;  %v2940_v18 = vmul.f32 %v8023_v4, %v8238_v52  ;;  %v2973_v51 = vrot.slane %v2939_v60, 2  ;;  %v1675_v4 = vsel %vm1345_vm3, %v1673_v53, %v1674_v37 }
 0x23a   : > { %v1556_v50 = vsel %vm1169_vm8, %v1528_v54, %v1530_v48  ;;  %v1960_v54 = vrot.slane %v1888_v63, 2  ;;  %v2067_v7 = vmul.f32 %v7663_v1, %v1857_v62  ;;  %v1959_v2 = vsel %vm1809_vm4, %v1957_v29, %v1958_v44 }
 0x23b   : > { %v1705_v57 = vpop.permute.xlu0 %1704  ;;  %1537 = vrot.lane.b32.xlu1 %v1498_v19, %s7288_s24  ;;  %v1572_v46 = vadd.f32 %v1556_v50, %v1379_v58  ;;  %v2974_v15 = vrot.slane %v2940_v18, 2  ;;  %v2549_v58 = vld [vmem:[#allocation2 + $0x78] sm:$0x1]  ;;  %v2135_v19 = vrot.slane %v2066_v47, 2  ;;  %v2577_v50 = vmul.f32 %v7764_v14, %v8201_v32 }
 0x23c   : > { %v1962_v37 = vsel %vm1809_vm4, %v1960_v54, %v1961_v30  ;;  %v2138_v44 = vrot.slane %v2067_v7, 2  ;;  %v2578_v60 = vmul.f32 %v7764_v14, %v2548_v35  ;;  %v2580_v18 = vmul.f32 %v7764_v14, %v2549_v58 }
 0x23d   : > { %v1707_v5 = vpop.permute.xlu1 %1706  ;;  %1712 = vrot.lane.b32.xlu0 %v1672_v20, %s7289_s0  ;;  %v8257_v48 = vsel %vm1809_vm4, %v2973_v51, %v2974_v15  ;;  %v2579_v20 = vmul.f32 %v7764_v14, %v8207_v31  ;;  %v2754_v47 = vmul.f32 %v7762_v12, %v8201_v32  ;;  %v2645_v54 = vrot.slane %v2577_v50, 1 }
 0x23e   : > { %v1733_v22 = vsel %vm1267_vm9, %v1705_v57, %v1707_v5  ;;  %v2137_v57 = vrot.slane %v2065_v6, 2  ;;  %v2755_v51 = vmul.f32 %v7762_v12, %v2548_v35  ;;  %v2757_v15 = vmul.f32 %v7762_v12, %v2549_v58 }
 0x23f   : > { %v1749_v63 = vadd.f32 %v1733_v22, %v1572_v46  ;;  %v1992_v3 = vpop.permute.xlu0 %1991  ;;  %1714 = vrot.lane.b32.xlu1 %v1675_v4, %s7289_s0  ;;  %v2136_v46 = vsel %vm1809_vm4, %v2134_v9, %v2135_v19  ;;  %v2646_v30 = vrot.slane %v2579_v20, 1  ;;  %v2648_v32 = vrot.slane %v2578_v60, 1  ;;  %v3012_v19 = vld [vmem:[#allocation2 + $0x78] sm:$0x3] }
 0x240   : > { %v2139_v4 = vsel %vm1809_vm4, %v2137_v57, %v2138_v44  ;;  %v2649_v7 = vrot.slane %v2580_v18, 1  ;;  %v2234_v50 = vmul.f32 %v7952_v0, %v7941_v45  ;;  %v3040_v58 = vmul.f32 %v7768_v17, %v8236_v42 }
 0x241   : > { %v1843_v62 = vadd.f32 %v7996_v27, %v1749_v63  ;;  %v1994_v53 = vpop.permute.xlu1 %1993  ;;  %1999 = vrot.lane.b32.xlu0 %v1959_v2, %s7288_s24  ;;  %v2756_v27 = vmul.f32 %v7762_v12, %v8207_v31  ;;  %v3011_v63 = vld [vmem:[#allocation2 + $0x68] sm:$0xfc]  ;;  %v2822_v2 = vrot.slane %v2754_v47, 1  ;;  %v2647_v35 = vsel %vm1345_vm3, %v2645_v54, %v2646_v30 }
 0x242   : > { %v2020_v29 = vsel %vm1169_vm8, %v1992_v3, %v1994_v53  ;;  %v3042_v20 = vmul.f32 %v7768_v17, %v8238_v52  ;;  %v2825_v53 = vrot.slane %v2755_v51, 1  ;;  %v3041_v57 = vmul.f32 %v7768_v17, %v3011_v63 }
 0x243   : > { %v2169_v8 = vpop.permute.xlu0 %2168  ;;  %2001 = vrot.lane.b32.xlu1 %v1962_v37, %s7288_s24  ;;  %v2036_v5 = vadd.f32 %v2020_v29, %v1843_v62  ;;  %v2823_v9 = vrot.slane %v2756_v27, 1  ;;  %v2826_v37 = vrot.slane %v2757_v15, 1  ;;  %v2650_v0 = vsel %vm1345_vm3, %v2648_v32, %v2649_v7 }
 0x244   : > { %v3043_v60 = vmul.f32 %v7768_v17, %v3012_v19  ;;  %v3108_v47 = vrot.slane %v3040_v58, 2  ;;  %v3109_v27 = vrot.slane %v3042_v20, 2  ;;  %v3219_v54 = vmul.f32 %v7766_v16, %v8238_v52  ;;  %v8315_v20 = vld [vmem:[#allocation2 + $0x80] sm:$0xff] }
 0x245   : > { %v2171_v6 = vpop.permute.xlu1 %2170  ;;  %2176 = vrot.lane.b32.xlu0 %v2136_v46, %s7289_s0  ;;  %v3217_v46 = vmul.f32 %v7766_v16, %v8236_v42  ;;  %v3111_v51 = vrot.slane %v3041_v57, 2  ;;  %v3220_v32 = vmul.f32 %v7766_v16, %v3012_v19 }
 0x246   : > { %v2197_v22 = vsel %vm1267_vm9, %v2169_v8, %v2171_v6  ;;  %v2824_v8 = vsel %vm1345_vm3, %v2822_v2, %v2823_v9  ;;  %v2827_v6 = vsel %vm1345_vm3, %v2825_v53, %v2826_v37  ;;  %v3110_v52 = vsel %vm1809_vm4, %v3108_v47, %v3109_v27 }
 0x247   : > { %v2213_v31 = vadd.f32 %v2197_v22, %v2036_v5  ;;  %v2682_v3 = vpop.permute.xlu0 %2681  ;;  %2178 = vrot.lane.b32.xlu1 %v2139_v4, %s7289_s0  ;;  %v3112_v22 = vrot.slane %v3043_v60, 2  ;;  %v3218_v4 = vmul.f32 %v7766_v16, %v3011_v63 }
 0x249   : > { %v2684_v62 = vpop.permute.xlu1 %2683  ;;  %2689 = vrot.lane.b32.xlu0 %v2647_v35, %s7288_s24  ;;  %v8290_v29 = vadd.f32 %v2234_v50, %v2213_v31  ;;  %v3286_v31 = vrot.slane %v3219_v54, 2  ;;  %v3113_v50 = vsel %vm1809_vm4, %v3111_v51, %v3112_v22  ;;  %v3288_v63 = vrot.slane %v3218_v4, 2 }
 0x24a   : > { %v2713_v44 = vsel %vm1169_vm8, %v2682_v3, %v2684_v62  ;;  %v3289_v35 = vrot.slane %v3220_v32, 2  ;;  %v1211_v51 = vmul.f32 %v7639_v41, %v8315_v20 }
 0x24b   : > { %v2859_v18 = vpop.permute.xlu0 %2858  ;;  %2691 = vrot.lane.b32.xlu1 %v2650_v0, %s7288_s24  ;;  %v2729_v30 = vadd.f32 %v2713_v44, %v8232_v33  ;;  %v3285_v33 = vrot.slane %v3217_v46, 2  ;;  %v8325_v44 = vld [vmem:[#allocation2 + $0x88] sm:$0xff] }
 0x24c   : > { %v3290_v57 = vsel %vm1809_vm4, %v3288_v63, %v3289_v35  ;;  %v1114_v27 = vmul.f32 %v7614_v25, %v8325_v44  ;;  %v1212_v4 = vmul.f32 %v7639_v41, %v8325_v44  ;;  %v2370_v35 = vmul.f32 %v7758_v10, %v8325_v44 }
 0x24d   : > { %v2861_v5 = vpop.permute.xlu1 %2860  ;;  %2866 = vrot.lane.b32.xlu0 %v2824_v8, %s7289_s0  ;;  %v3287_v58 = vsel %vm1809_vm4, %v3285_v33, %v3286_v31  ;;  %v2273_v33 = vmul.f32 %v7760_v11, %v8325_v44 }
 0x24e   : > { %v2890_v15 = vsel %vm1267_vm9, %v2859_v18, %v2861_v5  ;;  %v1113_v18 = vmul.f32 %v7614_v25, %v8315_v20 }
 0x24f   : > { %v2906_v7 = vadd.f32 %v2890_v15, %v2729_v30  ;;  %v3145_v42 = vpop.permute.xlu0 %3144  ;;  %2868 = vrot.lane.b32.xlu1 %v2827_v6, %s7289_s0  ;;  %v8341_v30 = vld [vmem:[%s11138_s7] ss:$0 sm:$0xff] }
 0x250   : > { %v1074_v5 = vmul.f32 %v8341_v30, %v7941_v45 }
 0x251   : > { %v2999_v3 = vadd.f32 %v8051_v61, %v2906_v7  ;;  %v3147_v2 = vpop.permute.xlu1 %3146  ;;  %3152 = vrot.lane.b32.xlu0 %v3110_v52, %s7288_s24  ;;  %v8320_v61 = vld [vmem:[%s11138_s7 + $0x12] ss:$0 sm:$0xff] }
 0x252   : > { %v3176_v9 = vsel %vm1169_vm8, %v3145_v42, %v3147_v2  ;;  %v3391_v8 = vmul.f32 %v8320_v61, %v7941_v45  ;;  %v2272_v45 = vmul.f32 %v7760_v11, %v8315_v20 }
 0x253   : > { %v3322_v19 = vpop.permute.xlu0 %3321  ;;  %3154 = vrot.lane.b32.xlu1 %v3113_v50, %s7288_s24  ;;  %v3192_v62 = vadd.f32 %v3176_v9, %v2999_v3  ;;  %v2369_v9 = vmul.f32 %v7758_v10, %v8315_v20 }
 0x255   : > { %v3324_v53 = vpop.permute.xlu1 %3323  ;;  %3329 = vrot.lane.b32.xlu0 %v3287_v58, %s7289_s0  ;;  %v1301_v58 = vld [vmem:[#allocation2 + $0x90] sm:$0x1] }
 0x256   : > { %v3353_v37 = vsel %vm1267_vm9, %v3322_v19, %v3324_v53  ;;  %v1300_v19 = vld [vmem:[#allocation2 + $0x80] sm:$0xfe] }
 0x257   : > { %v3369_v0 = vadd.f32 %v3353_v37, %v3192_v62  ;;  %v1146_v60 = vpop.permute.xlu0 %1145  ;;  %3331 = vrot.lane.b32.xlu1 %v3290_v57, %s7289_s0  ;;  %v3428_v37 = vmul.f32 %v7774_v26, %v8315_v20  ;;  %v1394_v57 = vld [vmem:[#allocation2 + $0x88] sm:$0xfe] }
 0x259   : > { %v1148_v47 = vpop.permute.xlu1 %1147  ;;  %1153 = vrot.lane.b32.xlu0 %v1113_v18, %s7288_s24  ;;  %v8335_v46 = vadd.f32 %v3391_v8, %v3369_v0  ;;  %v1427_v0 = vmul.f32 %v7612_v24, %v1300_v19  ;;  %v3429_v8 = vmul.f32 %v7774_v26, %v8325_v44 }
 0x25a   : > { %v1172_v54 = vsel %vm1169_vm8, %v1146_v60, %v1148_v47  ;;  %v1429_v60 = vmul.f32 %v7612_v24, %v1301_v58 }
 0x25b   : > { %v1244_v6 = vpop.permute.xlu0 %1243  ;;  %1155 = vrot.lane.b32.xlu1 %v1114_v27, %s7288_s24  ;;  %v1188_v15 = vadd.f32 %v1172_v54, %v1074_v5  ;;  %v1428_v27 = vmul.f32 %v7612_v24, %v1394_v57 }
 0x25d   : > { %v1246_v22 = vpop.permute.xlu1 %1245  ;;  %1251 = vrot.lane.b32.xlu0 %v1211_v51, %s7289_s0  ;;  %v1604_v51 = vmul.f32 %v7629_v34, %v1300_v19 }
 0x25e   : > { %v1270_v32 = vsel %vm1267_vm9, %v1244_v6, %v1246_v22  ;;  %v3525_v6 = vmul.f32 %v7772_v23, %v8315_v20  ;;  %v1500_v22 = vrot.slane %v1429_v60, 1 }
 0x25f   : > { %v1286_v7 = vadd.f32 %v1270_v32, %v1188_v15  ;;  %v2303_v42 = vpop.permute.xlu0 %2302  ;;  %1253 = vrot.lane.b32.xlu1 %v1212_v4, %s7289_s0  ;;  %v1499_v15 = vrot.slane %v1427_v0, 1  ;;  %v1606_v4 = vmul.f32 %v7629_v34, %v1301_v58 }
 0x261   : > { %v2305_v52 = vpop.permute.xlu1 %2304  ;;  %2310 = vrot.lane.b32.xlu0 %v2272_v45, %s7288_s24  ;;  %v8359_v31 = vadd.f32 %v8092_v40, %v1286_v7  ;;  %v1764_v7 = vld [vmem:[#allocation2 + $0x80] sm:$0xfc]  ;;  %v1502_v45 = vrot.slane %v1428_v27, 1 }
 0x262   : > { %v2331_v3 = vsel %vm1169_vm8, %v2303_v42, %v2305_v52  ;;  %v1765_v42 = vld [vmem:[#allocation2 + $0x90] sm:$0x3]  ;;  %v1891_v19 = vmul.f32 %v7654_v56, %v1764_v7 }
 0x263   : > { %v2400_v2 = vpop.permute.xlu0 %2399  ;;  %2312 = vrot.lane.b32.xlu1 %v2273_v33, %s7288_s24  ;;  %v2347_v50 = vadd.f32 %v2331_v3, %v8290_v29  ;;  %v1395_v29 = vld [vmem:[#allocation2 + $0x98] sm:$0x1]  ;;  %v1605_v33 = vmul.f32 %v7629_v34, %v1394_v57  ;;  %v1858_v3 = vld [vmem:[#allocation2 + $0x88] sm:$0xfc] }
 0x264   : > { %v1430_v54 = vmul.f32 %v7612_v24, %v1395_v29  ;;  %v1607_v20 = vmul.f32 %v7629_v34, %v1395_v29 }
 0x265   : > { %v2402_v63 = vpop.permute.xlu1 %2401  ;;  %2407 = vrot.lane.b32.xlu0 %v2369_v9, %s7289_s0  ;;  %v1679_v29 = vrot.slane %v1605_v33, 1  ;;  %v2458_v33 = vld [vmem:[#allocation2 + $0x90] sm:$0x1] }
 0x266   : > { %v2428_v40 = vsel %vm1267_vm9, %v2400_v2, %v2402_v63  ;;  %v1503_v52 = vrot.slane %v1430_v54, 1  ;;  %v1859_v2 = vld [vmem:[#allocation2 + $0x98] sm:$0x3]  ;;  %v1501_v63 = vsel %vm1345_vm3, %v1499_v15, %v1500_v22  ;;  %v1680_v0 = vrot.slane %v1607_v20, 1 }
 0x267   : > { %v2444_v62 = vadd.f32 %v2428_v40, %v2347_v50  ;;  %v8370_v53 = vpop.permute.xlu0 %3456  ;;  %2409 = vrot.lane.b32.xlu1 %v2370_v35, %s7289_s0  ;;  %v1676_v50 = vrot.slane %v1604_v51, 1  ;;  %v1677_v35 = vrot.slane %v1606_v4, 1  ;;  %v1892_v40 = vmul.f32 %v7654_v56, %v1858_v3 }
 0x268   : > { %v1504_v57 = vsel %vm1345_vm3, %v1502_v45, %v1503_v52  ;;  %v1963_v54 = vrot.slane %v1891_v19, 2  ;;  %v2070_v51 = vmul.f32 %v7663_v1, %v1765_v42  ;;  %v2069_v45 = vmul.f32 %v7663_v1, %v1858_v3  ;;  %v2457_v52 = vld [vmem:[#allocation2 + $0x80] sm:$0xfe] }
 0x269   : > { %v8377_v18 = vpop.permute.xlu1 %3458  ;;  %3464 = vrot.lane.b32.xlu0 %v3428_v37, %s7288_s24  ;;  %v8383_v47 = vadd.f32 %v8128_v36, %v2444_v62  ;;  %v3526_v36 = vmul.f32 %v7772_v23, %v8325_v44  ;;  %v1893_v44 = vmul.f32 %v7654_v56, %v1765_v42  ;;  %v1894_v62 = vmul.f32 %v7654_v56, %v1859_v2  ;;  %v2550_v42 = vld [vmem:[#allocation2 + $0x88] sm:$0xfe] }
 0x26a   : > { %v1678_v27 = vsel %vm1345_vm3, %v1676_v50, %v1677_v35  ;;  %v1966_v4 = vrot.slane %v1892_v40, 2  ;;  %v2551_v35 = vld [vmem:[#allocation2 + $0x98] sm:$0x1]  ;;  %v2581_v3 = vmul.f32 %v7764_v14, %v2457_v52 }
 0x26b   : > { %v8387_v5 = vpop.permute.xlu0 %3553  ;;  %3466 = vrot.lane.b32.xlu1 %v3429_v8, %s7288_s24  ;;  %v2068_v8 = vmul.f32 %v7663_v1, %v1764_v7  ;;  %v1681_v7 = vsel %vm1345_vm3, %v1679_v29, %v1680_v0  ;;  %v2582_v0 = vmul.f32 %v7764_v14, %v2550_v42 }
 0x26d   : > { %v8394_v32 = vpop.permute.xlu1 %3555  ;;  %3561 = vrot.lane.b32.xlu0 %v3525_v6, %s7289_s0  ;;  %v1964_v6 = vrot.slane %v1893_v44, 2  ;;  %v2141_v44 = vrot.slane %v2070_v51, 2 }
 0x26f   : > { %v1532_v9 = vpop.permute.xlu0 %1531  ;;  %3563 = vrot.lane.b32.xlu1 %v3526_v36, %s7289_s0  ;;  %v1967_v36 = vrot.slane %v1894_v62, 2  ;;  %v1965_v19 = vsel %vm1809_vm4, %v1963_v54, %v1964_v6  ;;  %v2651_v6 = vrot.slane %v2581_v3, 1  ;;  %v3014_v3 = vld [vmem:[#allocation2 + $0x98] sm:$0x3] }
 0x271   : > { %v1534_v58 = vpop.permute.xlu1 %1533  ;;  %1539 = vrot.lane.b32.xlu0 %v1501_v63, %s7288_s24 }
 0x272   : > { %v1557_v37 = vsel %vm1169_vm8, %v1532_v9, %v1534_v58  ;;  %v2071_v9 = vmul.f32 %v7663_v1, %v1859_v2  ;;  %v2583_v58 = vmul.f32 %v7764_v14, %v2458_v33  ;;  %v1968_v2 = vsel %vm1809_vm4, %v1966_v4, %v1967_v36 }
 0x273   : > { %v1709_v60 = vpop.permute.xlu0 %1708  ;;  %1541 = vrot.lane.b32.xlu1 %v1504_v57, %s7288_s24  ;;  %v1573_v15 = vadd.f32 %v1557_v37, %v8359_v31  ;;  %v2140_v31 = vrot.slane %v2068_v8, 2  ;;  %v2143_v37 = vrot.slane %v2069_v45, 2  ;;  %v2759_v4 = vmul.f32 %v7762_v12, %v2550_v42  ;;  %v2920_v45 = vld [vmem:[#allocation2 + $0x80] sm:$0xfc]  ;;  %v7192_v42 = vld [vmem:[%s11138_s7 + $0x9] ss:$0 sm:$0xff] }
 0x274   : > { %v2144_v29 = vrot.slane %v2071_v9, 2  ;;  %v2652_v51 = vrot.slane %v2583_v58, 1  ;;  %v2761_v36 = vmul.f32 %v7762_v12, %v2551_v35  ;;  %v2654_v9 = vrot.slane %v2582_v0, 1 }
 0x275   : > { %v1711_v22 = vpop.permute.xlu1 %1710  ;;  %1716 = vrot.lane.b32.xlu0 %v1678_v27, %s7289_s0  ;;  %v2758_v27 = vmul.f32 %v7762_v12, %v2457_v52  ;;  %v2142_v54 = vsel %vm1809_vm4, %v2140_v31, %v2141_v44 }
 0x276   : > { %v1734_v20 = vsel %vm1267_vm9, %v1709_v60, %v1711_v22  ;;  %v2584_v60 = vmul.f32 %v7764_v14, %v2551_v35  ;;  %v2145_v52 = vsel %vm1809_vm4, %v2143_v37, %v2144_v29  ;;  %v2235_v35 = vmul.f32 %v7192_v42, %v8143_v13 }
 0x277   : > { %v1750_v50 = vadd.f32 %v1734_v20, %v1573_v15  ;;  %v1996_v63 = vpop.permute.xlu0 %1995  ;;  %1718 = vrot.lane.b32.xlu1 %v1681_v7, %s7289_s0  ;;  %v2921_v20 = vld [vmem:[#allocation2 + $0x90] sm:$0x3]  ;;  %v2653_v58 = vsel %vm1345_vm3, %v2651_v6, %v2652_v51  ;;  %v2831_v37 = vrot.slane %v2759_v4, 1 }
 0x279   : > { %v1844_v40 = vadd.f32 %v8109_v59, %v1750_v50  ;;  %v1998_v62 = vpop.permute.xlu1 %1997  ;;  %2003 = vrot.lane.b32.xlu0 %v1965_v19, %s7288_s24  ;;  %v2760_v59 = vmul.f32 %v7762_v12, %v2458_v33  ;;  %v2655_v33 = vrot.slane %v2584_v60, 1  ;;  %v3013_v50 = vld [vmem:[#allocation2 + $0x88] sm:$0xfc]  ;;  %v2828_v19 = vrot.slane %v2758_v27, 1 }
 0x27a   : > { %v2021_v57 = vsel %vm1169_vm8, %v1996_v63, %v1998_v62  ;;  %v3046_v62 = vmul.f32 %v7768_v17, %v2921_v20  ;;  %v3045_v29 = vmul.f32 %v7768_v17, %v3013_v50  ;;  %v3047_v27 = vmul.f32 %v7768_v17, %v3014_v3 }
 0x27b   : > { %v2173_v8 = vpop.permute.xlu0 %2172  ;;  %2005 = vrot.lane.b32.xlu1 %v1968_v2, %s7288_s24  ;;  %v2037_v15 = vadd.f32 %v2021_v57, %v1844_v40  ;;  %v2829_v44 = vrot.slane %v2760_v59, 1  ;;  %v3044_v40 = vmul.f32 %v7768_v17, %v2920_v45  ;;  %v2832_v57 = vrot.slane %v2761_v36, 1 }
 0x27c   : > { %v3115_v51 = vrot.slane %v3046_v62, 2 }
 0x27d   : > { %v2175_v22 = vpop.permute.xlu1 %2174  ;;  %2180 = vrot.lane.b32.xlu0 %v2142_v54, %s7289_s0  ;;  %v2830_v54 = vsel %vm1345_vm3, %v2828_v19, %v2829_v44  ;;  %v3114_v6 = vrot.slane %v3044_v40, 2 }
 0x27e   : > { %v2198_v7 = vsel %vm1267_vm9, %v2173_v8, %v2175_v22  ;;  %v2656_v8 = vsel %vm1345_vm3, %v2654_v9, %v2655_v33  ;;  %v3223_v22 = vmul.f32 %v7766_v16, %v2921_v20  ;;  %v3118_v33 = vrot.slane %v3047_v27, 2 }
 0x27f   : > { %v2214_v63 = vadd.f32 %v2198_v7, %v2037_v15  ;;  %v2686_v31 = vpop.permute.xlu0 %2685  ;;  %2182 = vrot.lane.b32.xlu1 %v2145_v52, %s7289_s0  ;;  %v3221_v15 = vmul.f32 %v7766_v16, %v2920_v45  ;;  %v2833_v7 = vsel %vm1345_vm3, %v2831_v37, %v2832_v57  ;;  %v3117_v52 = vrot.slane %v3045_v29, 2  ;;  %v1064_v37 = vld [vmem:[#allocation2 + $0xa0] sm:$0xff] }
 0x280   : > { %v3116_v45 = vsel %vm1809_vm4, %v3114_v6, %v3115_v51  ;;  %v3292_v20 = vrot.slane %v3223_v22, 2  ;;  %v3392_v6 = vmul.f32 %v8320_v61, %v8143_v13 }
 0x281   : > { %v2688_v2 = vpop.permute.xlu1 %2687  ;;  %2693 = vrot.lane.b32.xlu0 %v2653_v58, %s7288_s24  ;;  %v8449_v0 = vadd.f32 %v2235_v35, %v2214_v63  ;;  %v3222_v63 = vmul.f32 %v7766_v16, %v3013_v50  ;;  %v3119_v40 = vsel %vm1809_vm4, %v3117_v52, %v3118_v33 }
 0x282   : > { %v2714_v60 = vsel %vm1169_vm8, %v2686_v31, %v2688_v2  ;;  %v3224_v31 = vmul.f32 %v7766_v16, %v3014_v3 }
 0x283   : > { %v2863_v59 = vpop.permute.xlu0 %2862  ;;  %2695 = vrot.lane.b32.xlu1 %v2656_v8, %s7288_s24  ;;  %v2730_v4 = vadd.f32 %v2714_v60, %v8383_v47  ;;  %v3291_v47 = vrot.slane %v3221_v15, 2  ;;  %v3294_v50 = vrot.slane %v3222_v63, 2  ;;  %v8475_v8 = vld [vmem:[#allocation2 + $0xa8] sm:$0xff]  ;;  %v2274_v63 = vmul.f32 %v7760_v11, %v1064_v37 }
 0x284   : > { %v3295_v62 = vrot.slane %v3224_v31, 2  ;;  %v1116_v15 = vmul.f32 %v7614_v25, %v8475_v8  ;;  %v1214_v61 = vmul.f32 %v7639_v41, %v8475_v8 }
 0x285   : > { %v2865_v36 = vpop.permute.xlu1 %2864  ;;  %2870 = vrot.lane.b32.xlu0 %v2830_v54, %s7289_s0  ;;  %v3293_v2 = vsel %vm1809_vm4, %v3291_v47, %v3292_v20  ;;  %v1115_v54 = vmul.f32 %v7614_v25, %v1064_v37 }
 0x286   : > { %v2891_v9 = vsel %vm1267_vm9, %v2863_v59, %v2865_v36  ;;  %v3296_v60 = vsel %vm1809_vm4, %v3294_v50, %v3295_v62  ;;  %v1213_v36 = vmul.f32 %v7639_v41, %v1064_v37 }
 0x287   : > { %v2907_v19 = vadd.f32 %v2891_v9, %v2730_v4  ;;  %v3149_v44 = vpop.permute.xlu0 %3148  ;;  %2872 = vrot.lane.b32.xlu1 %v2833_v7, %s7289_s0  ;;  %v1075_v9 = vmul.f32 %v8341_v30, %v8143_v13  ;;  %v2371_v13 = vmul.f32 %v7758_v10, %v1064_v37 }
 0x289   : > { %v3000_v42 = vadd.f32 %v8140_v21, %v2907_v19  ;;  %v3151_v35 = vpop.permute.xlu1 %3150  ;;  %3156 = vrot.lane.b32.xlu0 %v3116_v45, %s7288_s24 }
 0x28a   : > { %v3177_v58 = vsel %vm1169_vm8, %v3149_v44, %v3151_v35  ;;  %v2275_v44 = vmul.f32 %v7760_v11, %v8475_v8  ;;  %v1302_v35 = vld [vmem:[#allocation2 + $0xa0] sm:$0xfe] }
 0x28b   : > { %v3326_v3 = vpop.permute.xlu0 %3325  ;;  %3158 = vrot.lane.b32.xlu1 %v3119_v40, %s7288_s24  ;;  %v3193_v57 = vadd.f32 %v3177_v58, %v3000_v42  ;;  %v2372_v42 = vmul.f32 %v7758_v10, %v8475_v8  ;;  %v1303_v58 = vld [vmem:[#allocation2 + $0xb0] sm:$0x1] }
 0x28d   : > { %v3328_v29 = vpop.permute.xlu1 %3327  ;;  %3333 = vrot.lane.b32.xlu0 %v3293_v2, %s7289_s0  ;;  %v1396_v2 = vld [vmem:[#allocation2 + $0xa8] sm:$0xfe] }
 0x28e   : > { %v3354_v21 = vsel %vm1267_vm9, %v3326_v3, %v3328_v29  ;;  %v3430_v3 = vmul.f32 %v7774_v26, %v1064_v37  ;;  %v1431_v29 = vmul.f32 %v7612_v24, %v1302_v35 }
 0x28f   : > { %v3370_v27 = vadd.f32 %v3354_v21, %v3193_v57  ;;  %v8477_v59 = vpop.permute.xlu0 %3839  ;;  %3335 = vrot.lane.b32.xlu1 %v3296_v60, %s7289_s0  ;;  %v1397_v57 = vld [vmem:[#allocation2 + $0xb8] sm:$0x1]  ;;  %v1433_v21 = vmul.f32 %v7612_v24, %v1303_v58 }
 0x291   : > { %v8483_v51 = vpop.permute.xlu1 %3841  ;;  %1157 = vrot.lane.b32.xlu0 %v1115_v54, %s7288_s24  ;;  %v8488_v22 = vadd.f32 %v3392_v6, %v3370_v27  ;;  %v1432_v6 = vmul.f32 %v7612_v24, %v1396_v2 }
 0x293   : > { %v1150_v4 = vpop.permute.xlu0 %1149  ;;  %1159 = vrot.lane.b32.xlu1 %v1116_v15, %s7288_s24  ;;  %v1434_v15 = vmul.f32 %v7612_v24, %v1397_v57 }
 0x295   : > { %v1152_v7 = vpop.permute.xlu1 %1151  ;;  %1255 = vrot.lane.b32.xlu0 %v1213_v36, %s7289_s0 }
 0x296   : > { %v1173_v52 = vsel %vm1169_vm8, %v1150_v4, %v1152_v7  ;;  %v3527_v7 = vmul.f32 %v7772_v23, %v1064_v37  ;;  %v1509_v37 = vrot.slane %v1434_v15, 1 }
 0x297   : > { %v1248_v33 = vpop.permute.xlu0 %1247  ;;  %1257 = vrot.lane.b32.xlu1 %v1214_v61, %s7289_s0  ;;  %v1189_v31 = vadd.f32 %v1173_v52, %v1075_v9  ;;  %v1506_v61 = vrot.slane %v1433_v21, 1  ;;  %v1608_v52 = vmul.f32 %v7629_v34, %v1302_v35  ;;  %v1610_v9 = vmul.f32 %v7629_v34, %v1303_v58 }
 0x299   : > { %v1250_v19 = vpop.permute.xlu1 %1249  ;;  %2314 = vrot.lane.b32.xlu0 %v2274_v63, %s7288_s24  ;;  %v1767_v63 = vld [vmem:[#allocation2 + $0xb0] sm:$0x3] }
 0x29a   : > { %v1271_v45 = vsel %vm1267_vm9, %v1248_v33, %v1250_v19  ;;  %v1766_v33 = vld [vmem:[#allocation2 + $0xa0] sm:$0xfc]  ;;  %v3528_v19 = vmul.f32 %v7772_v23, %v8475_v8  ;;  %v1897_v58 = vmul.f32 %v7654_v56, %v1767_v63  ;;  %v2074_v15 = vmul.f32 %v7663_v1, %v1767_v63  ;;  %v2552_v63 = vld [vmem:[#allocation2 + $0xa8] sm:$0xfe] }
 0x29b   : > { %v1287_v47 = vadd.f32 %v1271_v45, %v1189_v31  ;;  %v2307_v20 = vpop.permute.xlu0 %2306  ;;  %2316 = vrot.lane.b32.xlu1 %v2275_v44, %s7288_s24  ;;  %v1508_v45 = vrot.slane %v1432_v6, 1  ;;  %v1895_v35 = vmul.f32 %v7654_v56, %v1766_v33  ;;  %v2072_v6 = vmul.f32 %v7663_v1, %v1766_v33 }
 0x29d   : > { %v2309_v30 = vpop.permute.xlu1 %2308  ;;  %2411 = vrot.lane.b32.xlu0 %v2371_v13, %s7289_s0  ;;  %v8510_v40 = vadd.f32 %v8166_v49, %v1287_v47  ;;  %v3431_v49 = vmul.f32 %v7774_v26, %v8475_v8  ;;  %v1609_v47 = vmul.f32 %v7629_v34, %v1396_v2  ;;  %v1860_v13 = vld [vmem:[#allocation2 + $0xa8] sm:$0xfc] }
 0x29e   : > { %v2332_v50 = vsel %vm1169_vm8, %v2307_v20, %v2309_v30  ;;  %v1611_v20 = vmul.f32 %v7629_v34, %v1397_v57  ;;  %v1861_v30 = vld [vmem:[#allocation2 + $0xb8] sm:$0x3]  ;;  %v1510_v57 = vsel %vm1345_vm3, %v1508_v45, %v1509_v37 }
 0x29f   : > { %v2404_v62 = vpop.permute.xlu0 %2403  ;;  %2413 = vrot.lane.b32.xlu1 %v2372_v42, %s7289_s0  ;;  %v2348_v60 = vadd.f32 %v2332_v50, %v8449_v0  ;;  %v1505_v0 = vrot.slane %v1431_v29, 1  ;;  %v1683_v50 = vrot.slane %v1610_v9, 1  ;;  %v1898_v2 = vmul.f32 %v7654_v56, %v1861_v30  ;;  %v2460_v9 = vld [vmem:[#allocation2 + $0xb0] sm:$0x1] }
 0x2a0   : > { %v1685_v29 = vrot.slane %v1609_v47, 1  ;;  %v1686_v21 = vrot.slane %v1611_v20, 1  ;;  %v2075_v37 = vmul.f32 %v7663_v1, %v1861_v30  ;;  %v2553_v20 = vld [vmem:[#allocation2 + $0xb8] sm:$0x1] }
 0x2a1   : > { %v2406_v27 = vpop.permute.xlu1 %2405  ;;  %3468 = vrot.lane.b32.xlu0 %v3430_v3, %s7288_s24  ;;  %v1507_v8 = vsel %vm1345_vm3, %v1505_v0, %v1506_v61  ;;  %v1896_v3 = vmul.f32 %v7654_v56, %v1860_v13  ;;  %v1973_v0 = vrot.slane %v1898_v2, 2  ;;  %v2073_v61 = vmul.f32 %v7663_v1, %v1860_v13 }
 0x2a2   : > { %v2429_v54 = vsel %vm1267_vm9, %v2404_v62, %v2406_v27  ;;  %v1969_v27 = vrot.slane %v1895_v35, 2  ;;  %v1687_v45 = vsel %vm1345_vm3, %v1685_v29, %v1686_v21  ;;  %v2146_v35 = vrot.slane %v2072_v6, 2 }
 0x2a3   : > { %v2445_v4 = vadd.f32 %v2429_v54, %v2348_v60  ;;  %v8524_v36 = vpop.permute.xlu0 %3460  ;;  %3470 = vrot.lane.b32.xlu1 %v3431_v49, %s7288_s24  ;;  %v1970_v49 = vrot.slane %v1897_v58, 2  ;;  %v2147_v58 = vrot.slane %v2074_v15, 2  ;;  %v2587_v13 = vmul.f32 %v7764_v14, %v2460_v9 }
 0x2a4   : > { %v2586_v29 = vmul.f32 %v7764_v14, %v2552_v63  ;;  %v2588_v21 = vmul.f32 %v7764_v14, %v2553_v20 }
 0x2a5   : > { %v8530_v31 = vpop.permute.xlu1 %3462  ;;  %3565 = vrot.lane.b32.xlu0 %v3527_v7, %s7289_s0  ;;  %v8536_v44 = vadd.f32 %v8227_v43, %v2445_v4  ;;  %v1682_v43 = vrot.slane %v1608_v52, 1  ;;  %v1972_v7 = vrot.slane %v1896_v3, 2  ;;  %v2459_v52 = vld [vmem:[#allocation2 + $0xa0] sm:$0xfe]  ;;  %v1971_v33 = vsel %vm1809_vm4, %v1969_v27, %v1970_v49 }
 0x2a6   : > { %v2149_v3 = vrot.slane %v2073_v61, 2  ;;  %v2764_v49 = vmul.f32 %v7762_v12, %v2460_v9  ;;  %v2658_v15 = vrot.slane %v2587_v13, 1  ;;  %v2765_v61 = vmul.f32 %v7762_v12, %v2553_v20 }
 0x2a7   : > { %v8540_v42 = vpop.permute.xlu0 %3557  ;;  %3567 = vrot.lane.b32.xlu1 %v3528_v19, %s7289_s0  ;;  %v1684_v54 = vsel %vm1345_vm3, %v1682_v43, %v1683_v50  ;;  %v1974_v30 = vsel %vm1809_vm4, %v1972_v7, %v1973_v0  ;;  %v2763_v0 = vmul.f32 %v7762_v12, %v2552_v63  ;;  %v2660_v9 = vrot.slane %v2586_v29, 1 }
 0x2a9   : > { %v8546_v62 = vpop.permute.xlu1 %3559  ;;  %1543 = vrot.lane.b32.xlu0 %v1507_v8, %s7288_s24  ;;  %v2585_v8 = vmul.f32 %v7764_v14, %v2459_v52 }
 0x2ab   : > { %v1536_v60 = vpop.permute.xlu0 %1535  ;;  %1545 = vrot.lane.b32.xlu1 %v1510_v57, %s7288_s24  ;;  %v2150_v57 = vrot.slane %v2075_v37, 2  ;;  %v2657_v6 = vrot.slane %v2585_v8, 1  ;;  %v2661_v37 = vrot.slane %v2588_v21, 1 }
 0x2ad   : > { %v1538_v4 = vpop.permute.xlu1 %1537  ;;  %1720 = vrot.lane.b32.xlu0 %v1684_v54, %s7289_s0  ;;  %v2148_v54 = vsel %vm1809_vm4, %v2146_v35, %v2147_v58  ;;  %v2835_v35 = vrot.slane %v2764_v49, 1  ;;  %v3016_v58 = vld [vmem:[#allocation2 + $0xb8] sm:$0x3]  ;;  %v2659_v8 = vsel %vm1345_vm3, %v2657_v6, %v2658_v15 }
 0x2ae   : > { %v1558_v19 = vsel %vm1169_vm8, %v1536_v60, %v1538_v4 }
 0x2af   : > { %v1713_v47 = vpop.permute.xlu0 %1712  ;;  %1722 = vrot.lane.b32.xlu1 %v1687_v45, %s7289_s0  ;;  %v1574_v43 = vadd.f32 %v1558_v19, %v8510_v40  ;;  %v2762_v40 = vmul.f32 %v7762_v12, %v2459_v52  ;;  %v2922_v19 = vld [vmem:[#allocation2 + $0xa0] sm:$0xfc]  ;;  %v2923_v45 = vld [vmem:[#allocation2 + $0xb0] sm:$0x3]  ;;  %v2151_v52 = vsel %vm1809_vm4, %v2149_v3, %v2150_v57  ;;  %v2662_v3 = vsel %vm1345_vm3, %v2660_v9, %v2661_v37 }
 0x2b0   : > { %v3048_v63 = vmul.f32 %v7768_v17, %v2922_v19  ;;  %v3050_v20 = vmul.f32 %v7768_v17, %v2923_v45  ;;  %v3227_v49 = vmul.f32 %v7766_v16, %v2923_v45  ;;  %v3228_v9 = vmul.f32 %v7766_v16, %v3016_v58 }
 0x2b1   : > { %v1715_v50 = vpop.permute.xlu1 %1714  ;;  %2007 = vrot.lane.b32.xlu0 %v1971_v33, %s7288_s24 }
 0x2b2   : > { %v1735_v2 = vsel %vm1267_vm9, %v1713_v47, %v1715_v50  ;;  %v3015_v47 = vld [vmem:[#allocation2 + $0xa8] sm:$0xfc]  ;;  %v2838_v50 = vrot.slane %v2765_v61, 1  ;;  %v3120_v21 = vrot.slane %v3048_v63, 2  ;;  %v3298_v45 = vrot.slane %v3227_v49, 2 }
 0x2b3   : > { %v1751_v60 = vadd.f32 %v1735_v2, %v1574_v43  ;;  %v8571_v27 = vpop.permute.xlu0 %1999  ;;  %2009 = vrot.lane.b32.xlu1 %v1974_v30, %s7288_s24  ;;  %v2837_v43 = vrot.slane %v2763_v0, 1  ;;  %v3049_v30 = vmul.f32 %v7768_v17, %v3015_v47  ;;  %v3051_v2 = vmul.f32 %v7768_v17, %v3016_v58 }
 0x2b5   : > { %v8578_v4 = vadd.f32 %v8193_v28, %v1751_v60  ;;  %v8580_v7 = vpop.permute.xlu1 %2001  ;;  %2184 = vrot.lane.b32.xlu0 %v2148_v54, %s7289_s0  ;;  %v2834_v28 = vrot.slane %v2762_v40, 1  ;;  %v3121_v60 = vrot.slane %v3050_v20, 2  ;;  %v3225_v40 = vmul.f32 %v7766_v16, %v2922_v19 }
 0x2b6   : > { %v2839_v6 = vsel %vm1345_vm3, %v2837_v43, %v2838_v50  ;;  %v3123_v15 = vrot.slane %v3049_v30, 2  ;;  %v3124_v61 = vrot.slane %v3051_v2, 2 }
 0x2b7   : > { %v8586_v33 = vpop.permute.xlu0 %2176  ;;  %2186 = vrot.lane.b32.xlu1 %v2151_v52, %s7289_s0  ;;  %v2836_v29 = vsel %vm1345_vm3, %v2834_v28, %v2835_v35  ;;  %v3226_v52 = vmul.f32 %v7766_v16, %v3015_v47  ;;  %v3122_v19 = vsel %vm1809_vm4, %v3120_v21, %v3121_v60  ;;  %v3297_v28 = vrot.slane %v3225_v40, 2 }
 0x2b8   : > { %11177 = vst [vmem:[#allocation6_spill] sm:$0xff] %v8586_v33  ;;  %v3125_v20 = vsel %vm1809_vm4, %v3123_v15, %v3124_v61  ;;  %v3301_v47 = vrot.slane %v3228_v9, 2 }
 0x2b9   : > { %v8592_v13 = vpop.permute.xlu1 %2178  ;;  %2697 = vrot.lane.b32.xlu0 %v2659_v8, %s7288_s24  ;;  %v3300_v43 = vrot.slane %v3226_v52, 2  ;;  %v3299_v30 = vsel %vm1809_vm4, %v3297_v28, %v3298_v45 }
 0x2bb   : > { %v2690_v57 = vpop.permute.xlu0 %2689  ;;  %2699 = vrot.lane.b32.xlu1 %v2662_v3, %s7288_s24  ;;  %v8617_v3 = vld [vmem:[#allocation2 + $0xc0] sm:$0xff] }
 0x2bc   : > { %v1117_v60 = vmul.f32 %v7614_v25, %v8617_v3  ;;  %v2276_v61 = vmul.f32 %v7760_v11, %v8617_v3  ;;  %v2373_v45 = vmul.f32 %v7758_v10, %v8617_v3 }
 0x2bd   : > { %v2692_v54 = vpop.permute.xlu1 %2691  ;;  %2874 = vrot.lane.b32.xlu0 %v2836_v29, %s7289_s0  ;;  %v8626_v29 = vld [vmem:[#allocation2 + $0xc8] sm:$0xff] }
 0x2be   : > { %v2715_v0 = vsel %vm1169_vm8, %v2690_v57, %v2692_v54  ;;  %v3302_v57 = vsel %vm1809_vm4, %v3300_v43, %v3301_v47  ;;  %v1215_v54 = vmul.f32 %v7639_v41, %v8617_v3  ;;  %v1216_v15 = vmul.f32 %v7639_v41, %v8626_v29 }
 0x2bf   : > { %v2867_v37 = vpop.permute.xlu0 %2866  ;;  %2876 = vrot.lane.b32.xlu1 %v2839_v6, %s7289_s0  ;;  %v2731_v35 = vadd.f32 %v2715_v0, %v8536_v44  ;;  %v2277_v9 = vmul.f32 %v7760_v11, %v8626_v29  ;;  %v2374_v47 = vmul.f32 %v7758_v10, %v8626_v29 }
 0x2c1   : > { %v2869_v8 = vpop.permute.xlu1 %2868  ;;  %3160 = vrot.lane.b32.xlu0 %v3122_v19, %s7288_s24  ;;  %v1305_v19 = vld [vmem:[#allocation2 + $0xd0] sm:$0x1] }
 0x2c2   : > { %v2892_v63 = vsel %vm1267_vm9, %v2867_v37, %v2869_v8  ;;  %v1304_v37 = vld [vmem:[#allocation2 + $0xc0] sm:$0xfe]  ;;  %v1399_v8 = vld [vmem:[#allocation2 + $0xd8] sm:$0x1] }
 0x2c3   : > { %v2908_v50 = vadd.f32 %v2892_v63, %v2731_v35  ;;  %v8613_v58 = vpop.permute.xlu0 %3152  ;;  %3162 = vrot.lane.b32.xlu1 %v3125_v20, %s7288_s24  ;;  %v1398_v35 = vld [vmem:[#allocation2 + $0xc8] sm:$0xfe]  ;;  %v1435_v63 = vmul.f32 %v7612_v24, %v1304_v37  ;;  %v1437_v20 = vmul.f32 %v7612_v24, %v1305_v19 }
 0x2c4   : > { %11178 = vst [vmem:[#allocation7_spill] sm:$0xff] %v8613_v58 }
 0x2c5   : > { %v8620_v44 = vadd.f32 %v8257_v48, %v2908_v50  ;;  %v8622_v2 = vpop.permute.xlu1 %3154  ;;  %3337 = vrot.lane.b32.xlu0 %v3299_v30, %s7289_s0  ;;  %v1118_v48 = vmul.f32 %v7614_v25, %v8626_v29  ;;  %v1436_v50 = vmul.f32 %v7612_v24, %v1398_v35  ;;  %v1438_v30 = vmul.f32 %v7612_v24, %v1399_v8 }
 0x2c6   : > { %11180 = vst [vmem:[#allocation9_spill] sm:$0xff] %v8622_v2  ;;  %v7202_v2 = vld [vmem:[#allocation2 + $0x80] sm:$0xfe] }
 0x2c7   : > { %11179 = vst [vmem:[#allocation8_spill] sm:$0xff] %v8620_v44  ;;  %v8628_v21 = vpop.permute.xlu0 %3329  ;;  %3339 = vrot.lane.b32.xlu1 %v3302_v57, %s7289_s0 }
 0x2c8   : > { %11181 = vst [vmem:[#allocation10_spill] sm:$0xff] %v8628_v21 }
 0x2c9   : > { %v8633_v40 = vpop.permute.xlu1 %3331  ;;  %1161 = vrot.lane.b32.xlu0 %v1117_v60, %s7288_s24  ;;  %v3432_v60 = vmul.f32 %v7774_v26, %v8617_v3 }
 0x2ca   : > { %11182 = vst [vmem:[#allocation11_spill] sm:$0xff] %v8633_v40  ;;  %v7199_v40 = vld [vmem:[#allocation2 + $0x80] sm:$0xfc] }
 0x2cb   : > { %v8638_v49 = vpop.permute.xlu0 %1153  ;;  %1163 = vrot.lane.b32.xlu1 %v1118_v48, %s7288_s24  ;;  %v1612_v48 = vmul.f32 %v7629_v34, %v1304_v37  ;;  %v1862_v37 = vld [vmem:[#allocation2 + $0xc8] sm:$0xfc] }
 0x2cc   : > { %11183 = vst [vmem:[#allocation12_spill] sm:$0xff] %v8638_v49 }
 0x2cd   : > { %v8643_v6 = vpop.permute.xlu1 %1155  ;;  %1259 = vrot.lane.b32.xlu0 %v1215_v54, %s7289_s0  ;;  %v1511_v54 = vrot.slane %v1435_v63, 1  ;;  %v1863_v63 = vld [vmem:[#allocation2 + $0xd8] sm:$0x3] }
 0x2ce   : > { %11184 = vst [vmem:[#allocation13_spill] sm:$0xff] %v8643_v6 }
 0x2cf   : > { %v8648_v0 = vpop.permute.xlu0 %1251  ;;  %1261 = vrot.lane.b32.xlu1 %v1216_v15, %s7289_s0  ;;  %v1512_v15 = vrot.slane %v1437_v20, 1 }
 0x2d0   : > { %11185 = vst [vmem:[#allocation14_spill] sm:$0xff] %v8648_v0  ;;  %v1613_v0 = vmul.f32 %v7629_v34, %v1398_v35  ;;  %v1900_v35 = vmul.f32 %v7654_v56, %v1862_v37 }
 0x2d1   : > { %v8653_v52 = vpop.permute.xlu1 %1253  ;;  %2318 = vrot.lane.b32.xlu0 %v2276_v61, %s7288_s24  ;;  %v1614_v61 = vmul.f32 %v7629_v34, %v1305_v19  ;;  %v1688_v19 = vrot.slane %v1612_v48, 1 }
 0x2d2   : > { %11186 = vst [vmem:[#allocation15_spill] sm:$0xff] %v8653_v52  ;;  %v1615_v52 = vmul.f32 %v7629_v34, %v1399_v8  ;;  %v1902_v8 = vmul.f32 %v7654_v56, %v1863_v63  ;;  %v1978_v21 = vrot.slane %v1900_v35, 2 }
 0x2d3   : > { %v8658_v28 = vpop.permute.xlu0 %2310  ;;  %2320 = vrot.lane.b32.xlu1 %v2277_v9, %s7288_s24 }
 0x2d4   : > { %11187 = vst [vmem:[#allocation16_spill] sm:$0xff] %v8658_v28  ;;  %v1768_v28 = vld [vmem:[#allocation2 + $0xc0] sm:$0xfc] }
 0x2d5   : > { %v8665_v43 = vpop.permute.xlu1 %2312  ;;  %2415 = vrot.lane.b32.xlu0 %v2373_v45, %s7289_s0  ;;  %v3433_v45 = vmul.f32 %v7774_v26, %v8626_v29  ;;  %v1899_v49 = vmul.f32 %v7654_v56, %v1768_v28 }
 0x2d6   : > { %11188 = vst [vmem:[#allocation17_spill] sm:$0xff] %v8665_v43  ;;  %v1514_v43 = vrot.slane %v1436_v50, 1 }
 0x2d7   : > { %v8672_v57 = vpop.permute.xlu0 %2407  ;;  %2417 = vrot.lane.b32.xlu1 %v2374_v47, %s7289_s0  ;;  %v1515_v47 = vrot.slane %v1438_v30, 1 }
 0x2d8   : > { %11189 = vst [vmem:[#allocation18_spill] sm:$0xff] %v8672_v57  ;;  %v1769_v57 = vld [vmem:[#allocation2 + $0xd0] sm:$0x3] }
 0x2d9   : > { %v8679_v9 = vpop.permute.xlu1 %2409  ;;  %3472 = vrot.lane.b32.xlu0 %v3432_v60, %s7288_s24  ;;  %v1513_v60 = vsel %vm1345_vm3, %v1511_v54, %v1512_v15  ;;  %v1901_v6 = vmul.f32 %v7654_v56, %v1769_v57  ;;  %v1516_v30 = vsel %vm1345_vm3, %v1514_v43, %v1515_v47  ;;  %v2076_v54 = vmul.f32 %v7663_v1, %v1768_v28 }
 0x2da   : > { %11190 = vst [vmem:[#allocation19_spill] sm:$0xff] %v8679_v9  ;;  %v1689_v9 = vrot.slane %v1614_v61, 1  ;;  %v1975_v61 = vrot.slane %v1899_v49, 2  ;;  %v1979_v43 = vrot.slane %v1902_v8, 2  ;;  %v2079_v28 = vmul.f32 %v7663_v1, %v1863_v63 }
 0x2db   : > { %v8686_v20 = vpop.permute.xlu0 %3464  ;;  %3474 = vrot.lane.b32.xlu1 %v3433_v45, %s7288_s24  ;;  %v1692_v45 = vrot.slane %v1615_v52, 1  ;;  %v2462_v52 = vld [vmem:[#allocation2 + $0xd0] sm:$0x1]  ;;  %v2152_v49 = vrot.slane %v2076_v54, 2 }
 0x2dc   : > { %11191 = vst [vmem:[#allocation20_spill] sm:$0xff] %v8686_v20  ;;  %v1691_v20 = vrot.slane %v1613_v0, 1  ;;  %v1690_v15 = vsel %vm1345_vm3, %v1688_v19, %v1689_v9  ;;  %v2461_v0 = vld [vmem:[#allocation2 + $0xc0] sm:$0xfe]  ;;  %v2591_v8 = vmul.f32 %v7764_v14, %v2462_v52 }
 0x2dd   : > { %v8692_v50 = vpop.permute.xlu1 %3466  ;;  %1547 = vrot.lane.b32.xlu0 %v1513_v60, %s7288_s24  ;;  %v2078_v60 = vmul.f32 %v7663_v1, %v1769_v57  ;;  %v2555_v57 = vld [vmem:[#allocation2 + $0xd8] sm:$0x1]  ;;  %v2589_v35 = vmul.f32 %v7764_v14, %v2461_v0 }
 0x2de   : > { %11192 = vst [vmem:[#allocation21_spill] sm:$0xff] %v8692_v50  ;;  %v1976_v50 = vrot.slane %v1901_v6, 2  ;;  %v1693_v47 = vsel %vm1345_vm3, %v1691_v20, %v1692_v45  ;;  %v2554_v6 = vld [vmem:[#allocation2 + $0xc8] sm:$0xfe]  ;;  %v2156_v20 = vrot.slane %v2079_v28, 2  ;;  %v2592_v54 = vmul.f32 %v7764_v14, %v2555_v57 }
 0x2df   : > { %v8698_v48 = vpop.permute.xlu0 %3561  ;;  %1549 = vrot.lane.b32.xlu1 %v1516_v30, %s7288_s24  ;;  %v2077_v30 = vmul.f32 %v7663_v1, %v1862_v37  ;;  %v2153_v19 = vrot.slane %v2078_v60, 2  ;;  %v1980_v37 = vsel %vm1809_vm4, %v1978_v21, %v1979_v43  ;;  %v2590_v45 = vmul.f32 %v7764_v14, %v2554_v6  ;;  %v2925_v28 = vld [vmem:[#allocation2 + $0xd0] sm:$0x3] }
 0x2e0   : > { %11193 = vst [vmem:[#allocation22_spill] sm:$0xff] %v8698_v48  ;;  %v1977_v9 = vsel %vm1809_vm4, %v1975_v61, %v1976_v50  ;;  %v2766_v50 = vmul.f32 %v7762_v12, %v2461_v0  ;;  %v2768_v61 = vmul.f32 %v7762_v12, %v2462_v52  ;;  %v2767_v21 = vmul.f32 %v7762_v12, %v2554_v6 }
 0x2e1   : > { %v8704_v44 = vpop.permute.xlu1 %3563  ;;  %1724 = vrot.lane.b32.xlu0 %v1690_v15, %s7289_s0  ;;  %v2155_v63 = vrot.slane %v2077_v30, 2  ;;  %v2154_v60 = vsel %vm1809_vm4, %v2152_v49, %v2153_v19  ;;  %v2769_v43 = vmul.f32 %v7762_v12, %v2555_v57  ;;  %v2924_v30 = vld [vmem:[#allocation2 + $0xc0] sm:$0xfc]  ;;  %v2667_v0 = vrot.slane %v2592_v54, 1  ;;  %v3017_v19 = vld [vmem:[#allocation2 + $0xc8] sm:$0xfc] }
 0x2e2   : > { %11194 = vst [vmem:[#allocation23_spill] sm:$0xff] %v8704_v44  ;;  %v2840_v52 = vrot.slane %v2766_v50, 1  ;;  %v2841_v49 = vrot.slane %v2768_v61, 1  ;;  %v3052_v6 = vmul.f32 %v7768_v17, %v2924_v30  ;;  %v3054_v57 = vmul.f32 %v7768_v17, %v2925_v28 }
 0x2e3   : > { %v8710_v48 = vpop.permute.xlu0 %1539  ;;  %1726 = vrot.lane.b32.xlu1 %v1693_v47, %s7289_s0  ;;  %v3053_v54 = vmul.f32 %v7768_v17, %v3017_v19 }
 0x2e4   : > { %11195 = vst [vmem:[#allocation24_spill] sm:$0xff] %v8710_v48  ;;  %v2663_v48 = vrot.slane %v2589_v35, 1  ;;  %v3018_v35 = vld [vmem:[#allocation2 + $0xd8] sm:$0x3] }
 0x2e5   : > { %v8716_v15 = vpop.permute.xlu1 %1541  ;;  %2011 = vrot.lane.b32.xlu0 %v1977_v9, %s7288_s24  ;;  %v2664_v9 = vrot.slane %v2591_v8, 1  ;;  %v3055_v50 = vmul.f32 %v7768_v17, %v3018_v35 }
 0x2e6   : > { %11196 = vst [vmem:[#allocation25_spill] sm:$0xff] %v8716_v15 }
 0x2e7   : > { %v8722_v47 = vpop.permute.xlu0 %1716  ;;  %2013 = vrot.lane.b32.xlu1 %v1980_v37, %s7288_s24  ;;  %v2157_v37 = vsel %vm1809_vm4, %v2155_v63, %v2156_v20  ;;  %v2665_v8 = vsel %vm1345_vm3, %v2663_v48, %v2664_v9  ;;  %v2843_v63 = vrot.slane %v2767_v21, 1  ;;  %v2844_v20 = vrot.slane %v2769_v43, 1 }
 0x2e8   : > { %11197 = vst [vmem:[#allocation26_spill] sm:$0xff] %v8722_v47  ;;  %v2666_v47 = vrot.slane %v2590_v45, 1  ;;  %v2842_v48 = vsel %vm1345_vm3, %v2840_v52, %v2841_v49  ;;  %v3126_v9 = vrot.slane %v3052_v6, 2  ;;  %v3129_v43 = vrot.slane %v3053_v54, 2 }
 0x2e9   : > { %v8728_v15 = vpop.permute.xlu1 %1718  ;;  %2188 = vrot.lane.b32.xlu0 %v2154_v60, %s7289_s0 }
 0x2ea   : > { %11198 = vst [vmem:[#allocation27_spill] sm:$0xff] %v8728_v15  ;;  %v2668_v45 = vsel %vm1345_vm3, %v2666_v47, %v2667_v0  ;;  %v2845_v47 = vsel %vm1345_vm3, %v2843_v63, %v2844_v20  ;;  %v3130_v0 = vrot.slane %v3055_v50, 2  ;;  %v8776_v50 = vld [vmem:[#allocation2 + $0xe8] sm:$0xff] }
 0x2eb   : > { %v8734_v44 = vpop.permute.xlu0 %2003  ;;  %2190 = vrot.lane.b32.xlu1 %v2157_v37, %s7289_s0  ;;  %v3127_v37 = vrot.slane %v3054_v57, 2 }
 0x2ec   : > { %11199 = vst [vmem:[#allocation28_spill] sm:$0xff] %v8734_v44  ;;  %v3229_v44 = vmul.f32 %v7766_v16, %v2924_v30  ;;  %v3131_v6 = vsel %vm1809_vm4, %v3129_v43, %v3130_v0  ;;  %v1218_v0 = vmul.f32 %v7639_v41, %v8776_v50 }
 0x2ed   : > { %v8740_v60 = vpop.permute.xlu1 %2005  ;;  %2701 = vrot.lane.b32.xlu0 %v2665_v8, %s7288_s24  ;;  %v3231_v8 = vmul.f32 %v7766_v16, %v2925_v28  ;;  %v3128_v30 = vsel %vm1809_vm4, %v3126_v9, %v3127_v37  ;;  %v1120_v37 = vmul.f32 %v7614_v25, %v8776_v50 }
 0x2ee   : > { %11200 = vst [vmem:[#allocation29_spill] sm:$0xff] %v8740_v60  ;;  %v3303_v52 = vrot.slane %v3229_v44, 2 }
 0x2ef   : > { %v8746_v61 = vpop.permute.xlu0 %2180  ;;  %2703 = vrot.lane.b32.xlu1 %v2668_v45, %s7288_s24  ;;  %v3232_v45 = vmul.f32 %v7766_v16, %v3018_v35  ;;  %v3304_v28 = vrot.slane %v3231_v8, 2  ;;  %v8770_v35 = vld [vmem:[#allocation2 + $0xe0] sm:$0xff] }
 0x2f0   : > { %11201 = vst [vmem:[#allocation30_spill] sm:$0xff] %v8746_v61  ;;  %v3230_v61 = vmul.f32 %v7766_v16, %v3017_v19 }
 0x2f1   : > { %v8752_v21 = vpop.permute.xlu1 %2182  ;;  %2878 = vrot.lane.b32.xlu0 %v2842_v48, %s7289_s0  ;;  %v3307_v63 = vrot.slane %v3232_v45, 2  ;;  %v3305_v19 = vsel %vm1809_vm4, %v3303_v52, %v3304_v28  ;;  %v1306_v45 = vld [vmem:[#allocation2 + $0xe0] sm:$0xfe]  ;;  %v1400_v28 = vld [vmem:[#allocation2 + $0xe8] sm:$0xfe] }
 0x2f2   : > { %11202 = vst [vmem:[#allocation31_spill] sm:$0xff] %v8752_v21  ;;  %v3306_v57 = vrot.slane %v3230_v61, 2  ;;  %v1119_v61 = vmul.f32 %v7614_v25, %v8770_v35  ;;  %v2278_v25 = vmul.f32 %v7760_v11, %v8770_v35 }
 0x2f3   : > { %v8758_v60 = vpop.permute.xlu0 %2693  ;;  %2880 = vrot.lane.b32.xlu1 %v2845_v47, %s7289_s0  ;;  %v1217_v47 = vmul.f32 %v7639_v41, %v8770_v35  ;;  %v2279_v41 = vmul.f32 %v7760_v11, %v8776_v50 }
 0x2f4   : > { %11203 = vst [vmem:[#allocation32_spill] sm:$0xff] %v8758_v60  ;;  %v3308_v44 = vsel %vm1809_vm4, %v3306_v57, %v3307_v63  ;;  %v1439_v57 = vmul.f32 %v7612_v24, %v1306_v45  ;;  %v1864_v60 = vld [vmem:[#allocation2 + $0xe8] sm:$0xfc] }
 0x2f5   : > { %v8762_v49 = vpop.permute.xlu1 %2695  ;;  %3164 = vrot.lane.b32.xlu0 %v3128_v30, %s7288_s24  ;;  %v1307_v30 = vld [vmem:[#allocation2 + $0xf0] sm:$0x1] }
 0x2f6   : > { %11204 = vst [vmem:[#allocation33_spill] sm:$0xff] %v8762_v49  ;;  %v1441_v63 = vmul.f32 %v7612_v24, %v1307_v30  ;;  %v1865_v49 = vld [vmem:[#allocation2 + $0xf8] sm:$0x3] }
 0x2f7   : > { %v8766_v20 = vpop.permute.xlu0 %2870  ;;  %3166 = vrot.lane.b32.xlu1 %v3131_v6, %s7288_s24  ;;  %v1401_v6 = vld [vmem:[#allocation2 + $0xf8] sm:$0x1] }
 0x2f8   : > { %11205 = vst [vmem:[#allocation34_spill] sm:$0xff] %v8766_v20 }
 0x2f9   : > { %v8772_v54 = vpop.permute.xlu1 %2872  ;;  %3341 = vrot.lane.b32.xlu0 %v3305_v19, %s7289_s0 }
 0x2fa   : > { %11206 = vst [vmem:[#allocation35_spill] sm:$0xff] %v8772_v54 }
 0x2fb   : > { %v8778_v48 = vpop.permute.xlu0 %3156  ;;  %3343 = vrot.lane.b32.xlu1 %v3308_v44, %s7289_s0  ;;  %v1440_v44 = vmul.f32 %v7612_v24, %v1400_v28 }
 0x2fc   : > { %11207 = vst [vmem:[#allocation36_spill] sm:$0xff] %v8778_v48  ;;  %v1770_v48 = vld [vmem:[#allocation2 + $0xe0] sm:$0xfc] }
 0x2fd   : > { %v8783_v9 = vpop.permute.xlu1 %3158  ;;  %1165 = vrot.lane.b32.xlu0 %v1119_v61, %s7288_s24  ;;  %v1442_v61 = vmul.f32 %v7612_v24, %v1401_v6  ;;  %v2376_v24 = vmul.f32 %v7758_v10, %v8776_v50  ;;  %v1520_v20 = vrot.slane %v1440_v44, 1  ;;  %v1904_v44 = vmul.f32 %v7654_v56, %v1864_v60 }
 0x2fe   : > { %11208 = vst [vmem:[#allocation37_spill] sm:$0xff] %v8783_v9  ;;  %v1771_v9 = vld [vmem:[#allocation2 + $0xf0] sm:$0x3] }
 0x2ff   : > { %v8788_v8 = vpop.permute.xlu0 %3333  ;;  %1167 = vrot.lane.b32.xlu1 %v1120_v37, %s7288_s24  ;;  %v1521_v54 = vrot.slane %v1442_v61, 1  ;;  %v1906_v61 = vmul.f32 %v7654_v56, %v1865_v49 }
 0x300   : > { %11209 = vst [vmem:[#allocation38_spill] sm:$0xff] %v8788_v8  ;;  %v1518_v8 = vrot.slane %v1441_v63, 1 }
 0x301   : > { %v8793_v43 = vpop.permute.xlu1 %3335  ;;  %1263 = vrot.lane.b32.xlu0 %v1217_v47, %s7289_s0  ;;  %v2375_v47 = vmul.f32 %v7758_v10, %v8770_v35 }
 0x302   : > { %11210 = vst [vmem:[#allocation39_spill] sm:$0xff] %v8793_v43  ;;  %v1616_v43 = vmul.f32 %v7629_v34, %v1306_v45  ;;  %v1903_v45 = vmul.f32 %v7654_v56, %v1770_v48 }
 0x303   : > { %v8798_v52 = vpop.permute.xlu0 %1157  ;;  %1265 = vrot.lane.b32.xlu1 %v1218_v0, %s7289_s0  ;;  %v1517_v0 = vrot.slane %v1439_v57, 1  ;;  %v1619_v57 = vmul.f32 %v7629_v34, %v1401_v6 }
 0x304   : > { %11211 = vst [vmem:[#allocation40_spill] sm:$0xff] %v8798_v52  ;;  %v1694_v15 = vrot.slane %v1616_v43, 1 }
 0x305   : > { %v8805_v19 = vpop.permute.xlu1 %1159  ;;  %2322 = vrot.lane.b32.xlu0 %v2278_v25, %s7288_s24  ;;  %v1618_v25 = vmul.f32 %v7629_v34, %v1307_v30  ;;  %v1905_v30 = vmul.f32 %v7654_v56, %v1771_v9  ;;  %v1698_v6 = vrot.slane %v1619_v57, 1  ;;  %v2083_v56 = vmul.f32 %v7663_v1, %v1865_v49  ;;  %v2464_v57 = vld [vmem:[#allocation2 + $0xf0] sm:$0x1] }
 0x306   : > { %11212 = vst [vmem:[#allocation41_spill] sm:$0xff] %v8805_v19 }
 0x307   : > { %v8812_v37 = vpop.permute.xlu0 %1255  ;;  %2324 = vrot.lane.b32.xlu1 %v2279_v41, %s7288_s24  ;;  %v1617_v41 = vmul.f32 %v7629_v34, %v1400_v28  ;;  %v1522_v34 = vsel %vm1345_vm3, %v1520_v20, %v1521_v54  ;;  %v2081_v20 = vmul.f32 %v7663_v1, %v1864_v60  ;;  %v2463_v54 = vld [vmem:[#allocation2 + $0xe0] sm:$0xfe] }
 0x308   : > { %11213 = vst [vmem:[#allocation42_spill] sm:$0xff] %v8812_v37  ;;  %v1695_v37 = vrot.slane %v1618_v25, 1  ;;  %v2082_v25 = vmul.f32 %v7663_v1, %v1771_v9  ;;  %v2557_v9 = vld [vmem:[#allocation2 + $0xf8] sm:$0x1]  ;;  %v2593_v60 = vmul.f32 %v7764_v14, %v2463_v54 }
 0x309   : > { %v8819_v21 = vpop.permute.xlu1 %1257  ;;  %2419 = vrot.lane.b32.xlu0 %v2375_v47, %s7289_s0  ;;  %v1519_v47 = vsel %vm1345_vm3, %v1517_v0, %v1518_v8  ;;  %v1697_v28 = vrot.slane %v1617_v41, 1  ;;  %v1982_v8 = vrot.slane %v1905_v30, 2  ;;  %v2080_v0 = vmul.f32 %v7663_v1, %v1770_v48  ;;  %v2556_v48 = vld [vmem:[#allocation2 + $0xe8] sm:$0xfe] }
 0x30a   : > { %11214 = vst [vmem:[#allocation43_spill] sm:$0xff] %v8819_v21  ;;  %v1696_v43 = vsel %vm1345_vm3, %v1694_v15, %v1695_v37  ;;  %v1985_v30 = vrot.slane %v1906_v61, 2  ;;  %v2595_v1 = vmul.f32 %v7764_v14, %v2464_v57  ;;  %v2594_v61 = vmul.f32 %v7764_v14, %v2556_v48 }
 0x30b   : > { %v8826_v63 = vpop.permute.xlu0 %2314  ;;  %2421 = vrot.lane.b32.xlu1 %v2376_v24, %s7289_s0  ;;  %v2158_v37 = vrot.slane %v2080_v0, 2  ;;  %v2770_v0 = vmul.f32 %v7762_v12, %v2463_v54  ;;  %v2773_v54 = vmul.f32 %v7762_v12, %v2557_v9 }
 0x30c   : > { %11215 = vst [vmem:[#allocation44_spill] sm:$0xff] %v8826_v63  ;;  %v1981_v63 = vrot.slane %v1903_v45, 2  ;;  %v1984_v45 = vrot.slane %v1904_v44, 2 }
 0x30d   : > { %v8832_v21 = vpop.permute.xlu1 %2316  ;;  %1551 = vrot.lane.b32.xlu0 %v1519_v47, %s7288_s24  ;;  %v1699_v47 = vsel %vm1345_vm3, %v1697_v28, %v1698_v6  ;;  %v2161_v28 = vrot.slane %v2081_v20, 2  ;;  %v2162_v6 = vrot.slane %v2083_v56, 2 }
 0x30e   : > { %11216 = vst [vmem:[#allocation45_spill] sm:$0xff] %v8832_v21  ;;  %v1983_v15 = vsel %vm1809_vm4, %v1981_v63, %v1982_v8  ;;  %v1986_v44 = vsel %vm1809_vm4, %v1984_v45, %v1985_v30  ;;  %v2596_v63 = vmul.f32 %v7764_v14, %v2557_v9  ;;  %v2926_v45 = vld [vmem:[#allocation2 + $0xe0] sm:$0xfc]  ;;  %v2927_v30 = vld [vmem:[#allocation2 + $0xf0] sm:$0x3] }
 0x30f   : > { %v8838_v24 = vpop.permute.xlu0 %2411  ;;  %1553 = vrot.lane.b32.xlu1 %v1522_v34, %s7288_s24  ;;  %v2163_v56 = vsel %vm1809_vm4, %v2161_v28, %v2162_v6  ;;  %v3056_v28 = vmul.f32 %v7768_v17, %v2926_v45  ;;  %v3058_v6 = vmul.f32 %v7768_v17, %v2927_v30 }
 0x310   : > { %11217 = vst [vmem:[#allocation46_spill] sm:$0xff] %v8838_v24  ;;  %v3019_v24 = vld [vmem:[#allocation2 + $0xe8] sm:$0xfc] }
 0x311   : > { %v8844_v41 = vpop.permute.xlu1 %2413  ;;  %1728 = vrot.lane.b32.xlu0 %v1696_v43, %s7289_s0  ;;  %v2159_v43 = vrot.slane %v2082_v25, 2  ;;  %v2772_v25 = vmul.f32 %v7762_v12, %v2464_v57 }
 0x312   : > { %11218 = vst [vmem:[#allocation47_spill] sm:$0xff] %v8844_v41 }
 0x313   : > { %v8850_v34 = vpop.permute.xlu0 %3468  ;;  %1730 = vrot.lane.b32.xlu1 %v1699_v47, %s7289_s0  ;;  %v2160_v47 = vsel %vm1809_vm4, %v2158_v37, %v2159_v43  ;;  %v2846_v37 = vrot.slane %v2770_v0, 1  ;;  %v2847_v43 = vrot.slane %v2772_v25, 1 }
 0x314   : > { %11219 = vst [vmem:[#allocation48_spill] sm:$0xff] %v8850_v34  ;;  %v2669_v34 = vrot.slane %v2593_v60, 1  ;;  %v3020_v60 = vld [vmem:[#allocation2 + $0xf8] sm:$0x3] }
 0x315   : > { %v8856_v49 = vpop.permute.xlu1 %3470  ;;  %2015 = vrot.lane.b32.xlu0 %v1983_v15, %s7288_s24  ;;  %v2670_v15 = vrot.slane %v2595_v1, 1  ;;  %v3059_v0 = vmul.f32 %v7768_v17, %v3020_v60 }
 0x316   : > { %11220 = vst [vmem:[#allocation49_spill] sm:$0xff] %v8856_v49  ;;  %v2672_v49 = vrot.slane %v2594_v61, 1 }
 0x317   : > { %v8862_v8 = vpop.permute.xlu0 %3565  ;;  %2017 = vrot.lane.b32.xlu1 %v1986_v44, %s7288_s24  ;;  %v2771_v44 = vmul.f32 %v7762_v12, %v2556_v48  ;;  %v2671_v1 = vsel %vm1345_vm3, %v2669_v34, %v2670_v15  ;;  %v3057_v48 = vmul.f32 %v7768_v17, %v3019_v24  ;;  %v2848_v34 = vsel %vm1345_vm3, %v2846_v37, %v2847_v43 }
 0x318   : > { %11221 = vst [vmem:[#allocation50_spill] sm:$0xff] %v8862_v8  ;;  %v2673_v8 = vrot.slane %v2596_v63, 1  ;;  %v3132_v15 = vrot.slane %v3056_v28, 2 }
 0x319   : > { %v8868_v20 = vpop.permute.xlu1 %3567  ;;  %2192 = vrot.lane.b32.xlu0 %v2160_v47, %s7289_s0  ;;  %v2849_v63 = vrot.slane %v2771_v44, 1  ;;  %v2850_v47 = vrot.slane %v2773_v54, 1  ;;  %v3136_v44 = vrot.slane %v3059_v0, 2  ;;  %v3234_v54 = vmul.f32 %v7766_v16, %v3019_v24  ;;  %v2466_v0 = vld [vmem:[#allocation2 + $0x110] sm:$0x1] }
 0x31a   : > { %11222 = vst [vmem:[#allocation51_spill] sm:$0xff] %v8868_v20  ;;  %v2674_v9 = vsel %vm1345_vm3, %v2672_v49, %v2673_v8  ;;  %v3233_v20 = vmul.f32 %v7766_v16, %v2926_v45  ;;  %v3135_v49 = vrot.slane %v3057_v48, 2 }
 0x31b   : > { %v8874_v57 = vpop.permute.xlu0 %1543  ;;  %2194 = vrot.lane.b32.xlu1 %v2163_v56, %s7289_s0  ;;  %v3133_v56 = vrot.slane %v3058_v6, 2  ;;  %v2851_v8 = vsel %vm1345_vm3, %v2849_v63, %v2850_v47  ;;  %v3312_v6 = vrot.slane %v3234_v54, 2  ;;  %v2599_v54 = vmul.f32 %v7764_v14, %v2466_v0 }
 0x31c   : > { %11223 = vst [vmem:[#allocation52_spill] sm:$0xff] %v8874_v57  ;;  %v3309_v37 = vrot.slane %v3233_v20, 2  ;;  %v3137_v28 = vsel %vm1809_vm4, %v3135_v49, %v3136_v44  ;;  %v2465_v20 = vld [vmem:[#allocation2 + $0x100] sm:$0xfe] }
 0x31d   : > { %v8880_v61 = vpop.permute.xlu1 %1545  ;;  %2705 = vrot.lane.b32.xlu0 %v2671_v1, %s7288_s24  ;;  %v3235_v1 = vmul.f32 %v7766_v16, %v2927_v30  ;;  %v3134_v45 = vsel %vm1809_vm4, %v3132_v15, %v3133_v56  ;;  %v8916_v15 = vld [vmem:[#allocation2 + $0x108] sm:$0xff]  ;;  %v2597_v44 = vmul.f32 %v7764_v14, %v2465_v20 }
 0x31e   : > { %11224 = vst [vmem:[#allocation53_spill] sm:$0xff] %v8880_v61  ;;  %v2558_v56 = vld [vmem:[#allocation2 + $0x108] sm:$0xfe] }
 0x31f   : > { %v8886_v25 = vpop.permute.xlu0 %1720  ;;  %2707 = vrot.lane.b32.xlu1 %v2674_v9, %s7288_s24  ;;  %v3236_v9 = vmul.f32 %v7766_v16, %v3020_v60  ;;  %v3310_v30 = vrot.slane %v3235_v1, 2  ;;  %v8910_v60 = vld [vmem:[#allocation2 + $0x100] sm:$0xff]  ;;  %v2559_v1 = vld [vmem:[#allocation2 + $0x118] sm:$0x1] }
 0x320   : > { %11225 = vst [vmem:[#allocation54_spill] sm:$0xff] %v8886_v25 }
 0x321   : > { %v8892_v41 = vpop.permute.xlu1 %1722  ;;  %2882 = vrot.lane.b32.xlu0 %v2848_v34, %s7289_s0  ;;  %v3313_v48 = vrot.slane %v3236_v9, 2  ;;  %v3311_v24 = vsel %vm1809_vm4, %v3309_v37, %v3310_v30  ;;  %v2598_v37 = vmul.f32 %v7764_v14, %v2558_v56  ;;  %v2600_v30 = vmul.f32 %v7764_v14, %v2559_v1 }
 0x322   : > { %11226 = vst [vmem:[#allocation55_spill] sm:$0xff] %v8892_v41 }
 0x323   : > { %v8898_v21 = vpop.permute.xlu0 %2007  ;;  %2884 = vrot.lane.b32.xlu1 %v2851_v8, %s7289_s0  ;;  %v3314_v34 = vsel %vm1809_vm4, %v3312_v6, %v3313_v48  ;;  %v2280_v8 = vmul.f32 %v7760_v11, %v8910_v60  ;;  %v2377_v6 = vmul.f32 %v7758_v10, %v8910_v60  ;;  %v2774_v48 = vmul.f32 %v7762_v12, %v2465_v20 }
 0x324   : > { %11227 = vst [vmem:[#allocation56_spill] sm:$0xff] %v8898_v21  ;;  %v2678_v14 = vrot.slane %v2598_v37, 1 }
 0x325   : > { %v8902_v43 = vpop.permute.xlu1 %2009  ;;  %3168 = vrot.lane.b32.xlu0 %v3134_v45, %s7288_s24  ;;  %v2281_v45 = vmul.f32 %v7760_v11, %v8916_v15  ;;  %v2378_v11 = vmul.f32 %v7758_v10, %v8916_v15 }
 0x326   : > { %11228 = vst [vmem:[#allocation57_spill] sm:$0xff] %v8902_v43 }
 0x327   : > { %v8906_v63 = vpop.permute.xlu0 %2184  ;;  %3170 = vrot.lane.b32.xlu1 %v3137_v28, %s7288_s24 }
 0x328   : > { %11229 = vst [vmem:[#allocation58_spill] sm:$0xff] %v8906_v63  ;;  %v2775_v63 = vmul.f32 %v7762_v12, %v2558_v56 }
 0x329   : > { %v8912_v47 = vpop.permute.xlu1 %2186  ;;  %3345 = vrot.lane.b32.xlu0 %v3311_v24, %s7289_s0  ;;  %v2675_v24 = vrot.slane %v2597_v44, 1  ;;  %v3021_v44 = vld [vmem:[#allocation2 + $0x108] sm:$0xfc] }
 0x32a   : > { %11230 = vst [vmem:[#allocation59_spill] sm:$0xff] %v8912_v47  ;;  %v2777_v47 = vmul.f32 %v7762_v12, %v2559_v1  ;;  %v3061_v21 = vmul.f32 %v7768_v17, %v3021_v44 }
 0x32b   : > { %v8918_v49 = vpop.permute.xlu0 %2697  ;;  %3347 = vrot.lane.b32.xlu1 %v3314_v34, %s7289_s0  ;;  %v2676_v34 = vrot.slane %v2599_v54, 1  ;;  %v3022_v54 = vld [vmem:[#allocation2 + $0x118] sm:$0x3] }
 0x32c   : > { %11231 = vst [vmem:[#allocation60_spill] sm:$0xff] %v8918_v49  ;;  %v3240_v58 = vmul.f32 %v7766_v16, %v3022_v54 }
 0x32d   : > { %v8925_v9 = vpop.permute.xlu1 %2699  ;;  %2326 = vrot.lane.b32.xlu0 %v2280_v8, %s7288_s24  ;;  %v2776_v8 = vmul.f32 %v7762_v12, %v2466_v0  ;;  %v2852_v0 = vrot.slane %v2774_v48, 1  ;;  %v2677_v10 = vsel %vm1345_vm3, %v2675_v24, %v2676_v34  ;;  %v8961_v48 = vld [vmem:[#allocation2 + $0x70] sm:$0x1]  ;;  %v3063_v24 = vmul.f32 %v7768_v17, %v3022_v54  ;;  %v8965_v34 = vld [vmem:[#allocation2 + $0x68] sm:$0xfe] }
 0x32e   : > { %11232 = vst [vmem:[#allocation61_spill] sm:$0xff] %v8925_v9  ;;  %v2928_v9 = vld [vmem:[#allocation2 + $0x100] sm:$0xfc]  ;;  %v3733_v41 = vmul.f32 %v7786_v39, %v8961_v48 }
 0x32f   : > { %v8932_v28 = vpop.permute.xlu0 %2874  ;;  %2328 = vrot.lane.b32.xlu1 %v2281_v45, %s7288_s24  ;;  %v2929_v45 = vld [vmem:[#allocation2 + $0x110] sm:$0x3]  ;;  %v2853_v37 = vrot.slane %v2776_v8, 1  ;;  %v8967_v8 = vld [vmem:[#allocation2 + $0x40] sm:$0xfe]  ;;  %v3142_v61 = vrot.slane %v3063_v24, 2 }
 0x330   : > { %11233 = vst [vmem:[#allocation62_spill] sm:$0xff] %v8932_v28  ;;  %v2679_v28 = vrot.slane %v2600_v30, 1  ;;  %v3060_v30 = vmul.f32 %v7768_v17, %v2928_v9  ;;  %v3062_v56 = vmul.f32 %v7768_v17, %v2929_v45  ;;  %v3239_v24 = vmul.f32 %v7766_v16, %v2929_v45 }
 0x331   : > { %v8939_v49 = vpop.permute.xlu1 %2876  ;;  %2423 = vrot.lane.b32.xlu0 %v2377_v6, %s7289_s0  ;;  %v6500_v6 = vld [vmem:[%s11138_s7 + $0x15] ss:$0 sm:$0xff]  ;;  %v2854_v17 = vsel %vm1345_vm3, %v2852_v0, %v2853_v37 }
 0x332   : > { %11234 = vst [vmem:[#allocation63_spill] sm:$0xff] %v8939_v49  ;;  %v8955_v49 = vld [vmem:[#allocation2 + $0x60] sm:$0xfe]  ;;  %v2680_v1 = vsel %vm1345_vm3, %v2678_v14, %v2679_v28  ;;  %v8970_v43 = vmul.f32 %v8967_v8, %v6500_v6  ;;  %v3138_v14 = vrot.slane %v3060_v30, 2  ;;  %v3139_v25 = vrot.slane %v3062_v56, 2 }
 0x333   : > { %v8946_v20 = vpop.permute.xlu0 %3160  ;;  %2425 = vrot.lane.b32.xlu1 %v2378_v11, %s7289_s0  ;;  %v2855_v11 = vrot.slane %v2775_v63, 1  ;;  %v3731_v63 = vmul.f32 %v7786_v39, %v8955_v49  ;;  %v8997_v30 = vld [vmem:[%s11138_s7 + $0x3] ss:$0 sm:$0xff] }
 0x334   : > { %11235 = vst [vmem:[#allocation64_spill] sm:$0xff] %v8946_v20  ;;  %v2856_v20 = vrot.slane %v2777_v47, 1  ;;  %v8980_v47 = vld [vmem:[#allocation2 + $0x78] sm:$0x1]  ;;  %v3662_v0 = vrot.slane %v8970_v43, 1  ;;  %v3237_v43 = vmul.f32 %v7766_v16, %v2928_v9 }
 0x335   : > { %v8957_v12 = vpop.permute.xlu1 %3162  ;;  %2709 = vrot.lane.b32.xlu0 %v2677_v10, %s7288_s24  ;;  %v3734_v52 = vmul.f32 %v7786_v39, %v8980_v47  ;;  %v7196_v56 = vld [vmem:[#allocation2 + $0x80] sm:$0xfe] }
 0x336   : > { %11236 = vst [vmem:[#allocation65_spill] sm:$0xff] %v8957_v12  ;;  %v8972_v12 = vld [vmem:[#allocation2 + $0x50] sm:$0x1] }
 0x337   : > { %v3631_v10 = vmul.f32 %v8972_v12, %v6500_v6  ;;  %v8975_v28 = vpop.permute.xlu0 %3337  ;;  %2711 = vrot.lane.b32.xlu1 %v2680_v1, %s7288_s24  ;;  %v3732_v6 = vmul.f32 %v7786_v39, %v8965_v34  ;;  %v2857_v1 = vsel %vm1345_vm3, %v2855_v11, %v2856_v20  ;;  %v3140_v20 = vsel %vm1809_vm4, %v3138_v14, %v3139_v25 }
 0x338   : > { %11237 = vst [vmem:[#allocation66_spill] sm:$0xff] %v8975_v28  ;;  %v3141_v28 = vrot.slane %v3061_v21, 2  ;;  %v3797_v21 = vrot.slane %v3731_v63, 1  ;;  %v3798_v11 = vrot.slane %v3733_v41, 1  ;;  %v7200_v63 = vld [vmem:[#allocation2 + $0x90] sm:$0x3] }
 0x339   : > { %v8985_v57 = vpop.permute.xlu1 %3339  ;;  %2886 = vrot.lane.b32.xlu0 %v2854_v17, %s7289_s0  ;;  %v3663_v37 = vrot.slane %v3631_v10, 1  ;;  %v9000_v17 = vmul.f32 %v7196_v56, %v8997_v30  ;;  %v7197_v10 = vld [vmem:[#allocation2 + $0x90] sm:$0x1]  ;;  %v9014_v56 = vld [vmem:[%s11138_s7 + $0x6] ss:$0 sm:$0xff]  ;;  %v3800_v9 = vrot.slane %v3732_v6, 1 }
 0x33a   : > { %11238 = vst [vmem:[#allocation67_spill] sm:$0xff] %v8985_v57  ;;  %v9009_v19 = vmul.f32 %v7197_v10, %v8997_v30  ;;  %11240 = vst [vmem:[#allocation69_spill] sm:$0xff] %v9014_v56  ;;  %v9020_v41 = vmul.f32 %v7200_v63, %v9014_v56  ;;  %v3143_v45 = vsel %vm1809_vm4, %v3141_v28, %v3142_v61  ;;  %v3801_v14 = vrot.slane %v3734_v52, 1  ;;  %v9034_v63 = vld [vmem:[%s11138_s7 + $0xc] ss:$0 sm:$0xff] }
 0x33b   : > { %v9002_v57 = vpop.permute.xlu0 %1161  ;;  %2888 = vrot.lane.b32.xlu1 %v2857_v1, %s7289_s0  ;;  %v9017_v1 = vmul.f32 %v7199_v40, %v9014_v56  ;;  %v3238_v10 = vmul.f32 %v7766_v16, %v3021_v44  ;;  %v3488_v40 = vsel %vm1169_vm8, %v8370_v53, %v8377_v18  ;;  %11242 = vst [vmem:[#allocation71_spill] sm:$0xff] %v9034_v63  ;;  %v7203_v6 = vld [vmem:[#allocation2 + $0x90] sm:$0x1]  ;;  %v9041_v52 = vld [vmem:[%s11138_s7 + $0xf] ss:$0 sm:$0xff]  ;;  %v3315_v28 = vrot.slane %v3237_v43, 2 }
 0x33c   : > { %11239 = vst [vmem:[#allocation68_spill] sm:$0xff] %v9002_v57  ;;  %v2479_v61 = vmul.f32 %v7203_v6, %v9034_v63  ;;  %v7205_v16 = vld [vmem:[#allocation2 + $0x80] sm:$0xfc]  ;;  %v7206_v18 = vld [vmem:[#allocation2 + $0x90] sm:$0x3]  ;;  %v3316_v57 = vrot.slane %v3239_v24, 2  ;;  %v3585_v6 = vsel %vm1267_vm9, %v8387_v5, %v8394_v32 }
 0x33d   : > { %v9022_v25 = vpop.permute.xlu1 %1163  ;;  %3172 = vrot.lane.b32.xlu0 %v3140_v20, %s7288_s24  ;;  %v2478_v20 = vmul.f32 %v7202_v2, %v9034_v63  ;;  %v2941_v44 = vmul.f32 %v7205_v16, %v9041_v52  ;;  %v2942_v54 = vmul.f32 %v7206_v18, %v9041_v52  ;;  %v3799_v2 = vsel %vm1345_vm3, %v3797_v21, %v3798_v11  ;;  %v9062_v18 = vld [vmem:[#allocation2 + $0x90] sm:$0x1]  ;;  %v9064_v5 = vld [vmem:[#allocation2 + $0x88] sm:$0xfe] }
 0x33e   : > { %11241 = vst [vmem:[#allocation70_spill] sm:$0xff] %v9022_v25  ;;  %v3664_v25 = vsel %vm1345_vm3, %v3662_v0, %v3663_v37  ;;  %v1358_v33 = vrot.slane %v9000_v17, 1  ;;  %v1359_v16 = vrot.slane %v9009_v19, 1  ;;  %v3504_v21 = vadd.f32 %v3488_v40, %v8335_v46  ;;  %v9085_v40 = vld [vmem:[%s11138_s7 + $0x9] ss:$0 sm:$0xff] }
 0x33f   : > { %v9044_v53 = vpop.permute.xlu0 %1259  ;;  %3174 = vrot.lane.b32.xlu1 %v3143_v45, %s7288_s24  ;;  %v9058_v45 = vld [vmem:[#allocation2 + $0x80] sm:$0xfe]  ;;  %v3802_v11 = vsel %vm1345_vm3, %v3800_v9, %v3801_v14  ;;  %v3318_v43 = vrot.slane %v3238_v10, 2  ;;  %v3319_v24 = vrot.slane %v3240_v58, 2  ;;  %v1822_v32 = vrot.slane %v9017_v1, 2 }
 0x340   : > { %11243 = vst [vmem:[#allocation72_spill] sm:$0xff] %v9044_v53  ;;  %v1823_v19 = vrot.slane %v9020_v41, 2  ;;  %v2513_v0 = vrot.slane %v2478_v20, 1  ;;  %v2514_v37 = vrot.slane %v2479_v61, 1  ;;  %v3601_v46 = vadd.f32 %v3585_v6, %v3504_v21  ;;  %v9077_v10 = vld [vmem:[%s11138_s7] ss:$0 sm:$0xff] }
 0x341   : > { %v9055_v53 = vpop.permute.xlu1 %1261  ;;  %3843 = vrot.lane.b32.xlu0 %v3799_v2, %s7288_s24  ;;  %v9071_v2 = vld [vmem:[#allocation2 + $0x98] sm:$0x1]  ;;  %v2976_v9 = vrot.slane %v2941_v44, 2  ;;  %v2977_v14 = vrot.slane %v2942_v54, 2  ;;  %v3317_v58 = vsel %vm1809_vm4, %v3315_v28, %v3316_v57  ;;  %v7208_v1 = vld [vmem:[#allocation2 + $0x80] sm:$0xff]  ;;  %v3735_v57 = vmul.f32 %v7786_v39, %v9058_v45 }
 0x342   : > { %11244 = vst [vmem:[#allocation73_spill] sm:$0xff] %v9055_v53  ;;  %v9080_v41 = vmul.f32 %v7208_v1, %v9077_v10  ;;  %v9088_v20 = vmul.f32 %v9085_v40, %v7208_v1  ;;  %v3737_v44 = vmul.f32 %v7786_v39, %v9062_v18  ;;  %v7210_v54 = vld [vmem:[%s11138_s7 + $0x12] ss:$0 sm:$0xff]  ;;  %v3320_v6 = vsel %vm1809_vm4, %v3318_v43, %v3319_v24 }
 0x343   : > { %v9068_v17 = vpop.permute.xlu0 %2318  ;;  %3845 = vrot.lane.b32.xlu1 %v3802_v11, %s7288_s24  ;;  %v9100_v28 = vmul.f32 %v7210_v54, %v7208_v1  ;;  %v3736_v21 = vmul.f32 %v7786_v39, %v9064_v5  ;;  %v3738_v11 = vmul.f32 %v7786_v39, %v9071_v2  ;;  %v3434_v43 = vmul.f32 %v7774_v26, %v8770_v35 }
 0x344   : > { %11245 = vst [vmem:[#allocation74_spill] sm:$0xff] %v9068_v17  ;;  %11246 = vst [vmem:[#allocation75_spill] sm:$0xff] %v9080_v41  ;;  %v9111_v17 = vsel %vm1809_vm4, %v1822_v32, %v1823_v19  ;;  %v3694_v24 = vadd.f32 %v3664_v25, %v3601_v46  ;;  %v9122_v1 = vsel %vm1809_vm4, %v2976_v9, %v2977_v14 }
 0x345   : > { %11247 = vst [vmem:[#allocation76_spill] sm:$0xff] %v9088_v20  ;;  %v9090_v61 = vpop.permute.xlu1 %2320  ;;  %3349 = vrot.lane.b32.xlu0 %v3317_v58, %s7289_s0  ;;  %11249 = vst [vmem:[#allocation78_spill] sm:$0xff] %v9100_v28  ;;  %v9108_v58 = vsel %vm1345_vm3, %v1358_v33, %v1359_v16  ;;  %v7211_v28 = vld [vmem:[#allocation2 + $0xa0] sm:$0xff]  ;;  %v3435_v19 = vmul.f32 %v7774_v26, %v8776_v50  ;;  %v3904_v25 = vmul.f32 %v8967_v8, %v7784_v38  ;;  %v7212_v8 = vld [vmem:[#allocation2 + $0x48] sm:$0xfe] }
 0x346   : > { %11248 = vst [vmem:[#allocation77_spill] sm:$0xff] %v9090_v61  ;;  %11250 = vst [vmem:[#allocation79_spill] sm:$0xff] %v9108_v58  ;;  %v9114_v61 = vsel %vm1345_vm3, %v2513_v0, %v2514_v37  ;;  %v9125_v33 = vmul.f32 %v7211_v28, %v9077_v10  ;;  %v9128_v16 = vmul.f32 %v7211_v28, %v9085_v40  ;;  %v3803_v0 = vrot.slane %v3735_v57, 1 }
 0x347   : > { %11251 = vst [vmem:[#allocation80_spill] sm:$0xff] %v9111_v17  ;;  %11252 = vst [vmem:[#allocation81_spill] sm:$0xff] %v9114_v61  ;;  %v9116_v41 = vpop.permute.xlu0 %2415  ;;  %3351 = vrot.lane.b32.xlu1 %v3320_v6, %s7289_s0  ;;  %v3804_v37 = vrot.slane %v3737_v44, 1  ;;  %v3529_v46 = vmul.f32 %v7772_v23, %v8617_v3  ;;  %v3806_v9 = vrot.slane %v3736_v21, 1  ;;  %v3807_v14 = vrot.slane %v3738_v11, 1 }
 0x348   : > { %11253 = vst [vmem:[#allocation82_spill] sm:$0xff] %v9116_v41  ;;  %11254 = vst [vmem:[#allocation83_spill] sm:$0xff] %v9122_v1  ;;  %v3906_v6 = vmul.f32 %v8972_v12, %v7784_v38  ;;  %v9143_v1 = vld [vmem:[#allocation2 + $0xb0] sm:$0x1]  ;;  %v3871_v57 = vsel %vm1169_vm8, %v8477_v59, %v8483_v51  ;;  %v3530_v3 = vmul.f32 %v7772_v23, %v8626_v29  ;;  %v7213_v11 = vld [vmem:[#allocation2 + $0x58] sm:$0x1] }
 0x349   : > { %11255 = vst [vmem:[#allocation84_spill] sm:$0xff] %v9125_v33  ;;  %11256 = vst [vmem:[#allocation85_spill] sm:$0xff] %v9128_v16  ;;  %v9130_v32 = vpop.permute.xlu1 %2417  ;;  %3476 = vrot.lane.b32.xlu0 %v3434_v43, %s7288_s24  ;;  %v9141_v16 = vld [vmem:[#allocation2 + $0xa0] sm:$0xfe]  ;;  %v3905_v21 = vmul.f32 %v7212_v8, %v7784_v38  ;;  %v3907_v12 = vmul.f32 %v7213_v11, %v7784_v38  ;;  %v9155_v43 = vld [vmem:[#allocation2 + $0xa8] sm:$0xfe]  ;;  %v3908_v59 = vmul.f32 %v7784_v38, %v8955_v49 }
 0x34a   : > { %11257 = vst [vmem:[#allocation86_spill] sm:$0xff] %v9130_v32  ;;  %v9157_v17 = vld [vmem:[#allocation2 + $0xb8] sm:$0x1]  ;;  %v3910_v51 = vmul.f32 %v7784_v38, %v8961_v48  ;;  %v3911_v29 = vmul.f32 %v7784_v38, %v8980_v47  ;;  %v3805_v11 = vsel %vm1345_vm3, %v3803_v0, %v3804_v37  ;;  %v3739_v41 = vmul.f32 %v7786_v39, %v9141_v16 }
 0x34b   : > { %v9148_v44 = vpop.permute.xlu0 %3472  ;;  %3478 = vrot.lane.b32.xlu1 %v3435_v19, %s7288_s24  ;;  %v3909_v19 = vmul.f32 %v7784_v38, %v8965_v34  ;;  %v3741_v49 = vmul.f32 %v7786_v39, %v9143_v1  ;;  %v3808_v48 = vsel %vm1345_vm3, %v3806_v9, %v3807_v14  ;;  %v3969_v32 = vrot.slane %v3906_v6, 1 }
 0x34c   : > { %11258 = vst [vmem:[#allocation87_spill] sm:$0xff] %v9148_v44  ;;  %v3968_v44 = vrot.slane %v3904_v25, 1  ;;  %v3740_v34 = vmul.f32 %v7786_v39, %v9155_v43  ;;  %v3742_v47 = vmul.f32 %v7786_v39, %v9157_v17  ;;  %v3971_v37 = vrot.slane %v3905_v21, 1 }
 0x34d   : > { %v9167_v8 = vpop.permute.xlu1 %3474  ;;  %3569 = vrot.lane.b32.xlu0 %v3529_v46, %s7289_s0  ;;  %v9182_v46 = vmul.f32 %v7211_v28, %v7210_v54  ;;  %v3972_v25 = vrot.slane %v3907_v12, 1  ;;  %v3974_v61 = vrot.slane %v3908_v59, 1  ;;  %v3975_v33 = vrot.slane %v3910_v51, 1 }
 0x34e   : > { %11259 = vst [vmem:[#allocation88_spill] sm:$0xff] %v9167_v8  ;;  %v9180_v8 = vadd.f32 %v3871_v57, %v3694_v24  ;;  %v3977_v9 = vrot.slane %v3909_v19, 1  ;;  %v3978_v14 = vrot.slane %v3911_v29, 1  ;;  %v3809_v58 = vrot.slane %v3739_v41, 1  ;;  %v7214_v24 = vld [vmem:[#allocation2 + $0xa0] sm:$0xfe] }
 0x34f   : > { %11261 = vst [vmem:[#allocation90_spill] sm:$0xff] %v9182_v46  ;;  %v9184_v0 = vpop.permute.xlu0 %1547  ;;  %3571 = vrot.lane.b32.xlu1 %v3530_v3, %s7289_s0  ;;  %v3810_v20 = vrot.slane %v3741_v49, 1  ;;  %v3912_v54 = vmul.f32 %v7784_v38, %v9058_v45  ;;  %v3914_v28 = vmul.f32 %v7784_v38, %v9062_v18  ;;  %v1323_v57 = vmul.f32 %v7214_v24, %v8997_v30  ;;  %v7215_v3 = vld [vmem:[#allocation2 + $0xb0] sm:$0x1] }
 0x350   : > { %11260 = vst [vmem:[#allocation89_spill] sm:$0xff] %v9180_v8  ;;  %11262 = vst [vmem:[#allocation91_spill] sm:$0xff] %v9184_v0  ;;  %v1324_v21 = vmul.f32 %v7215_v3, %v8997_v30  ;;  %v3812_v12 = vrot.slane %v3740_v34, 1  ;;  %v3813_v59 = vrot.slane %v3742_v47, 1  ;;  %v3970_v41 = vsel %vm1345_vm3, %v3968_v44, %v3969_v32  ;;  %v9220_v44 = vld [vmem:[#allocation2 + $0xc0] sm:$0xfe] }
 0x351   : > { %v9187_v6 = vpop.permute.xlu1 %1549  ;;  %3847 = vrot.lane.b32.xlu0 %v3805_v11, %s7288_s24  ;;  %v3973_v19 = vsel %vm1345_vm3, %v3971_v37, %v3972_v25  ;;  %v3436_v45 = vmul.f32 %v7774_v26, %v8910_v60  ;;  %v9205_v18 = vmul.f32 %v7784_v38, %v9064_v5  ;;  %v3976_v29 = vsel %vm1345_vm3, %v3974_v61, %v3975_v33  ;;  %v9224_v5 = vld [vmem:[#allocation2 + $0xc8] sm:$0xfe]  ;;  %v9233_v37 = vld [vmem:[#allocation2 + $0xd8] sm:$0x1]  ;;  %v9298_v0 = vld [vmem:[#allocation2 + $0x60] sm:$0xfc] }
 0x352   : > { %11263 = vst [vmem:[#allocation92_spill] sm:$0xff] %v9187_v6  ;;  %v9210_v11 = vmul.f32 %v7774_v26, %v8916_v15  ;;  %v9214_v49 = vmul.f32 %v7772_v23, %v8770_v35  ;;  %v9218_v32 = vmul.f32 %v7772_v23, %v8776_v50  ;;  %v3979_v61 = vsel %vm1345_vm3, %v3977_v9, %v3978_v14 }
 0x353   : > { %v9196_v51 = vpop.permute.xlu0 %1724  ;;  %3849 = vrot.lane.b32.xlu1 %v3808_v48, %s7288_s24  ;;  %v9222_v48 = vld [vmem:[#allocation2 + $0xd0] sm:$0x1]  ;;  %v9231_v33 = vsel %vm1345_vm3, %v3809_v58, %v3810_v20  ;;  %v3980_v35 = vrot.slane %v3912_v54, 1  ;;  %v3981_v47 = vrot.slane %v3914_v28, 1  ;;  %v1361_v50 = vrot.slane %v1323_v57, 1  ;;  %v9244_v20 = vld [vmem:[#allocation2 + $0x128] sm:$0xff] }
 0x354   : > { %11264 = vst [vmem:[#allocation93_spill] sm:$0xff] %v9196_v51  ;;  %v1362_v25 = vrot.slane %v1324_v21, 1  ;;  %v9236_v24 = vsel %vm1345_vm3, %v3812_v12, %v3813_v59  ;;  %v3915_v3 = vmul.f32 %v7784_v38, %v9071_v2  ;;  %v3983_v9 = vrot.slane %v9205_v18, 1  ;;  %v7216_v28 = vld [vmem:[#allocation2 + $0xa0] sm:$0xfc] }
 0x355   : > { %v9226_v34 = vpop.permute.xlu1 %1726  ;;  %4016 = vrot.lane.b32.xlu0 %v3970_v41, %s7289_s0  ;;  %v3743_v58 = vmul.f32 %v7786_v39, %v9220_v44  ;;  %v3745_v14 = vmul.f32 %v7786_v39, %v9222_v48  ;;  %v3744_v54 = vmul.f32 %v7786_v39, %v9224_v5  ;;  %v1787_v2 = vmul.f32 %v7216_v28, %v9014_v56  ;;  %v7217_v59 = vld [vmem:[#allocation2 + $0xb0] sm:$0x3] }
 0x356   : > { %11265 = vst [vmem:[#allocation94_spill] sm:$0xff] %v9226_v34  ;;  %v3746_v57 = vmul.f32 %v7786_v39, %v9233_v37  ;;  %v3916_v21 = vmul.f32 %v7784_v38, %v9141_v16  ;;  %v3918_v12 = vmul.f32 %v7784_v38, %v9143_v1  ;;  %v1788_v41 = vmul.f32 %v7217_v59, %v9014_v56  ;;  %v9270_v16 = vld [vmem:[#allocation2 + $0x40] sm:$0xfc] }
 0x357   : > { %v9240_v46 = vpop.permute.xlu0 %2011  ;;  %4018 = vrot.lane.b32.xlu1 %v3973_v19, %s7289_s0  ;;  %v9264_v18 = vsel %vm1345_vm3, %v3980_v35, %v3981_v47  ;;  %v3917_v28 = vmul.f32 %v7784_v38, %v9155_v43  ;;  %v3919_v8 = vmul.f32 %v7784_v38, %v9157_v17  ;;  %v9273_v1 = vsel %vm1345_vm3, %v1361_v50, %v1362_v25  ;;  %v9275_v59 = vld [vmem:[#allocation2] sm:$0xff]  ;;  %v9285_v43 = vld [vmem:[#allocation2 + $0x50] sm:$0x3]  ;;  %v9287_v47 = vld [vmem:[#allocation2 + $0x48] sm:$0xfc] }
 0x358   : > { %11266 = vst [vmem:[#allocation95_spill] sm:$0xff] %v9240_v46  ;;  %11268 = vst [vmem:[#allocation97_spill] sm:$0xff] %v9273_v1  ;;  %v3984_v46 = vrot.slane %v3915_v3, 1  ;;  %v9283_v35 = vmul.f32 %v7774_v26, %v9244_v20  ;;  %v9294_v50 = vmul.f32 %v7772_v23, %v8910_v60  ;;  %v3815_v25 = vrot.slane %v3743_v58, 1  ;;  %v9305_v58 = vld [vmem:[#allocation2 + $0x70] sm:$0x3] }
 0x359   : > { %v9260_v19 = vpop.permute.xlu1 %2013  ;;  %4020 = vrot.lane.b32.xlu0 %v3976_v29, %s7289_s0  ;;  %v9279_v29 = vmul.f32 %v9275_v59, %v7774_v26  ;;  %v3816_v3 = vrot.slane %v3745_v14, 1  ;;  %v3818_v1 = vrot.slane %v3744_v54, 1  ;;  %v1825_v51 = vrot.slane %v1787_v2, 2 }
 0x35a   : > { %11267 = vst [vmem:[#allocation96_spill] sm:$0xff] %v9260_v19  ;;  %v9296_v19 = vld [vmem:[#allocation2 + $0x58] sm:$0x3]  ;;  %v3819_v26 = vrot.slane %v3746_v57, 1  ;;  %v3986_v34 = vrot.slane %v3916_v21, 1  ;;  %v3987_v56 = vrot.slane %v3918_v12, 1  ;;  %v4190_v60 = vmul.f32 %v7807_v55, %v9270_v16 }
 0x35b   : > { %v9289_v17 = vpop.permute.xlu0 %2188  ;;  %4022 = vrot.lane.b32.xlu1 %v3979_v61, %s7289_s0  ;;  %v1826_v6 = vrot.slane %v1788_v41, 2  ;;  %v3989_v61 = vrot.slane %v3917_v28, 1  ;;  %v3489_v14 = vsel %vm1169_vm8, %v8524_v36, %v8530_v31  ;;  %v4192_v54 = vmul.f32 %v7807_v55, %v9285_v43  ;;  %v9332_v12 = vld [vmem:[#allocation2 + $0x68] sm:$0xfc]  ;;  %v9347_v28 = vld [vmem:[#allocation2 + $0xf0] sm:$0x1] }
 0x35c   : > { %11269 = vst [vmem:[#allocation98_spill] sm:$0xff] %v9289_v17  ;;  %v3990_v17 = vrot.slane %v3919_v8, 1  ;;  %v4191_v2 = vmul.f32 %v7807_v55, %v9287_v47  ;;  %v9321_v8 = vsel %vm1345_vm3, %v3983_v9, %v3984_v46  ;;  %v9325_v36 = vmul.f32 %v7772_v23, %v8916_v15  ;;  %v9345_v9 = vld [vmem:[#allocation2 + $0xe0] sm:$0xfe] }
 0x35d   : > { %v9300_v53 = vpop.permute.xlu1 %2190  ;;  %3480 = vrot.lane.b32.xlu0 %v3436_v45, %s7288_s24  ;;  %v4193_v45 = vmul.f32 %v7807_v55, %v9296_v19  ;;  %v9328_v31 = vsel %vm1345_vm3, %v3815_v25, %v3816_v3  ;;  %v4194_v21 = vmul.f32 %v7807_v55, %v9298_v0  ;;  %v3586_v41 = vsel %vm1267_vm9, %v8540_v42, %v8546_v62 }
 0x35e   : > { %11270 = vst [vmem:[#allocation99_spill] sm:$0xff] %v9300_v53  ;;  %v9341_v46 = vsel %vm1345_vm3, %v3986_v34, %v3987_v56  ;;  %v4196_v15 = vmul.f32 %v7807_v55, %v9305_v58  ;;  %v3505_v25 = vadd.f32 %v3489_v14, %v8488_v22  ;;  %v9351_v3 = vsel %vm1809_vm4, %v1825_v51, %v1826_v6  ;;  %v9360_v56 = vld [vmem:[#allocation2 + $0x78] sm:$0x3]  ;;  %v9362_v34 = vld [vmem:[#allocation2 + $0xe8] sm:$0xfe] }
 0x35f   : > { %v9316_v57 = vpop.permute.xlu0 %2701  ;;  %3482 = vrot.lane.b32.xlu1 %v9210_v11, %s7288_s24  ;;  %v9338_v11 = vsel %vm1345_vm3, %v3818_v1, %v3819_v26  ;;  %11272 = vst [vmem:[#allocation101_spill] sm:$0xff] %v9351_v3  ;;  %v9358_v42 = vsel %vm1345_vm3, %v3989_v61, %v3990_v17  ;;  %v4254_v62 = vrot.slane %v4190_v60, 2  ;;  %v4255_v1 = vrot.slane %v4192_v54, 2  ;;  %v9366_v6 = vld [vmem:[#allocation2 + $0xf8] sm:$0x1] }
 0x360   : > { %11271 = vst [vmem:[#allocation100_spill] sm:$0xff] %v9316_v57  ;;  %v4257_v26 = vrot.slane %v4191_v2, 2  ;;  %v4258_v53 = vrot.slane %v4193_v45, 2  ;;  %v4195_v22 = vmul.f32 %v7807_v55, %v9332_v12  ;;  %v9368_v51 = vadd.f32 %v3586_v41, %v3505_v25  ;;  %v7219_v14 = vld [vmem:[#allocation2 + $0xa0] sm:$0xfe] }
 0x361   : > { %v9353_v57 = vpop.permute.xlu1 %2703  ;;  %3573 = vrot.lane.b32.xlu0 %v9214_v49, %s7289_s0  ;;  %v2480_v49 = vmul.f32 %v7219_v14, %v9034_v63  ;;  %v7220_v17 = vld [vmem:[#allocation2 + $0xb0] sm:$0x1]  ;;  %v4260_v54 = vrot.slane %v4194_v21, 2  ;;  %v4261_v2 = vrot.slane %v4196_v15, 2  ;;  %v4197_v45 = vmul.f32 %v7807_v55, %v9360_v56 }
 0x362   : > { %11273 = vst [vmem:[#allocation102_spill] sm:$0xff] %v9353_v57  ;;  %11274 = vst [vmem:[#allocation103_spill] sm:$0xff] %v9368_v51  ;;  %v2481_v61 = vmul.f32 %v7220_v17, %v9034_v63  ;;  %v3747_v41 = vmul.f32 %v7786_v39, %v9345_v9  ;;  %v3749_v25 = vmul.f32 %v7786_v39, %v9347_v28  ;;  %v9404_v51 = vld [vmem:[#allocation2 + $0x80] sm:$0xfc] }
 0x363   : > { %v9372_v60 = vpop.permute.xlu0 %2878  ;;  %3575 = vrot.lane.b32.xlu1 %v9218_v32, %s7289_s0  ;;  %v3748_v17 = vmul.f32 %v7786_v39, %v9362_v34  ;;  %v3750_v32 = vmul.f32 %v7786_v39, %v9366_v6  ;;  %v3920_v21 = vmul.f32 %v7784_v38, %v9220_v44  ;;  %v3922_v15 = vmul.f32 %v7784_v38, %v9222_v48 }
 0x364   : > { %11275 = vst [vmem:[#allocation104_spill] sm:$0xff] %v9372_v60  ;;  %v9395_v60 = vsel %vm1809_vm4, %v4254_v62, %v4255_v1  ;;  %v3923_v57 = vmul.f32 %v7784_v38, %v9233_v37  ;;  %v2516_v3 = vrot.slane %v2480_v49, 1  ;;  %v2517_v63 = vrot.slane %v2481_v61, 1  ;;  %v9414_v62 = vld [vmem:[#allocation2 + $0x90] sm:$0x3] }
 0x365   : > { %v9382_v14 = vpop.permute.xlu1 %2880  ;;  %3851 = vrot.lane.b32.xlu0 %v9231_v33, %s7288_s24  ;;  %v3921_v33 = vmul.f32 %v7784_v38, %v9224_v5  ;;  %v4263_v48 = vrot.slane %v4195_v22, 2  ;;  %v9417_v5 = vsel %vm1809_vm4, %v4260_v54, %v4261_v2  ;;  %v4264_v37 = vrot.slane %v4197_v45, 2  ;;  %v9419_v49 = vld [vmem:[#allocation2 + $0x88] sm:$0xfc] }
 0x366   : > { %11276 = vst [vmem:[#allocation105_spill] sm:$0xff] %v9382_v14  ;;  %v9398_v14 = vsel %vm1809_vm4, %v4257_v26, %v4258_v53  ;;  %v9412_v53 = vmul.f32 %v9275_v59, %v7772_v23  ;;  %v3821_v1 = vrot.slane %v3747_v41, 1  ;;  %v3822_v26 = vrot.slane %v3749_v25, 1  ;;  %v9430_v41 = vld [vmem:[#allocation2 + $0x98] sm:$0x3] }
 0x367   : > { %v9406_v44 = vpop.permute.xlu0 %3164  ;;  %3853 = vrot.lane.b32.xlu1 %v9236_v24, %s7288_s24  ;;  %v3824_v24 = vrot.slane %v3748_v17, 1  ;;  %v3825_v22 = vrot.slane %v3750_v32, 1  ;;  %v3993_v59 = vrot.slane %v3922_v15, 1  ;;  %v3995_v54 = vrot.slane %v3921_v33, 1 }
 0x368   : > { %11277 = vst [vmem:[#allocation106_spill] sm:$0xff] %v9406_v44  ;;  %11278 = vst [vmem:[#allocation107_spill] sm:$0xff] %v9412_v53  ;;  %v3992_v44 = vrot.slane %v3920_v21, 1  ;;  %v2022_v53 = vsel %vm1169_vm8, %v8571_v27, %v8580_v7  ;;  %v3996_v2 = vrot.slane %v3923_v57, 1  ;;  %v4198_v45 = vmul.f32 %v7807_v55, %v9404_v51  ;;  %v7221_v57 = vld [vmem:[#allocation2 + $0xa0] sm:$0xfc] }
 0x369   : > { %v9421_v61 = vpop.permute.xlu1 %3166  ;;  %4024 = vrot.lane.b32.xlu0 %v9264_v18, %s7289_s0  ;;  %v9433_v25 = vsel %vm1345_vm3, %v2516_v3, %v2517_v63  ;;  %v9441_v18 = vmul.f32 %v7772_v23, %v9244_v20  ;;  %v4200_v27 = vmul.f32 %v7807_v55, %v9414_v62  ;;  %v4199_v7 = vmul.f32 %v7807_v55, %v9419_v49  ;;  %v7222_v63 = vld [vmem:[#allocation2 + $0xb0] sm:$0x3] }
 0x36a   : > { %11279 = vst [vmem:[#allocation108_spill] sm:$0xff] %v9421_v61  ;;  %11280 = vst [vmem:[#allocation109_spill] sm:$0xff] %v9433_v25  ;;  %v9448_v17 = vmul.f32 %v7221_v57, %v9041_v52  ;;  %v9451_v3 = vmul.f32 %v7222_v63, %v9041_v52  ;;  %v9457_v23 = vsel %vm1345_vm3, %v3821_v1, %v3822_v26  ;;  %v11286_v1 = vld [vmem:[#allocation4_spill] sm:$0xff]  ;;  %v7224_v57 = vld [vmem:[#allocation2 + $0xd0] sm:$0x1] }
 0x36b   : > { %v9435_v61 = vpop.permute.xlu0 %3341  ;;  %4026 = vrot.lane.b32.xlu1 %v9321_v8, %s7289_s0  ;;  %v9454_v8 = vsel %vm1809_vm4, %v4263_v48, %v4264_v37  ;;  %v2038_v20 = vadd.f32 %v2022_v53, %v8578_v4  ;;  %v9465_v21 = vsel %vm1345_vm3, %v3824_v24, %v3825_v22  ;;  %v9468_v15 = vsel %vm1345_vm3, %v3992_v44, %v3993_v59  ;;  %v11285_v48 = vld [vmem:[#allocation6_spill] sm:$0xff] }
 0x36c   : > { %11281 = vst [vmem:[#allocation110_spill] sm:$0xff] %v9435_v61  ;;  %11282 = vst [vmem:[#allocation111_spill] sm:$0xff] %v9448_v17  ;;  %v4201_v33 = vmul.f32 %v7807_v55, %v9430_v41  ;;  %v2199_v37 = vsel %vm1267_vm9, %v11285_v48, %v8592_v13  ;;  %v9476_v4 = vsel %vm1345_vm3, %v3995_v54, %v3996_v2  ;;  %v4266_v53 = vrot.slane %v4198_v45, 2  ;;  %v11287_v59 = vld [vmem:[#allocation70_spill] sm:$0xff]  ;;  %v11288_v54 = vld [vmem:[#allocation68_spill] sm:$0xff] }
 0x36d   : > { %11283 = vst [vmem:[#allocation112_spill] sm:$0xff] %v9451_v3  ;;  %v9460_v32 = vpop.permute.xlu1 %3343  ;;  %3484 = vrot.lane.b32.xlu0 %v9279_v29, %s7288_s24  ;;  %v4367_v29 = vmul.f32 %v11286_v1, %v9270_v16  ;;  %v4267_v44 = vrot.slane %v4200_v27, 2  ;;  %v4269_v24 = vrot.slane %v4199_v7, 2  ;;  %v4369_v22 = vmul.f32 %v11286_v1, %v9285_v43  ;;  %v7223_v45 = vld [vmem:[#allocation2 + $0xc0] sm:$0xfe]  ;;  %v11297_v17 = vld [vmem:[#allocation69_spill] sm:$0xff] }
 0x36e   : > { %11284 = vst [vmem:[#allocation113_spill] sm:$0xff] %v9460_v32  ;;  %v4368_v13 = vmul.f32 %v11286_v1, %v9287_v47  ;;  %v1176_v2 = vsel %vm1169_vm8, %v11288_v54, %v11287_v59  ;;  %v1325_v16 = vmul.f32 %v7223_v45, %v8997_v30  ;;  %v1326_v63 = vmul.f32 %v7224_v57, %v8997_v30  ;;  %v7225_v7 = vld [vmem:[#allocation2 + $0xc0] sm:$0xff]  ;;  %v11290_v54 = vld [vmem:[#allocation73_spill] sm:$0xff] }
 0x36f   : > { %v9480_v26 = vpop.permute.xlu0 %1165  ;;  %3486 = vrot.lane.b32.xlu1 %v9283_v35, %s7288_s24  ;;  %v4370_v35 = vmul.f32 %v11286_v1, %v9296_v19  ;;  %v2215_v27 = vadd.f32 %v2199_v37, %v2038_v20  ;;  %v1078_v43 = vmul.f32 %v7225_v7, %v9077_v10  ;;  %v9497_v48 = vmul.f32 %v7225_v7, %v9085_v40  ;;  %v11291_v45 = vld [vmem:[#allocation72_spill] sm:$0xff] }
 0x370   : > { %v4270_v59 = vrot.slane %v4201_v33, 2  ;;  %v1274_v57 = vsel %vm1267_vm9, %v11291_v45, %v11290_v54  ;;  %v4431_v25 = vrot.slane %v4367_v29, 2  ;;  %v4371_v19 = vmul.f32 %v11286_v1, %v9298_v0  ;;  %v9510_v37 = vld [vmem:[#allocation2 + $0x100] sm:$0xfe]  ;;  %v9520_v54 = vld [vmem:[#allocation2 + $0x110] sm:$0x1] }
 0x371   : > { %11289 = vst [vmem:[#allocation6_spill] sm:$0xff] %v9497_v48  ;;  %v9499_v47 = vpop.permute.xlu1 %1167  ;;  %3577 = vrot.lane.b32.xlu0 %v9294_v50, %s7289_s0  ;;  %v4373_v20 = vmul.f32 %v11286_v1, %v9305_v58  ;;  %v1192_v7 = vadd.f32 %v1176_v2, %v1078_v43  ;;  %v4432_v50 = vrot.slane %v4369_v22, 2  ;;  %v4372_v33 = vmul.f32 %v11286_v1, %v9332_v12  ;;  %v9525_v43 = vld [vmem:[#allocation2 + $0x108] sm:$0xfe]  ;;  %v11292_v61 = vld [vmem:[#allocation76_spill] sm:$0xff] }
 0x372   : > { %v4374_v29 = vmul.f32 %v11286_v1, %v9360_v56  ;;  %v1364_v0 = vrot.slane %v1325_v16, 1  ;;  %v1365_v45 = vrot.slane %v1326_v63, 1  ;;  %v9523_v58 = vsel %vm1809_vm4, %v4266_v53, %v4267_v44  ;;  %v9545_v16 = vld [vmem:[#allocation2 + $0x118] sm:$0x1] }
 0x373   : > { %v9512_v3 = vpop.permute.xlu0 %1263  ;;  %3579 = vrot.lane.b32.xlu1 %v9325_v36, %s7289_s0  ;;  %v4434_v2 = vrot.slane %v4368_v13, 2  ;;  %v9528_v32 = vadd.f32 %v11292_v61, %v2215_v27  ;;  %v1290_v36 = vadd.f32 %v1274_v57, %v1192_v7  ;;  %v4435_v12 = vrot.slane %v4370_v35, 2  ;;  %v11295_v57 = vld [vmem:[#allocation92_spill] sm:$0xff] }
 0x374   : > { %v9536_v56 = vmul.f32 %v7786_v39, %v9510_v37  ;;  %v9539_v53 = vsel %vm1809_vm4, %v4269_v24, %v4270_v59  ;;  %v4437_v44 = vrot.slane %v4371_v19, 2  ;;  %v4438_v13 = vrot.slane %v4373_v20, 2  ;;  %v11296_v19 = vld [vmem:[#allocation91_spill] sm:$0xff]  ;;  %v7226_v7 = vld [vmem:[#allocation2 + $0xc0] sm:$0xfc] }
 0x375   : > { %11293 = vst [vmem:[#allocation4_spill] sm:$0xff] %v9528_v32  ;;  %v9530_v22 = vpop.permute.xlu1 %1265  ;;  %3855 = vrot.lane.b32.xlu0 %v9328_v31, %s7288_s24  ;;  %v9543_v61 = vmul.f32 %v7786_v39, %v9520_v54  ;;  %v9552_v31 = vsel %vm1809_vm4, %v4431_v25, %v4432_v50  ;;  %v4440_v35 = vrot.slane %v4372_v33, 2  ;;  %v4441_v27 = vrot.slane %v4374_v29, 2  ;;  %v7227_v32 = vld [vmem:[#allocation2 + $0xd0] sm:$0x3] }
 0x376   : > { %11294 = vst [vmem:[#allocation70_spill] sm:$0xff] %v9552_v31  ;;  %v9556_v24 = vmul.f32 %v7786_v39, %v9525_v43  ;;  %v1366_v59 = vsel %vm1345_vm3, %v1364_v0, %v1365_v45  ;;  %v1561_v20 = vsel %vm1169_vm8, %v11296_v19, %v11295_v57  ;;  %v1789_v48 = vmul.f32 %v7226_v7, %v11297_v17  ;;  %v11299_v45 = vld [vmem:[#allocation94_spill] sm:$0xff]  ;;  %v11300_v57 = vld [vmem:[#allocation93_spill] sm:$0xff] }
 0x377   : > { %v9547_v63 = vpop.permute.xlu0 %2322  ;;  %3857 = vrot.lane.b32.xlu1 %v9338_v11, %s7288_s24  ;;  %v1790_v11 = vmul.f32 %v7227_v32, %v11297_v17  ;;  %v1384_v25 = vadd.f32 %v1366_v59, %v1290_v36  ;;  %v9569_v33 = vsel %vm1809_vm4, %v4434_v2, %v4435_v12  ;;  %v3827_v29 = vrot.slane %v9536_v56, 1  ;;  %v9583_v59 = vld [vmem:[#allocation2 + $0xa0] sm:$0xfc]  ;;  %v9585_v2 = vld [vmem:[#allocation2 + $0xb0] sm:$0x3] }
 0x378   : > { %11298 = vst [vmem:[#allocation68_spill] sm:$0xff] %v9569_v33  ;;  %v3754_v0 = vmul.f32 %v7786_v39, %v9545_v16  ;;  %v1738_v19 = vsel %vm1267_vm9, %v11300_v57, %v11299_v45  ;;  %v9578_v32 = vsel %vm1809_vm4, %v4437_v44, %v4438_v13  ;;  %v3828_v36 = vrot.slane %v9543_v61, 1  ;;  %11302 = vst [vmem:[#allocation72_spill] sm:$0xff] %v9583_v59  ;;  %v9597_v61 = vld [vmem:[#allocation2 + $0xa8] sm:$0xfc] }
 0x379   : > { %v9564_v50 = vpop.permute.xlu1 %2324  ;;  %4028 = vrot.lane.b32.xlu0 %v9341_v46, %s7289_s0  ;;  %11301 = vst [vmem:[#allocation73_spill] sm:$0xff] %v9578_v32  ;;  %v3924_v46 = vmul.f32 %v7784_v38, %v9345_v9  ;;  %11303 = vst [vmem:[#allocation76_spill] sm:$0xff] %v9585_v2  ;;  %v1577_v12 = vadd.f32 %v1561_v20, %v1384_v25  ;;  %v9592_v7 = vsel %vm1809_vm4, %v4440_v35, %v4441_v27  ;;  %v9599_v9 = vld [vmem:[#allocation2 + $0xb8] sm:$0x3]  ;;  %v11307_v25 = vld [vmem:[#allocation9_spill] sm:$0xff] }
 0x37a   : > { %11304 = vst [vmem:[#allocation92_spill] sm:$0xff] %v9592_v7  ;;  %v3830_v44 = vrot.slane %v9556_v24, 1  ;;  %v3926_v13 = vmul.f32 %v7784_v38, %v9347_v28  ;;  %11305 = vst [vmem:[#allocation91_spill] sm:$0xff] %v9597_v61  ;;  %v1828_v45 = vrot.slane %v1789_v48, 2  ;;  %v1829_v57 = vrot.slane %v1790_v11, 2  ;;  %v11308_v35 = vld [vmem:[#allocation7_spill] sm:$0xff] }
 0x37b   : > { %v9587_v56 = vpop.permute.xlu0 %2419  ;;  %4030 = vrot.lane.b32.xlu1 %v9358_v42, %s7289_s0  ;;  %11306 = vst [vmem:[#allocation69_spill] sm:$0xff] %v9599_v9  ;;  %v3925_v20 = vmul.f32 %v7784_v38, %v9362_v34  ;;  %v3927_v42 = vmul.f32 %v7784_v38, %v9366_v6  ;;  %v3178_v27 = vsel %vm1169_vm8, %v11308_v35, %v11307_v25  ;;  %v3831_v34 = vrot.slane %v3754_v0, 1 }
 0x37c   : > { %v1754_v24 = vadd.f32 %v1738_v19, %v1577_v12  ;;  %v4202_v28 = vmul.f32 %v7807_v55, %v9583_v59  ;;  %v4204_v48 = vmul.f32 %v7807_v55, %v9585_v2  ;;  %v3998_v11 = vrot.slane %v3924_v46, 1  ;;  %v11309_v19 = vld [vmem:[#allocation11_spill] sm:$0xff]  ;;  %v11310_v12 = vld [vmem:[#allocation10_spill] sm:$0xff] }
 0x37d   : > { %v9608_v7 = vpop.permute.xlu1 %2421  ;;  %4302 = vrot.lane.b32.xlu0 %v9395_v60, %s7288_s24  ;;  %v4203_v6 = vmul.f32 %v7807_v55, %v9597_v61  ;;  %v4205_v25 = vmul.f32 %v7807_v55, %v9599_v9  ;;  %v3355_v35 = vsel %vm1267_vm9, %v11310_v12, %v11309_v19  ;;  %v3999_v60 = vrot.slane %v3926_v13, 1  ;;  %v11311_v61 = vld [vmem:[#allocation8_spill] sm:$0xff] }
 0x37e   : > { %v4375_v0 = vmul.f32 %v11286_v1, %v9404_v51  ;;  %v4377_v46 = vmul.f32 %v11286_v1, %v9414_v62  ;;  %v3194_v2 = vadd.f32 %v3178_v27, %v11311_v61  ;;  %v1830_v9 = vsel %vm1809_vm4, %v1828_v45, %v1829_v57  ;;  %v11312_v55 = vld [vmem:[#allocation96_spill] sm:$0xff]  ;;  %v11313_v62 = vld [vmem:[#allocation95_spill] sm:$0xff] }
 0x37f   : > { %v9623_v32 = vpop.permute.xlu0 %1551  ;;  %4304 = vrot.lane.b32.xlu1 %v9398_v14, %s7288_s24  ;;  %v4001_v59 = vrot.slane %v3925_v20, 1  ;;  %v4002_v33 = vrot.slane %v3927_v42, 1  ;;  %v1848_v31 = vadd.f32 %v1830_v9, %v1754_v24  ;;  %v9638_v14 = vsel %vm1345_vm3, %v3827_v29, %v3828_v36  ;;  %v11314_v20 = vld [vmem:[#allocation99_spill] sm:$0xff] }
 0x380   : > { %v4272_v13 = vrot.slane %v4202_v28, 2  ;;  %v4273_v51 = vrot.slane %v4204_v48, 2  ;;  %v3371_v12 = vadd.f32 %v3355_v35, %v3194_v2  ;;  %v2025_v61 = vsel %vm1169_vm8, %v11313_v62, %v11312_v55  ;;  %v9654_v2 = vld [vmem:[#allocation2 + $0x120] sm:$0xfe]  ;;  %v11315_v55 = vld [vmem:[#allocation98_spill] sm:$0xff]  ;;  %v11316_v35 = vld [vmem:[#allocation107_spill] sm:$0xff] }
 0x381   : > { %v9633_v19 = vpop.permute.xlu1 %1553  ;;  %4306 = vrot.lane.b32.xlu0 %v9417_v5, %s7288_s24  ;;  %v4275_v27 = vrot.slane %v4203_v6, 2  ;;  %v4276_v45 = vrot.slane %v4205_v25, 2  ;;  %v9648_v9 = vsel %vm1345_vm3, %v3830_v44, %v3831_v34  ;;  %v4443_v5 = vrot.slane %v4375_v0, 2  ;;  %v7228_v48 = vld [vmem:[#allocation2 + $0xe0] sm:$0xfe] }
 0x382   : > { %v4444_v29 = vrot.slane %v4377_v46, 2  ;;  %v9652_v36 = vmul.f32 %v11286_v1, %v9419_v49  ;;  %v2202_v42 = vsel %vm1267_vm9, %v11315_v55, %v11314_v20  ;;  %v9660_v24 = vsel %vm1345_vm3, %v3998_v11, %v3999_v60  ;;  %v7229_v34 = vld [vmem:[#allocation2 + $0xf0] sm:$0x1]  ;;  %v9691_v46 = vld [vmem:[#allocation2 + $0xe0] sm:$0xff] }
 0x383   : > { %v9643_v57 = vpop.permute.xlu0 %1728  ;;  %4308 = vrot.lane.b32.xlu1 %v9454_v8, %s7288_s24  ;;  %v9663_v8 = vsel %vm1345_vm3, %v4001_v59, %v4002_v33  ;;  %v9667_v44 = vmul.f32 %v11286_v1, %v9430_v41  ;;  %v2041_v28 = vadd.f32 %v2025_v61, %v1848_v31  ;;  %v1327_v49 = vmul.f32 %v7228_v48, %v8997_v30  ;;  %v9676_v33 = vld [vmem:[#allocation2 + $0x130] sm:$0x1]  ;;  %v11319_v62 = vld [vmem:[#allocation12_spill] sm:$0xff]  ;;  %v11320_v48 = vld [vmem:[#allocation71_spill] sm:$0xff] }
 0x384   : > { %v1328_v6 = vmul.f32 %v7229_v34, %v8997_v30  ;;  %v9674_v11 = vsel %vm1809_vm4, %v4272_v13, %v4273_v51  ;;  %v11317_v59 = vld [vmem:[#allocation78_spill] sm:$0xff]  ;;  %v1177_v41 = vsel %vm1169_vm8, %v9480_v26, %v9499_v47  ;;  %v9685_v31 = vsel %vm1809_vm4, %v4275_v27, %v4276_v45 }
 0x385   : > { %v1731_v25 = vpop.permute.xlu1 %1730  ;;  %3581 = vrot.lane.b32.xlu0 %v11316_v35, %s7289_s0  ;;  %v9679_v60 = vadd.f32 %v11317_v59, %v3371_v12  ;;  %v9689_v30 = vmul.f32 %v7786_v39, %v9654_v2  ;;  %v2218_v0 = vadd.f32 %v2202_v42, %v2041_v28  ;;  %v1079_v13 = vmul.f32 %v9691_v46, %v9077_v10  ;;  %v11318_v12 = vld [vmem:[#allocation13_spill] sm:$0xff]  ;;  %v7231_v28 = vld [vmem:[#allocation2 + $0xe0] sm:$0xfe]  ;;  %v7232_v35 = vld [vmem:[#allocation2 + $0xf0] sm:$0x1] }
 0x386   : > { %v9700_v26 = vsel %vm1809_vm4, %v4443_v5, %v4444_v29  ;;  %v4446_v47 = vrot.slane %v9652_v36, 2  ;;  %v1174_v61 = vsel %vm1169_vm8, %v11319_v62, %v11318_v12  ;;  %v1275_v27 = vsel %vm1267_vm9, %v9512_v3, %v9530_v22  ;;  %v9722_v3 = vld [vmem:[#allocation2 + $0x138] sm:$0x1] }
 0x387   : > { %v9695_v51 = vpop.permute.xlu0 %2015  ;;  %3583 = vrot.lane.b32.xlu1 %v9441_v18, %s7289_s0  ;;  %v4447_v10 = vrot.slane %v9667_v44, 2  ;;  %v9712_v45 = vmul.f32 %v7786_v39, %v9676_v33  ;;  %v9714_v18 = vld [vmem:[#allocation2 + $0x128] sm:$0xfe]  ;;  %v1193_v5 = vadd.f32 %v1177_v41, %v1079_v13  ;;  %v2239_v29 = vmul.f32 %v9691_v46, %v9085_v40 }
 0x388   : > { %v1367_v20 = vrot.slane %v1327_v49, 1  ;;  %v1368_v55 = vrot.slane %v1328_v6, 1  ;;  %v2336_v22 = vsel %vm1169_vm8, %v9547_v63, %v9564_v50  ;;  %v2484_v34 = vmul.f32 %v7231_v28, %v11320_v48  ;;  %v11321_v6 = vld [vmem:[#allocation75_spill] sm:$0xff]  ;;  %v7234_v28 = vld [vmem:[#allocation2 + $0xf0] sm:$0x3] }
 0x389   : > { %v9718_v42 = vpop.permute.xlu1 %2017  ;;  %3859 = vrot.lane.b32.xlu0 %v9457_v23, %s7288_s24  ;;  %v2485_v59 = vmul.f32 %v7232_v35, %v11320_v48  ;;  %v3833_v49 = vrot.slane %v9689_v30, 1  ;;  %v9731_v41 = vadd.f32 %v1174_v61, %v11321_v6  ;;  %v1291_v13 = vadd.f32 %v1275_v27, %v1193_v5  ;;  %v7233_v5 = vld [vmem:[#allocation2 + $0xe0] sm:$0xfc] }
 0x38a   : > { %v2247_v12 = vadd.f32 %v2239_v29, %v2218_v0  ;;  %v9737_v63 = vmul.f32 %v7786_v39, %v9714_v18  ;;  %v2433_v50 = vsel %vm1267_vm9, %v9587_v56, %v9608_v7  ;;  %v3834_v62 = vrot.slane %v9712_v45, 1  ;;  %v11332_v30 = vld [vmem:[#allocation92_spill] sm:$0xff] }
 0x38b   : > { %v2193_v23 = vpop.permute.xlu0 %2192  ;;  %3861 = vrot.lane.b32.xlu1 %v9465_v21, %s7288_s24  ;;  %v9745_v61 = vmul.f32 %v7786_v39, %v9722_v3  ;;  %v9749_v0 = vmul.f32 %v7784_v38, %v9510_v37  ;;  %v1369_v21 = vsel %vm1345_vm3, %v1367_v20, %v1368_v55  ;;  %v1791_v29 = vmul.f32 %v7233_v5, %v11297_v17 }
 0x38c   : > { %v2352_v27 = vadd.f32 %v2336_v22, %v2247_v12  ;;  %v1792_v48 = vmul.f32 %v7234_v28, %v11297_v17  ;;  %v1562_v39 = vsel %vm1169_vm8, %v9623_v32, %v9633_v19  ;;  %v2522_v7 = vrot.slane %v2484_v34, 1  ;;  %v7235_v19 = vld [vmem:[#allocation2 + $0xe0] sm:$0xfc]  ;;  %v7236_v34 = vld [vmem:[#allocation2 + $0xf0] sm:$0x3] }
 0x38d   : > { %v2195_v56 = vpop.permute.xlu1 %2194  ;;  %4032 = vrot.lane.b32.xlu0 %v9468_v15, %s7289_s0  ;;  %v2523_v22 = vrot.slane %v2485_v59, 1  ;;  %v1385_v55 = vadd.f32 %v1369_v21, %v1291_v13  ;;  %v9767_v15 = vmul.f32 %v7784_v38, %v9520_v54  ;;  %v1739_v32 = vsel %vm1267_vm9, %v9643_v57, %v1731_v25  ;;  %v9779_v12 = vld [vmem:[#allocation2 + $0xd0] sm:$0x3] }
 0x38e   : > { %v9760_v37 = vsel %vm1267_vm9, %v2193_v23, %v2195_v56  ;;  %v2449_v20 = vadd.f32 %v2433_v50, %v2352_v27  ;;  %v2947_v6 = vmul.f32 %v7235_v19, %v9041_v52  ;;  %v2948_v59 = vmul.f32 %v7236_v34, %v9041_v52  ;;  %v11322_v23 = vld [vmem:[#allocation15_spill] sm:$0xff]  ;;  %v11323_v54 = vld [vmem:[#allocation14_spill] sm:$0xff] }
 0x38f   : > { %v2706_v35 = vpop.permute.xlu0 %2705  ;;  %4034 = vrot.lane.b32.xlu1 %v9476_v4, %s7289_s0  ;;  %v9775_v13 = vmul.f32 %v7784_v38, %v9525_v43  ;;  %v9777_v4 = vld [vmem:[#allocation2 + $0xc0] sm:$0xfc]  ;;  %v1272_v50 = vsel %vm1267_vm9, %v11323_v54, %v11322_v23  ;;  %v1578_v27 = vadd.f32 %v1562_v39, %v1385_v55  ;;  %v3837_v25 = vrot.slane %v9745_v61, 1  ;;  %v11324_v39 = vld [vmem:[#allocation5_spill] sm:$0xff] }
 0x390   : > { %v3931_v52 = vmul.f32 %v7784_v38, %v9545_v16  ;;  %v1831_v43 = vrot.slane %v1791_v29, 2  ;;  %v1832_v21 = vrot.slane %v1792_v48, 2  ;;  %v2524_v5 = vsel %vm1345_vm3, %v2522_v7, %v2523_v22  ;;  %v9800_v29 = vld [vmem:[%s11138_s7 + $0x15] ss:$0 sm:$0xff]  ;;  %v7238_v48 = vld [vmem:[#allocation2 + $0x60] sm:$0xfe] }
 0x391   : > { %v2708_v57 = vpop.permute.xlu1 %2707  ;;  %4310 = vrot.lane.b32.xlu0 %v9523_v58, %s7288_s24  ;;  %v1755_v56 = vadd.f32 %v1739_v32, %v1578_v27  ;;  %v2542_v19 = vadd.f32 %v2524_v5, %v2449_v20  ;;  %v4206_v58 = vmul.f32 %v11324_v39, %v9777_v4  ;;  %v4208_v61 = vmul.f32 %v11324_v39, %v9779_v12  ;;  %v7239_v22 = vld [vmem:[#allocation2 + $0x70] sm:$0x1] }
 0x392   : > { %v2719_v28 = vsel %vm1169_vm8, %v2706_v35, %v2708_v57  ;;  %v2985_v55 = vrot.slane %v2947_v6, 2  ;;  %v2986_v16 = vrot.slane %v2948_v59, 2  ;;  %v3632_v7 = vmul.f32 %v7238_v48, %v9800_v29  ;;  %v11325_v32 = vld [vmem:[#allocation70_spill] sm:$0xff] }
 0x393   : > { %v2883_v34 = vpop.permute.xlu0 %2882  ;;  %4312 = vrot.lane.b32.xlu1 %v9539_v53, %s7288_s24  ;;  %v3633_v20 = vmul.f32 %v7239_v22, %v9800_v29  ;;  %v2735_v53 = vadd.f32 %v2719_v28, %v2542_v19  ;;  %v4004_v23 = vrot.slane %v9749_v0, 1  ;;  %v4005_v6 = vrot.slane %v9767_v15, 1  ;;  %v11326_v19 = vld [vmem:[#allocation68_spill] sm:$0xff] }
 0x394   : > { %v4007_v59 = vrot.slane %v9775_v13, 1  ;;  %v1288_v54 = vadd.f32 %v1272_v50, %v9731_v41  ;;  %v1833_v27 = vsel %vm1809_vm4, %v1831_v43, %v1832_v21  ;;  %v4008_v5 = vrot.slane %v3931_v52, 1  ;;  %v9818_v50 = vld [vmem:[#allocation2 + $0xc8] sm:$0xfc]  ;;  %v9820_v43 = vld [vmem:[#allocation2 + $0xd8] sm:$0x3] }
 0x395   : > { %v2885_v35 = vpop.permute.xlu1 %2884  ;;  %4479 = vrot.lane.b32.xlu0 %v11325_v32, %s7289_s0  ;;  %v1849_v48 = vadd.f32 %v1833_v27, %v1755_v56  ;;  %v4278_v32 = vrot.slane %v4206_v58, 2  ;;  %v4279_v17 = vrot.slane %v4208_v61, 2  ;;  %v2026_v0 = vsel %vm1169_vm8, %v9695_v51, %v9718_v42  ;;  %v11327_v52 = vld [vmem:[#allocation17_spill] sm:$0xff]  ;;  %v11328_v21 = vld [vmem:[#allocation16_spill] sm:$0xff]  ;;  %v11330_v61 = vld [vmem:[#allocation79_spill] sm:$0xff] }
 0x396   : > { %v2896_v57 = vsel %vm1267_vm9, %v2883_v34, %v2885_v35  ;;  %v2987_v15 = vsel %vm1809_vm4, %v2985_v55, %v2986_v16  ;;  %v3665_v41 = vrot.slane %v3632_v7, 1  ;;  %v3666_v13 = vrot.slane %v3633_v20, 1  ;;  %v11329_v58 = vld [vmem:[#allocation73_spill] sm:$0xff]  ;;  %v11333_v20 = vld [vmem:[#allocation4_spill] sm:$0xff] }
 0x397   : > { %v2912_v22 = vadd.f32 %v2896_v57, %v2735_v53  ;;  %v3169_v28 = vpop.permute.xlu0 %3168  ;;  %4481 = vrot.lane.b32.xlu1 %v11326_v19, %s7289_s0  ;;  %v2333_v56 = vsel %vm1169_vm8, %v11328_v21, %v11327_v52  ;;  %v9832_v51 = vsel %vm1809_vm4, %v4446_v47, %v4447_v10  ;;  %v9839_v42 = vsel %vm1345_vm3, %v3833_v49, %v3834_v62  ;;  %v11339_v19 = vld [vmem:[#allocation40_spill] sm:$0xff] }
 0x398   : > { %v9842_v55 = vadd.f32 %v11330_v61, %v1288_v54  ;;  %v11331_v7 = vrot.slane %v9737_v63, 1  ;;  %v9851_v36 = vsel %vm1345_vm3, %v4004_v23, %v4005_v6  ;;  %v2042_v47 = vadd.f32 %v2026_v0, %v1849_v48  ;;  %v11334_v6 = vld [vmem:[#allocation19_spill] sm:$0xff]  ;;  %v11335_v54 = vld [vmem:[#allocation18_spill] sm:$0xff]  ;;  %v9891_v21 = vld [vmem:[#allocation2 + $0x100] sm:$0xff] }
 0x399   : > { %v3005_v34 = vadd.f32 %v2987_v15, %v2912_v22  ;;  %v3171_v53 = vpop.permute.xlu1 %3170  ;;  %4483 = vrot.lane.b32.xlu0 %v11329_v58, %s7289_s0  ;;  %v4207_v49 = vmul.f32 %v11324_v39, %v9818_v50  ;;  %v4209_v62 = vmul.f32 %v11324_v39, %v9820_v43  ;;  %v2349_v63 = vadd.f32 %v2333_v56, %v11333_v20  ;;  %v11336_v22 = vld [vmem:[#allocation72_spill] sm:$0xff]  ;;  %v11340_v15 = vld [vmem:[#allocation91_spill] sm:$0xff] }
 0x39a   : > { %v3182_v16 = vsel %vm1169_vm8, %v3169_v28, %v3171_v53  ;;  %v9848_v44 = vsel %vm1345_vm3, %v11331_v7, %v3837_v25  ;;  %v9861_v25 = vsel %vm1345_vm3, %v4007_v59, %v4008_v5  ;;  %v9864_v35 = vsel %vm1809_vm4, %v4278_v32, %v4279_v17  ;;  %v11337_v5 = vld [vmem:[#allocation76_spill] sm:$0xff]  ;;  %v11338_v28 = vld [vmem:[#allocation41_spill] sm:$0xff]  ;;  %v11342_v61 = vld [vmem:[#allocation43_spill] sm:$0xff] }
 0x39b   : > { %v3198_v10 = vadd.f32 %v3182_v16, %v3005_v34  ;;  %v3346_v45 = vpop.permute.xlu0 %3345  ;;  %4485 = vrot.lane.b32.xlu1 %v11332_v30, %s7289_s0  ;;  %v9867_v23 = vsel %vm1345_vm3, %v3665_v41, %v3666_v13  ;;  %v2430_v27 = vsel %vm1267_vm9, %v11335_v54, %v11334_v6  ;;  %v2219_v57 = vadd.f32 %v9760_v37, %v2042_v47  ;;  %v11341_v37 = vld [vmem:[#allocation69_spill] sm:$0xff]  ;;  %v11343_v16 = vld [vmem:[#allocation42_spill] sm:$0xff]  ;;  %v11344_v20 = vld [vmem:[#allocation84_spill] sm:$0xff] }
 0x39c   : > { %v4379_v59 = vmul.f32 %v11286_v1, %v11336_v22  ;;  %v4381_v17 = vmul.f32 %v11286_v1, %v11337_v5  ;;  %v1175_v32 = vsel %vm1169_vm8, %v11339_v19, %v11338_v28  ;;  %v4380_v41 = vmul.f32 %v11286_v1, %v11340_v15  ;;  %v7241_v47 = vld [vmem:[%s11138_s7 + $0xc] ss:$0 sm:$0xff]  ;;  %v7243_v30 = vld [vmem:[#allocation2 + $0x110] sm:$0x1]  ;;  %v9909_v5 = vld [vmem:[#allocation2 + $0xe0] sm:$0xfc] }
 0x39d   : > { %v3348_v48 = vpop.permute.xlu1 %3347  ;;  %3863 = vrot.lane.b32.xlu0 %v9638_v14, %s7288_s24  ;;  %v4382_v13 = vmul.f32 %v11286_v1, %v11341_v37  ;;  %v2240_v56 = vmul.f32 %v9891_v21, %v9085_v40  ;;  %v4281_v34 = vrot.slane %v4207_v49, 2  ;;  %v4282_v53 = vrot.slane %v4209_v62, 2  ;;  %v11347_v37 = vld [vmem:[#allocation20_spill] sm:$0xff] }
 0x39e   : > { %v3359_v0 = vsel %vm1267_vm9, %v3346_v45, %v3348_v48  ;;  %v2446_v58 = vadd.f32 %v2430_v27, %v2349_v63  ;;  %v1273_v7 = vsel %vm1267_vm9, %v11343_v16, %v11342_v61  ;;  %v1191_v6 = vadd.f32 %v1175_v32, %v11344_v20  ;;  %v9947_v16 = vld [vmem:[#allocation2 + $0xf0] sm:$0x3]  ;;  %v9953_v20 = vld [vmem:[#allocation2 + $0xe8] sm:$0xfc] }
 0x39f   : > { %v9887_v52 = vadd.f32 %v3359_v0, %v3198_v10  ;;  %v2327_v14 = vpop.permute.xlu0 %2326  ;;  %3865 = vrot.lane.b32.xlu1 %v9648_v9, %s7288_s24  ;;  %v7242_v10 = vld [vmem:[#allocation2 + $0x100] sm:$0xfe]  ;;  %v2487_v9 = vmul.f32 %v7243_v30, %v7241_v47  ;;  %v2248_v40 = vadd.f32 %v2240_v56, %v2219_v57  ;;  %v4449_v62 = vrot.slane %v4379_v59, 2  ;;  %v11345_v59 = vld [vmem:[#allocation81_spill] sm:$0xff] }
 0x3a0   : > { %v2486_v45 = vmul.f32 %v7242_v10, %v7241_v47  ;;  %v4450_v63 = vrot.slane %v4381_v17, 2  ;;  %v4452_v27 = vrot.slane %v4380_v41, 2  ;;  %v4453_v48 = vrot.slane %v4382_v13, 2  ;;  %v11346_v41 = vld [vmem:[#allocation21_spill] sm:$0xff] }
 0x3a1   : > { %4036 = vrot.lane.b32.xlu0 %v9660_v24, %s7289_s0  ;;  %v2329_v49 = vpop.permute.xlu1 %2328  ;;  %v9907_v22 = vmul.f32 %v7784_v38, %v9654_v2  ;;  %v1289_v28 = vadd.f32 %v1273_v7, %v1191_v6  ;;  %v9914_v24 = vsel %vm1809_vm4, %v4281_v34, %v4282_v53  ;;  %v9918_v57 = vmul.f32 %v7784_v38, %v9676_v33  ;;  %v11348_v34 = vld [vmem:[#allocation53_spill] sm:$0xff]  ;;  %v11351_v6 = vld [vmem:[#allocation55_spill] sm:$0xff] }
 0x3a2   : > { %v2337_v54 = vsel %vm1169_vm8, %v2327_v14, %v2329_v49  ;;  %v9921_v17 = vadd.f32 %v11345_v59, %v2446_v58  ;;  %v2525_v2 = vrot.slane %v2486_v45, 1  ;;  %v2526_v0 = vrot.slane %v2487_v9, 1  ;;  %v11350_v7 = vld [vmem:[#allocation97_spill] sm:$0xff] }
 0x3a3   : > { %v2353_v19 = vadd.f32 %v2337_v54, %v2248_v40  ;;  %v2424_v32 = vpop.permute.xlu0 %2423  ;;  %4038 = vrot.lane.b32.xlu1 %v9663_v8, %s7289_s0  ;;  %v3933_v15 = vmul.f32 %v7784_v38, %v9714_v18  ;;  %v3490_v13 = vsel %vm1169_vm8, %v11347_v37, %v11346_v41  ;;  %v9931_v14 = vsel %vm1809_vm4, %v4449_v62, %v4450_v63  ;;  %v11349_v18 = vld [vmem:[#allocation52_spill] sm:$0xff]  ;;  %v11352_v40 = vld [vmem:[#allocation54_spill] sm:$0xff]  ;;  %v7245_v63 = vld [vmem:[%s11138_s7 + $0xf] ss:$0 sm:$0xff] }
 0x3a4   : > { %v3935_v33 = vmul.f32 %v7784_v38, %v9722_v3  ;;  %v9937_v56 = vmul.f32 %v11324_v39, %v9909_v5  ;;  %v1560_v53 = vsel %vm1169_vm8, %v11349_v18, %v11348_v34  ;;  %v9944_v61 = vsel %vm1809_vm4, %v4452_v27, %v4453_v48  ;;  %v7244_v38 = vld [vmem:[#allocation2 + $0xc0] sm:$0xfe]  ;;  %v7247_v48 = vld [vmem:[#allocation2 + $0x110] sm:$0x3]  ;;  %v11353_v34 = vld [vmem:[#allocation23_spill] sm:$0xff] }
 0x3a5   : > { %4314 = vrot.lane.b32.xlu0 %v9674_v11, %s7288_s24  ;;  %v2426_v8 = vpop.permute.xlu1 %2425  ;;  %v4010_v11 = vrot.slane %v9907_v22, 1  ;;  %v1383_v10 = vadd.f32 %v11350_v7, %v1289_v28  ;;  %v2482_v3 = vmul.f32 %v7244_v38, %v7241_v47  ;;  %v4011_v9 = vrot.slane %v9918_v57, 1  ;;  %v7246_v54 = vld [vmem:[#allocation2 + $0x100] sm:$0xfc]  ;;  %v9962_v28 = vld [vmem:[#allocation2 + $0xf8] sm:$0x3] }
 0x3a6   : > { %v2434_v58 = vsel %vm1267_vm9, %v2424_v32, %v2426_v8  ;;  %v1737_v49 = vsel %vm1267_vm9, %v11352_v40, %v11351_v6  ;;  %v2527_v62 = vsel %vm1345_vm3, %v2525_v2, %v2526_v0  ;;  %v2949_v27 = vmul.f32 %v7246_v54, %v7245_v63  ;;  %v11354_v18 = vld [vmem:[#allocation22_spill] sm:$0xff] }
 0x3a7   : > { %v2450_v45 = vadd.f32 %v2434_v58, %v2353_v19  ;;  %v2710_v30 = vpop.permute.xlu0 %2709  ;;  %4316 = vrot.lane.b32.xlu1 %v9685_v31, %s7288_s24  ;;  %v2950_v22 = vmul.f32 %v7247_v48, %v7245_v63  ;;  %v1576_v31 = vadd.f32 %v1560_v53, %v1383_v10  ;;  %v7248_v19 = vld [vmem:[#allocation2 + $0xd0] sm:$0x1]  ;;  %v4212_v2 = vmul.f32 %v11324_v39, %v9947_v16  ;;  %v11356_v48 = vld [vmem:[#allocation57_spill] sm:$0xff] }
 0x3a8   : > { %v2483_v32 = vmul.f32 %v7248_v19, %v7241_v47  ;;  %v4013_v41 = vrot.slane %v3933_v15, 1  ;;  %v4014_v37 = vrot.slane %v3935_v33, 1  ;;  %v4211_v8 = vmul.f32 %v11324_v39, %v9953_v20 }
 0x3a9   : > { %4487 = vrot.lane.b32.xlu0 %v9700_v26, %s7289_s0  ;;  %v2543_v57 = vadd.f32 %v2527_v62, %v2450_v45  ;;  %v2712_v59 = vpop.permute.xlu1 %2711  ;;  %v3587_v53 = vsel %vm1267_vm9, %v11354_v18, %v11353_v34  ;;  %v1753_v47 = vadd.f32 %v1737_v49, %v1576_v31  ;;  %v4213_v26 = vmul.f32 %v11324_v39, %v9962_v28  ;;  %v7251_v18 = vld [vmem:[#allocation2 + $0xd0] sm:$0x3] }
 0x3aa   : > { %v2720_v0 = vsel %vm1169_vm8, %v2710_v30, %v2712_v59  ;;  %v3506_v10 = vadd.f32 %v3490_v13, %v9679_v60  ;;  %v2988_v15 = vrot.slane %v2949_v27, 2  ;;  %v2989_v33 = vrot.slane %v2950_v22, 2  ;;  %v11357_v22 = vld [vmem:[#allocation56_spill] sm:$0xff] }
 0x3ab   : > { %v2736_v58 = vadd.f32 %v2720_v0, %v2543_v57  ;;  %v2887_v7 = vpop.permute.xlu0 %2886  ;;  %4489 = vrot.lane.b32.xlu1 %v9832_v51, %s7289_s0  ;;  %v4284_v38 = vrot.slane %v9937_v56, 2  ;;  %v2519_v45 = vrot.slane %v2482_v3, 1  ;;  %v2520_v30 = vrot.slane %v2483_v32, 1  ;;  %v11355_v56 = vld [vmem:[#allocation101_spill] sm:$0xff] }
 0x3ac   : > { %v4285_v40 = vrot.slane %v4212_v2, 2  ;;  %v9984_v49 = vmul.f32 %v11286_v1, %v9777_v4  ;;  %v9986_v51 = vadd.f32 %v3587_v53, %v3506_v10  ;;  %v9990_v60 = vsel %vm1345_vm3, %v4010_v11, %v4011_v9  ;;  %v7249_v9 = vld [vmem:[#allocation2 + $0x80] sm:$0xfe] }
 0x3ad   : > { %3867 = vrot.lane.b32.xlu0 %v9839_v42, %s7288_s24  ;;  %v2889_v6 = vpop.permute.xlu1 %2888  ;;  %v9993_v13 = vsel %vm1345_vm3, %v4013_v41, %v4014_v37  ;;  %v1847_v3 = vadd.f32 %v11355_v56, %v1753_v47  ;;  %v4287_v27 = vrot.slane %v4211_v8, 2  ;;  %v4288_v4 = vrot.slane %v4213_v26, 2  ;;  %v11358_v41 = vld [vmem:[#allocation59_spill] sm:$0xff]  ;;  %v11359_v37 = vld [vmem:[#allocation58_spill] sm:$0xff]  ;;  %v7250_v8 = vld [vmem:[#allocation2 + $0xc0] sm:$0xfc] }
 0x3ae   : > { %v2897_v62 = vsel %vm1267_vm9, %v2887_v7, %v2889_v6  ;;  %v2024_v31 = vsel %vm1169_vm8, %v11357_v22, %v11356_v48  ;;  %v2990_v19 = vsel %vm1809_vm4, %v2988_v15, %v2989_v33  ;;  %v4385_v11 = vmul.f32 %v11286_v1, %v9779_v12  ;;  %v11362_v56 = vld [vmem:[#allocation27_spill] sm:$0xff] }
 0x3af   : > { %v2913_v54 = vadd.f32 %v2897_v62, %v2736_v58  ;;  %v3173_v42 = vpop.permute.xlu0 %3172  ;;  %3869 = vrot.lane.b32.xlu1 %v9848_v44, %s7288_s24  ;;  %v10005_v32 = vmul.f32 %v7249_v9, %v9800_v29  ;;  %v10008_v57 = vsel %vm1345_vm3, %v2519_v45, %v2520_v30  ;;  %v10013_v2 = vsel %vm1809_vm4, %v4284_v38, %v4285_v40  ;;  %v11361_v58 = vld [vmem:[#allocation24_spill] sm:$0xff]  ;;  %v10034_v45 = vld [vmem:[#allocation2 + $0x110] sm:$0x3]  ;;  %v10040_v62 = vld [vmem:[#allocation2 + $0x108] sm:$0xfc] }
 0x3b0   : > { %v4455_v0 = vrot.slane %v9984_v49, 2  ;;  %v2201_v12 = vsel %vm1267_vm9, %v11359_v37, %v11358_v41  ;;  %v10019_v34 = vmul.f32 %v7250_v8, %v7245_v63  ;;  %v10021_v53 = vmul.f32 %v7251_v18, %v7245_v63  ;;  %v10032_v38 = vld [vmem:[#allocation2 + $0x100] sm:$0xfc]  ;;  %v7252_v30 = vld [vmem:[#allocation2 + $0x90] sm:$0x1] }
 0x3b1   : > { %4040 = vrot.lane.b32.xlu0 %v9851_v36, %s7289_s0  ;;  %v3006_v44 = vadd.f32 %v2990_v19, %v2913_v54  ;;  %v3175_v59 = vpop.permute.xlu1 %3174  ;;  %v11360_v36 = vld [vmem:[#allocation25_spill] sm:$0xff]  ;;  %v2040_v26 = vadd.f32 %v2024_v31, %v1847_v3  ;;  %v10030_v33 = vsel %vm1809_vm4, %v4287_v27, %v4288_v4  ;;  %v4456_v63 = vrot.slane %v4385_v11, 2  ;;  %v10051_v22 = vld [vmem:[#allocation2 + $0x118] sm:$0x3]  ;;  %v11367_v8 = vld [vmem:[#allocation6_spill] sm:$0xff] }
 0x3b2   : > { %v3183_v47 = vsel %vm1169_vm8, %v3173_v42, %v3175_v59  ;;  %v1559_v7 = vsel %vm1169_vm8, %v11361_v58, %v11360_v36  ;;  %v3635_v6 = vmul.f32 %v7252_v30, %v9800_v29  ;;  %v3668_v40 = vrot.slane %v10005_v32, 1  ;;  %v11364_v42 = vld [vmem:[#allocation103_spill] sm:$0xff]  ;;  %v11366_v59 = vld [vmem:[#allocation74_spill] sm:$0xff] }
 0x3b3   : > { %v3199_v10 = vadd.f32 %v3183_v47, %v3006_v44  ;;  %v3844_v15 = vpop.permute.xlu0 %3843  ;;  %4042 = vrot.lane.b32.xlu1 %v9861_v25, %s7289_s0  ;;  %v4384_v49 = vmul.f32 %v11286_v1, %v9818_v50  ;;  %v11363_v25 = vld [vmem:[#allocation26_spill] sm:$0xff]  ;;  %v2217_v54 = vadd.f32 %v2201_v12, %v2040_v26  ;;  %v3695_v27 = vadd.f32 %v9867_v23, %v11364_v42  ;;  %v11365_v44 = vld [vmem:[#allocation77_spill] sm:$0xff] }
 0x3b4   : > { %v1736_v3 = vsel %vm1267_vm9, %v11363_v25, %v11362_v56  ;;  %v4386_v48 = vmul.f32 %v11286_v1, %v9820_v43  ;;  %v1575_v50 = vadd.f32 %v1559_v7, %v9842_v55  ;;  %v4214_v19 = vmul.f32 %v11324_v39, %v10032_v38  ;;  %v11368_v36 = vld [vmem:[#allocation86_spill] sm:$0xff]  ;;  %v11371_v56 = vld [vmem:[#allocation32_spill] sm:$0xff] }
 0x3b5   : > { %4318 = vrot.lane.b32.xlu0 %v9864_v35, %s7288_s24  ;;  %v3846_v4 = vpop.permute.xlu1 %3845  ;;  %v4216_v11 = vmul.f32 %v11324_v39, %v10034_v45  ;;  %v2982_v35 = vrot.slane %v10019_v34, 2  ;;  %v2983_v23 = vrot.slane %v10021_v53, 2  ;;  %v4215_v43 = vmul.f32 %v11324_v39, %v10040_v62  ;;  %v11369_v58 = vld [vmem:[#allocation82_spill] sm:$0xff] }
 0x3b6   : > { %v3872_v31 = vsel %vm1169_vm8, %v3844_v15, %v3846_v4  ;;  %v1752_v55 = vadd.f32 %v1736_v3, %v1575_v50  ;;  %v2335_v41 = vsel %vm1169_vm8, %v11366_v59, %v11365_v44  ;;  %v3669_v37 = vrot.slane %v3635_v6, 1  ;;  %v11370_v6 = vld [vmem:[#allocation33_spill] sm:$0xff]  ;;  %v11374_v50 = vld [vmem:[#allocation28_spill] sm:$0xff] }
 0x3b7   : > { %v10061_v9 = vadd.f32 %v3872_v31, %v3695_v27  ;;  %v3350_v32 = vpop.permute.xlu0 %3349  ;;  %4320 = vrot.lane.b32.xlu1 %v9914_v24, %s7288_s24  ;;  %v4217_v12 = vmul.f32 %v11324_v39, %v10051_v22  ;;  %v2246_v34 = vadd.f32 %v11367_v8, %v2217_v54  ;;  %v10076_v24 = vsel %vm1809_vm4, %v4455_v0, %v4456_v63  ;;  %v11372_v63 = vld [vmem:[#allocation80_spill] sm:$0xff]  ;;  %v11378_v8 = vld [vmem:[#allocation30_spill] sm:$0xff] }
 0x3b8   : > { %v4458_v53 = vrot.slane %v4384_v49, 2  ;;  %v4459_v47 = vrot.slane %v4386_v48, 2  ;;  %v2432_v7 = vsel %vm1267_vm9, %v11369_v58, %v11368_v36  ;;  %v4290_v15 = vrot.slane %v4214_v19, 2  ;;  %v11373_v48 = vld [vmem:[#allocation29_spill] sm:$0xff]  ;;  %v11376_v19 = vld [vmem:[#allocation34_spill] sm:$0xff]  ;;  %v11380_v58 = vld [vmem:[#allocation100_spill] sm:$0xff] }
 0x3b9   : > { %4491 = vrot.lane.b32.xlu0 %v9931_v14, %s7289_s0  ;;  %v3352_v18 = vpop.permute.xlu1 %3351  ;;  %v4291_v30 = vrot.slane %v4216_v11, 2  ;;  %v2716_v25 = vsel %vm1169_vm8, %v11371_v56, %v11370_v6  ;;  %v2351_v3 = vadd.f32 %v2335_v41, %v2246_v34  ;;  %v4293_v0 = vrot.slane %v4215_v43, 2  ;;  %v11379_v36 = vld [vmem:[#allocation102_spill] sm:$0xff]  ;;  %v10142_v56 = vld [vmem:[#allocation2 + $0x138] sm:$0x3] }
 0x3ba   : > { %v3360_v26 = vsel %vm1267_vm9, %v3350_v32, %v3352_v18  ;;  %v1846_v49 = vadd.f32 %v11372_v63, %v1752_v55  ;;  %v4294_v42 = vrot.slane %v4217_v12, 2  ;;  %v4387_v27 = vmul.f32 %v11286_v1, %v9909_v5  ;;  %v11377_v12 = vld [vmem:[#allocation31_spill] sm:$0xff]  ;;  %v11383_v63 = vld [vmem:[#allocation104_spill] sm:$0xff] }
 0x3bb   : > { %v10085_v14 = vadd.f32 %v3360_v26, %v3199_v10  ;;  %v3477_v54 = vpop.permute.xlu0 %3476  ;;  %4493 = vrot.lane.b32.xlu1 %v9944_v61, %s7289_s0  ;;  %v4389_v4 = vmul.f32 %v11286_v1, %v9947_v16  ;;  %v2023_v31 = vsel %vm1169_vm8, %v11374_v50, %v11373_v48  ;;  %v11375_v10 = vld [vmem:[#allocation35_spill] sm:$0xff]  ;;  %v2448_v32 = vadd.f32 %v2432_v7, %v2351_v3 }
 0x3bc   : > { %v2893_v11 = vsel %vm1267_vm9, %v11376_v19, %v11375_v10  ;;  %v10104_v43 = vmul.f32 %v11286_v1, %v9953_v20  ;;  %v2732_v55 = vadd.f32 %v2716_v25, %v9921_v17  ;;  %v10108_v44 = vsel %vm1809_vm4, %v2982_v35, %v2983_v23  ;;  %v10125_v23 = vld [vmem:[#allocation2 + $0x120] sm:$0xfc]  ;;  %v11384_v50 = vld [vmem:[#allocation83_spill] sm:$0xff] }
 0x3bd   : > { %4044 = vrot.lane.b32.xlu0 %v9990_v60, %s7289_s0  ;;  %v3479_v61 = vpop.permute.xlu1 %3478  ;;  %v3670_v41 = vsel %vm1345_vm3, %v3668_v40, %v3669_v37  ;;  %v2200_v34 = vsel %vm1267_vm9, %v11378_v8, %v11377_v12  ;;  %v4460_v20 = vsel %vm1809_vm4, %v4458_v53, %v4459_v47  ;;  %v4292_v17 = vsel %vm1809_vm4, %v4290_v15, %v4291_v30  ;;  %v4563_v40 = vld [vmem:[%s11139_s8 + $0x78] sm:$0xff]  ;;  %v10133_v53 = vld [vmem:[#allocation2 + $0x130] sm:$0x3]  ;;  %v10135_v47 = vld [vmem:[#allocation2 + $0x128] sm:$0xfc] }
 0x3be   : > { %v10111_v59 = vsel %vm1169_vm8, %v3477_v54, %v3479_v61  ;;  %v10123_v35 = vmul.f32 %v11286_v1, %v9962_v28  ;;  %v2039_v37 = vadd.f32 %v2023_v31, %v1846_v49  ;;  %v2909_v18 = vadd.f32 %v2893_v11, %v2732_v55  ;;  %6876 = vmatpush3.msra.mxu0 %v4563_v40  ;;  %v10144_v25 = vld [vmem:[#allocation2] sm:$0xff]  ;;  %v11382_v54 = vld [vmem:[#allocation105_spill] sm:$0xff] }
 0x3bf   : > { %v3570_v60 = vpop.permute.xlu0 %3569  ;;  %4046 = vrot.lane.b32.xlu1 %v9993_v13, %s7289_s0  ;;  %v2718_v13 = vsel %vm1169_vm8, %v11380_v58, %v11379_v36  ;;  %v4461_v7 = vrot.slane %v4387_v27, 2  ;;  %v2541_v28 = vadd.f32 %v10008_v57, %v2448_v32  ;;  %v4295_v15 = vsel %vm1809_vm4, %v4293_v0, %v4294_v42  ;;  %11381 = vst [vmem:[#allocation94_spill] sm:$0xff] %v10144_v25  ;;  %v11386_v32 = vld [vmem:[#allocation36_spill] sm:$0xff]  ;;  %v11389_v40 = vld [vmem:[#allocation85_spill] sm:$0xff] }
 0x3c0   : > { %v4462_v30 = vrot.slane %v4389_v4, 2  ;;  %v4464_v6 = vrot.slane %v10104_v43, 2  ;;  %6877 = vmatprep.subr.mxu0 %v10144_v25  ;;  %v2216_v3 = vadd.f32 %v2200_v34, %v2039_v37  ;;  %v2895_v57 = vsel %vm1267_vm9, %v11383_v63, %v11382_v54  ;;  %v11387_v43 = vld [vmem:[#allocation45_spill] sm:$0xff]  ;;  %v11388_v55 = vld [vmem:[#allocation44_spill] sm:$0xff]  ;;  %6907 = vmatprep.mubr.msk.f32.mxu0 %vm7290_vm10, %v10144_v25 }
 0x3c1   : > { %4322 = vrot.lane.b32.xlu0 %v10013_v2, %s7288_s24  ;;  %v3572_v26 = vpop.permute.xlu1 %3571  ;;  %v4218_v2 = vmul.f32 %v11324_v39, %v10125_v23  ;;  %v2734_v0 = vadd.f32 %v2718_v13, %v2541_v28  ;;  %v4465_v27 = vrot.slane %v10123_v35, 2  ;;  %v4220_v4 = vmul.f32 %v11324_v39, %v10133_v53  ;;  %v4561_v35 = vld [vmem:[%s11139_s8 + $0x68] sm:$0xff]  ;;  %v11391_v13 = vld [vmem:[#allocation38_spill] sm:$0xff] }
 0x3c2   : > { %v10151_v49 = vsel %vm1267_vm9, %v3570_v60, %v3572_v26  ;;  %v4219_v48 = vmul.f32 %v11324_v39, %v10135_v47  ;;  %v3002_v31 = vadd.f32 %v11384_v50, %v2909_v18  ;;  %v4221_v10 = vmul.f32 %v11324_v39, %v10142_v56  ;;  %v4562_v60 = vld [vmem:[%s11139_s8 + $0x70] sm:$0xff] }
 0x3c3   : > { %v3848_v42 = vpop.permute.xlu0 %3847  ;;  %4324 = vrot.lane.b32.xlu1 %v10030_v33, %s7288_s24  ;;  %v4391_v19 = vmul.f32 %v11286_v1, %v10032_v38  ;;  %v4393_v11 = vmul.f32 %v11286_v1, %v10034_v45  ;;  %v11385_v33 = vld [vmem:[#allocation37_spill] sm:$0xff]  ;;  %v2334_v12 = vsel %vm1169_vm8, %v11388_v55, %v11387_v43  ;;  %v2911_v8 = vadd.f32 %v2895_v57, %v2734_v0  ;;  %v11393_v28 = vld [vmem:[#allocation46_spill] sm:$0xff] }
 0x3c4   : > { %v3179_v61 = vsel %vm1169_vm8, %v11386_v32, %v11385_v33  ;;  %v3696_v39 = vadd.f32 %v3670_v41, %v9986_v51  ;;  %v2245_v37 = vadd.f32 %v11389_v40, %v2216_v3  ;;  %v4463_v36 = vsel %vm1809_vm4, %v4461_v7, %v4462_v30  ;;  %6878 = vmatpush3.msra.mxu0 %v4562_v60  ;;  %v11392_v41 = vld [vmem:[#allocation47_spill] sm:$0xff]  ;;  %v4560_v7 = vld [vmem:[%s11139_s8 + $0x60] sm:$0xff] }
 0x3c5   : > { %4495 = vrot.lane.b32.xlu0 %v10076_v24, %s7289_s0  ;;  %v3850_v34 = vpop.permute.xlu1 %3849  ;;  %v4296_v58 = vrot.slane %v4218_v2, 2  ;;  %v11390_v24 = vld [vmem:[#allocation39_spill] sm:$0xff]  ;;  %v2431_v26 = vsel %vm1267_vm9, %v11393_v28, %v11392_v41  ;;  %v4297_v3 = vrot.slane %v4220_v4, 2  ;;  %6879 = vmatprep.subr.mxu0 %v10144_v25  ;;  %v3195_v30 = vadd.f32 %v3179_v61, %v3002_v31  ;;  %v11400_v40 = vld [vmem:[#allocation112_spill] sm:$0xff]  ;;  %v11402_v28 = vld [vmem:[#allocation109_spill] sm:$0xff] }
 0x3c6   : > { %v3873_v18 = vsel %vm1169_vm8, %v3848_v42, %v3850_v34  ;;  %v3356_v51 = vsel %vm1267_vm9, %v11391_v13, %v11390_v24  ;;  %v2350_v57 = vadd.f32 %v2334_v12, %v2245_v37  ;;  %v4299_v2 = vrot.slane %v4219_v48, 2  ;;  %6880 = vmatpush3.msra.mxu0 %v4561_v35  ;;  %v4559_v32 = vld [vmem:[%s11139_s8 + $0x58] sm:$0xff]  ;;  %v11394_v48 = vld [vmem:[#allocation108_spill] sm:$0xff]  ;;  %v4557_v13 = vld [vmem:[%s11139_s8 + $0x48] sm:$0xff] }
 0x3c7   : > { %v10193_v54 = vadd.f32 %v3873_v18, %v3696_v39  ;;  %v4017_v63 = vpop.permute.xlu0 %4016  ;;  %4497 = vrot.lane.b32.xlu1 %v4460_v20, %s7289_s0  ;;  %v4300_v0 = vrot.slane %v4221_v10, 2  ;;  %v3004_v42 = vadd.f32 %v10108_v44, %v2911_v8  ;;  %v4466_v33 = vsel %vm1809_vm4, %v4464_v6, %v4465_v27  ;;  %6881 = vmatprep.subr.mxu0 %v10144_v25  ;;  %v11395_v10 = vld [vmem:[#allocation106_spill] sm:$0xff]  ;;  %v11397_v6 = vld [vmem:[#allocation89_spill] sm:$0xff] }
 0x3c8   : > { %v4467_v20 = vrot.slane %v4391_v19, 2  ;;  %v4468_v4 = vrot.slane %v4393_v11, 2  ;;  %v3372_v31 = vadd.f32 %v3356_v51, %v3195_v30  ;;  %v2447_v61 = vadd.f32 %v2431_v26, %v2350_v57  ;;  %6882 = vmatpush3.msra.mxu0 %v4560_v7  ;;  %v11398_v8 = vld [vmem:[#allocation113_spill] sm:$0xff]  ;;  %v11399_v39 = vld [vmem:[#allocation110_spill] sm:$0xff] }
 0x3c9   : > { %4326 = vrot.lane.b32.xlu0 %v4292_v17, %s7288_s24  ;;  %v4019_v50 = vpop.permute.xlu1 %4018  ;;  %v3181_v43 = vsel %vm1169_vm8, %v11395_v10, %v11394_v48  ;;  %v11396_v17 = vld [vmem:[#allocation111_spill] sm:$0xff]  ;;  %v4298_v11 = vsel %vm1809_vm4, %v4296_v58, %v4297_v3  ;;  %v10219_v12 = vmul.f32 %v11286_v1, %v10040_v62  ;;  %6883 = vmatprep.subr.mxu0 %v10144_v25  ;;  %v2980_v37 = vrot.slane %v11400_v40, 2  ;;  %v11401_v51 = vld [vmem:[#allocation90_spill] sm:$0xff]  ;;  %v11403_v26 = vld [vmem:[#allocation61_spill] sm:$0xff] }
 0x3ca   : > { %v4048_v44 = vsel %vm1267_vm9, %v4017_v63, %v4019_v50  ;;  %v2979_v55 = vrot.slane %v11396_v17, 2  ;;  %v3358_v34 = vsel %vm1267_vm9, %v11399_v39, %v11398_v8  ;;  %v4301_v60 = vsel %vm1809_vm4, %v4299_v2, %v4300_v0  ;;  %6884 = vmatpush3.msra.mxu0 %v4559_v32  ;;  %v11404_v63 = vld [vmem:[#allocation60_spill] sm:$0xff]  ;;  %v10257_v0 = vld [vmem:[%s11138_s7 + $0x12] ss:$0 sm:$0xff]  ;;  %v11407_v32 = vld [vmem:[#allocation63_spill] sm:$0xff] }
 0x3cb   : > { %v10213_v27 = vadd.f32 %v4048_v44, %v11397_v6  ;;  %v4021_v19 = vpop.permute.xlu0 %4020  ;;  %4328 = vrot.lane.b32.xlu1 %v4295_v15, %s7288_s24  ;;  %v4394_v35 = vmul.f32 %v11286_v1, %v10051_v22  ;;  %v10230_v15 = vmul.f32 %v11286_v1, %v10125_v23  ;;  %v3197_v62 = vadd.f32 %v3181_v43, %v3004_v42  ;;  %v4558_v22 = vld [vmem:[%s11139_s8 + $0x50] sm:$0xff]  ;;  %v11409_v8 = vld [vmem:[#allocation51_spill] sm:$0xff]  ;;  %v11411_v17 = vld [vmem:[#allocation65_spill] sm:$0xff] }
 0x3cc   : > { %v4469_v58 = vsel %vm1809_vm4, %v4467_v20, %v4468_v4  ;;  %v4397_v24 = vmul.f32 %v11286_v1, %v10133_v53  ;;  %6885 = vmatprep.subr.mxu0 %v10144_v25  ;;  %v3402_v41 = vadd.f32 %v11401_v51, %v3372_v31  ;;  %v2717_v3 = vsel %vm1169_vm8, %v11404_v63, %v11403_v26  ;;  %v11405_v20 = vld [vmem:[#allocation49_spill] sm:$0xff]  ;;  %v11406_v4 = vld [vmem:[#allocation48_spill] sm:$0xff]  ;;  %v11408_v31 = vld [vmem:[#allocation62_spill] sm:$0xff] }
 0x3cd   : > { %4499 = vrot.lane.b32.xlu0 %v4463_v36, %s7289_s0  ;;  %v4023_v18 = vpop.permute.xlu1 %4022  ;;  %v2540_v36 = vadd.f32 %v11402_v28, %v2447_v61  ;;  %6886 = vmatpush3.msra.mxu0 %v4558_v22  ;;  %v3374_v30 = vadd.f32 %v3358_v34, %v3197_v62  ;;  %v3397_v42 = vmul.f32 %v10257_v0, %v9891_v21  ;;  %v4470_v50 = vrot.slane %v10219_v12, 2  ;;  %v7255_v61 = vld [vmem:[#allocation2 + $0xa0] sm:$0xfe]  ;;  %v7256_v10 = vld [vmem:[#allocation2 + $0xb0] sm:$0x1] }
 0x3ce   : > { %v4049_v7 = vsel %vm1267_vm9, %v4021_v19, %v4023_v18  ;;  %6887 = vmatprep.subr.mxu0 %v10144_v25  ;;  %v3636_v48 = vmul.f32 %v7255_v61, %v9800_v29  ;;  %v3637_v43 = vmul.f32 %v7256_v10, %v9800_v29  ;;  %v3396_v44 = vmul.f32 %v10257_v0, %v9691_v46  ;;  %v11410_v39 = vld [vmem:[#allocation50_spill] sm:$0xff] }
 0x3cf   : > { %v10251_v57 = vadd.f32 %v4049_v7, %v10061_v9  ;;  %v3481_v2 = vpop.permute.xlu0 %3480  ;;  %4501 = vrot.lane.b32.xlu1 %v4466_v33, %s7289_s0  ;;  %v3491_v9 = vsel %vm1169_vm8, %v11406_v4, %v11405_v20  ;;  %v2894_v33 = vsel %vm1267_vm9, %v11408_v31, %v11407_v32  ;;  %6888 = vmatpush3.msra.mxu0 %v4557_v13  ;;  %v4471_v12 = vrot.slane %v4394_v35, 2 }
 0x3d0   : > { %v2733_v21 = vadd.f32 %v2717_v3, %v2540_v36  ;;  %v3405_v6 = vadd.f32 %v3397_v42, %v9887_v52  ;;  %6889 = vmatprep.subr.mxu0 %v10144_v25  ;;  %v3588_v34 = vsel %vm1267_vm9, %v11410_v39, %v11409_v8  ;;  %v4396_v62 = vmul.f32 %v11286_v1, %v10135_v47  ;;  %v11413_v42 = vld [vmem:[#allocation67_spill] sm:$0xff]  ;;  %v4554_v39 = vld [vmem:[%s11139_s8 + $0x30] sm:$0xff] }
 0x3d1   : > { %4330 = vrot.lane.b32.xlu0 %v4298_v11, %s7288_s24  ;;  %v3483_v19 = vpop.permute.xlu1 %3482  ;;  %v4398_v46 = vmul.f32 %v11286_v1, %v10142_v56  ;;  %v3507_v18 = vadd.f32 %v3491_v9, %v3402_v41  ;;  %v3404_v22 = vadd.f32 %v3396_v44, %v3374_v30  ;;  %v4473_v13 = vrot.slane %v10230_v15, 2  ;;  %v11412_v30 = vld [vmem:[#allocation64_spill] sm:$0xff] }
 0x3d2   : > { %v3494_v40 = vsel %vm1169_vm8, %v3481_v2, %v3483_v19  ;;  %v2910_v11 = vadd.f32 %v2894_v33, %v2733_v21  ;;  %v4474_v51 = vrot.slane %v4397_v24, 2  ;;  %v3671_v28 = vrot.slane %v3636_v48, 1  ;;  %v4555_v21 = vld [vmem:[%s11139_s8 + $0x38] sm:$0xff] }
 0x3d3   : > { %v10284_v52 = vadd.f32 %v3494_v40, %v3405_v6  ;;  %v3574_v35 = vpop.permute.xlu0 %3573  ;;  %4332 = vrot.lane.b32.xlu1 %v4301_v60, %s7288_s24  ;;  %v3672_v36 = vrot.slane %v3637_v43, 1  ;;  %v3604_v26 = vadd.f32 %v3588_v34, %v3507_v18  ;;  %v2981_v47 = vsel %vm1809_vm4, %v2979_v55, %v2980_v37  ;;  %v4556_v43 = vld [vmem:[%s11139_s8 + $0x40] sm:$0xff]  ;;  %v11416_v40 = vld [vmem:[#allocation87_spill] sm:$0xff] }
 0x3d4   : > { %v3509_v1 = vadd.f32 %v10111_v59, %v3404_v22  ;;  %v4472_v63 = vsel %vm1809_vm4, %v4470_v50, %v4471_v12  ;;  %v4476_v60 = vrot.slane %v4396_v62, 2  ;;  %v4477_v3 = vrot.slane %v4398_v46, 2  ;;  %v11414_v50 = vld [vmem:[#allocation66_spill] sm:$0xff]  ;;  %6890 = vmatpush3.msra.mxu0 %v4556_v43  ;;  %v7257_v6 = vld [vmem:[#allocation2 + $0xc0] sm:$0xff] }
 0x3d5   : > { %4503 = vrot.lane.b32.xlu0 %v4469_v58, %s7289_s0  ;;  %v3576_v56 = vpop.permute.xlu1 %3575  ;;  %v3003_v15 = vadd.f32 %v2981_v47, %v2910_v11  ;;  %v3180_v55 = vsel %vm1169_vm8, %v11412_v30, %v11411_v17  ;;  %v4475_v59 = vsel %vm1809_vm4, %v4473_v13, %v4474_v51  ;;  %v3673_v37 = vsel %vm1345_vm3, %v3671_v28, %v3672_v36  ;;  %v11415_v34 = vld [vmem:[#allocation88_spill] sm:$0xff]  ;;  %v7259_v11 = vld [vmem:[#allocation2 + $0xd0] sm:$0x1]  ;;  %v4553_v13 = vld [vmem:[%s11139_s8 + $0x28] sm:$0xff] }
 0x3d6   : > { %v3590_v41 = vsel %vm1267_vm9, %v3574_v35, %v3576_v56  ;;  %v3697_v58 = vadd.f32 %v3673_v37, %v3604_v26  ;;  %v3357_v20 = vsel %vm1267_vm9, %v11414_v50, %v11413_v42  ;;  %v4478_v9 = vsel %vm1809_vm4, %v4476_v60, %v4477_v3  ;;  %6891 = vmatprep.subr.mxu0 %v10144_v25  ;;  %v7258_v46 = vld [vmem:[#allocation2 + $0xc0] sm:$0xfe]  ;;  %v4551_v60 = vld [vmem:[%s11139_s8 + $0x18] sm:$0xff] }
 0x3d7   : > { %v10295_v24 = vadd.f32 %v3590_v41, %v3509_v1  ;;  %v3852_v7 = vpop.permute.xlu0 %3851  ;;  %4505 = vrot.lane.b32.xlu1 %v4472_v63, %s7289_s0  ;;  %v3196_v32 = vadd.f32 %v3180_v55, %v3003_v15  ;;  %v3398_v10 = vmul.f32 %v10257_v0, %v10144_v25  ;;  %v3395_v19 = vmul.f32 %v7257_v6, %v10257_v0  ;;  %v10352_v63 = vld [vmem:[%s11138_s7 + $0x18] ss:$0 sm:$0xff]  ;;  %v7260_v30 = vld [vmem:[#allocation2 + $0x40] sm:$0xfc] }
 0x3d8   : > { %v3492_v62 = vsel %vm1169_vm8, %v11416_v40, %v11415_v34  ;;  %v3638_v18 = vmul.f32 %v7258_v46, %v9800_v29  ;;  %v3639_v0 = vmul.f32 %v7259_v11, %v9800_v29  ;;  %6892 = vmatpush3.msra.mxu0 %v4555_v21  ;;  %v4093_v55 = vmul.f32 %v7260_v30, %v10352_v63 }
 0x3d9   : > { %4507 = vrot.lane.b32.xlu0 %v4475_v59, %s7289_s0  ;;  %v3854_v2 = vpop.permute.xlu1 %3853  ;;  %v3373_v61 = vadd.f32 %v3357_v20, %v3196_v32  ;;  %v3406_v22 = vadd.f32 %v3398_v10, %v10085_v14  ;;  %6893 = vmatprep.subr.mxu0 %v10144_v25  ;;  %v4552_v14 = vld [vmem:[%s11139_s8 + $0x20] sm:$0xff]  ;;  %v7261_v59 = vld [vmem:[#allocation2 + $0x50] sm:$0x3] }
 0x3da   : > { %v3874_v4 = vsel %vm1169_vm8, %v3852_v7, %v3854_v2  ;;  %6894 = vmatpush3.msra.mxu0 %v4554_v39  ;;  %v3674_v47 = vrot.slane %v3638_v18, 1  ;;  %v3675_v1 = vrot.slane %v3639_v0, 1  ;;  %v4094_v37 = vmul.f32 %v7261_v59, %v10352_v63  ;;  %v7264_v0 = vld [vmem:[#allocation2 + $0xe0] sm:$0xfe] }
 0x3db   : > { %v10309_v31 = vadd.f32 %v3874_v4, %v3697_v58  ;;  %v4025_v33 = vpop.permute.xlu0 %4024  ;;  %4509 = vrot.lane.b32.xlu1 %v4478_v9, %s7289_s0  ;;  %6895 = vmatprep.subr.mxu0 %v10144_v25  ;;  %v4548_v4 = vld [vmem:[%s11139_s8] sm:$0xff]  ;;  %v4125_v9 = vrot.slane %v4093_v55, 2 }
 0x3dc   : > { %6896 = vmatpush3.msra.mxu0 %v4553_v13  ;;  %v3676_v17 = vsel %vm1345_vm3, %v3674_v47, %v3675_v1  ;;  %v4126_v32 = vrot.slane %v4094_v37, 2 }
 0x3dd   : > { %v4027_v48 = vpop.permute.xlu1 %4026  ;;  %6897 = vmatprep.subr.mxu0 %v10144_v25 }
 0x3de   : > { %v4050_v44 = vsel %vm1267_vm9, %v4025_v33, %v4027_v48  ;;  %6898 = vmatpush3.msra.mxu0 %v4552_v14  ;;  %v7262_v33 = vld [vmem:[#allocation2 + $0x60] sm:$0xfc]  ;;  %v7263_v48 = vld [vmem:[#allocation2 + $0x70] sm:$0x3] }
 0x3df   : > { %v10325_v12 = vadd.f32 %v4050_v44, %v10193_v54  ;;  %v3485_v8 = vpop.permute.xlu0 %3484  ;;  %v3403_v54 = vadd.f32 %v3395_v19, %v3373_v61  ;;  %6899 = vmatprep.subr.mxu0 %v10144_v25  ;;  %v4095_v61 = vmul.f32 %v7262_v33, %v10352_v63  ;;  %v4096_v10 = vmul.f32 %v7263_v48, %v10352_v63 }
 0x3e0   : > { %6900 = vmatpush3.msra.mxu0 %v4551_v60  ;;  %v4127_v19 = vsel %vm1809_vm4, %v4125_v9, %v4126_v32 }
 0x3e1   : > { %v3487_v35 = vpop.permute.xlu1 %3486  ;;  %v3508_v28 = vadd.f32 %v3492_v62, %v3403_v54  ;;  %6901 = vmatprep.subr.mxu0 %v10144_v25  ;;  %v4129_v39 = vrot.slane %v4096_v10, 2  ;;  %v4157_v34 = vadd.f32 %v4127_v19, %v10213_v27  ;;  %v7265_v54 = vld [vmem:[#allocation2 + $0xf0] sm:$0x1] }
 0x3e2   : > { %v3495_v51 = vsel %vm1169_vm8, %v3485_v8, %v3487_v35  ;;  %v4128_v8 = vrot.slane %v4095_v61, 2 }
 0x3e3   : > { %v10342_v36 = vadd.f32 %v3495_v51, %v3406_v22  ;;  %v3578_v26 = vpop.permute.xlu0 %3577  ;;  %v3605_v56 = vadd.f32 %v10151_v49, %v3508_v28  ;;  %v4550_v49 = vld [vmem:[%s11139_s8 + $0x10] sm:$0xff]  ;;  %v3641_v22 = vmul.f32 %v7265_v54, %v9800_v29 }
 0x3e4   : > { %6902 = vmatpush3.msra.mxu0 %v4550_v49  ;;  %v4130_v11 = vsel %vm1809_vm4, %v4128_v8, %v4129_v39  ;;  %v7269_v54 = vld [vmem:[#allocation2 + $0xb0] sm:$0x3] }
 0x3e5   : > { %v3580_v41 = vpop.permute.xlu1 %3579  ;;  %v3698_v58 = vadd.f32 %v3676_v17, %v3605_v56  ;;  %6903 = vmatprep.subr.mxu0 %v10144_v25  ;;  %v4158_v35 = vadd.f32 %v4130_v11, %v10251_v57  ;;  %v3678_v14 = vrot.slane %v3641_v22, 1  ;;  %v4100_v22 = vmul.f32 %v7269_v54, %v10352_v63 }
 0x3e6   : > { %v3591_v3 = vsel %vm1267_vm9, %v3578_v26, %v3580_v41 }
 0x3e7   : > { %v10360_v15 = vadd.f32 %v3591_v3, %v10284_v52  ;;  %v3856_v7 = vpop.permute.xlu0 %3855  ;;  %v4549_v52 = vld [vmem:[%s11139_s8 + $0x8] sm:$0xff] }
 0x3e8   : > { %6904 = vmatpush3.msra.mxu0 %v4549_v52 }
 0x3e9   : > { %v3858_v2 = vpop.permute.xlu1 %3857  ;;  %6905 = vmatprep.subr.mxu0 %v10144_v25 }
 0x3ea   : > { %v3875_v42 = vsel %vm1169_vm8, %v3856_v7, %v3858_v2  ;;  %6906 = vmatpush3.msra.mxu0 %v4548_v4 }
 0x3eb   : > { %v3891_v50 = vadd.f32 %v3875_v42, %v3698_v58  ;;  %v4029_v20 = vpop.permute.xlu0 %4028  ;;  %6910 = vmatprep.subr.mxu0 %v10144_v25 }
 0x3ed   : > { %v4031_v43 = vpop.permute.xlu1 %4030 }
 0x3ee   : > { %v4051_v21 = vsel %vm1267_vm9, %v4029_v20, %v4031_v43 }
 0x3ef   : > { %v10383_v44 = vadd.f32 %v4051_v21, %v10309_v31  ;;  %v4303_v6 = vpop.permute.xlu0 %4302  ;;  %v3640_v31 = vmul.f32 %v7264_v0, %v9800_v29  ;;  %v7268_v0 = vld [vmem:[#allocation2 + $0xa0] sm:$0xfc] }
 0x3f1   : > { %v4305_v40 = vpop.permute.xlu1 %4304  ;;  %v3677_v26 = vrot.slane %v3640_v31, 1  ;;  %v4099_v31 = vmul.f32 %v7268_v0, %v10352_v63 }
 0x3f2   : > { %v4334_v62 = vsel %vm1169_vm8, %v4303_v6, %v4305_v40  ;;  %v7266_v40 = vld [vmem:[#allocation2 + $0x80] sm:$0xfc] }
 0x3f3   : > { %v10389_v46 = vadd.f32 %v4334_v62, %v4157_v34  ;;  %v4307_v18 = vpop.permute.xlu0 %4306  ;;  %v3679_v60 = vsel %vm1345_vm3, %v3677_v26, %v3678_v14  ;;  %v4097_v62 = vmul.f32 %v7266_v40, %v10352_v63  ;;  %v7273_v14 = vld [vmem:[#allocation2 + $0xc0] sm:$0xfc]  ;;  %v4134_v54 = vrot.slane %v4099_v31, 2 }
 0x3f4   : > { %v3699_v29 = vadd.f32 %v3679_v60, %v10295_v24 }
 0x3f5   : > { %v4309_v13 = vpop.permute.xlu1 %4308 }
 0x3f6   : > { %v4335_v51 = vsel %vm1169_vm8, %v4307_v18, %v4309_v13  ;;  %v7267_v18 = vld [vmem:[#allocation2 + $0x90] sm:$0x3]  ;;  %v7271_v13 = vld [vmem:[#allocation2 + $0x100] sm:$0xfe] }
 0x3f7   : > { %v10396_v27 = vadd.f32 %v4335_v51, %v4158_v35  ;;  %v3582_v28 = vpop.permute.xlu0 %3581  ;;  %v4098_v11 = vmul.f32 %v7267_v18, %v10352_v63  ;;  %v7270_v35 = vld [vmem:[%s11138_s7 + $0x15] ss:$0 sm:$0xff]  ;;  %v4131_v18 = vrot.slane %v4097_v62, 2 }
 0x3f8   : > { %v3642_v51 = vmul.f32 %v7271_v13, %v7270_v35  ;;  %v4135_v13 = vrot.slane %v4100_v22, 2  ;;  %v4107_v22 = vmul.f32 %v10352_v63, %v10125_v23 }
 0x3f9   : > { %v3584_v47 = vpop.permute.xlu1 %3583  ;;  %v4132_v0 = vrot.slane %v4098_v11, 2 }
 0x3fa   : > { %v3592_v1 = vsel %vm1267_vm9, %v3582_v28, %v3584_v47  ;;  %v7272_v28 = vld [vmem:[#allocation2 + $0x110] sm:$0x1]  ;;  %v4101_v47 = vmul.f32 %v7273_v14, %v10352_v63  ;;  %v4136_v11 = vsel %vm1809_vm4, %v4134_v54, %v4135_v13 }
 0x3fb   : > { %v10400_v56 = vadd.f32 %v3592_v1, %v10342_v36  ;;  %v3860_v41 = vpop.permute.xlu0 %3859  ;;  %v3643_v26 = vmul.f32 %v7272_v28, %v7270_v35  ;;  %v7274_v1 = vld [vmem:[#allocation2 + $0xd0] sm:$0x3]  ;;  %v3680_v28 = vrot.slane %v3642_v51, 1  ;;  %v4133_v62 = vsel %vm1809_vm4, %v4131_v18, %v4132_v0 }
 0x3fc   : > { %v4108_v51 = vmul.f32 %v10352_v63, %v10133_v53  ;;  %v4159_v53 = vadd.f32 %v4133_v62, %v10325_v12  ;;  %v4146_v12 = vrot.slane %v4107_v22, 2 }
 0x3fd   : > { %v3862_v57 = vpop.permute.xlu1 %3861  ;;  %v3681_v14 = vrot.slane %v3643_v26, 1 }
 0x3fe   : > { %v3876_v3 = vsel %vm1169_vm8, %v3860_v41, %v3862_v57  ;;  %v4102_v41 = vmul.f32 %v7274_v1, %v10352_v63  ;;  %v4137_v1 = vrot.slane %v4101_v47, 2 }
 0x3ff   : > { %v10405_v7 = vadd.f32 %v3876_v3, %v3699_v29  ;;  %v4033_v49 = vpop.permute.xlu0 %4032  ;;  %v7275_v29 = vld [vmem:[#allocation2 + $0x120] sm:$0xfe]  ;;  %v7276_v3 = vld [vmem:[#allocation2 + $0x130] sm:$0x1]  ;;  %v3682_v26 = vsel %vm1345_vm3, %v3680_v28, %v3681_v14 }
 0x400   : > { %v3644_v57 = vmul.f32 %v7275_v29, %v7270_v35  ;;  %v4138_v25 = vrot.slane %v4102_v41, 2 }
 0x401   : > { %v4035_v17 = vpop.permute.xlu1 %4034 }
 0x402   : > { %v4052_v30 = vsel %vm1267_vm9, %v4033_v49, %v4035_v17  ;;  %v3645_v49 = vmul.f32 %v7276_v3, %v7270_v35  ;;  %v4103_v17 = vmul.f32 %v10352_v63, %v9909_v5  ;;  %v4105_v5 = vmul.f32 %v10352_v63, %v10032_v38 }
 0x403   : > { %v10408_v55 = vadd.f32 %v4052_v30, %v3891_v50  ;;  %v10410_v59 = vpop.permute.xlu0 %4310  ;;  %v4104_v30 = vmul.f32 %v10352_v63, %v9947_v16  ;;  %v4106_v16 = vmul.f32 %v10352_v63, %v10034_v45  ;;  %v4139_v38 = vsel %vm1809_vm4, %v4137_v1, %v4138_v25 }
 0x404   : > { %v3684_v29 = vrot.slane %v3645_v49, 1  ;;  %v4143_v23 = vrot.slane %v4105_v5, 2 }
 0x405   : > { %v10412_v36 = vpop.permute.xlu1 %4312  ;;  %v4141_v35 = vrot.slane %v4104_v30, 2  ;;  %v4144_v49 = vrot.slane %v4106_v16, 2 }
 0x406   : > { %v4336_v45 = vsel %vm1169_vm8, %v10410_v59, %v10412_v36  ;;  %v3700_v36 = vadd.f32 %v3682_v26, %v10360_v15 }
 0x407   : > { %v10414_v37 = vpop.permute.xlu0 %4479  ;;  %v4145_v28 = vsel %vm1809_vm4, %v4143_v23, %v4144_v49 }
 0x409   : > { %v10416_v58 = vpop.permute.xlu1 %4481 }
 0x40a   : > { %v4511_v63 = vsel %vm1267_vm9, %v10414_v37, %v10416_v58 }
 0x40b   : > { %v10418_v24 = vpop.permute.xlu0 %4483  ;;  %v10517_v15 = vadd.f32 %v4511_v63, %v10389_v46 }
 0x40d   : > { %v10420_v2 = vpop.permute.xlu1 %4485 }
 0x40f   : > { %v10422_v52 = vpop.permute.xlu0 %3863 }
 0x411   : > { %v10424_v42 = vpop.permute.xlu1 %3865 }
 0x412   : > { %v3877_v25 = vsel %vm1169_vm8, %v10422_v52, %v10424_v42 }
 0x413   : > { %v10426_v20 = vpop.permute.xlu0 %4036  ;;  %v3893_v42 = vadd.f32 %v3877_v25, %v3700_v36 }
 0x415   : > { %v10428_v50 = vpop.permute.xlu1 %4038 }
 0x416   : > { %v4053_v59 = vsel %vm1267_vm9, %v10426_v20, %v10428_v50  ;;  %v4160_v50 = vadd.f32 %v4136_v11, %v10383_v44  ;;  %v4161_v44 = vadd.f32 %v4139_v38, %v10408_v55 }
 0x417   : > { %v10430_v4 = vpop.permute.xlu0 %4314  ;;  %v4069_v20 = vadd.f32 %v4053_v59, %v10405_v7 }
 0x419   : > { %v10432_v9 = vpop.permute.xlu1 %4316 }
 0x41a   : > { %v4337_v58 = vsel %vm1169_vm8, %v10430_v4, %v10432_v9 }
 0x41b   : > { %v10434_v32 = vpop.permute.xlu0 %4487  ;;  %v4353_v9 = vadd.f32 %v4337_v58, %v4160_v50  ;;  %v11423_v58 = vld [vmem:[#allocation94_spill] sm:$0xff]  ;;  %v4636_v50 = vld [vmem:[%s11141_s10] sm:$0x1] }
 0x41d   : > { %v10436_v33 = vpop.permute.xlu1 %4489 }
 0x41f   : > { %v10438_v61 = vpop.permute.xlu0 %3867 }
 0x421   : > { %v10440_v48 = vpop.permute.xlu1 %3869 }
 0x423   : > { %v10442_v10 = vpop.permute.xlu0 %4040 }
 0x425   : > { %v10444_v43 = vpop.permute.xlu1 %4042 }
 0x426   : > { %v4054_v52 = vsel %vm1267_vm9, %v10442_v10, %v10444_v43 }
 0x427   : > { %v10446_v21 = vpop.permute.xlu0 %4318  ;;  %v4070_v10 = vadd.f32 %v4054_v52, %v3893_v42 }
 0x429   : > { %v10448_v6 = vpop.permute.xlu1 %4320 }
 0x42a   : > { %v4338_v4 = vsel %vm1169_vm8, %v10446_v21, %v10448_v6 }
 0x42b   : > { %v10450_v19 = vpop.permute.xlu0 %4491 }
 0x42d   : > { %v10452_v8 = vpop.permute.xlu1 %4493 }
 0x42e   : > { %v4514_v46 = vsel %vm1267_vm9, %v10450_v19, %v10452_v8  ;;  %v4354_v8 = vadd.f32 %v4338_v4, %v4161_v44  ;;  %v4899_v44 = vld [vmem:[%s11145_s14 + $0x70] sm:$0xff] }
 0x42f   : > { %v10454_v39 = vpop.permute.xlu0 %4044  ;;  %v10542_v54 = vadd.f32 %v4514_v46, %v4353_v9  ;;  %v4799_v9 = vld [vmem:[%s11144_s13 + $0x8] sm:$0xff] }
 0x430   : > { %11417 = vst [vmem:[#allocation93_spill] sm:$0xff] %v10454_v39  ;;  %v3683_v39 = vrot.slane %v3644_v57, 1  ;;  %v4512_v57 = vsel %vm1267_vm9, %v10418_v24, %v10420_v2  ;;  %v4513_v24 = vsel %vm1267_vm9, %v10434_v32, %v10436_v33 }
 0x431   : > { %v10456_v34 = vpop.permute.xlu1 %4046  ;;  %v10508_v37 = vadd.f32 %v4512_v57, %v10396_v27  ;;  %v3878_v27 = vsel %vm1169_vm8, %v10438_v61, %v10440_v48 }
 0x432   : > { %11418 = vst [vmem:[#allocation9_spill] sm:$0xff] %v10456_v34  ;;  %v4140_v34 = vrot.slane %v4103_v17, 2  ;;  %v3685_v47 = vsel %vm1345_vm3, %v3683_v39, %v3684_v29  ;;  %v4147_v39 = vrot.slane %v4108_v51, 2 }
 0x433   : > { %v10467_v60 = vpop.permute.xlu0 %4322  ;;  %v3701_v7 = vadd.f32 %v3685_v47, %v10400_v56  ;;  %v4535_v30 = vadd.f32 %v10508_v37, %v10517_v15 }
 0x434   : > { %11419 = vst [vmem:[#allocation7_spill] sm:$0xff] %v10467_v60  ;;  %v4142_v41 = vsel %vm1809_vm4, %v4140_v34, %v4141_v35  ;;  %v4352_v34 = vadd.f32 %v4336_v45, %v4159_v53 }
 0x435   : > { %v4325_v40 = vpop.permute.xlu1 %4324  ;;  %v3894_v19 = vadd.f32 %v3878_v27, %v3701_v7  ;;  %v4162_v56 = vadd.f32 %v4142_v41, %v4069_v20  ;;  %v4712_v20 = vld [vmem:[%s11142_s11] sm:$0xf] }
 0x436   : > { %v10521_v33 = vadd.f32 %v4513_v24, %v4352_v34  ;;  %v4634_v34 = vld [vmem:[%s11140_s9] sm:$0xff] }
 0x437   : > { %v4496_v60 = vpop.permute.xlu0 %4495  ;;  %v11421_v61 = vld [vmem:[#allocation93_spill] sm:$0xff]  ;;  %v4798_v7 = vld [vmem:[%s11144_s13] sm:$0xff] }
 0x438   : > { %v4536_v55 = vadd.f32 %v4535_v30, %v10521_v33  ;;  %v4898_v30 = vld [vmem:[%s11145_s14 + $0x68] sm:$0xff] }
 0x439   : > { %v4498_v3 = vpop.permute.xlu1 %4497  ;;  %v11420_v18 = vld [vmem:[#allocation9_spill] sm:$0xff] }
 0x43a   : > { %v4055_v48 = vsel %vm1267_vm9, %v11421_v61, %v11420_v18  ;;  %v4515_v6 = vsel %vm1267_vm9, %v4496_v60, %v4498_v3  ;;  %v4148_v3 = vsel %vm1809_vm4, %v4146_v12, %v4147_v39  ;;  %v4537_v16 = vadd.f32 %v4536_v55, %v10542_v54  ;;  %v4635_v39 = vld [vmem:[%s11140_s9 + $0x8] sm:$0xff]  ;;  %v4897_v18 = vld [vmem:[%s11145_s14 + $0x60] sm:$0xff]  ;;  %v4896_v61 = vld [vmem:[%s11145_s14 + $0x58] sm:$0xff] }
 0x43b   : > { %v4327_v31 = vpop.permute.xlu0 %4326  ;;  %v11422_v0 = vld [vmem:[#allocation7_spill] sm:$0xff]  ;;  %v4071_v29 = vadd.f32 %v4055_v48, %v3894_v19  ;;  %v10548_v5 = vadd.f32 %v4515_v6, %v4354_v8  ;;  %v4895_v48 = vld [vmem:[%s11145_s14 + $0x50] sm:$0xff]  ;;  %v4890_v8 = vld [vmem:[%s11145_s14 + $0x28] sm:$0xff] }
 0x43c   : > { %v4339_v21 = vsel %vm1169_vm8, %v11422_v0, %v4325_v40  ;;  %v4163_v40 = vadd.f32 %v4145_v28, %v4070_v10  ;;  %v4900_v10 = vld [vmem:[%s11145_s14 + $0x78] sm:$0xff]  ;;  %v4894_v0 = vld [vmem:[%s11145_s14 + $0x48] sm:$0xff]  ;;  %v4891_v19 = vld [vmem:[%s11145_s14 + $0x30] sm:$0xff] }
 0x43d   : > { %v4329_v17 = vpop.permute.xlu1 %4328  ;;  %v4355_v35 = vadd.f32 %v4339_v21, %v4162_v56  ;;  %v4538_v26 = vadd.f32 %v4537_v16, %v10548_v5  ;;  %v4164_v47 = vadd.f32 %v4148_v3, %v4071_v29  ;;  %6929 = vmatprep.subr.mxu1 %v4900_v10  ;;  %v4893_v21 = vld [vmem:[%s11145_s14 + $0x40] sm:$0xff]  ;;  %v4892_v6 = vld [vmem:[%s11145_s14 + $0x38] sm:$0xff]  ;;  %v4887_v55 = vld [vmem:[%s11145_s14 + $0x10] sm:$0xff] }
 0x43e   : > { %v4340_v14 = vsel %vm1169_vm8, %v4327_v31, %v4329_v17  ;;  %6930 = vmatpush3.msra.mxu1 %v4900_v10  ;;  %v4889_v56 = vld [vmem:[%s11145_s14 + $0x20] sm:$0xff]  ;;  %v6553_v10 = vld [vmem:[%s11147_s16 + $0x78] sm:$0xff] }
 0x43f   : > { %v4500_v2 = vpop.permute.xlu0 %4499  ;;  %v4356_v62 = vadd.f32 %v4340_v14, %v4163_v40  ;;  %6931 = vmatprep.subr.mxu1 %v4899_v44  ;;  %v4713_v28 = vld [vmem:[%s11143_s12] sm:$0x1] }
 0x440   : > { %6932 = vmatpush3.msra.mxu1 %v4899_v44  ;;  %v5013_v16 = vld [vmem:[%s7433_s30] sm:$0xff]  ;;  %v6599_v44 = vld [vmem:[%s11147_s16 + $0xe8] sm:$0xff] }
 0x441   : > { %v4502_v32 = vpop.permute.xlu1 %4501  ;;  %6933 = vmatprep.subr.mxu1 %v4898_v30 }
 0x442   : > { %v4516_v1 = vsel %vm1267_vm9, %v4500_v2, %v4502_v32  ;;  %6934 = vmatpush3.msra.mxu1 %v4898_v30  ;;  %v6597_v30 = vld [vmem:[%s11147_s16 + $0xd8] sm:$0xff] }
 0x443   : > { %v4331_v43 = vpop.permute.xlu0 %4330  ;;  %v10552_v11 = vadd.f32 %v4516_v1, %v4355_v35  ;;  %6935 = vmatprep.subr.mxu1 %v4897_v18 }
 0x444   : > { %6936 = vmatpush3.msra.mxu1 %v4897_v18  ;;  %v6596_v18 = vld [vmem:[%s11147_s16 + $0xd0] sm:$0xff] }
 0x445   : > { %v4333_v13 = vpop.permute.xlu1 %4332  ;;  %v4539_v41 = vadd.f32 %v4538_v26, %v10552_v11  ;;  %6937 = vmatprep.subr.mxu1 %v4896_v61  ;;  %v5021_v26 = vld [vmem:[%s11147_s16] sm:$0xff] }
 0x446   : > { %v4341_v51 = vsel %vm1169_vm8, %v4331_v43, %v4333_v13  ;;  %v5025_v43 = vld [vmem:[%s11147_s16 + $0x20] sm:$0xff]  ;;  %6938 = vmatpush3.msra.mxu1 %v4896_v61  ;;  %v4888_v13 = vld [vmem:[%s11145_s14 + $0x18] sm:$0xff] }
 0x447   : > { %v4504_v60 = vpop.permute.xlu0 %4503  ;;  %v4357_v45 = vadd.f32 %v4341_v51, %v4164_v47  ;;  %6939 = vmatprep.subr.mxu1 %v4895_v48  ;;  %v5023_v51 = vld [vmem:[%s11147_s16 + $0x10] sm:$0xff]  ;;  %v10798_v61 = vld [vmem:[%s7433_s30 + $0x80] sm:$0xff] }
 0x448   : > { %6940 = vmatpush3.msra.mxu1 %v4895_v48  ;;  %v10658_v47 = vld [vmem:[%s7433_s30 + $0x10] sm:$0xff]  ;;  %v6595_v48 = vld [vmem:[%s11147_s16 + $0xc8] sm:$0xff] }
 0x449   : > { %v4506_v22 = vpop.permute.xlu1 %4505  ;;  %6941 = vmatprep.subr.mxu1 %v4894_v0 }
 0x44a   : > { %v4517_v31 = vsel %vm1267_vm9, %v4504_v60, %v4506_v22  ;;  %6942 = vmatpush3.msra.mxu1 %v4894_v0  ;;  %v5024_v22 = vld [vmem:[%s11147_s16 + $0x18] sm:$0xff] }
 0x44b   : > { %v10557_v38 = vadd.f32 %v4517_v31, %v4356_v62  ;;  %v4508_v57 = vpop.permute.xlu0 %4507  ;;  %6943 = vmatprep.subr.mxu1 %v4893_v21  ;;  %v5022_v31 = vld [vmem:[%s11147_s16 + $0x8] sm:$0xff]  ;;  %v10804_v0 = vld [vmem:[%s7433_s30 + $0x12] sm:$0xff] }
 0x44c   : > { %6944 = vmatpush3.msra.mxu1 %v4893_v21  ;;  %v10811_v21 = vld [vmem:[%s7433_s30 + $0x22] sm:$0xff] }
 0x44d   : > { %v4510_v23 = vpop.permute.xlu1 %4509  ;;  %v4540_v17 = vadd.f32 %v4539_v41, %v10557_v38  ;;  %6945 = vmatprep.subr.mxu1 %v4892_v6  ;;  %v6523_v41 = vld [vmem:[%s11147_s16 + $0x48] sm:$0xff] }
 0x44e   : > { %v4518_v49 = vsel %vm1267_vm9, %v4508_v57, %v4510_v23  ;;  %6946 = vmatpush3.msra.mxu1 %v4892_v6  ;;  %v10671_v57 = vld [vmem:[%s7433_s30 + $0x30] sm:$0xff]  ;;  %v10674_v23 = vld [vmem:[%s7433_s30 + $0x40] sm:$0xff] }
 0x44f   : > { %v10562_v53 = vadd.f32 %v4518_v49, %v4357_v45  ;;  %6947 = vmatprep.subr.mxu1 %v4891_v19  ;;  %v10664_v45 = vld [vmem:[%s7433_s30 + $0x20] sm:$0xff]  ;;  %v10681_v49 = vld [vmem:[%s7433_s30 + $0x50] sm:$0xff] }
 0x450   : > { %6948 = vmatpush3.msra.mxu1 %v4891_v19  ;;  %v10814_v6 = vld [vmem:[%s7433_s30 + $0x32] sm:$0xff]  ;;  %v10821_v19 = vld [vmem:[%s7433_s30 + $0x42] sm:$0xff] }
 0x451   : > { %v4541_v63 = vadd.f32 %v4540_v17, %v10562_v53  ;;  %6949 = vmatprep.subr.mxu1 %v4890_v8  ;;  %v6522_v17 = vld [vmem:[%s11147_s16 + $0x40] sm:$0xff] }
 0x452   : > { %6950 = vmatpush3.msra.mxu1 %v4890_v8  ;;  %v6641_v8 = vld [vmem:[%s11147_s16 + $0x138] sm:$0xff] }
 0x453   : > { %v4542_v25 = vrot.slane %v4541_v63, 4  ;;  %6951 = vmatprep.subr.mxu1 %v4889_v56 }
 0x454   : > { %6952 = vmatpush3.msra.mxu1 %v4889_v56  ;;  %v6640_v56 = vld [vmem:[%s11147_s16 + $0x130] sm:$0xff] }
 0x455   : > { %v4543_v59 = vadd.f32 %v4542_v25, %v4541_v63  ;;  %6953 = vmatprep.subr.mxu1 %v4888_v13  ;;  %v4886_v63 = vld [vmem:[%s11145_s14 + $0x8] sm:$0xff]  ;;  %v6521_v25 = vld [vmem:[%s11147_s16 + $0x38] sm:$0xff] }
 0x456   : > { %6954 = vmatpush3.msra.mxu1 %v4888_v13  ;;  %v10830_v13 = vld [vmem:[%s7433_s30 + $0x52] sm:$0xff] }
 0x457   : > { %v4544_v36 = vrot.slane %v4543_v59, 2  ;;  %6955 = vmatprep.subr.mxu1 %v4887_v55 }
 0x458   : > { %6956 = vmatpush3.msra.mxu1 %v4887_v55  ;;  %v10837_v55 = vld [vmem:[%s7433_s30 + $0x62] sm:$0xff] }
 0x459   : > { %v4545_v24 = vadd.f32 %v4544_v36, %v4543_v59  ;;  %v4885_v59 = vld [vmem:[%s11145_s14] sm:$0xff]  ;;  %6957 = vmatprep.subr.mxu1 %v4886_v63 }
 0x45a   : > { %v10698_v36 = vld [vmem:[%s7433_s30 + $0x60] sm:$0xff]  ;;  %6958 = vmatpush3.msra.mxu1 %v4886_v63 }
 0x45b   : > { %v4546_v2 = vrot.slane %v4545_v24, 1  ;;  %6959 = vmatprep.subr.mxu1 %v4885_v59  ;;  %v6534_v63 = vld [vmem:[%s11147_s16 + $0x60] sm:$0xff] }
 0x45c   : > { %6960 = vmatpush3.msra.mxu1 %v4885_v59 }
 0x45d   : > { %v4547_v12 = vadd.f32 %v4546_v2, %v4545_v24  ;;  %v10701_v24 = vld [vmem:[%s7433_s30 + $0x70] sm:$0xff] }
 0x45e   : > { %v6520_v2 = vld [vmem:[%s11147_s16 + $0x30] sm:$0xff] }
 0x45f   : > { %6908 = vmatmul.mubr.f32.vlgmr.msra.gmra.mxu0 %v4547_v12  ;;  %v10711_v12 = vld [vmem:[%s11147_s16 + $0x70] sm:$0xff] }
 0x460   : > { %6911 = vmatpush3.msra.mxu0 %v4635_v39  ;;  %6914 = vmatprep.mubr.msk.f32.mxu0 %vm7290_vm10, %v11423_v58  ;;  %v6519_v39 = vld [vmem:[%s11147_s16 + $0x28] sm:$0xff] }
 0x461   : > { %6912 = vmatprep.subr.mxu0 %v11423_v58  ;;  %7017 = vmatprep.subr.mxu1 %v10711_v12 }
 0x462   : > { %6913 = vmatpush3.msra.mxu0 %v4634_v34  ;;  %v5163_v34 = vld [vmem:[%s7433_s30 + $0x1] sm:$0xff] }
 0x463   : > { %6917 = vmatprep.subr.mxu0 %v11423_v58 }
 0x51f   : > { %v4630_v52 = vpop.f32.mrf.mxu0 }
 0x520   : > { %6915 = vmatmul.mubr.msk.f32.vlgmr.msra.gmra.mxu0 %vm4637_vm11, %v4630_v52  ;;  %v10727_v52 = vld [vmem:[%s7433_s30 + $0x21] sm:$0xff] }
 0x521   : > { %v6909_v42 = vpop.f32.mrf.mxu0  ;;  %6919 = vmatprep.mubr.msk.f32.mxu0 %vm7290_vm10, %v11423_v58  ;;  %6918 = vmatpush3.msk.msra.mxu0 %vm4718_vm12, %v4712_v20  ;;  %v6557_v20 = vld [vmem:[%s11147_s16 + $0x98] sm:$0xff] }
 0x522   : > { %6922 = vmatprep.subr.mxu0 %v11423_v58  ;;  %v10732_v42 = vld [vmem:[%s7433_s30 + $0x31] sm:$0xff] }
 0x5e0   : > { %v4707_v32 = vpop.f32.mrf.mxu0 }
 0x5e1   : > { %v4708_v27 = vadd.f32 %v4707_v32, %v4636_v50  ;;  %v10740_v50 = vld [vmem:[%s7433_s30 + $0x41] sm:$0xff]  ;;  %v10745_v32 = vld [vmem:[%s7433_s30 + $0x51] sm:$0xff] }
 0x5e2   : > { %v6916_v4 = vpop.f32.mrf.mxu0 }
 0x5e3   : > { %v4711_v46 = vmax.f32 %v4708_v27, 0.0  ;;  %v6556_v27 = vld [vmem:[%s11147_s16 + $0x90] sm:$0xff]  ;;  %v6555_v4 = vld [vmem:[%s11147_s16 + $0x88] sm:$0xff] }
 0x5e5   : > { %6920 = vmatmul.mubr.msk.f32.vlgmr.msra.gmra.mxu0 %vm4714_vm13, %v4711_v46  ;;  %v10754_v46 = vld [vmem:[%s7433_s30 + $0x61] sm:$0xff] }
 0x5e6   : > { %6926 = vmatprep.mubr.msk.f32.mxu0 %vm7290_vm10, %v11423_v58  ;;  %6923 = vmatpush3.msra.mxu0 %v4799_v9  ;;  %v6554_v9 = vld [vmem:[%s11147_s16 + $0x80] sm:$0xff] }
 0x5e7   : > { %6924 = vmatprep.subr.mxu0 %v11423_v58  ;;  %v10721_v58 = vld [vmem:[%s7433_s30 + $0x11] sm:$0xff] }
 0x5e8   : > { %6925 = vmatpush3.msra.mxu0 %v4798_v7  ;;  %v10764_v7 = vld [vmem:[%s7433_s30 + $0x71] sm:$0xff] }
 0x5e9   : > { %6973 = vmatprep.subr.mxu0 %v5025_v43 }
 0x6a5   : > { %v4788_v14 = vpop.f32.mrf.mxu0 }
 0x6a6   : > { %v4789_v1 = vadd.f32 %v4788_v14, %v4713_v28  ;;  %v6639_v28 = vld [vmem:[%s11147_s16 + $0x128] sm:$0xff]  ;;  %v10843_v14 = vld [vmem:[%s7433_s30 + $0x72] sm:$0xff] }
 0x6a7   : > { %v6921_v29 = vpop.f32.mrf.mxu0 }
 0x6a8   : > { %v4792_v35 = vsub.f32 0.0, %v4789_v1  ;;  %v6638_v1 = vld [vmem:[%s11147_s16 + $0x120] sm:$0xff] }
 0x6a9   : > { %v10853_v29 = vld [vmem:[%s7433_s30 + $0x82] sm:$0xff] }
 0x6aa   : > { %v4793_v40 = vmul.f32 1.442695, %v4792_v35  ;;  %v6637_v35 = vld [vmem:[%s11147_s16 + $0x118] sm:$0xff] }
 0x6ac   : > { %7186 = vpow2.f32 %v4793_v40  ;;  %v10871_v40 = vld [vmem:[%s7433_s30 + $0x81] sm:$0xff] }
 0x6b9   : > { %v7187_v60 = vpop.eup %7186 }
 0x6ba   : > { %v4795_v3 = vadd.f32 1.0, %v7187_v60  ;;  %v6636_v60 = vld [vmem:[%s7433_s30 + $0x91] sm:$0xff] }
 0x6bc   : > { %7188 = vrcp.f32 %v4795_v3  ;;  %v11424_v3 = vlaneseq }
 0x6c9   : > { %v7189_v62 = vpop.eup %7188 }
 0x6ca   : > { %6927 = vmatmul.mubr.msk.f32.vlgmr.msra.gmra.mxu0 %vm4637_vm11, %v7189_v62 }
 0x6cb   : > { %6974 = vmatpush3.msra.mxu0 %v5025_v43  ;;  %6983 = vmatprep.mubr.msk.f32.mxu0 %vm601_vm0, %v5013_v16  ;;  %v6598_v43 = vld [vmem:[%s11147_s16 + $0xe0] sm:$0xff]  ;;  %v4874_v16 = vshrl.u32 %v11424_v3, 7 }
 0x6cc   : > { %6975 = vmatprep.subr.mxu0 %v5024_v22 }
 0x6cd   : > { %6976 = vmatpush3.msra.mxu0 %v5024_v22  ;;  %v4875_v62 = vsub.s32 0, %v4874_v16 }
 0x6ce   : > { %6977 = vmatprep.subr.mxu0 %v5023_v51 }
 0x6cf   : > { %6978 = vmatpush3.msra.mxu0 %v5023_v51 }
 0x6d0   : > { %6979 = vmatprep.subr.mxu0 %v5022_v31 }
 0x6d1   : > { %6980 = vmatpush3.msra.mxu0 %v5022_v31 }
 0x6d2   : > { %6981 = vmatprep.subr.mxu0 %v5021_v26 }
 0x6d3   : > { %6982 = vmatpush3.msra.mxu0 %v5021_v26 }
 0x6d4   : > { %6984 = vmatmul.mubr.msk.f32.vlgmr.msra.gmra.mxu0 %vm601_vm0, %v10658_v47  ;;  %6995 = vmatprep.subr.mxu0 %v6523_v41 }
 0x6d5   : > { %6986 = vmatprep.mubr.msk.f32.mxu0 %vm601_vm0, %v10664_v45  ;;  %6996 = vmatpush3.msra.mxu0 %v6523_v41 }
 0x6d6   : > { %6997 = vmatprep.subr.mxu0 %v6522_v17 }
 0x6d7   : > { %6998 = vmatpush3.msra.mxu0 %v6522_v17  ;;  %v6535_v17 = vld [vmem:[%s11147_s16 + $0x68] sm:$0xff] }
 0x6d8   : > { %6987 = vmatmul.mubr.msk.f32.gmra.mxu0 %vm601_vm0, %v10671_v57  ;;  %6999 = vmatprep.subr.mxu0 %v6521_v25 }
 0x6d9   : > { %6989 = vmatprep.mubr.msk.f32.mxu0 %vm601_vm0, %v10674_v23  ;;  %7000 = vmatpush3.msra.mxu0 %v6521_v25  ;;  %v6532_v25 = vld [vmem:[%s11147_s16 + $0x50] sm:$0xff] }
 0x6da   : > { %7001 = vmatprep.subr.mxu0 %v6520_v2 }
 0x6db   : > { %7002 = vmatpush3.msra.mxu0 %v6520_v2 }
 0x6dc   : > { %6990 = vmatmul.mubr.msk.f32.gmra.mxu0 %vm601_vm0, %v10681_v49  ;;  %7003 = vmatprep.subr.mxu0 %v6519_v39 }
 0x6dd   : > { %6992 = vmatprep.mubr.msk.f32.mxu0 %vm601_vm0, %v10698_v36  ;;  %7004 = vmatpush3.msra.mxu0 %v6519_v39  ;;  %v6574_v39 = vld [vmem:[%s11147_s16 + $0xa0] sm:$0xff] }
 0x6de   : > { %7039 = vmatprep.subr.mxu0 %v6557_v20 }
 0x6e0   : > { %6993 = vmatmul.mubr.msk.f32.gmra.mxu0 %vm601_vm0, %v10701_v24 }
 0x6e1   : > { %7005 = vmatprep.mubr.msk.f32.mxu0 %vm601_vm0, %v5163_v34  ;;  %v6620_v34 = vld [vmem:[%s11147_s16 + $0x110] sm:$0xff] }
 0x6e4   : > { %7006 = vmatmul.mubr.msk.f32.vlgmr.msra.gmra.mxu0 %vm601_vm0, %v10721_v58 }
 0x6e5   : > { %7008 = vmatprep.mubr.msk.f32.mxu0 %vm601_vm0, %v10727_v52  ;;  %7040 = vmatpush3.msra.mxu0 %v6557_v20  ;;  %v6619_v20 = vld [vmem:[%s11147_s16 + $0x108] sm:$0xff] }
 0x6e6   : > { %7041 = vmatprep.subr.mxu0 %v6556_v27 }
 0x6e7   : > { %7042 = vmatpush3.msra.mxu0 %v6556_v27  ;;  %v6618_v27 = vld [vmem:[%s11147_s16 + $0x100] sm:$0xff] }
 0x6e8   : > { %7009 = vmatmul.mubr.msk.f32.gmra.mxu0 %vm601_vm0, %v10732_v42  ;;  %7043 = vmatprep.subr.mxu0 %v6555_v4 }
 0x6e9   : > { %7011 = vmatprep.mubr.msk.f32.mxu0 %vm601_vm0, %v10740_v50  ;;  %7044 = vmatpush3.msra.mxu0 %v6555_v4 }
 0x6ea   : > { %7045 = vmatprep.subr.mxu0 %v6554_v9 }
 0x6eb   : > { %7046 = vmatpush3.msra.mxu0 %v6554_v9 }
 0x6ec   : > { %7012 = vmatmul.mubr.msk.f32.gmra.mxu0 %vm601_vm0, %v10745_v32  ;;  %7047 = vmatprep.subr.mxu0 %v6553_v10 }
 0x6ed   : > { %7014 = vmatprep.mubr.msk.f32.mxu0 %vm601_vm0, %v10754_v46  ;;  %7048 = vmatpush3.msra.mxu0 %v6553_v10 }
 0x6ee   : > { %7083 = vmatprep.subr.mxu0 %v6599_v44 }
 0x6f0   : > { %7015 = vmatmul.mubr.msk.f32.gmra.mxu0 %vm601_vm0, %v10764_v7 }
 0x6f1   : > { %7049 = vmatprep.mubr.msk.f32.mxu0 %vm601_vm0, %v10658_v47 }
 0x6f4   : > { %7050 = vmatmul.mubr.msk.f32.vlgmr.msra.gmra.mxu0 %vm601_vm0, %v10664_v45 }
 0x6f5   : > { %7052 = vmatprep.mubr.msk.f32.mxu0 %vm601_vm0, %v10671_v57  ;;  %7084 = vmatpush3.msra.mxu0 %v6599_v44 }
 0x6f6   : > { %7085 = vmatprep.subr.mxu0 %v6598_v43 }
 0x6f7   : > { %7086 = vmatpush3.msra.mxu0 %v6598_v43 }
 0x6f8   : > { %7053 = vmatmul.mubr.msk.f32.gmra.mxu0 %vm601_vm0, %v10674_v23  ;;  %7087 = vmatprep.subr.mxu0 %v6597_v30 }
 0x6f9   : > { %7055 = vmatprep.mubr.msk.f32.mxu0 %vm601_vm0, %v10681_v49  ;;  %7088 = vmatpush3.msra.mxu0 %v6597_v30 }
 0x6fa   : > { %7089 = vmatprep.subr.mxu0 %v6596_v18 }
 0x6fb   : > { %7090 = vmatpush3.msra.mxu0 %v6596_v18 }
 0x6fc   : > { %7056 = vmatmul.mubr.msk.f32.gmra.mxu0 %vm601_vm0, %v10698_v36  ;;  %7091 = vmatprep.subr.mxu0 %v6595_v48 }
 0x6fd   : > { %7058 = vmatprep.mubr.msk.f32.mxu0 %vm601_vm0, %v10701_v24  ;;  %7092 = vmatpush3.msra.mxu0 %v6595_v48 }
 0x6fe   : > { %7127 = vmatprep.subr.mxu0 %v6641_v8 }
 0x700   : > { %7059 = vmatmul.mubr.msk.f32.gmra.mxu0 %vm601_vm0, %v10798_v61 }
 0x701   : > { %7093 = vmatprep.mubr.msk.f32.mxu0 %vm601_vm0, %v10804_v0 }
 0x704   : > { %7094 = vmatmul.mubr.msk.f32.vlgmr.msra.gmra.mxu0 %vm601_vm0, %v10811_v21 }
 0x705   : > { %7096 = vmatprep.mubr.msk.f32.mxu0 %vm601_vm0, %v10814_v6  ;;  %7128 = vmatpush3.msra.mxu0 %v6641_v8 }
 0x706   : > { %7129 = vmatprep.subr.mxu0 %v6640_v56 }
 0x707   : > { %7130 = vmatpush3.msra.mxu0 %v6640_v56 }
 0x708   : > { %7097 = vmatmul.mubr.msk.f32.gmra.mxu0 %vm601_vm0, %v10821_v19  ;;  %7131 = vmatprep.subr.mxu0 %v6639_v28 }
 0x709   : > { %7099 = vmatprep.mubr.msk.f32.mxu0 %vm601_vm0, %v10830_v13  ;;  %7132 = vmatpush3.msra.mxu0 %v6639_v28 }
 0x70a   : > { %7133 = vmatprep.subr.mxu0 %v6638_v1 }
 0x70b   : > { %7134 = vmatpush3.msra.mxu0 %v6638_v1 }
 0x70c   : > { %7100 = vmatmul.mubr.msk.f32.gmra.mxu0 %vm601_vm0, %v10837_v55  ;;  %7135 = vmatprep.subr.mxu0 %v6637_v35 }
 0x70d   : > { %7102 = vmatprep.mubr.msk.f32.mxu0 %vm601_vm0, %v10843_v14  ;;  %7136 = vmatpush3.msra.mxu0 %v6637_v35 }
 0x710   : > { %7103 = vmatmul.mubr.msk.f32.gmra.mxu0 %vm601_vm0, %v10853_v29 }
 0x711   : > { %7137 = vmatprep.mubr.msk.f32.mxu0 %vm601_vm0, %v10727_v52 }
 0x714   : > { %7138 = vmatmul.mubr.msk.f32.vlgmr.msra.gmra.mxu0 %vm601_vm0, %v10732_v42 }
 0x715   : > { %7140 = vmatprep.mubr.msk.f32.mxu0 %vm601_vm0, %v10740_v50 }
 0x718   : > { %7141 = vmatmul.mubr.msk.f32.gmra.mxu0 %vm601_vm0, %v10745_v32 }
 0x719   : > { %7143 = vmatprep.mubr.msk.f32.mxu0 %vm601_vm0, %v10754_v46 }
 0x71c   : > { %7144 = vmatmul.mubr.msk.f32.gmra.mxu0 %vm601_vm0, %v10764_v7 }
 0x71d   : > { %7146 = vmatprep.mubr.msk.f32.mxu0 %vm601_vm0, %v10871_v40 }
 0x720   : > { %7147 = vmatmul.mubr.msk.f32.gmra.mxu0 %vm601_vm0, %v6636_v60 }
 0x78a   : > { %v4869_v22 = vpop.f32.mrf.mxu0 }
 0x78b   : > { %v4876_v51 = vrot.slane %v4869_v22, %v4875_v62 }
 0x78c   : > { %v6928_v31 = vpop.f32.mrf.mxu0 }
 0x78d   : > { %v4877_v26 = vmul.f32 %v4876_v51, %v10517_v15  ;;  %v4878_v47 = vmul.f32 %v4876_v51, %v10508_v37  ;;  %v4879_v41 = vmul.f32 %v4876_v51, %v10521_v33  ;;  %v4880_v15 = vmul.f32 %v4876_v51, %v10542_v54  ;;  %v6533_v33 = vld [vmem:[%s11147_s16 + $0x58] sm:$0xff] }
 0x78e   : > { %v4881_v37 = vmul.f32 %v4876_v51, %v10548_v5  ;;  %v4882_v59 = vmul.f32 %v4876_v51, %v10552_v11  ;;  %v4883_v54 = vmul.f32 %v4876_v51, %v10557_v38  ;;  %v6578_v5 = vld [vmem:[%s11147_s16 + $0xc0] sm:$0xff]  ;;  %v4884_v2 = vmul.f32 %v4876_v51, %v10562_v53  ;;  %v6577_v11 = vld [vmem:[%s11147_s16 + $0xb8] sm:$0xff]  ;;  %v6576_v38 = vld [vmem:[%s11147_s16 + $0xb0] sm:$0xff] }
 0x78f   : > { %6961 = vmatprep.mubr.f32.mxu1 %v4877_v26  ;;  %v6575_v53 = vld [vmem:[%s11147_s16 + $0xa8] sm:$0xff] }
 0x790   : > { %6962 = vmatmul.mubr.f32.vlgmr.msra.gmra.mxu1 %v4878_v47 }
 0x791   : > { %7018 = vmatpush3.msra.mxu1 %v10711_v12  ;;  %6964 = vmatprep.mubr.f32.mxu1 %v4879_v41  ;;  %v5314_v12 = vld [vmem:[%s7433_s30 + $0x2] sm:$0xff] }
 0x792   : > { %7019 = vmatprep.subr.mxu1 %v6535_v17 }
 0x793   : > { %7020 = vmatpush3.msra.mxu1 %v6535_v17 }
 0x794   : > { %6965 = vmatmul.mubr.f32.gmra.mxu1 %v4880_v15  ;;  %7021 = vmatprep.subr.mxu1 %v6534_v63 }
 0x795   : > { %6967 = vmatprep.mubr.f32.mxu1 %v4881_v37  ;;  %7022 = vmatpush3.msra.mxu1 %v6534_v63 }
 0x796   : > { %7023 = vmatprep.subr.mxu1 %v6533_v33 }
 0x797   : > { %7024 = vmatpush3.msra.mxu1 %v6533_v33 }
 0x798   : > { %6968 = vmatmul.mubr.f32.gmra.mxu1 %v4882_v59  ;;  %7025 = vmatprep.subr.mxu1 %v6532_v25 }
 0x799   : > { %6970 = vmatprep.mubr.f32.mxu1 %v4883_v54  ;;  %7026 = vmatpush3.msra.mxu1 %v6532_v25 }
 0x79a   : > { %7061 = vmatprep.subr.mxu1 %v6578_v5 }
 0x79c   : > { %6971 = vmatmul.mubr.f32.gmra.mxu1 %v4884_v2  ;;  %v6510_v2 = vld [vmem:[%s11146_s15] ss:$0 sm:$0xff] }
 0x79d   : > { %7027 = vmatprep.mubr.msk.f32.mxu1 %vm601_vm0, %v5314_v12 }
 0x7a0   : > { %7028 = vmatmul.mubr.msk.f32.vlgmr.msra.gmra.mxu1 %vm601_vm0, %v10804_v0 }
 0x7a1   : > { %7062 = vmatpush3.msra.mxu1 %v6578_v5  ;;  %7030 = vmatprep.mubr.msk.f32.mxu1 %vm601_vm0, %v10811_v21 }
 0x7a2   : > { %7063 = vmatprep.subr.mxu1 %v6577_v11 }
 0x7a3   : > { %7064 = vmatpush3.msra.mxu1 %v6577_v11 }
 0x7a4   : > { %7031 = vmatmul.mubr.msk.f32.gmra.mxu1 %vm601_vm0, %v10814_v6  ;;  %7065 = vmatprep.subr.mxu1 %v6576_v38 }
 0x7a5   : > { %7033 = vmatprep.mubr.msk.f32.mxu1 %vm601_vm0, %v10821_v19  ;;  %7066 = vmatpush3.msra.mxu1 %v6576_v38 }
 0x7a6   : > { %7067 = vmatprep.subr.mxu1 %v6575_v53 }
 0x7a7   : > { %7068 = vmatpush3.msra.mxu1 %v6575_v53 }
 0x7a8   : > { %7034 = vmatmul.mubr.msk.f32.gmra.mxu1 %vm601_vm0, %v10830_v13  ;;  %7069 = vmatprep.subr.mxu1 %v6574_v39 }
 0x7a9   : > { %7036 = vmatprep.mubr.msk.f32.mxu1 %vm601_vm0, %v10837_v55  ;;  %7070 = vmatpush3.msra.mxu1 %v6574_v39 }
 0x7aa   : > { %7105 = vmatprep.subr.mxu1 %v6620_v34 }
 0x7ac   : > { %7037 = vmatmul.mubr.msk.f32.gmra.mxu1 %vm601_vm0, %v10843_v14 }
 0x7ad   : > { %7071 = vmatprep.mubr.msk.f32.mxu1 %vm601_vm0, %v10721_v58  ;;  %v6617_v58 = vld [vmem:[%s11147_s16 + $0xf8] sm:$0xff] }
 0x7b0   : > { %7072 = vmatmul.mubr.msk.f32.vlgmr.msra.gmra.mxu1 %vm601_vm0, %v10727_v52  ;;  %v6616_v52 = vld [vmem:[%s11147_s16 + $0xf0] sm:$0xff] }
 0x7b1   : > { %7106 = vmatpush3.msra.mxu1 %v6620_v34  ;;  %7074 = vmatprep.mubr.msk.f32.mxu1 %vm601_vm0, %v10732_v42  ;;  %v6662_v42 = vld [vmem:[%s11147_s16 + $0x160] sm:$0xff] }
 0x7b2   : > { %7107 = vmatprep.subr.mxu1 %v6619_v20 }
 0x7b3   : > { %7108 = vmatpush3.msra.mxu1 %v6619_v20 }
 0x7b4   : > { %7075 = vmatmul.mubr.msk.f32.gmra.mxu1 %vm601_vm0, %v10740_v50  ;;  %7109 = vmatprep.subr.mxu1 %v6618_v27  ;;  %v6661_v50 = vld [vmem:[%s11147_s16 + $0x158] sm:$0xff] }
 0x7b5   : > { %7077 = vmatprep.mubr.msk.f32.mxu1 %vm601_vm0, %v10745_v32  ;;  %7110 = vmatpush3.msra.mxu1 %v6618_v27  ;;  %v6660_v32 = vld [vmem:[%s11147_s16 + $0x150] sm:$0xff] }
 0x7b6   : > { %7111 = vmatprep.subr.mxu1 %v6617_v58 }
 0x7b7   : > { %7112 = vmatpush3.msra.mxu1 %v6617_v58 }
 0x7b8   : > { %7078 = vmatmul.mubr.msk.f32.gmra.mxu1 %vm601_vm0, %v10754_v46  ;;  %7113 = vmatprep.subr.mxu1 %v6616_v52 }
 0x7b9   : > { %7080 = vmatprep.mubr.msk.f32.mxu1 %vm601_vm0, %v10764_v7  ;;  %7114 = vmatpush3.msra.mxu1 %v6616_v52 }
 0x7ba   : > { %7149 = vmatprep.subr.mxu1 %v6662_v42 }
 0x7bc   : > { %7081 = vmatmul.mubr.msk.f32.gmra.mxu1 %vm601_vm0, %v10871_v40 }
 0x7bd   : > { %7115 = vmatprep.mubr.msk.f32.mxu1 %vm601_vm0, %v10664_v45  ;;  %v6659_v45 = vld [vmem:[%s11147_s16 + $0x148] sm:$0xff] }
 0x7c0   : > { %7116 = vmatmul.mubr.msk.f32.vlgmr.msra.gmra.mxu1 %vm601_vm0, %v10671_v57  ;;  %v6658_v57 = vld [vmem:[%s11147_s16 + $0x140] sm:$0xff] }
 0x7c1   : > { %7150 = vmatpush3.msra.mxu1 %v6662_v42  ;;  %7118 = vmatprep.mubr.msk.f32.mxu1 %vm601_vm0, %v10674_v23  ;;  %v6615_v23 = vld [vmem:[%s7433_s30 + $0x90] sm:$0xff] }
 0x7c2   : > { %7151 = vmatprep.subr.mxu1 %v6661_v50 }
 0x7c3   : > { %7152 = vmatpush3.msra.mxu1 %v6661_v50 }
 0x7c4   : > { %7119 = vmatmul.mubr.msk.f32.gmra.mxu1 %vm601_vm0, %v10681_v49  ;;  %7153 = vmatprep.subr.mxu1 %v6660_v32  ;;  %v6657_v49 = vld [vmem:[%s7433_s30 + $0x92] sm:$0xff] }
 0x7c5   : > { %7121 = vmatprep.mubr.msk.f32.mxu1 %vm601_vm0, %v10698_v36  ;;  %7154 = vmatpush3.msra.mxu1 %v6660_v32  ;;  %v6985_v36 = vpop.f32.mrf.mxu0 }
 0x7c6   : > { %7155 = vmatprep.subr.mxu1 %v6659_v45 }
 0x7c7   : > { %7156 = vmatpush3.msra.mxu1 %v6659_v45 }
 0x7c8   : > { %7122 = vmatmul.mubr.msk.f32.gmra.mxu1 %vm601_vm0, %v10701_v24  ;;  %7157 = vmatprep.subr.mxu1 %v6658_v57  ;;  %v5116_v24 = vpop.f32.mrf.mxu0 }
 0x7c9   : > { %7124 = vmatprep.mubr.msk.f32.mxu1 %vm601_vm0, %v10798_v61  ;;  %7158 = vmatpush3.msra.mxu1 %v6658_v57 }
 0x7ca   : > { %v6988_v4 = vpop.f32.mrf.mxu0 }
 0x7cc   : > { %7125 = vmatmul.mubr.msk.f32.gmra.mxu1 %vm601_vm0, %v6615_v23  ;;  %v11010_v46 = vpop.f32.mrf.mxu0 }
 0x7cd   : > { %7159 = vmatprep.mubr.msk.f32.mxu1 %vm601_vm0, %v10811_v21 }
 0x7ce   : > { %v11012_v9 = vpop.f32.mrf.mxu0 }
 0x7d0   : > { %7160 = vmatmul.mubr.msk.f32.vlgmr.msra.gmra.mxu1 %vm601_vm0, %v10814_v6  ;;  %v11014_v7 = vpop.f32.mrf.mxu0 }
 0x7d1   : > { %7162 = vmatprep.mubr.msk.f32.mxu1 %vm601_vm0, %v10821_v19 }
 0x7d2   : > { %v11016_v10 = vpop.f32.mrf.mxu0 }
 0x7d4   : > { %7163 = vmatmul.mubr.msk.f32.gmra.mxu1 %vm601_vm0, %v10830_v13  ;;  %v11018_v44 = vpop.f32.mrf.mxu0 }
 0x7d5   : > { %7165 = vmatprep.mubr.msk.f32.mxu1 %vm601_vm0, %v10837_v55 }
 0x7d6   : > { %v7007_v43 = vpop.f32.mrf.mxu0 }
 0x7d8   : > { %7166 = vmatmul.mubr.msk.f32.gmra.mxu1 %vm601_vm0, %v10843_v14  ;;  %v5267_v30 = vpop.f32.mrf.mxu0 }
 0x7d9   : > { %7168 = vmatprep.mubr.msk.f32.mxu1 %vm601_vm0, %v10853_v29 }
 0x7da   : > { %v11020_v18 = vpop.f32.mrf.mxu0 }
 0x7dc   : > { %7169 = vmatmul.mubr.msk.f32.gmra.mxu1 %vm601_vm0, %v6657_v49  ;;  %v11022_v61 = vpop.f32.mrf.mxu0 }
 0x7de   : > { %v11024_v48 = vpop.f32.mrf.mxu0 }
 0x7e0   : > { %v11026_v0 = vpop.f32.mrf.mxu0 }
 0x7e2   : > { %v11028_v21 = vpop.f32.mrf.mxu0 }
 0x7e4   : > { %v11030_v6 = vpop.f32.mrf.mxu0 }
 0x7e6   : > { %v11032_v19 = vpop.f32.mrf.mxu0 }
 0x7e8   : > { %v11034_v8 = vpop.f32.mrf.mxu0 }
 0x7ea   : > { %v11036_v56 = vpop.f32.mrf.mxu0 }
 0x7ec   : > { %v11038_v13 = vpop.f32.mrf.mxu0 }
 0x7ee   : > { %v11040_v55 = vpop.f32.mrf.mxu0 }
 0x7f0   : > { %v11042_v1 = vpop.f32.mrf.mxu0 }
 0x7f2   : > { %v11044_v40 = vpop.f32.mrf.mxu0 }
 0x7f4   : > { %v11046_v16 = vpop.f32.mrf.mxu0 }
 0x7f5   : > { %11425 = vst [vmem:[#allocation11_spill] sm:$0xff] %v11046_v16 }
 0x7f6   : > { %v11048_v51 = vpop.f32.mrf.mxu0 }
 0x7f8   : > { %v11050_v47 = vpop.f32.mrf.mxu0 }
 0x7fa   : > { %v11052_v63 = vpop.f32.mrf.mxu0 }
 0x7fc   : > { %v11054_v33 = vpop.f32.mrf.mxu0 }
 0x7fd   : > { %11426 = vst [vmem:[#allocation10_spill] sm:$0xff] %v11054_v33 }
 0x7fe   : > { %v11060_v54 = vpop.f32.mrf.mxu0 }
 0x7ff   : > { %11427 = vst [vmem:[#allocation8_spill] sm:$0xff] %v11060_v54 }
 0x800   : > { %v11065_v11 = vpop.f32.mrf.mxu0 }
 0x801   : > { %11428 = vst [vmem:[#allocation96_spill] sm:$0xff] %v11065_v11 }
 0x802   : > { %v11067_v34 = vpop.f32.mrf.mxu0 }
 0x803   : > { %11429 = vst [vmem:[#allocation95_spill] sm:$0xff] %v11067_v34 }
 0x804   : > { %v11069_v50 = vpop.f32.mrf.mxu0 }
 0x850   : > { %v6963_v28 = vpop.f32.mrf.mxu1 }
 0x851   : > { %v4980_v53 = vadd.f32 %v6963_v28, %v6510_v2  ;;  %v7139_v28 = vpop.f32.mrf.mxu0 }
 0x852   : > { %v4974_v14 = vpop.f32.mrf.mxu1 }
 0x853   : > { %v4975_v20 = vadd.f32 %v6510_v2, %v4974_v14  ;;  %v5156_v58 = vadd.f32 %v6985_v36, %v4980_v53 }
 0x854   : > { %v6966_v29 = vpop.f32.mrf.mxu1 }
 0x855   : > { %v4990_v52 = vadd.f32 %v6966_v29, %v6510_v2  ;;  %v5155_v32 = vadd.f32 %v5116_v24, %v4975_v20  ;;  %v5307_v49 = vadd.f32 %v7007_v43, %v5156_v58 }
 0x856   : > { %v4984_v35 = vpop.f32.mrf.mxu1 }
 0x857   : > { %v4985_v45 = vadd.f32 %v6510_v2, %v4984_v35  ;;  %v5158_v54 = vadd.f32 %v6988_v4, %v4990_v52  ;;  %v5306_v33 = vadd.f32 %v5267_v30, %v5155_v32  ;;  %v6174_v4 = vpop.f32.mrf.mxu0 }
 0x858   : > { %v6969_v60 = vpop.f32.mrf.mxu1 }
 0x859   : > { %v5000_v57 = vadd.f32 %v6969_v60, %v6510_v2  ;;  %v5157_v14 = vadd.f32 %v11010_v46, %v4985_v45  ;;  %v5309_v53 = vadd.f32 %v11020_v18, %v5158_v54  ;;  %v7142_v54 = vpop.f32.mrf.mxu0 }
 0x85a   : > { %v4994_v3 = vpop.f32.mrf.mxu1 }
 0x85b   : > { %v4995_v11 = vadd.f32 %v6510_v2, %v4994_v3  ;;  %v5160_v36 = vadd.f32 %v11012_v9, %v5000_v57  ;;  %v5308_v3 = vadd.f32 %v11022_v61, %v5157_v14  ;;  %v11431_v14 = vld [vmem:[#allocation11_spill] sm:$0xff] }
 0x85c   : > { %v6972_v62 = vpop.f32.mrf.mxu1 }
 0x85d   : > { %v5010_v24 = vadd.f32 %v6972_v62, %v6510_v2  ;;  %v5159_v60 = vadd.f32 %v11014_v7, %v4995_v11  ;;  %v5311_v46 = vadd.f32 %v11024_v48, %v5160_v36 }
 0x85e   : > { %v5004_v22 = vpop.f32.mrf.mxu1 }
 0x85f   : > { %v5005_v20 = vadd.f32 %v6510_v2, %v5004_v22  ;;  %v5162_v9 = vadd.f32 %v11016_v10, %v5010_v24 }
 0x860   : > { %v7029_v31 = vpop.f32.mrf.mxu1 }
 0x861   : > { %v5458_v34 = vadd.f32 %v7029_v31, %v5307_v49  ;;  %v5161_v7 = vadd.f32 %v11018_v44, %v5005_v20  ;;  %v5313_v48 = vadd.f32 %v11028_v21, %v5162_v9 }
 0x862   : > { %v5418_v26 = vpop.f32.mrf.mxu1 }
 0x863   : > { %v5457_v35 = vadd.f32 %v5418_v26, %v5306_v33  ;;  %v5609_v58 = vadd.f32 %v11032_v19, %v5458_v34  ;;  %v5310_v26 = vadd.f32 %v11026_v0, %v5159_v60  ;;  %v5312_v0 = vadd.f32 %v11030_v6, %v5161_v7 }
 0x864   : > { %v7032_v41 = vpop.f32.mrf.mxu1 }
 0x865   : > { %v5460_v30 = vadd.f32 %v7032_v41, %v5309_v53  ;;  %v5608_v52 = vadd.f32 %v11034_v8, %v5457_v35 }
 0x866   : > { %v5428_v17 = vpop.f32.mrf.mxu1 }
 0x867   : > { %v5459_v18 = vadd.f32 %v5428_v17, %v5308_v3  ;;  %v5611_v61 = vadd.f32 %v11036_v56, %v5460_v30  ;;  %v11434_v30 = vld [vmem:[#allocation95_spill] sm:$0xff] }
 0x868   : > { %v7035_v15 = vpop.f32.mrf.mxu1 }
 0x869   : > { %v5462_v22 = vadd.f32 %v7035_v15, %v5311_v46  ;;  %v5610_v10 = vadd.f32 %v11038_v13, %v5459_v18  ;;  %v6184_v15 = vpop.f32.mrf.mxu0 }
 0x86a   : > { %v5438_v37 = vpop.f32.mrf.mxu1 }
 0x86b   : > { %v5461_v41 = vadd.f32 %v5438_v37, %v5310_v26  ;;  %v5613_v44 = vadd.f32 %v11040_v55, %v5462_v22  ;;  %v7145_v55 = vpop.f32.mrf.mxu0 }
 0x86c   : > { %v11056_v25 = vpop.f32.mrf.mxu1 }
 0x86d   : > { %v5464_v11 = vadd.f32 %v11056_v25, %v5313_v48  ;;  %v5612_v21 = vadd.f32 %v11042_v1, %v5461_v41  ;;  %v11430_v25 = vld [vmem:[#allocation10_spill] sm:$0xff]  ;;  %v11432_v1 = vld [vmem:[#allocation8_spill] sm:$0xff]  ;;  %v6194_v24 = vpop.f32.mrf.mxu0 }
 0x86e   : > { %v11058_v59 = vpop.f32.mrf.mxu1 }
 0x86f   : > { %v5463_v13 = vadd.f32 %v11058_v59, %v5312_v0  ;;  %v5615_v57 = vadd.f32 %v11044_v40, %v5464_v11  ;;  %v7148_v9 = vpop.f32.mrf.mxu0 }
 0x870   : > { %v7073_v5 = vpop.f32.mrf.mxu1 }
 0x871   : > { %v5760_v62 = vadd.f32 %v7073_v5, %v5609_v58  ;;  %v5614_v36 = vadd.f32 %v11431_v14, %v5463_v13 }
 0x872   : > { %v5720_v12 = vpop.f32.mrf.mxu1 }
 0x873   : > { %v5759_v19 = vadd.f32 %v5720_v12, %v5608_v52  ;;  %v5911_v8 = vadd.f32 %v11048_v51, %v5760_v62 }
 0x874   : > { %v7076_v38 = vpop.f32.mrf.mxu1 }
 0x875   : > { %v5762_v17 = vadd.f32 %v7076_v38, %v5611_v61  ;;  %v5910_v56 = vadd.f32 %v11050_v47, %v5759_v19  ;;  %v6204_v61 = vpop.f32.mrf.mxu0 }
 0x876   : > { %v5730_v39 = vpop.f32.mrf.mxu1 }
 0x877   : > { %v5761_v37 = vadd.f32 %v5730_v39, %v5610_v10  ;;  %v5913_v38 = vadd.f32 %v11052_v63, %v5762_v17 }
 0x878   : > { %v7079_v27 = vpop.f32.mrf.mxu1 }
 0x879   : > { %v5764_v34 = vadd.f32 %v7079_v27, %v5613_v44  ;;  %v5912_v49 = vadd.f32 %v11430_v25, %v5761_v37 }
 0x87a   : > { %v5740_v42 = vpop.f32.mrf.mxu1 }
 0x87b   : > { %v5763_v6 = vadd.f32 %v5740_v42, %v5612_v21 }
 0x87c   : > { %v11071_v23 = vpop.f32.mrf.mxu1 }
 0x87d   : > { %v5766_v59 = vadd.f32 %v11071_v23, %v5615_v57 }
 0x87e   : > { %v11073_v16 = vpop.f32.mrf.mxu1 }
 0x87f   : > { %v5765_v60 = vadd.f32 %v11073_v16, %v5614_v36  ;;  %v5917_v23 = vadd.f32 %v11434_v30, %v5766_v59 }
 0x880   : > { %v7117_v29 = vpop.f32.mrf.mxu1 }
 0x881   : > { %v6063_v12 = vadd.f32 %v7117_v29, %v5911_v8  ;;  %v5915_v29 = vadd.f32 %v11432_v1, %v5764_v34  ;;  %v5916_v16 = vadd.f32 %v11069_v50, %v5765_v60 }
 0x882   : > { %v6023_v43 = vpop.f32.mrf.mxu1 }
 0x883   : > { %v6062_v32 = vadd.f32 %v6023_v43, %v5910_v56  ;;  %v6214_v47 = vadd.f32 %v7139_v28, %v6063_v12  ;;  %v11433_v28 = vld [vmem:[#allocation96_spill] sm:$0xff] }
 0x884   : > { %v7120_v31 = vpop.f32.mrf.mxu1  ;;  %v5914_v53 = vadd.f32 %v11433_v28, %v5763_v6 }
 0x885   : > { %v6065_v39 = vadd.f32 %v7120_v31, %v5913_v38  ;;  %v6213_v40 = vadd.f32 %v6174_v4, %v6062_v32 }
 0x886   : > { %v6033_v33 = vpop.f32.mrf.mxu1 }
 0x887   : > { %v6064_v27 = vadd.f32 %v6033_v33, %v5912_v49  ;;  %v6216_v20 = vadd.f32 %v7142_v54, %v6065_v39 }
 0x888   : > { %v7123_v2 = vpop.f32.mrf.mxu1 }
 0x889   : > { %v6067_v43 = vadd.f32 %v7123_v2, %v5915_v29  ;;  %v6215_v46 = vadd.f32 %v6184_v15, %v6064_v27 }
 0x88a   : > { %v6043_v5 = vpop.f32.mrf.mxu1 }
 0x88b   : > { %v6066_v4 = vadd.f32 %v6043_v5, %v5914_v53  ;;  %v6218_v18 = vadd.f32 %v7145_v55, %v6067_v43 }
 0x88c   : > { %v7126_v51 = vpop.f32.mrf.mxu1 }
 0x88d   : > { %v6069_v62 = vadd.f32 %v7126_v51, %v5917_v23  ;;  %v6217_v22 = vadd.f32 %v6194_v24, %v6066_v4 }
 0x88e   : > { %v6053_v45 = vpop.f32.mrf.mxu1 }
 0x88f   : > { %v6068_v33 = vadd.f32 %v6053_v45, %v5916_v16  ;;  %v6220_v41 = vadd.f32 %v7148_v9, %v6069_v62 }
 0x890   : > { %v7161_v63 = vpop.f32.mrf.mxu1 }
 0x891   : > { %v6365_v42 = vadd.f32 %v7161_v63, %v6214_v47  ;;  %v6219_v48 = vadd.f32 %v6204_v61, %v6068_v33 }
 0x892   : > { %v6325_v35 = vpop.f32.mrf.mxu1 }
 0x893   : > { %6374 = vst.msk [vmem:[%s11105_s19 + $0x8] sm:$0xff] %vm6372_vm14, %v6365_v42  ;;  %v6364_v3 = vadd.f32 %v6325_v35, %v6213_v40 }
 0x894   : > { %v7164_v58 = vpop.f32.mrf.mxu1 }
 0x895   : > { %6373 = vst.msk [vmem:[%s11105_s19] sm:$0xff] %vm6372_vm14, %v6364_v3  ;;  %v6367_v31 = vadd.f32 %v7164_v58, %v6216_v20 }
 0x896   : > { %v6335_v52 = vpop.f32.mrf.mxu1 }
 0x897   : > { %6376 = vst.msk [vmem:[%s11105_s19 + $0x18] sm:$0xff] %vm6372_vm14, %v6367_v31  ;;  %v6366_v26 = vadd.f32 %v6335_v52, %v6215_v46 }
 0x898   : > { %v7167_v7 = vpop.f32.mrf.mxu1 }
 0x899   : > { %6375 = vst.msk [vmem:[%s11105_s19 + $0x10] sm:$0xff] %vm6372_vm14, %v6366_v26  ;;  %v6369_v54 = vadd.f32 %v7167_v7, %v6218_v18 }
 0x89a   : > { %v6345_v19 = vpop.f32.mrf.mxu1 }
 0x89b   : > { %6378 = vst.msk [vmem:[%s11105_s19 + $0x28] sm:$0xff] %vm6372_vm14, %v6369_v54  ;;  %v6368_v50 = vadd.f32 %v6345_v19, %v6217_v22 }
 0x89c   : > { %v7170_v2 = vpop.f32.mrf.mxu1 }
 0x89d   : > { %6377 = vst.msk [vmem:[%s11105_s19 + $0x20] sm:$0xff] %vm6372_vm14, %v6368_v50  ;;  %v6371_v10 = vadd.f32 %v7170_v2, %v6220_v41 }
 0x89e   : > { %v6355_v8 = vpop.f32.mrf.mxu1 }
 0x89f   : > { %6380 = vst.msk [vmem:[%s11105_s19 + $0x38] sm:$0xff] %vm6372_vm14, %v6371_v10  ;;  %v6370_v17 = vadd.f32 %v6355_v8, %v6219_v48 }
 0x8a1   : > { %6379 = vst.msk [vmem:[%s11105_s19 + $0x30] sm:$0xff] %vm6372_vm14, %v6370_v17 }
 0x8a2 PF: > { %s11435_s25 = sld [smem:[#allocation3_spill]] }
 0x8a8   : > { %s27_s24 = sadd.s32 1, %s11435_s25  }
 0x8a9   : > { %p24_p4 = scmp.ge.s32.totalorder %s27_s24, 4  }
 0x8ab   :  { %26 = sbr.rel (!%p24_p4) target bundleno = 3 (0x3), region = 146 }

</bundles_post_ra>
